<compile_context>
chip_gen: v6e
topology: v6e:2x2x1
jax: 0.10.0
libtpu: 0.0.40
codegen_flags: <defaults>
</compile_context>

<pallas_src>
import jax
import jax.numpy as jnp
from jax import lax
from jax.experimental import pallas as pl
from jax.experimental.pallas import tpu as pltpu

# Fixed topology mask from the PyTorch module.
TOPO = [[0, 0, 1, 0, 0, 0, 0, 1],
        [0, 0, 0, 1, 1, 0, 1, 0],
        [1, 0, 0, 1, 0, 1, 0, 1],
        [0, 1, 1, 0, 1, 0, 1, 0],
        [0, 1, 0, 1, 0, 1, 1, 0],
        [0, 0, 1, 0, 1, 0, 0, 1],
        [0, 1, 0, 1, 1, 0, 0, 1],
        [1, 0, 1, 0, 0, 1, 1, 0]]

T_SEQ = 10        # sequence length == conv1 in_channels
HID = 64          # LSTM input/hidden size
SP = 8            # spatial side
N_SP = SP * SP    # flattened 8x8 spatial size (== HID by construction of the module)


def lstm_cnn_kernel(x_ref, wih_ref, whh_ref, lb_ref,
                    m1_ref, b1_ref, m2_ref, b2_ref, m3_ref, b3_ref, topo_ref,
                    out_ref, seq_scr):
    bt = out_ref.shape[0]
    h = jnp.zeros((bt, HID), jnp.float32)
    c = jnp.zeros((bt, HID), jnp.float32)

    # ---------------- LSTM: statically unrolled serial recurrence, batched over BT rows ----
    for t in range(T_SEQ):
        x_t = x_ref[t]                                                       # (BT, 64)
        g = (jnp.dot(x_t, wih_ref[...], preferred_element_type=jnp.float32)
             + jnp.dot(h, whh_ref[...], preferred_element_type=jnp.float32)
             + lb_ref[...])                                                  # (BT, 256) i|f|g|o
        i_g = jax.nn.sigmoid(g[:, 0 * HID:1 * HID])
        f_g = jax.nn.sigmoid(g[:, 1 * HID:2 * HID])
        g_g = jnp.tanh(g[:, 2 * HID:3 * HID])
        o_g = jax.nn.sigmoid(g[:, 3 * HID:4 * HID])
        c = f_g * c + i_g * g_g
        h = o_g * jnp.tanh(c)
        # time step t == input channel t of conv1: lane block [t*64, (t+1)*64).
        seq_scr[:, t * N_SP:(t + 1) * N_SP] = h

    seq = seq_scr[...]                                                       # (BT, 640)

    # ---------------- CNN head: one dense MXU matmul per conv (conv folded into M1/M2/M3) --
    a1 = jnp.maximum(
        jnp.dot(seq, m1_ref[...], preferred_element_type=jnp.float32) + b1_ref[...], 0.0)
    a2 = jnp.maximum(
        jnp.dot(a1, m2_ref[...], preferred_element_type=jnp.float32) + b2_ref[...], 0.0)
    y = jnp.maximum(
        jnp.dot(a2, m3_ref[...], preferred_element_type=jnp.float32) + b3_ref[...], 0.0)

    out_ref[...] = y * topo_ref[...]                                         # lane-dense (BT, 64)


def _round_up(v, m):
    return ((v + m - 1) // m) * m


def _conv3x3_as_matrix(w):
    """Fold a 3x3 'same'-padded conv on the fixed 8x8 grid into a dense matrix.

    w: (Cout, Cin, 3, 3).  Returns M of shape (Cin*64, Cout*64) such that, for activations
    laid out as act[b, ci*64 + q] (q = y*8 + x, row-major), the conv output is
    out[b, co*64 + p] = sum_{ci,q} act[b, ci*64 + q] * M[ci*64 + q, co*64 + p].
    """
    cout, cin, kh, kw = w.shape
    p = jnp.arange(N_SP)
    py, px = p // SP, p % SP
    taps = []
    for ky in range(kh):
        for kx in range(kw):
            iy = py + (ky - 1)
            ix = px + (kx - 1)
            valid = (iy >= 0) & (iy < SP) & (ix >= 0) & (ix < SP)
            q = jnp.clip(iy, 0, SP - 1) * SP + jnp.clip(ix, 0, SP - 1)
            taps.append(((jnp.arange(N_SP)[:, None] == q[None, :]) &
                         valid[None, :]).astype(w.dtype))                    # (64_in, 64_out)
    s = jnp.stack(taps, 0).reshape(kh, kw, N_SP, N_SP)
    m = jnp.einsum('ocyx,yxqp->cqop', w, s)                                  # (Cin, 64, Cout, 64)
    return m.reshape(cin * N_SP, cout * N_SP)


def lstm_cnn_forward(x, adj, params, batch_tile=128):
    """Pallas forward of LSTM_CNN.  x: (B, 10, 8, 8) float32; adj is unused (as in PyTorch)."""
    del adj
    B = x.shape[0]
    hs = params["b1"].shape[0]
    x2 = x.reshape(B, T_SEQ, HID).astype(jnp.float32)                        # x.view(B, T, -1)

    # Batch tiling: BT rows per grid step (multiple of 8); pad B up to a multiple of BT.
    bt = min(batch_tile, _round_up(B, 8))
    b_pad = _round_up(B, bt)
    if b_pad != B:
        x2 = jnp.pad(x2, ((0, b_pad - B), (0, 0), (0, 0)))
    x_tbf = jnp.transpose(x2, (1, 0, 2))                                     # (T, B_pad, 64)

    # ---- parameter plumbing (plain JAX, once per call) ----
    wih_t = params["W_ih"].T                                                 # (64, 256)
    whh_t = params["W_hh"].T                                                 # (64, 256)
    lbias = (params["b_ih"] + params["b_hh"])[None, :]                       # (1, 256)
    m1 = _conv3x3_as_matrix(params["W1"])                                    # (640, hs*64)
    m2 = _conv3x3_as_matrix(params["W2"])                                    # (hs*64, hs*64)
    m3 = (params["W3"].reshape(hs, 1, 1) *
          jnp.eye(N_SP, dtype=jnp.float32)[None]).reshape(hs * N_SP, N_SP)   # 1x1 conv
    b1row = jnp.repeat(params["b1"], N_SP)[None, :]                          # (1, hs*64)
    b2row = jnp.repeat(params["b2"], N_SP)[None, :]                          # (1, hs*64)
    b3 = params["b3"].reshape(1, 1)
    topo_row = params["topo"].reshape(1, N_SP)                               # (1, 64)

    rep2 = lambda g: (0, 0)                                                  # grid-invariant blocks
    in_specs = [
        pl.BlockSpec((T_SEQ, bt, HID), lambda g: (0, g, 0)),                 # x   (T, BT, 64)
        pl.BlockSpec((HID, 4 * HID), rep2),                                  # W_ih^T
        pl.BlockSpec((HID, 4 * HID), rep2),                                  # W_hh^T
        pl.BlockSpec((1, 4 * HID), rep2),                                    # b_ih + b_hh
        pl.BlockSpec((T_SEQ * N_SP, hs * N_SP), rep2),                       # folded conv1
        pl.BlockSpec((1, hs * N_SP), rep2),                                  # conv1 bias row
        pl.BlockSpec((hs * N_SP, hs * N_SP), rep2),                          # folded conv2
        pl.BlockSpec((1, hs * N_SP), rep2),                                  # conv2 bias row
        pl.BlockSpec((hs * N_SP, N_SP), rep2),                               # folded conv3 (1x1)
        pl.BlockSpec((1, 1), rep2),                                          # conv3 bias
        pl.BlockSpec((1, N_SP), rep2),                                       # topo mask
    ]

    out = pl.pallas_call(
        lstm_cnn_kernel,
        out_shape=jax.ShapeDtypeStruct((b_pad, N_SP), jnp.float32),
        grid=(b_pad // bt,),
        in_specs=in_specs,
        out_specs=pl.BlockSpec((bt, N_SP), lambda g: (g, 0)),
        scratch_shapes=[pltpu.VMEM((bt, T_SEQ * N_SP), jnp.float32)],        # LSTM-out / conv1-in
        compiler_params=pltpu.CompilerParams(
            dimension_semantics=("parallel",),          # batch tiles are independent (v7x megacore)
            vmem_limit_bytes=48 * 1024 * 1024),         # budgeted for v7x (64 MiB physical)
    )(x_tbf, wih_t, whh_t, lbias, m1, b1row, m2, b2row, m3, b3, topo_row)
    return out[:B].reshape(B, SP, SP)


def init_params(key, hidden_size):
    """Deterministic synthetic parameters with the shapes implied by LSTM_CNN.__init__."""
    ks = jax.random.split(key, 10)

    def u(k, shape, scale=0.1):
        return jax.random.uniform(k, shape, jnp.float32, -1.0, 1.0) * scale

    params = dict(
        W_ih=u(ks[0], (4 * HID, HID)),             # nn.LSTM weight_ih_l0
        W_hh=u(ks[1], (4 * HID, HID)),             # nn.LSTM weight_hh_l0
        b_ih=u(ks[2], (4 * HID,)),
        b_hh=u(ks[3], (4 * HID,)),
        W1=u(ks[4], (hidden_size, T_SEQ, 3, 3)),   # Conv2d(10 -> HS, 3x3, pad=1)
        b1=u(ks[5], (hidden_size,)),
        W2=u(ks[6], (hidden_size, hidden_size, 3, 3)),
        b2=u(ks[7], (hidden_size,)),
        W3=u(ks[8], (1, hidden_size, 1, 1)),       # Conv2d(HS -> 1, 1x1)
        b3=u(ks[9], (1,)),
        topo=jnp.array(TOPO, jnp.float32),
    )
    # NOTE: self.fc / self.relu / dropout exist in __init__ but are unused by forward -> omitted.
    return params


def reference_forward(x, adj, p):
    """Pure-JAX (XLA) reference of the PyTorch forward, for validation."""
    del adj
    B = x.shape[0]
    x2 = x.reshape(B, T_SEQ, HID).astype(jnp.float32)
    wih_t, whh_t = p["W_ih"].T, p["W_hh"].T
    b = p["b_ih"] + p["b_hh"]
    hi = jax.lax.Precision.HIGHEST

    def step(carry, xt):
        h, c = carry
        g = jnp.dot(xt, wih_t, precision=hi) + jnp.dot(h, whh_t, precision=hi) + b
        i = jax.nn.sigmoid(g[:, 0 * HID:1 * HID])
        f = jax.nn.sigmoid(g[:, 1 * HID:2 * HID])
        gg = jnp.tanh(g[:, 2 * HID:3 * HID])
        o = jax.nn.sigmoid(g[:, 3 * HID:4 * HID])
        c = f * c + i * gg
        h = o * jnp.tanh(c)
        return (h, c), h

    init = (jnp.zeros((B, HID), jnp.float32), jnp.zeros((B, HID), jnp.float32))
    _, outs = lax.scan(step, init, jnp.swapaxes(x2, 0, 1))
    seq = jnp.swapaxes(outs, 0, 1).reshape(B, T_SEQ, SP, SP)                 # (B, 10, 8, 8)

    dn = ("NCHW", "OIHW", "NCHW")
    y = lax.conv_general_dilated(seq, p["W1"], (1, 1), ((1, 1), (1, 1)),
                                 dimension_numbers=dn, precision=hi)
    y = jnp.maximum(y + p["b1"][None, :, None, None], 0.0)
    y = lax.conv_general_dilated(y, p["W2"], (1, 1), ((1, 1), (1, 1)),
                                 dimension_numbers=dn, precision=hi)
    y = jnp.maximum(y + p["b2"][None, :, None, None], 0.0)
    y = lax.conv_general_dilated(y, p["W3"], (1, 1), ((0, 0), (0, 0)),
                                 dimension_numbers=dn, precision=hi)
    y = jnp.maximum(y + p["b3"][None, :, None, None], 0.0)[:, 0]             # squeeze(1) -> (B,8,8)
    return y * p["topo"][None]


if __name__ == "__main__":
    B, hidden_size = 2, 16
    key = jax.random.PRNGKey(0)
    kx, kp, kx2 = jax.random.split(key, 3)
    x = jax.random.normal(kx, (B, T_SEQ, SP, SP), dtype=jnp.float32)         # (2, 10, 8, 8)
    adj = jnp.zeros((SP, SP), jnp.float32)                                   # unused by forward
    params = init_params(kp, hidden_size)

    out = jax.block_until_ready(lstm_cnn_forward(x, adj, params))
    ref = jax.block_until_ready(reference_forward(x, adj, params))
    assert out.shape == (B, SP, SP), out.shape
    err = float(jnp.max(jnp.abs(out - ref)))
    if err > 5e-3:
        raise RuntimeError(f"Pallas kernel mismatch vs reference: max abs err = {err}")

    # Also exercise the batch-tiled path (grid > 1, padded batch remainder).
    B2 = 200
    xb = jax.random.normal(kx2, (B2, T_SEQ, SP, SP), dtype=jnp.float32)
    out2 = jax.block_until_ready(lstm_cnn_forward(xb, adj, params))
    ref2 = jax.block_until_ready(reference_forward(xb, adj, params))
    err2 = float(jnp.max(jnp.abs(out2 - ref2)))
    if err2 > 5e-3:
        raise RuntimeError(f"Pallas kernel mismatch (batched) vs reference: max abs err = {err2}")

    print("KERNEL_OK")
</pallas_src>

<mosaic_0001>
module attributes {stable_mosaic.version = 11 : i64} {
  func.func @lstm_cnn_kernel(%arg0: i32, %arg1: memref<10x8x64xf32, #tpu.memory_space<vmem>>, %arg2: memref<64x256xf32, #tpu.memory_space<vmem>>, %arg3: memref<64x256xf32, #tpu.memory_space<vmem>>, %arg4: memref<1x256xf32, #tpu.memory_space<vmem>>, %arg5: memref<640x1024xf32, #tpu.memory_space<vmem>>, %arg6: memref<1x1024xf32, #tpu.memory_space<vmem>>, %arg7: memref<1024x1024xf32, #tpu.memory_space<vmem>>, %arg8: memref<1x1024xf32, #tpu.memory_space<vmem>>, %arg9: memref<1024x64xf32, #tpu.memory_space<vmem>>, %arg10: memref<1x1xf32, #tpu.memory_space<vmem>>, %arg11: memref<1x64xf32, #tpu.memory_space<vmem>>, %arg12: memref<8x64xf32, #tpu.memory_space<vmem>>, %arg13: memref<8x640xf32, #tpu.memory_space<vmem>>) attributes {dimension_semantics = [#tpu.dimension_semantics<parallel>], iteration_bounds = array<i64: 1>, scalar_prefetch = 0 : i64, scratch_operands = 1 : i64, tpu.core_type = #tpu.core_type<tc>, window_params = [{transform_indices = @transform_0, window_bounds = array<i64: 10, 8, 64>}, {pipeline_mode = #tpu.pipeline_mode<synchronous>, transform_indices = @transform_1, window_bounds = array<i64: 64, 256>}, {pipeline_mode = #tpu.pipeline_mode<synchronous>, transform_indices = @transform_2, window_bounds = array<i64: 64, 256>}, {pipeline_mode = #tpu.pipeline_mode<synchronous>, transform_indices = @transform_3, window_bounds = array<i64: 1, 256>}, {pipeline_mode = #tpu.pipeline_mode<synchronous>, transform_indices = @transform_4, window_bounds = array<i64: 640, 1024>}, {pipeline_mode = #tpu.pipeline_mode<synchronous>, transform_indices = @transform_5, window_bounds = array<i64: 1, 1024>}, {pipeline_mode = #tpu.pipeline_mode<synchronous>, transform_indices = @transform_6, window_bounds = array<i64: 1024, 1024>}, {pipeline_mode = #tpu.pipeline_mode<synchronous>, transform_indices = @transform_7, window_bounds = array<i64: 1, 1024>}, {pipeline_mode = #tpu.pipeline_mode<synchronous>, transform_indices = @transform_8, window_bounds = array<i64: 1024, 64>}, {pipeline_mode = #tpu.pipeline_mode<synchronous>, transform_indices = @transform_9, window_bounds = array<i64: 1, 1>}, {pipeline_mode = #tpu.pipeline_mode<synchronous>, transform_indices = @transform_10, window_bounds = array<i64: 1, 64>}, {transform_indices = @transform_11, window_bounds = array<i64: 8, 64>}]} {
    %cst = arith.constant 0.000000e+00 : f32
    %0 = vector.broadcast %cst : f32 to vector<8x64xf32>
    %cst_0 = arith.constant 0.000000e+00 : f32
    %1 = vector.broadcast %cst_0 : f32 to vector<8x64xf32>
    %c0 = arith.constant 0 : index
    %c0_1 = arith.constant 0 : index
    %c0_2 = arith.constant 0 : index
    %2 = vector.load %arg1[%c0, %c0_1, %c0_2] : memref<10x8x64xf32, #tpu.memory_space<vmem>>, vector<1x8x64xf32>
    %3 = vector.shape_cast %2 : vector<1x8x64xf32> to vector<8x64xf32>
    %c0_3 = arith.constant 0 : index
    %c0_4 = arith.constant 0 : index
    %4 = vector.load %arg2[%c0_3, %c0_4] : memref<64x256xf32, #tpu.memory_space<vmem>>, vector<64x256xf32>
    %cst_5 = arith.constant dense<0.000000e+00> : vector<8x256xf32>
    %5 = tpu.matmul %3, %4, %cst_5 {dimension_numbers = #tpu.dot_dimension_numbers<[1], [0], [0], [1], [0, 0, 1, 1], [], []>} : vector<8x64xf32>, vector<64x256xf32>, vector<8x256xf32> -> vector<8x256xf32>
    %c0_6 = arith.constant 0 : index
    %c0_7 = arith.constant 0 : index
    %6 = vector.load %arg3[%c0_6, %c0_7] : memref<64x256xf32, #tpu.memory_space<vmem>>, vector<64x256xf32>
    %cst_8 = arith.constant dense<0.000000e+00> : vector<8x256xf32>
    %7 = tpu.matmul %0, %6, %cst_8 {dimension_numbers = #tpu.dot_dimension_numbers<[1], [0], [0], [1], [0, 0, 1, 1], [], []>} : vector<8x64xf32>, vector<64x256xf32>, vector<8x256xf32> -> vector<8x256xf32>
    %8 = arith.addf %5, %7 : vector<8x256xf32>
    %c0_9 = arith.constant 0 : index
    %c0_10 = arith.constant 0 : index
    %9 = vector.load %arg4[%c0_9, %c0_10] : memref<1x256xf32, #tpu.memory_space<vmem>>, vector<1x256xf32>
    %10 = vector.broadcast %9 : vector<1x256xf32> to vector<8x256xf32>
    %11 = arith.addf %8, %10 : vector<8x256xf32>
    %12 = vector.extract_strided_slice %11 {offsets = [0, 0], sizes = [8, 64], strides = [1, 1]} : vector<8x256xf32> to vector<8x64xf32>
    %13 = arith.negf %12 : vector<8x64xf32>
    %14 = math.exp %13 : vector<8x64xf32>
    %cst_11 = arith.constant 1.000000e+00 : f32
    %15 = vector.broadcast %cst_11 : f32 to vector<8x64xf32>
    %16 = arith.addf %15, %14 : vector<8x64xf32>
    %17 = arith.divf %15, %16 : vector<8x64xf32>
    %18 = vector.extract_strided_slice %11 {offsets = [0, 64], sizes = [8, 64], strides = [1, 1]} : vector<8x256xf32> to vector<8x64xf32>
    %19 = arith.negf %18 : vector<8x64xf32>
    %20 = math.exp %19 : vector<8x64xf32>
    %cst_12 = arith.constant 1.000000e+00 : f32
    %21 = vector.broadcast %cst_12 : f32 to vector<8x64xf32>
    %22 = arith.addf %21, %20 : vector<8x64xf32>
    %23 = arith.divf %21, %22 : vector<8x64xf32>
    %24 = vector.extract_strided_slice %11 {offsets = [0, 128], sizes = [8, 64], strides = [1, 1]} : vector<8x256xf32> to vector<8x64xf32>
    %25 = math.tanh %24 : vector<8x64xf32>
    %26 = vector.extract_strided_slice %11 {offsets = [0, 192], sizes = [8, 64], strides = [1, 1]} : vector<8x256xf32> to vector<8x64xf32>
    %27 = arith.negf %26 : vector<8x64xf32>
    %28 = math.exp %27 : vector<8x64xf32>
    %cst_13 = arith.constant 1.000000e+00 : f32
    %29 = vector.broadcast %cst_13 : f32 to vector<8x64xf32>
    %30 = arith.addf %29, %28 : vector<8x64xf32>
    %31 = arith.divf %29, %30 : vector<8x64xf32>
    %32 = arith.mulf %23, %1 : vector<8x64xf32>
    %33 = arith.mulf %17, %25 : vector<8x64xf32>
    %34 = arith.addf %32, %33 : vector<8x64xf32>
    %35 = math.tanh %34 : vector<8x64xf32>
    %36 = arith.mulf %31, %35 : vector<8x64xf32>
    %c0_14 = arith.constant 0 : index
    %c0_15 = arith.constant 0 : index
    %37 = vector.load %arg13[%c0_14, %c0_15] : memref<8x640xf32, #tpu.memory_space<vmem>>, vector<8x64xf32>
    tpu.vector_store %arg13[%c0_14, %c0_15], %36 {strides = array<i32>} : memref<8x640xf32, #tpu.memory_space<vmem>>, vector<8x64xf32>,
    %c1 = arith.constant 1 : index
    %c0_16 = arith.constant 0 : index
    %c0_17 = arith.constant 0 : index
    %38 = vector.load %arg1[%c1, %c0_16, %c0_17] : memref<10x8x64xf32, #tpu.memory_space<vmem>>, vector<1x8x64xf32>
    %39 = vector.shape_cast %38 : vector<1x8x64xf32> to vector<8x64xf32>
    %c0_18 = arith.constant 0 : index
    %c0_19 = arith.constant 0 : index
    %40 = vector.load %arg2[%c0_18, %c0_19] : memref<64x256xf32, #tpu.memory_space<vmem>>, vector<64x256xf32>
    %cst_20 = arith.constant dense<0.000000e+00> : vector<8x256xf32>
    %41 = tpu.matmul %39, %40, %cst_20 {dimension_numbers = #tpu.dot_dimension_numbers<[1], [0], [0], [1], [0, 0, 1, 1], [], []>} : vector<8x64xf32>, vector<64x256xf32>, vector<8x256xf32> -> vector<8x256xf32>
    %c0_21 = arith.constant 0 : index
    %c0_22 = arith.constant 0 : index
    %42 = vector.load %arg3[%c0_21, %c0_22] : memref<64x256xf32, #tpu.memory_space<vmem>>, vector<64x256xf32>
    %cst_23 = arith.constant dense<0.000000e+00> : vector<8x256xf32>
    %43 = tpu.matmul %36, %42, %cst_23 {dimension_numbers = #tpu.dot_dimension_numbers<[1], [0], [0], [1], [0, 0, 1, 1], [], []>} : vector<8x64xf32>, vector<64x256xf32>, vector<8x256xf32> -> vector<8x256xf32>
    %44 = arith.addf %41, %43 : vector<8x256xf32>
    %c0_24 = arith.constant 0 : index
    %c0_25 = arith.constant 0 : index
    %45 = vector.load %arg4[%c0_24, %c0_25] : memref<1x256xf32, #tpu.memory_space<vmem>>, vector<1x256xf32>
    %46 = vector.broadcast %45 : vector<1x256xf32> to vector<8x256xf32>
    %47 = arith.addf %44, %46 : vector<8x256xf32>
    %48 = vector.extract_strided_slice %47 {offsets = [0, 0], sizes = [8, 64], strides = [1, 1]} : vector<8x256xf32> to vector<8x64xf32>
    %49 = arith.negf %48 : vector<8x64xf32>
    %50 = math.exp %49 : vector<8x64xf32>
    %cst_26 = arith.constant 1.000000e+00 : f32
    %51 = vector.broadcast %cst_26 : f32 to vector<8x64xf32>
    %52 = arith.addf %51, %50 : vector<8x64xf32>
    %53 = arith.divf %51, %52 : vector<8x64xf32>
    %54 = vector.extract_strided_slice %47 {offsets = [0, 64], sizes = [8, 64], strides = [1, 1]} : vector<8x256xf32> to vector<8x64xf32>
    %55 = arith.negf %54 : vector<8x64xf32>
    %56 = math.exp %55 : vector<8x64xf32>
    %cst_27 = arith.constant 1.000000e+00 : f32
    %57 = vector.broadcast %cst_27 : f32 to vector<8x64xf32>
    %58 = arith.addf %57, %56 : vector<8x64xf32>
    %59 = arith.divf %57, %58 : vector<8x64xf32>
    %60 = vector.extract_strided_slice %47 {offsets = [0, 128], sizes = [8, 64], strides = [1, 1]} : vector<8x256xf32> to vector<8x64xf32>
    %61 = math.tanh %60 : vector<8x64xf32>
    %62 = vector.extract_strided_slice %47 {offsets = [0, 192], sizes = [8, 64], strides = [1, 1]} : vector<8x256xf32> to vector<8x64xf32>
    %63 = arith.negf %62 : vector<8x64xf32>
    %64 = math.exp %63 : vector<8x64xf32>
    %cst_28 = arith.constant 1.000000e+00 : f32
    %65 = vector.broadcast %cst_28 : f32 to vector<8x64xf32>
    %66 = arith.addf %65, %64 : vector<8x64xf32>
    %67 = arith.divf %65, %66 : vector<8x64xf32>
    %68 = arith.mulf %59, %34 : vector<8x64xf32>
    %69 = arith.mulf %53, %61 : vector<8x64xf32>
    %70 = arith.addf %68, %69 : vector<8x64xf32>
    %71 = math.tanh %70 : vector<8x64xf32>
    %72 = arith.mulf %67, %71 : vector<8x64xf32>
    %c0_29 = arith.constant 0 : index
    %c64 = arith.constant 64 : index
    %73 = vector.load %arg13[%c0_29, %c64] : memref<8x640xf32, #tpu.memory_space<vmem>>, vector<8x64xf32>
    tpu.vector_store %arg13[%c0_29, %c64], %72 {strides = array<i32>} : memref<8x640xf32, #tpu.memory_space<vmem>>, vector<8x64xf32>,
    %c2 = arith.constant 2 : index
    %c0_30 = arith.constant 0 : index
    %c0_31 = arith.constant 0 : index
    %74 = vector.load %arg1[%c2, %c0_30, %c0_31] : memref<10x8x64xf32, #tpu.memory_space<vmem>>, vector<1x8x64xf32>
    %75 = vector.shape_cast %74 : vector<1x8x64xf32> to vector<8x64xf32>
    %c0_32 = arith.constant 0 : index
    %c0_33 = arith.constant 0 : index
    %76 = vector.load %arg2[%c0_32, %c0_33] : memref<64x256xf32, #tpu.memory_space<vmem>>, vector<64x256xf32>
    %cst_34 = arith.constant dense<0.000000e+00> : vector<8x256xf32>
    %77 = tpu.matmul %75, %76, %cst_34 {dimension_numbers = #tpu.dot_dimension_numbers<[1], [0], [0], [1], [0, 0, 1, 1], [], []>} : vector<8x64xf32>, vector<64x256xf32>, vector<8x256xf32> -> vector<8x256xf32>
    %c0_35 = arith.constant 0 : index
    %c0_36 = arith.constant 0 : index
    %78 = vector.load %arg3[%c0_35, %c0_36] : memref<64x256xf32, #tpu.memory_space<vmem>>, vector<64x256xf32>
    %cst_37 = arith.constant dense<0.000000e+00> : vector<8x256xf32>
    %79 = tpu.matmul %72, %78, %cst_37 {dimension_numbers = #tpu.dot_dimension_numbers<[1], [0], [0], [1], [0, 0, 1, 1], [], []>} : vector<8x64xf32>, vector<64x256xf32>, vector<8x256xf32> -> vector<8x256xf32>
    %80 = arith.addf %77, %79 : vector<8x256xf32>
    %c0_38 = arith.constant 0 : index
    %c0_39 = arith.constant 0 : index
    %81 = vector.load %arg4[%c0_38, %c0_39] : memref<1x256xf32, #tpu.memory_space<vmem>>, vector<1x256xf32>
    %82 = vector.broadcast %81 : vector<1x256xf32> to vector<8x256xf32>
    %83 = arith.addf %80, %82 : vector<8x256xf32>
    %84 = vector.extract_strided_slice %83 {offsets = [0, 0], sizes = [8, 64], strides = [1, 1]} : vector<8x256xf32> to vector<8x64xf32>
    %85 = arith.negf %84 : vector<8x64xf32>
    %86 = math.exp %85 : vector<8x64xf32>
    %cst_40 = arith.constant 1.000000e+00 : f32
    %87 = vector.broadcast %cst_40 : f32 to vector<8x64xf32>
    %88 = arith.addf %87, %86 : vector<8x64xf32>
    %89 = arith.divf %87, %88 : vector<8x64xf32>
    %90 = vector.extract_strided_slice %83 {offsets = [0, 64], sizes = [8, 64], strides = [1, 1]} : vector<8x256xf32> to vector<8x64xf32>
    %91 = arith.negf %90 : vector<8x64xf32>
    %92 = math.exp %91 : vector<8x64xf32>
    %cst_41 = arith.constant 1.000000e+00 : f32
    %93 = vector.broadcast %cst_41 : f32 to vector<8x64xf32>
    %94 = arith.addf %93, %92 : vector<8x64xf32>
    %95 = arith.divf %93, %94 : vector<8x64xf32>
    %96 = vector.extract_strided_slice %83 {offsets = [0, 128], sizes = [8, 64], strides = [1, 1]} : vector<8x256xf32> to vector<8x64xf32>
    %97 = math.tanh %96 : vector<8x64xf32>
    %98 = vector.extract_strided_slice %83 {offsets = [0, 192], sizes = [8, 64], strides = [1, 1]} : vector<8x256xf32> to vector<8x64xf32>
    %99 = arith.negf %98 : vector<8x64xf32>
    %100 = math.exp %99 : vector<8x64xf32>
    %cst_42 = arith.constant 1.000000e+00 : f32
    %101 = vector.broadcast %cst_42 : f32 to vector<8x64xf32>
    %102 = arith.addf %101, %100 : vector<8x64xf32>
    %103 = arith.divf %101, %102 : vector<8x64xf32>
    %104 = arith.mulf %95, %70 : vector<8x64xf32>
    %105 = arith.mulf %89, %97 : vector<8x64xf32>
    %106 = arith.addf %104, %105 : vector<8x64xf32>
    %107 = math.tanh %106 : vector<8x64xf32>
    %108 = arith.mulf %103, %107 : vector<8x64xf32>
    %c0_43 = arith.constant 0 : index
    %c128 = arith.constant 128 : index
    %109 = vector.load %arg13[%c0_43, %c128] : memref<8x640xf32, #tpu.memory_space<vmem>>, vector<8x64xf32>
    tpu.vector_store %arg13[%c0_43, %c128], %108 {strides = array<i32>} : memref<8x640xf32, #tpu.memory_space<vmem>>, vector<8x64xf32>,
    %c3 = arith.constant 3 : index
    %c0_44 = arith.constant 0 : index
    %c0_45 = arith.constant 0 : index
    %110 = vector.load %arg1[%c3, %c0_44, %c0_45] : memref<10x8x64xf32, #tpu.memory_space<vmem>>, vector<1x8x64xf32>
    %111 = vector.shape_cast %110 : vector<1x8x64xf32> to vector<8x64xf32>
    %c0_46 = arith.constant 0 : index
    %c0_47 = arith.constant 0 : index
    %112 = vector.load %arg2[%c0_46, %c0_47] : memref<64x256xf32, #tpu.memory_space<vmem>>, vector<64x256xf32>
    %cst_48 = arith.constant dense<0.000000e+00> : vector<8x256xf32>
    %113 = tpu.matmul %111, %112, %cst_48 {dimension_numbers = #tpu.dot_dimension_numbers<[1], [0], [0], [1], [0, 0, 1, 1], [], []>} : vector<8x64xf32>, vector<64x256xf32>, vector<8x256xf32> -> vector<8x256xf32>
    %c0_49 = arith.constant 0 : index
    %c0_50 = arith.constant 0 : index
    %114 = vector.load %arg3[%c0_49, %c0_50] : memref<64x256xf32, #tpu.memory_space<vmem>>, vector<64x256xf32>
    %cst_51 = arith.constant dense<0.000000e+00> : vector<8x256xf32>
    %115 = tpu.matmul %108, %114, %cst_51 {dimension_numbers = #tpu.dot_dimension_numbers<[1], [0], [0], [1], [0, 0, 1, 1], [], []>} : vector<8x64xf32>, vector<64x256xf32>, vector<8x256xf32> -> vector<8x256xf32>
    %116 = arith.addf %113, %115 : vector<8x256xf32>
    %c0_52 = arith.constant 0 : index
    %c0_53 = arith.constant 0 : index
    %117 = vector.load %arg4[%c0_52, %c0_53] : memref<1x256xf32, #tpu.memory_space<vmem>>, vector<1x256xf32>
    %118 = vector.broadcast %117 : vector<1x256xf32> to vector<8x256xf32>
    %119 = arith.addf %116, %118 : vector<8x256xf32>
    %120 = vector.extract_strided_slice %119 {offsets = [0, 0], sizes = [8, 64], strides = [1, 1]} : vector<8x256xf32> to vector<8x64xf32>
    %121 = arith.negf %120 : vector<8x64xf32>
    %122 = math.exp %121 : vector<8x64xf32>
    %cst_54 = arith.constant 1.000000e+00 : f32
    %123 = vector.broadcast %cst_54 : f32 to vector<8x64xf32>
    %124 = arith.addf %123, %122 : vector<8x64xf32>
    %125 = arith.divf %123, %124 : vector<8x64xf32>
    %126 = vector.extract_strided_slice %119 {offsets = [0, 64], sizes = [8, 64], strides = [1, 1]} : vector<8x256xf32> to vector<8x64xf32>
    %127 = arith.negf %126 : vector<8x64xf32>
    %128 = math.exp %127 : vector<8x64xf32>
    %cst_55 = arith.constant 1.000000e+00 : f32
    %129 = vector.broadcast %cst_55 : f32 to vector<8x64xf32>
    %130 = arith.addf %129, %128 : vector<8x64xf32>
    %131 = arith.divf %129, %130 : vector<8x64xf32>
    %132 = vector.extract_strided_slice %119 {offsets = [0, 128], sizes = [8, 64], strides = [1, 1]} : vector<8x256xf32> to vector<8x64xf32>
    %133 = math.tanh %132 : vector<8x64xf32>
    %134 = vector.extract_strided_slice %119 {offsets = [0, 192], sizes = [8, 64], strides = [1, 1]} : vector<8x256xf32> to vector<8x64xf32>
    %135 = arith.negf %134 : vector<8x64xf32>
    %136 = math.exp %135 : vector<8x64xf32>
    %cst_56 = arith.constant 1.000000e+00 : f32
    %137 = vector.broadcast %cst_56 : f32 to vector<8x64xf32>
    %138 = arith.addf %137, %136 : vector<8x64xf32>
    %139 = arith.divf %137, %138 : vector<8x64xf32>
    %140 = arith.mulf %131, %106 : vector<8x64xf32>
    %141 = arith.mulf %125, %133 : vector<8x64xf32>
    %142 = arith.addf %140, %141 : vector<8x64xf32>
    %143 = math.tanh %142 : vector<8x64xf32>
    %144 = arith.mulf %139, %143 : vector<8x64xf32>
    %c0_57 = arith.constant 0 : index
    %c192 = arith.constant 192 : index
    %145 = vector.load %arg13[%c0_57, %c192] : memref<8x640xf32, #tpu.memory_space<vmem>>, vector<8x64xf32>
    tpu.vector_store %arg13[%c0_57, %c192], %144 {strides = array<i32>} : memref<8x640xf32, #tpu.memory_space<vmem>>, vector<8x64xf32>,
    %c4 = arith.constant 4 : index
    %c0_58 = arith.constant 0 : index
    %c0_59 = arith.constant 0 : index
    %146 = vector.load %arg1[%c4, %c0_58, %c0_59] : memref<10x8x64xf32, #tpu.memory_space<vmem>>, vector<1x8x64xf32>
    %147 = vector.shape_cast %146 : vector<1x8x64xf32> to vector<8x64xf32>
    %c0_60 = arith.constant 0 : index
    %c0_61 = arith.constant 0 : index
    %148 = vector.load %arg2[%c0_60, %c0_61] : memref<64x256xf32, #tpu.memory_space<vmem>>, vector<64x256xf32>
    %cst_62 = arith.constant dense<0.000000e+00> : vector<8x256xf32>
    %149 = tpu.matmul %147, %148, %cst_62 {dimension_numbers = #tpu.dot_dimension_numbers<[1], [0], [0], [1], [0, 0, 1, 1], [], []>} : vector<8x64xf32>, vector<64x256xf32>, vector<8x256xf32> -> vector<8x256xf32>
    %c0_63 = arith.constant 0 : index
    %c0_64 = arith.constant 0 : index
    %150 = vector.load %arg3[%c0_63, %c0_64] : memref<64x256xf32, #tpu.memory_space<vmem>>, vector<64x256xf32>
    %cst_65 = arith.constant dense<0.000000e+00> : vector<8x256xf32>
    %151 = tpu.matmul %144, %150, %cst_65 {dimension_numbers = #tpu.dot_dimension_numbers<[1], [0], [0], [1], [0, 0, 1, 1], [], []>} : vector<8x64xf32>, vector<64x256xf32>, vector<8x256xf32> -> vector<8x256xf32>
    %152 = arith.addf %149, %151 : vector<8x256xf32>
    %c0_66 = arith.constant 0 : index
    %c0_67 = arith.constant 0 : index
    %153 = vector.load %arg4[%c0_66, %c0_67] : memref<1x256xf32, #tpu.memory_space<vmem>>, vector<1x256xf32>
    %154 = vector.broadcast %153 : vector<1x256xf32> to vector<8x256xf32>
    %155 = arith.addf %152, %154 : vector<8x256xf32>
    %156 = vector.extract_strided_slice %155 {offsets = [0, 0], sizes = [8, 64], strides = [1, 1]} : vector<8x256xf32> to vector<8x64xf32>
    %157 = arith.negf %156 : vector<8x64xf32>
    %158 = math.exp %157 : vector<8x64xf32>
    %cst_68 = arith.constant 1.000000e+00 : f32
    %159 = vector.broadcast %cst_68 : f32 to vector<8x64xf32>
    %160 = arith.addf %159, %158 : vector<8x64xf32>
    %161 = arith.divf %159, %160 : vector<8x64xf32>
    %162 = vector.extract_strided_slice %155 {offsets = [0, 64], sizes = [8, 64], strides = [1, 1]} : vector<8x256xf32> to vector<8x64xf32>
    %163 = arith.negf %162 : vector<8x64xf32>
    %164 = math.exp %163 : vector<8x64xf32>
    %cst_69 = arith.constant 1.000000e+00 : f32
    %165 = vector.broadcast %cst_69 : f32 to vector<8x64xf32>
    %166 = arith.addf %165, %164 : vector<8x64xf32>
    %167 = arith.divf %165, %166 : vector<8x64xf32>
    %168 = vector.extract_strided_slice %155 {offsets = [0, 128], sizes = [8, 64], strides = [1, 1]} : vector<8x256xf32> to vector<8x64xf32>
    %169 = math.tanh %168 : vector<8x64xf32>
    %170 = vector.extract_strided_slice %155 {offsets = [0, 192], sizes = [8, 64], strides = [1, 1]} : vector<8x256xf32> to vector<8x64xf32>
    %171 = arith.negf %170 : vector<8x64xf32>
    %172 = math.exp %171 : vector<8x64xf32>
    %cst_70 = arith.constant 1.000000e+00 : f32
    %173 = vector.broadcast %cst_70 : f32 to vector<8x64xf32>
    %174 = arith.addf %173, %172 : vector<8x64xf32>
    %175 = arith.divf %173, %174 : vector<8x64xf32>
    %176 = arith.mulf %167, %142 : vector<8x64xf32>
    %177 = arith.mulf %161, %169 : vector<8x64xf32>
    %178 = arith.addf %176, %177 : vector<8x64xf32>
    %179 = math.tanh %178 : vector<8x64xf32>
    %180 = arith.mulf %175, %179 : vector<8x64xf32>
    %c0_71 = arith.constant 0 : index
    %c256 = arith.constant 256 : index
    %181 = vector.load %arg13[%c0_71, %c256] : memref<8x640xf32, #tpu.memory_space<vmem>>, vector<8x64xf32>
    tpu.vector_store %arg13[%c0_71, %c256], %180 {strides = array<i32>} : memref<8x640xf32, #tpu.memory_space<vmem>>, vector<8x64xf32>,
    %c5 = arith.constant 5 : index
    %c0_72 = arith.constant 0 : index
    %c0_73 = arith.constant 0 : index
    %182 = vector.load %arg1[%c5, %c0_72, %c0_73] : memref<10x8x64xf32, #tpu.memory_space<vmem>>, vector<1x8x64xf32>
    %183 = vector.shape_cast %182 : vector<1x8x64xf32> to vector<8x64xf32>
    %c0_74 = arith.constant 0 : index
    %c0_75 = arith.constant 0 : index
    %184 = vector.load %arg2[%c0_74, %c0_75] : memref<64x256xf32, #tpu.memory_space<vmem>>, vector<64x256xf32>
    %cst_76 = arith.constant dense<0.000000e+00> : vector<8x256xf32>
    %185 = tpu.matmul %183, %184, %cst_76 {dimension_numbers = #tpu.dot_dimension_numbers<[1], [0], [0], [1], [0, 0, 1, 1], [], []>} : vector<8x64xf32>, vector<64x256xf32>, vector<8x256xf32> -> vector<8x256xf32>
    %c0_77 = arith.constant 0 : index
    %c0_78 = arith.constant 0 : index
    %186 = vector.load %arg3[%c0_77, %c0_78] : memref<64x256xf32, #tpu.memory_space<vmem>>, vector<64x256xf32>
    %cst_79 = arith.constant dense<0.000000e+00> : vector<8x256xf32>
    %187 = tpu.matmul %180, %186, %cst_79 {dimension_numbers = #tpu.dot_dimension_numbers<[1], [0], [0], [1], [0, 0, 1, 1], [], []>} : vector<8x64xf32>, vector<64x256xf32>, vector<8x256xf32> -> vector<8x256xf32>
    %188 = arith.addf %185, %187 : vector<8x256xf32>
    %c0_80 = arith.constant 0 : index
    %c0_81 = arith.constant 0 : index
    %189 = vector.load %arg4[%c0_80, %c0_81] : memref<1x256xf32, #tpu.memory_space<vmem>>, vector<1x256xf32>
    %190 = vector.broadcast %189 : vector<1x256xf32> to vector<8x256xf32>
    %191 = arith.addf %188, %190 : vector<8x256xf32>
    %192 = vector.extract_strided_slice %191 {offsets = [0, 0], sizes = [8, 64], strides = [1, 1]} : vector<8x256xf32> to vector<8x64xf32>
    %193 = arith.negf %192 : vector<8x64xf32>
    %194 = math.exp %193 : vector<8x64xf32>
    %cst_82 = arith.constant 1.000000e+00 : f32
    %195 = vector.broadcast %cst_82 : f32 to vector<8x64xf32>
    %196 = arith.addf %195, %194 : vector<8x64xf32>
    %197 = arith.divf %195, %196 : vector<8x64xf32>
    %198 = vector.extract_strided_slice %191 {offsets = [0, 64], sizes = [8, 64], strides = [1, 1]} : vector<8x256xf32> to vector<8x64xf32>
    %199 = arith.negf %198 : vector<8x64xf32>
    %200 = math.exp %199 : vector<8x64xf32>
    %cst_83 = arith.constant 1.000000e+00 : f32
    %201 = vector.broadcast %cst_83 : f32 to vector<8x64xf32>
    %202 = arith.addf %201, %200 : vector<8x64xf32>
    %203 = arith.divf %201, %202 : vector<8x64xf32>
    %204 = vector.extract_strided_slice %191 {offsets = [0, 128], sizes = [8, 64], strides = [1, 1]} : vector<8x256xf32> to vector<8x64xf32>
    %205 = math.tanh %204 : vector<8x64xf32>
    %206 = vector.extract_strided_slice %191 {offsets = [0, 192], sizes = [8, 64], strides = [1, 1]} : vector<8x256xf32> to vector<8x64xf32>
    %207 = arith.negf %206 : vector<8x64xf32>
    %208 = math.exp %207 : vector<8x64xf32>
    %cst_84 = arith.constant 1.000000e+00 : f32
    %209 = vector.broadcast %cst_84 : f32 to vector<8x64xf32>
    %210 = arith.addf %209, %208 : vector<8x64xf32>
    %211 = arith.divf %209, %210 : vector<8x64xf32>
    %212 = arith.mulf %203, %178 : vector<8x64xf32>
    %213 = arith.mulf %197, %205 : vector<8x64xf32>
    %214 = arith.addf %212, %213 : vector<8x64xf32>
    %215 = math.tanh %214 : vector<8x64xf32>
    %216 = arith.mulf %211, %215 : vector<8x64xf32>
    %c0_85 = arith.constant 0 : index
    %c320 = arith.constant 320 : index
    %217 = vector.load %arg13[%c0_85, %c320] : memref<8x640xf32, #tpu.memory_space<vmem>>, vector<8x64xf32>
    tpu.vector_store %arg13[%c0_85, %c320], %216 {strides = array<i32>} : memref<8x640xf32, #tpu.memory_space<vmem>>, vector<8x64xf32>,
    %c6 = arith.constant 6 : index
    %c0_86 = arith.constant 0 : index
    %c0_87 = arith.constant 0 : index
    %218 = vector.load %arg1[%c6, %c0_86, %c0_87] : memref<10x8x64xf32, #tpu.memory_space<vmem>>, vector<1x8x64xf32>
    %219 = vector.shape_cast %218 : vector<1x8x64xf32> to vector<8x64xf32>
    %c0_88 = arith.constant 0 : index
    %c0_89 = arith.constant 0 : index
    %220 = vector.load %arg2[%c0_88, %c0_89] : memref<64x256xf32, #tpu.memory_space<vmem>>, vector<64x256xf32>
    %cst_90 = arith.constant dense<0.000000e+00> : vector<8x256xf32>
    %221 = tpu.matmul %219, %220, %cst_90 {dimension_numbers = #tpu.dot_dimension_numbers<[1], [0], [0], [1], [0, 0, 1, 1], [], []>} : vector<8x64xf32>, vector<64x256xf32>, vector<8x256xf32> -> vector<8x256xf32>
    %c0_91 = arith.constant 0 : index
    %c0_92 = arith.constant 0 : index
    %222 = vector.load %arg3[%c0_91, %c0_92] : memref<64x256xf32, #tpu.memory_space<vmem>>, vector<64x256xf32>
    %cst_93 = arith.constant dense<0.000000e+00> : vector<8x256xf32>
    %223 = tpu.matmul %216, %222, %cst_93 {dimension_numbers = #tpu.dot_dimension_numbers<[1], [0], [0], [1], [0, 0, 1, 1], [], []>} : vector<8x64xf32>, vector<64x256xf32>, vector<8x256xf32> -> vector<8x256xf32>
    %224 = arith.addf %221, %223 : vector<8x256xf32>
    %c0_94 = arith.constant 0 : index
    %c0_95 = arith.constant 0 : index
    %225 = vector.load %arg4[%c0_94, %c0_95] : memref<1x256xf32, #tpu.memory_space<vmem>>, vector<1x256xf32>
    %226 = vector.broadcast %225 : vector<1x256xf32> to vector<8x256xf32>
    %227 = arith.addf %224, %226 : vector<8x256xf32>
    %228 = vector.extract_strided_slice %227 {offsets = [0, 0], sizes = [8, 64], strides = [1, 1]} : vector<8x256xf32> to vector<8x64xf32>
    %229 = arith.negf %228 : vector<8x64xf32>
    %230 = math.exp %229 : vector<8x64xf32>
    %cst_96 = arith.constant 1.000000e+00 : f32
    %231 = vector.broadcast %cst_96 : f32 to vector<8x64xf32>
    %232 = arith.addf %231, %230 : vector<8x64xf32>
    %233 = arith.divf %231, %232 : vector<8x64xf32>
    %234 = vector.extract_strided_slice %227 {offsets = [0, 64], sizes = [8, 64], strides = [1, 1]} : vector<8x256xf32> to vector<8x64xf32>
    %235 = arith.negf %234 : vector<8x64xf32>
    %236 = math.exp %235 : vector<8x64xf32>
    %cst_97 = arith.constant 1.000000e+00 : f32
    %237 = vector.broadcast %cst_97 : f32 to vector<8x64xf32>
    %238 = arith.addf %237, %236 : vector<8x64xf32>
    %239 = arith.divf %237, %238 : vector<8x64xf32>
    %240 = vector.extract_strided_slice %227 {offsets = [0, 128], sizes = [8, 64], strides = [1, 1]} : vector<8x256xf32> to vector<8x64xf32>
    %241 = math.tanh %240 : vector<8x64xf32>
    %242 = vector.extract_strided_slice %227 {offsets = [0, 192], sizes = [8, 64], strides = [1, 1]} : vector<8x256xf32> to vector<8x64xf32>
    %243 = arith.negf %242 : vector<8x64xf32>
    %244 = math.exp %243 : vector<8x64xf32>
    %cst_98 = arith.constant 1.000000e+00 : f32
    %245 = vector.broadcast %cst_98 : f32 to vector<8x64xf32>
    %246 = arith.addf %245, %244 : vector<8x64xf32>
    %247 = arith.divf %245, %246 : vector<8x64xf32>
    %248 = arith.mulf %239, %214 : vector<8x64xf32>
    %249 = arith.mulf %233, %241 : vector<8x64xf32>
    %250 = arith.addf %248, %249 : vector<8x64xf32>
    %251 = math.tanh %250 : vector<8x64xf32>
    %252 = arith.mulf %247, %251 : vector<8x64xf32>
    %c0_99 = arith.constant 0 : index
    %c384 = arith.constant 384 : index
    %253 = vector.load %arg13[%c0_99, %c384] : memref<8x640xf32, #tpu.memory_space<vmem>>, vector<8x64xf32>
    tpu.vector_store %arg13[%c0_99, %c384], %252 {strides = array<i32>} : memref<8x640xf32, #tpu.memory_space<vmem>>, vector<8x64xf32>,
    %c7 = arith.constant 7 : index
    %c0_100 = arith.constant 0 : index
    %c0_101 = arith.constant 0 : index
    %254 = vector.load %arg1[%c7, %c0_100, %c0_101] : memref<10x8x64xf32, #tpu.memory_space<vmem>>, vector<1x8x64xf32>
    %255 = vector.shape_cast %254 : vector<1x8x64xf32> to vector<8x64xf32>
    %c0_102 = arith.constant 0 : index
    %c0_103 = arith.constant 0 : index
    %256 = vector.load %arg2[%c0_102, %c0_103] : memref<64x256xf32, #tpu.memory_space<vmem>>, vector<64x256xf32>
    %cst_104 = arith.constant dense<0.000000e+00> : vector<8x256xf32>
    %257 = tpu.matmul %255, %256, %cst_104 {dimension_numbers = #tpu.dot_dimension_numbers<[1], [0], [0], [1], [0, 0, 1, 1], [], []>} : vector<8x64xf32>, vector<64x256xf32>, vector<8x256xf32> -> vector<8x256xf32>
    %c0_105 = arith.constant 0 : index
    %c0_106 = arith.constant 0 : index
    %258 = vector.load %arg3[%c0_105, %c0_106] : memref<64x256xf32, #tpu.memory_space<vmem>>, vector<64x256xf32>
    %cst_107 = arith.constant dense<0.000000e+00> : vector<8x256xf32>
    %259 = tpu.matmul %252, %258, %cst_107 {dimension_numbers = #tpu.dot_dimension_numbers<[1], [0], [0], [1], [0, 0, 1, 1], [], []>} : vector<8x64xf32>, vector<64x256xf32>, vector<8x256xf32> -> vector<8x256xf32>
    %260 = arith.addf %257, %259 : vector<8x256xf32>
    %c0_108 = arith.constant 0 : index
    %c0_109 = arith.constant 0 : index
    %261 = vector.load %arg4[%c0_108, %c0_109] : memref<1x256xf32, #tpu.memory_space<vmem>>, vector<1x256xf32>
    %262 = vector.broadcast %261 : vector<1x256xf32> to vector<8x256xf32>
    %263 = arith.addf %260, %262 : vector<8x256xf32>
    %264 = vector.extract_strided_slice %263 {offsets = [0, 0], sizes = [8, 64], strides = [1, 1]} : vector<8x256xf32> to vector<8x64xf32>
    %265 = arith.negf %264 : vector<8x64xf32>
    %266 = math.exp %265 : vector<8x64xf32>
    %cst_110 = arith.constant 1.000000e+00 : f32
    %267 = vector.broadcast %cst_110 : f32 to vector<8x64xf32>
    %268 = arith.addf %267, %266 : vector<8x64xf32>
    %269 = arith.divf %267, %268 : vector<8x64xf32>
    %270 = vector.extract_strided_slice %263 {offsets = [0, 64], sizes = [8, 64], strides = [1, 1]} : vector<8x256xf32> to vector<8x64xf32>
    %271 = arith.negf %270 : vector<8x64xf32>
    %272 = math.exp %271 : vector<8x64xf32>
    %cst_111 = arith.constant 1.000000e+00 : f32
    %273 = vector.broadcast %cst_111 : f32 to vector<8x64xf32>
    %274 = arith.addf %273, %272 : vector<8x64xf32>
    %275 = arith.divf %273, %274 : vector<8x64xf32>
    %276 = vector.extract_strided_slice %263 {offsets = [0, 128], sizes = [8, 64], strides = [1, 1]} : vector<8x256xf32> to vector<8x64xf32>
    %277 = math.tanh %276 : vector<8x64xf32>
    %278 = vector.extract_strided_slice %263 {offsets = [0, 192], sizes = [8, 64], strides = [1, 1]} : vector<8x256xf32> to vector<8x64xf32>
    %279 = arith.negf %278 : vector<8x64xf32>
    %280 = math.exp %279 : vector<8x64xf32>
    %cst_112 = arith.constant 1.000000e+00 : f32
    %281 = vector.broadcast %cst_112 : f32 to vector<8x64xf32>
    %282 = arith.addf %281, %280 : vector<8x64xf32>
    %283 = arith.divf %281, %282 : vector<8x64xf32>
    %284 = arith.mulf %275, %250 : vector<8x64xf32>
    %285 = arith.mulf %269, %277 : vector<8x64xf32>
    %286 = arith.addf %284, %285 : vector<8x64xf32>
    %287 = math.tanh %286 : vector<8x64xf32>
    %288 = arith.mulf %283, %287 : vector<8x64xf32>
    %c0_113 = arith.constant 0 : index
    %c448 = arith.constant 448 : index
    %289 = vector.load %arg13[%c0_113, %c448] : memref<8x640xf32, #tpu.memory_space<vmem>>, vector<8x64xf32>
    tpu.vector_store %arg13[%c0_113, %c448], %288 {strides = array<i32>} : memref<8x640xf32, #tpu.memory_space<vmem>>, vector<8x64xf32>,
    %c8 = arith.constant 8 : index
    %c0_114 = arith.constant 0 : index
    %c0_115 = arith.constant 0 : index
    %290 = vector.load %arg1[%c8, %c0_114, %c0_115] : memref<10x8x64xf32, #tpu.memory_space<vmem>>, vector<1x8x64xf32>
    %291 = vector.shape_cast %290 : vector<1x8x64xf32> to vector<8x64xf32>
    %c0_116 = arith.constant 0 : index
    %c0_117 = arith.constant 0 : index
    %292 = vector.load %arg2[%c0_116, %c0_117] : memref<64x256xf32, #tpu.memory_space<vmem>>, vector<64x256xf32>
    %cst_118 = arith.constant dense<0.000000e+00> : vector<8x256xf32>
    %293 = tpu.matmul %291, %292, %cst_118 {dimension_numbers = #tpu.dot_dimension_numbers<[1], [0], [0], [1], [0, 0, 1, 1], [], []>} : vector<8x64xf32>, vector<64x256xf32>, vector<8x256xf32> -> vector<8x256xf32>
    %c0_119 = arith.constant 0 : index
    %c0_120 = arith.constant 0 : index
    %294 = vector.load %arg3[%c0_119, %c0_120] : memref<64x256xf32, #tpu.memory_space<vmem>>, vector<64x256xf32>
    %cst_121 = arith.constant dense<0.000000e+00> : vector<8x256xf32>
    %295 = tpu.matmul %288, %294, %cst_121 {dimension_numbers = #tpu.dot_dimension_numbers<[1], [0], [0], [1], [0, 0, 1, 1], [], []>} : vector<8x64xf32>, vector<64x256xf32>, vector<8x256xf32> -> vector<8x256xf32>
    %296 = arith.addf %293, %295 : vector<8x256xf32>
    %c0_122 = arith.constant 0 : index
    %c0_123 = arith.constant 0 : index
    %297 = vector.load %arg4[%c0_122, %c0_123] : memref<1x256xf32, #tpu.memory_space<vmem>>, vector<1x256xf32>
    %298 = vector.broadcast %297 : vector<1x256xf32> to vector<8x256xf32>
    %299 = arith.addf %296, %298 : vector<8x256xf32>
    %300 = vector.extract_strided_slice %299 {offsets = [0, 0], sizes = [8, 64], strides = [1, 1]} : vector<8x256xf32> to vector<8x64xf32>
    %301 = arith.negf %300 : vector<8x64xf32>
    %302 = math.exp %301 : vector<8x64xf32>
    %cst_124 = arith.constant 1.000000e+00 : f32
    %303 = vector.broadcast %cst_124 : f32 to vector<8x64xf32>
    %304 = arith.addf %303, %302 : vector<8x64xf32>
    %305 = arith.divf %303, %304 : vector<8x64xf32>
    %306 = vector.extract_strided_slice %299 {offsets = [0, 64], sizes = [8, 64], strides = [1, 1]} : vector<8x256xf32> to vector<8x64xf32>
    %307 = arith.negf %306 : vector<8x64xf32>
    %308 = math.exp %307 : vector<8x64xf32>
    %cst_125 = arith.constant 1.000000e+00 : f32
    %309 = vector.broadcast %cst_125 : f32 to vector<8x64xf32>
    %310 = arith.addf %309, %308 : vector<8x64xf32>
    %311 = arith.divf %309, %310 : vector<8x64xf32>
    %312 = vector.extract_strided_slice %299 {offsets = [0, 128], sizes = [8, 64], strides = [1, 1]} : vector<8x256xf32> to vector<8x64xf32>
    %313 = math.tanh %312 : vector<8x64xf32>
    %314 = vector.extract_strided_slice %299 {offsets = [0, 192], sizes = [8, 64], strides = [1, 1]} : vector<8x256xf32> to vector<8x64xf32>
    %315 = arith.negf %314 : vector<8x64xf32>
    %316 = math.exp %315 : vector<8x64xf32>
    %cst_126 = arith.constant 1.000000e+00 : f32
    %317 = vector.broadcast %cst_126 : f32 to vector<8x64xf32>
    %318 = arith.addf %317, %316 : vector<8x64xf32>
    %319 = arith.divf %317, %318 : vector<8x64xf32>
    %320 = arith.mulf %311, %286 : vector<8x64xf32>
    %321 = arith.mulf %305, %313 : vector<8x64xf32>
    %322 = arith.addf %320, %321 : vector<8x64xf32>
    %323 = math.tanh %322 : vector<8x64xf32>
    %324 = arith.mulf %319, %323 : vector<8x64xf32>
    %c0_127 = arith.constant 0 : index
    %c512 = arith.constant 512 : index
    %325 = vector.load %arg13[%c0_127, %c512] : memref<8x640xf32, #tpu.memory_space<vmem>>, vector<8x64xf32>
    tpu.vector_store %arg13[%c0_127, %c512], %324 {strides = array<i32>} : memref<8x640xf32, #tpu.memory_space<vmem>>, vector<8x64xf32>,
    %c9 = arith.constant 9 : index
    %c0_128 = arith.constant 0 : index
    %c0_129 = arith.constant 0 : index
    %326 = vector.load %arg1[%c9, %c0_128, %c0_129] : memref<10x8x64xf32, #tpu.memory_space<vmem>>, vector<1x8x64xf32>
    %327 = vector.shape_cast %326 : vector<1x8x64xf32> to vector<8x64xf32>
    %c0_130 = arith.constant 0 : index
    %c0_131 = arith.constant 0 : index
    %328 = vector.load %arg2[%c0_130, %c0_131] : memref<64x256xf32, #tpu.memory_space<vmem>>, vector<64x256xf32>
    %cst_132 = arith.constant dense<0.000000e+00> : vector<8x256xf32>
    %329 = tpu.matmul %327, %328, %cst_132 {dimension_numbers = #tpu.dot_dimension_numbers<[1], [0], [0], [1], [0, 0, 1, 1], [], []>} : vector<8x64xf32>, vector<64x256xf32>, vector<8x256xf32> -> vector<8x256xf32>
    %c0_133 = arith.constant 0 : index
    %c0_134 = arith.constant 0 : index
    %330 = vector.load %arg3[%c0_133, %c0_134] : memref<64x256xf32, #tpu.memory_space<vmem>>, vector<64x256xf32>
    %cst_135 = arith.constant dense<0.000000e+00> : vector<8x256xf32>
    %331 = tpu.matmul %324, %330, %cst_135 {dimension_numbers = #tpu.dot_dimension_numbers<[1], [0], [0], [1], [0, 0, 1, 1], [], []>} : vector<8x64xf32>, vector<64x256xf32>, vector<8x256xf32> -> vector<8x256xf32>
    %332 = arith.addf %329, %331 : vector<8x256xf32>
    %c0_136 = arith.constant 0 : index
    %c0_137 = arith.constant 0 : index
    %333 = vector.load %arg4[%c0_136, %c0_137] : memref<1x256xf32, #tpu.memory_space<vmem>>, vector<1x256xf32>
    %334 = vector.broadcast %333 : vector<1x256xf32> to vector<8x256xf32>
    %335 = arith.addf %332, %334 : vector<8x256xf32>
    %336 = vector.extract_strided_slice %335 {offsets = [0, 0], sizes = [8, 64], strides = [1, 1]} : vector<8x256xf32> to vector<8x64xf32>
    %337 = arith.negf %336 : vector<8x64xf32>
    %338 = math.exp %337 : vector<8x64xf32>
    %cst_138 = arith.constant 1.000000e+00 : f32
    %339 = vector.broadcast %cst_138 : f32 to vector<8x64xf32>
    %340 = arith.addf %339, %338 : vector<8x64xf32>
    %341 = arith.divf %339, %340 : vector<8x64xf32>
    %342 = vector.extract_strided_slice %335 {offsets = [0, 64], sizes = [8, 64], strides = [1, 1]} : vector<8x256xf32> to vector<8x64xf32>
    %343 = arith.negf %342 : vector<8x64xf32>
    %344 = math.exp %343 : vector<8x64xf32>
    %cst_139 = arith.constant 1.000000e+00 : f32
    %345 = vector.broadcast %cst_139 : f32 to vector<8x64xf32>
    %346 = arith.addf %345, %344 : vector<8x64xf32>
    %347 = arith.divf %345, %346 : vector<8x64xf32>
    %348 = vector.extract_strided_slice %335 {offsets = [0, 128], sizes = [8, 64], strides = [1, 1]} : vector<8x256xf32> to vector<8x64xf32>
    %349 = math.tanh %348 : vector<8x64xf32>
    %350 = vector.extract_strided_slice %335 {offsets = [0, 192], sizes = [8, 64], strides = [1, 1]} : vector<8x256xf32> to vector<8x64xf32>
    %351 = arith.negf %350 : vector<8x64xf32>
    %352 = math.exp %351 : vector<8x64xf32>
    %cst_140 = arith.constant 1.000000e+00 : f32
    %353 = vector.broadcast %cst_140 : f32 to vector<8x64xf32>
    %354 = arith.addf %353, %352 : vector<8x64xf32>
    %355 = arith.divf %353, %354 : vector<8x64xf32>
    %356 = arith.mulf %347, %322 : vector<8x64xf32>
    %357 = arith.mulf %341, %349 : vector<8x64xf32>
    %358 = arith.addf %356, %357 : vector<8x64xf32>
    %359 = math.tanh %358 : vector<8x64xf32>
    %360 = arith.mulf %355, %359 : vector<8x64xf32>
    %c0_141 = arith.constant 0 : index
    %c576 = arith.constant 576 : index
    %361 = vector.load %arg13[%c0_141, %c576] : memref<8x640xf32, #tpu.memory_space<vmem>>, vector<8x64xf32>
    tpu.vector_store %arg13[%c0_141, %c576], %360 {strides = array<i32>} : memref<8x640xf32, #tpu.memory_space<vmem>>, vector<8x64xf32>,
    %c0_142 = arith.constant 0 : index
    %c0_143 = arith.constant 0 : index
    %362 = vector.load %arg13[%c0_142, %c0_143] : memref<8x640xf32, #tpu.memory_space<vmem>>, vector<8x640xf32>
    %c0_144 = arith.constant 0 : index
    %c0_145 = arith.constant 0 : index
    %363 = vector.load %arg5[%c0_144, %c0_145] : memref<640x1024xf32, #tpu.memory_space<vmem>>, vector<640x1024xf32>
    %cst_146 = arith.constant dense<0.000000e+00> : vector<8x1024xf32>
    %364 = tpu.matmul %362, %363, %cst_146 {dimension_numbers = #tpu.dot_dimension_numbers<[1], [0], [0], [1], [0, 0, 1, 1], [], []>} : vector<8x640xf32>, vector<640x1024xf32>, vector<8x1024xf32> -> vector<8x1024xf32>
    %c0_147 = arith.constant 0 : index
    %c0_148 = arith.constant 0 : index
    %365 = vector.load %arg6[%c0_147, %c0_148] : memref<1x1024xf32, #tpu.memory_space<vmem>>, vector<1x1024xf32>
    %366 = vector.broadcast %365 : vector<1x1024xf32> to vector<8x1024xf32>
    %367 = arith.addf %364, %366 : vector<8x1024xf32>
    %cst_149 = arith.constant 0.000000e+00 : f32
    %368 = vector.broadcast %cst_149 : f32 to vector<8x1024xf32>
    %369 = arith.maximumf %367, %368 : vector<8x1024xf32>
    %c0_150 = arith.constant 0 : index
    %c0_151 = arith.constant 0 : index
    %370 = vector.load %arg7[%c0_150, %c0_151] : memref<1024x1024xf32, #tpu.memory_space<vmem>>, vector<1024x1024xf32>
    %cst_152 = arith.constant dense<0.000000e+00> : vector<8x1024xf32>
    %371 = tpu.matmul %369, %370, %cst_152 {dimension_numbers = #tpu.dot_dimension_numbers<[1], [0], [0], [1], [0, 0, 1, 1], [], []>} : vector<8x1024xf32>, vector<1024x1024xf32>, vector<8x1024xf32> -> vector<8x1024xf32>
    %c0_153 = arith.constant 0 : index
    %c0_154 = arith.constant 0 : index
    %372 = vector.load %arg8[%c0_153, %c0_154] : memref<1x1024xf32, #tpu.memory_space<vmem>>, vector<1x1024xf32>
    %373 = vector.broadcast %372 : vector<1x1024xf32> to vector<8x1024xf32>
    %374 = arith.addf %371, %373 : vector<8x1024xf32>
    %cst_155 = arith.constant 0.000000e+00 : f32
    %375 = vector.broadcast %cst_155 : f32 to vector<8x1024xf32>
    %376 = arith.maximumf %374, %375 : vector<8x1024xf32>
    %c0_156 = arith.constant 0 : index
    %c0_157 = arith.constant 0 : index
    %377 = vector.load %arg9[%c0_156, %c0_157] : memref<1024x64xf32, #tpu.memory_space<vmem>>, vector<1024x64xf32>
    %cst_158 = arith.constant dense<0.000000e+00> : vector<8x64xf32>
    %378 = tpu.matmul %376, %377, %cst_158 {dimension_numbers = #tpu.dot_dimension_numbers<[1], [0], [0], [1], [0, 0, 1, 1], [], []>} : vector<8x1024xf32>, vector<1024x64xf32>, vector<8x64xf32> -> vector<8x64xf32>
    %c0_159 = arith.constant 0 : index
    %c0_160 = arith.constant 0 : index
    %379 = vector.load %arg10[%c0_159, %c0_160] : memref<1x1xf32, #tpu.memory_space<vmem>>, vector<1x1xf32>
    %380 = vector.broadcast %379 : vector<1x1xf32> to vector<8x64xf32>
    %381 = arith.addf %378, %380 : vector<8x64xf32>
    %cst_161 = arith.constant 0.000000e+00 : f32
    %382 = vector.broadcast %cst_161 : f32 to vector<8x64xf32>
    %383 = arith.maximumf %381, %382 : vector<8x64xf32>
    %c0_162 = arith.constant 0 : index
    %c0_163 = arith.constant 0 : index
    %384 = vector.load %arg11[%c0_162, %c0_163] : memref<1x64xf32, #tpu.memory_space<vmem>>, vector<1x64xf32>
    %385 = vector.broadcast %384 : vector<1x64xf32> to vector<8x64xf32>
    %386 = arith.mulf %383, %385 : vector<8x64xf32>
    %c0_164 = arith.constant 0 : index
    %c0_165 = arith.constant 0 : index
    %387 = vector.load %arg12[%c0_164, %c0_165] : memref<8x64xf32, #tpu.memory_space<vmem>>, vector<8x64xf32>
    tpu.vector_store %arg12[%c0_164, %c0_165], %386 {strides = array<i32>} : memref<8x64xf32, #tpu.memory_space<vmem>>, vector<8x64xf32>,
    return
  }
  func.func @transform_0(%arg0: i32) -> (i32, i32, i32) {
    %c0_i32 = arith.constant 0 : i32
    %c0_i32_0 = arith.constant 0 : i32
    %c0_i32_1 = arith.constant 0 : i32
    return %c0_i32, %arg0, %c0_i32_0 : i32, i32, i32
  }
  func.func @transform_1(%arg0: i32) -> (i32, i32) {
    %c0_i32 = arith.constant 0 : i32
    %c0_i32_0 = arith.constant 0 : i32
    %c0_i32_1 = arith.constant 0 : i32
    return %c0_i32, %c0_i32_0 : i32, i32
  }
  func.func @transform_2(%arg0: i32) -> (i32, i32) {
    %c0_i32 = arith.constant 0 : i32
    %c0_i32_0 = arith.constant 0 : i32
    %c0_i32_1 = arith.constant 0 : i32
    return %c0_i32, %c0_i32_0 : i32, i32
  }
  func.func @transform_3(%arg0: i32) -> (i32, i32) {
    %c0_i32 = arith.constant 0 : i32
    %c0_i32_0 = arith.constant 0 : i32
    %c0_i32_1 = arith.constant 0 : i32
    return %c0_i32, %c0_i32_0 : i32, i32
  }
  func.func @transform_4(%arg0: i32) -> (i32, i32) {
    %c0_i32 = arith.constant 0 : i32
    %c0_i32_0 = arith.constant 0 : i32
    %c0_i32_1 = arith.constant 0 : i32
    return %c0_i32, %c0_i32_0 : i32, i32
  }
  func.func @transform_5(%arg0: i32) -> (i32, i32) {
    %c0_i32 = arith.constant 0 : i32
    %c0_i32_0 = arith.constant 0 : i32
    %c0_i32_1 = arith.constant 0 : i32
    return %c0_i32, %c0_i32_0 : i32, i32
  }
  func.func @transform_6(%arg0: i32) -> (i32, i32) {
    %c0_i32 = arith.constant 0 : i32
    %c0_i32_0 = arith.constant 0 : i32
    %c0_i32_1 = arith.constant 0 : i32
    return %c0_i32, %c0_i32_0 : i32, i32
  }
  func.func @transform_7(%arg0: i32) -> (i32, i32) {
    %c0_i32 = arith.constant 0 : i32
    %c0_i32_0 = arith.constant 0 : i32
    %c0_i32_1 = arith.constant 0 : i32
    return %c0_i32, %c0_i32_0 : i32, i32
  }
  func.func @transform_8(%arg0: i32) -> (i32, i32) {
    %c0_i32 = arith.constant 0 : i32
    %c0_i32_0 = arith.constant 0 : i32
    %c0_i32_1 = arith.constant 0 : i32
    return %c0_i32, %c0_i32_0 : i32, i32
  }
  func.func @transform_9(%arg0: i32) -> (i32, i32) {
    %c0_i32 = arith.constant 0 : i32
    %c0_i32_0 = arith.constant 0 : i32
    %c0_i32_1 = arith.constant 0 : i32
    return %c0_i32, %c0_i32_0 : i32, i32
  }
  func.func @transform_10(%arg0: i32) -> (i32, i32) {
    %c0_i32 = arith.constant 0 : i32
    %c0_i32_0 = arith.constant 0 : i32
    %c0_i32_1 = arith.constant 0 : i32
    return %c0_i32, %c0_i32_0 : i32, i32
  }
  func.func @transform_11(%arg0: i32) -> (i32, i32) {
    %c0_i32 = arith.constant 0 : i32
    %c0_i32_0 = arith.constant 0 : i32
    return %arg0, %c0_i32 : i32, i32
  }
}

</mosaic_0001>

<bundles_post_ra>
// kernel: tpu_custom_call.1
= control target key start
LH: loop header
LB: loop body
LE: loop exit
PB: predicated region body
PF: predicated region fallthrough
CT: control target
= control target key end

     0   :  { %s8369_s0 = inlined_call_operand.hbm [shape: f32[10,8,64], index: 0, kind: input, shape index: {}]   ;;  %s8370_s1 = inlined_call_operand.hbm [shape: f32[64,256], index: 1, kind: input, shape index: {}]   ;;  %s8371_s2 = inlined_call_operand.hbm [shape: f32[64,256], index: 2, kind: input, shape index: {}]   ;;  %s8372_s3 = inlined_call_operand.hbm [shape: f32[1,256], index: 3, kind: input, shape index: {}]   ;;  %s8373_s4 = inlined_call_operand.hbm [shape: f32[640,1024], index: 4, kind: input, shape index: {}]   ;;  %s8374_s5 = inlined_call_operand.hbm [shape: f32[1,1024], index: 5, kind: input, shape index: {}]   ;;  %s8375_s6 = inlined_call_operand.hbm [shape: f32[1024,1024], index: 6, kind: input, shape index: {}]   ;;  %s8376_s7 = inlined_call_operand.hbm [shape: f32[1,1024], index: 7, kind: input, shape index: {}]   ;;  %s8377_s8 = inlined_call_operand.vmem [shape: f32[1024,64], index: 8, kind: input, shape index: {}]   ;;  %s8378_s9 = inlined_call_operand.<no memory space> [shape: f32[1,1], index: 9, kind: input, shape index: {}]   ;;  %s8379_s10 = inlined_call_operand.hbm [shape: f32[1,64], index: 10, kind: input, shape index: {}]   ;;  %s8380_s11 = inlined_call_operand.hbm [shape: f32[8,64], index: 11, kind: output, shape index: {}]  }
   0x1   :  { %v16_v0 = vstv %s8378_s9 }
   0x2   :  { %17 = vst [vmem:[#allocation3] sm:$0x1] %v16_v0 }
   0x3   :  { %18 = vsyncpa [#allocation5], 0 }
   0x4   :  { %19 = vsyncpa [#allocation8], 0 }
   0x5   :  { %20 = vsyncpa [#allocation11], 0 }
   0x6   :  { %21 = vsyncpa [#allocation14], 0 }
   0x7   :  { %22 = vsyncpa [#allocation17], 0 }
   0x8   :  { %23 = vsyncpa [#allocation6], 0  ;;  %s7116_s19 = smov [#allocation7]  }
   0x9   :  { %s41_s20 = sshll.u32 %s7116_s19, 4  ;;  %s42_s20 = int_to_ptr.vmem [resolvable:$true] %s41_s20 }
   0xa   :  { %s6912_s21 = scalar_lea.vmem %s42_s20, 2048  ;;  %p6917_p1 = scmp.lt.s32.totalorder %s42_s20, %s42_s20 }
   0xb   :  { %p6913_p0 = scmp.ne.s32.totalorder %s42_s20, %s6912_s21  ;;  %p6918_p2 = scmp.lt.s32.totalorder %s6912_s21, %s6912_s21 }
   0xd   :  { %p6919_p3 = por %p6918_p2, %p6917_p1 }
   0xf   :  { %p6920_p4 = pnand %p6919_p3, %p6913_p0 }
  0x11   :  { %6923 = shalt.err (!%p6920_p4)
}
  0x12   :  { %s7117_s22 = smov 256   ;;  %s7118_s23 = smov 16  }
  0x13   :  { %47 = dma.hbm_to_vmem [thread:$0]  %s8370_s1, 2048, %s42_s20, [#allocation8], %s7117_s22, %s7117_s22, %s7118_s23  }
  0x14   :  { %s7119_s25 = smov [#allocation10]   ;;  %s7120_s27 = smov [#allocation13]  }
  0x15   :  { %s66_s26 = sshll.u32 %s7119_s25, 4  ;;  %s88_s28 = sshll.u32 %s7120_s27, 4  ;;  %s67_s26 = int_to_ptr.vmem [resolvable:$true] %s66_s26  ;;  %s89_s28 = int_to_ptr.vmem [resolvable:$true] %s88_s28 }
  0x16   :  { %s6932_s29 = scalar_lea.vmem %s67_s26, 32  ;;  %p6937_p6 = scmp.lt.s32.totalorder %s67_s26, %s67_s26 }
  0x17   :  { %p6933_p5 = scmp.ne.s32.totalorder %s67_s26, %s6932_s29  ;;  %p6938_p7 = scmp.lt.s32.totalorder %s6932_s29, %s6932_s29 }
  0x19   :  { %p6939_p8 = por %p6938_p7, %p6937_p6 }
  0x1b   :  { %p6940_p9 = pnand %p6939_p8, %p6933_p5 }
  0x1d   :  { %6943 = shalt.err (!%p6940_p9)
}
  0x1e   :  { %69 = dma.hbm_to_vmem [thread:$0]  %s8372_s3, 32, %s67_s26, [#allocation11]  }
  0x1f   :  { %s6952_s13 = scalar_lea.vmem %s89_s28, 128  ;;  %p6957_p11 = scmp.lt.s32.totalorder %s89_s28, %s89_s28 }
  0x20   :  { %p6953_p10 = scmp.ne.s32.totalorder %s89_s28, %s6952_s13  ;;  %p6958_p12 = scmp.lt.s32.totalorder %s6952_s13, %s6952_s13 }
  0x22   :  { %p6959_p13 = por %p6958_p12, %p6957_p11 }
  0x24   :  { %p6960_p0 = pnand %p6959_p13, %p6953_p10 }
  0x26   :  { %6963 = shalt.err (!%p6960_p0)
}
  0x27   :  { %91 = dma.hbm_to_vmem [thread:$0]  %s8374_s5, 128, %s89_s28, [#allocation14]  }
  0x28   :  { %s7121_s15 = smov [#allocation16]   ;;  %s7122_s17 = smov [#allocation4]  }
  0x29   :  { %s110_s16 = sshll.u32 %s7121_s15, 4  ;;  %s29_s18 = sshll.u32 %s7122_s17, 4  ;;  %s111_s16 = int_to_ptr.vmem [resolvable:$true] %s110_s16  ;;  %s30_s18 = int_to_ptr.vmem [resolvable:$true] %s29_s18 }
  0x2a   :  { %s6972_s19 = scalar_lea.vmem %s111_s16, 128  ;;  %p6977_p2 = scmp.lt.s32.totalorder %s111_s16, %s111_s16 }
  0x2b   :  { %p6973_p1 = scmp.ne.s32.totalorder %s111_s16, %s6972_s19  ;;  %p6978_p3 = scmp.lt.s32.totalorder %s6972_s19, %s6972_s19 }
  0x2d   :  { %p6979_p4 = por %p6978_p3, %p6977_p2 }
  0x2f   :  { %p6980_p5 = pnand %p6979_p4, %p6973_p1 }
  0x31   :  { %6983 = shalt.err (!%p6980_p5)
}
  0x32   :  { %113 = dma.hbm_to_vmem [thread:$0]  %s8376_s7, 128, %s111_s16, [#allocation17]  }
  0x33   :  { %s6992_s21 = scalar_lea.vmem %s30_s18, 1280  ;;  %p6997_p7 = scmp.lt.s32.totalorder %s30_s18, %s30_s18 }
  0x34   :  { %p6993_p6 = scmp.ne.s32.totalorder %s30_s18, %s6992_s21  ;;  %p6998_p8 = scmp.lt.s32.totalorder %s6992_s21, %s6992_s21 }
  0x36   :  { %p6999_p9 = por %p6998_p8, %p6997_p7 }
  0x38   :  { %p7000_p10 = pnand %p6999_p9, %p6993_p6 }
  0x3a   :  { %7003 = shalt.err (!%p7000_p10)
}
  0x3b   :  { %s7123_s5 = smov 128   ;;  %s7124_s9 = smov 8  }
  0x3c   :  { %35 = dma.hbm_to_vmem [thread:$0]  %s8369_s0, 1280, %s30_s18, [#allocation5], %s7123_s5, %s7123_s5, %s7124_s9  }
  0x3d   :  { %s7125_s26 = smov [#allocation9]   ;;  %s7126_s28 = smov [#allocation12]  }
  0x3e   :  { %s53_s27 = sshll.u32 %s7125_s26, 4  ;;  %s75_s29 = sshll.u32 %s7126_s28, 4  ;;  %s54_s27 = int_to_ptr.vmem [resolvable:$true] %s53_s27  ;;  %s76_s29 = int_to_ptr.vmem [resolvable:$true] %s75_s29 }
  0x3f   :  { %s7012_s7 = scalar_lea.vmem %s54_s27, 2048  ;;  %p7017_p12 = scmp.lt.s32.totalorder %s54_s27, %s54_s27 }
  0x40   :  { %p7013_p11 = scmp.ne.s32.totalorder %s54_s27, %s7012_s7  ;;  %p7018_p13 = scmp.lt.s32.totalorder %s7012_s7, %s7012_s7 }
  0x42   :  { %p7019_p0 = por %p7018_p13, %p7017_p12 }
  0x44   :  { %p7020_p1 = pnand %p7019_p0, %p7013_p11 }
  0x46   :  { %7023 = shalt.err (!%p7020_p1)
}
  0x47   :  { %59 = dma.hbm_to_vmem [thread:$0]  %s8371_s2, 2048, %s54_s27, [#allocation8], %s7117_s22, %s7117_s22, %s7118_s23  }
  0x48   :  { %s7032_s0 = scalar_lea.vmem %s76_s29, 81920  ;;  %p7037_p3 = scmp.lt.s32.totalorder %s76_s29, %s76_s29 }
  0x49   :  { %p7033_p2 = scmp.ne.s32.totalorder %s76_s29, %s7032_s0  ;;  %p7038_p4 = scmp.lt.s32.totalorder %s7032_s0, %s7032_s0 }
  0x4b   :  { %p7039_p5 = por %p7038_p4, %p7037_p3 }
  0x4d   :  { %p7040_p6 = pnand %p7039_p5, %p7033_p2 }
  0x4f   :  { %7043 = shalt.err (!%p7040_p6)
}
  0x50   :  { %s7127_s13 = smov 1024   ;;  %s7128_s1 = smov 64  }
  0x51   :  { %81 = dma.hbm_to_vmem [thread:$0]  %s8373_s4, 81920, %s76_s29, [#allocation11], %s7127_s13, %s7127_s13, %s7128_s1  }
  0x52   :  { %s7129_s16 = smov [#allocation15]   ;;  %s7130_s18 = smov [#allocation18]  }
  0x53   :  { %s97_s17 = sshll.u32 %s7129_s16, 4  ;;  %s124_s2 = sshll.u32 %s7130_s18, 4  ;;  %s98_s17 = int_to_ptr.vmem [resolvable:$true] %s97_s17  ;;  %s125_s2 = int_to_ptr.vmem [resolvable:$true] %s124_s2 }
  0x54   :  { %s7052_s22 = scalar_lea.vmem %s98_s17, 131072  ;;  %p7057_p8 = scmp.lt.s32.totalorder %s98_s17, %s98_s17 }
  0x55   :  { %p7053_p7 = scmp.ne.s32.totalorder %s98_s17, %s7052_s22  ;;  %p7058_p9 = scmp.lt.s32.totalorder %s7052_s22, %s7052_s22 }
  0x57   :  { %p7059_p10 = por %p7058_p9, %p7057_p8 }
  0x59   :  { %p7060_p11 = pnand %p7059_p10, %p7053_p7 }
  0x5b   :  { %7063 = shalt.err (!%p7060_p11)
}
  0x5c   :  { %103 = dma.hbm_to_vmem [thread:$0]  %s8375_s6, 131072, %s98_s17, [#allocation14], %s7127_s13, %s7127_s13, %s7128_s1  }
  0x5d   :  { %s7072_s3 = scalar_lea.vmem %s125_s2, 16  ;;  %s7076_s4 = scalar_lea.vmem %s125_s2, 32 }
  0x5e   :  { %p7073_p12 = scmp.ne.s32.totalorder %s125_s2, %s7072_s3  ;;  %p7077_p13 = scmp.lt.s32.totalorder %s125_s2, %s125_s2 }
  0x5f   :  { %p7078_p0 = scmp.lt.s32.totalorder %s7076_s4, %s7072_s3 }
  0x61   :  { %p7079_p1 = por %p7078_p0, %p7077_p13 }
  0x63   :  { %p7080_p2 = pnand %p7079_p1, %p7073_p12 }
  0x65   :  { %7083 = shalt.err (!%p7080_p2)
}
  0x66   :  { %127 = dma.hbm_to_vmem [thread:$0]  %s8379_s10, 16, %s125_s2, [#allocation17]  }
  0x67   :  { %7104 = dma.done.wait [#allocation5], 1280  }
  0x68   :  { %7105 = vsyncadd [#allocation5], 4294966016 }
  0x69   :  { %7106 = dma.done.wait [#allocation8], 4096  }
  0x6a   :  { %7107 = vsyncadd [#allocation8], 4294963200 }
  0x6b   :  { %7108 = dma.done.wait [#allocation11], 81952  }
  0x6c   :  { %7109 = vsyncadd [#allocation11], 4294885344 }
  0x6d   :  { %7110 = dma.done.wait [#allocation14], 131200  }
  0x6e   :  { %7111 = vsyncadd [#allocation14], 4294836096 }
  0x6f   :  { %7112 = dma.done.wait [#allocation17], 144  }
  0x70   :  { %7113 = vsyncadd [#allocation17], 4294967152  ;;  %v7131_v1 = vmov 0.0   ;;  %v7234_v2 = vld [vmem:[#allocation9 + $0x78] sm:$0xff]  ;;  %v7238_v4 = vld [vmem:[#allocation9 + $0x70] sm:$0xff]  ;;  %vm188_vm0 = vcmask 523264   ;;  %v339_v35 = vlaneseq }
  0x71   :  { %256 = vmatprep.mubr.f32.mxu0 %v7131_v1  ;;  %330 = vmatprep.mubr.f32.mxu1 %v7131_v1  ;;  %v7236_v3 = vld [vmem:[#allocation7 + $0x78] sm:$0xff]  ;;  %v7242_v5 = vld [vmem:[#allocation7 + $0x70] sm:$0xff]  ;;  %v7244_v6 = vld [vmem:[#allocation9 + $0x68] sm:$0xff]  ;;  %vm595_vm1 = vcmask 1048064  }
  0x72   :  { %208 = vmatprep.subr.mxu0 %v7234_v2  ;;  %282 = vmatprep.subr.mxu1 %v7236_v3  ;;  %v7246_v7 = vld [vmem:[#allocation7 + $0x68] sm:$0xff]  ;;  %v7250_v8 = vld [vmem:[#allocation9 + $0x60] sm:$0xff]  ;;  %v7254_v10 = vld [vmem:[#allocation9 + $0x58] sm:$0xff]  ;;  %v7368_v36 = vshrl.u32 %v339_v35, 7 }
  0x73   :  { %209 = vmatpush1.msra.mxu0 %v7238_v4  ;;  %283 = vmatpush1.msra.mxu1 %v7242_v5  ;;  %v7252_v9 = vld [vmem:[#allocation7 + $0x60] sm:$0xff]  ;;  %v7258_v11 = vld [vmem:[#allocation7 + $0x58] sm:$0xff]  ;;  %v7260_v12 = vld [vmem:[#allocation9 + $0x50] sm:$0xff] }
  0x74   :  { %210 = vmatprep.subr.mxu0 %v7244_v6  ;;  %284 = vmatprep.subr.mxu1 %v7246_v7  ;;  %v7262_v13 = vld [vmem:[#allocation7 + $0x50] sm:$0xff]  ;;  %v7266_v14 = vld [vmem:[#allocation9 + $0x48] sm:$0xff]  ;;  %v7272_v16 = vld [vmem:[#allocation9 + $0x40] sm:$0xff]  ;;  %v7371_v37 = vsub.s32 0, %v7368_v36  ;;  %v7375_v45 = vsub.s32 1, %v7368_v36 }
  0x75   :  { %211 = vmatpush1.msra.mxu0 %v7250_v8  ;;  %285 = vmatpush1.msra.mxu1 %v7252_v9  ;;  %v7268_v15 = vld [vmem:[#allocation7 + $0x48] sm:$0xff]  ;;  %v7274_v17 = vld [vmem:[#allocation7 + $0x40] sm:$0xff]  ;;  %v7278_v18 = vld [vmem:[#allocation9 + $0x38] sm:$0xff] }
  0x76   :  { %212 = vmatprep.subr.mxu0 %v7254_v10  ;;  %286 = vmatprep.subr.mxu1 %v7258_v11  ;;  %v7280_v19 = vld [vmem:[#allocation7 + $0x38] sm:$0xff]  ;;  %v7284_v20 = vld [vmem:[#allocation9 + $0x30] sm:$0xff]  ;;  %v7290_v22 = vld [vmem:[#allocation9 + $0x28] sm:$0xff] }
  0x77   :  { %213 = vmatpush1.msra.mxu0 %v7260_v12  ;;  %287 = vmatpush1.msra.mxu1 %v7262_v13  ;;  %v7286_v21 = vld [vmem:[#allocation7 + $0x30] sm:$0xff]  ;;  %v7292_v23 = vld [vmem:[#allocation7 + $0x28] sm:$0xff]  ;;  %v7296_v24 = vld [vmem:[#allocation9 + $0x20] sm:$0xff] }
  0x78   :  { %214 = vmatprep.subr.mxu0 %v7266_v14  ;;  %288 = vmatprep.subr.mxu1 %v7268_v15  ;;  %v7298_v25 = vld [vmem:[#allocation7 + $0x20] sm:$0xff]  ;;  %v7302_v26 = vld [vmem:[#allocation9 + $0x18] sm:$0xff]  ;;  %v7308_v28 = vld [vmem:[#allocation9 + $0x10] sm:$0xff] }
  0x79   :  { %215 = vmatpush1.msra.mxu0 %v7272_v16  ;;  %289 = vmatpush1.msra.mxu1 %v7274_v17  ;;  %v7304_v27 = vld [vmem:[#allocation7 + $0x18] sm:$0xff]  ;;  %v7310_v29 = vld [vmem:[#allocation7 + $0x10] sm:$0xff]  ;;  %v7314_v30 = vld [vmem:[#allocation9 + $0x8] sm:$0xff] }
  0x7a   :  { %216 = vmatprep.subr.mxu0 %v7278_v18  ;;  %290 = vmatprep.subr.mxu1 %v7280_v19  ;;  %v7316_v31 = vld [vmem:[#allocation7 + $0x8] sm:$0xff]  ;;  %v7320_v32 = vld [vmem:[#allocation9] sm:$0xff]  ;;  %v155_v34 = vld [vmem:[#allocation4] sm:$0xff] }
  0x7b   :  { %217 = vmatpush1.msra.mxu0 %v7284_v20  ;;  %291 = vmatpush1.msra.mxu1 %v7286_v21  ;;  %v7322_v33 = vld [vmem:[#allocation7] sm:$0xff]  ;;  %v379_v56 = vld [vmem:[#allocation4 + $0x8] sm:$0xff] }
  0x7c   :  { %218 = vmatprep.subr.mxu0 %v7290_v22  ;;  %292 = vmatprep.subr.mxu1 %v7292_v23  ;;  %v337_v38 = vld [vmem:[#allocation10] sm:$0x3] }
  0x7d   :  { %219 = vmatpush1.msra.mxu0 %v7296_v24  ;;  %293 = vmatpush1.msra.mxu1 %v7298_v25  ;;  %v342_v39 = vrot.slane %v337_v38, %v7371_v37  ;;  %v346_v49 = vrot.slane %v337_v38, %v7375_v45  ;;  %v559_v38 = vld [vmem:[#allocation10] sm:$0x3] }
  0x7e   :  { %220 = vmatprep.subr.mxu0 %v7302_v26  ;;  %294 = vmatprep.subr.mxu1 %v7304_v27 }
  0x7f   :  { %221 = vmatpush1.msra.mxu0 %v7308_v28  ;;  %295 = vmatpush1.msra.mxu1 %v7310_v29 }
  0x80   :  { %222 = vmatprep.subr.mxu0 %v7314_v30  ;;  %296 = vmatprep.subr.mxu1 %v7316_v31 }
  0x81   :  { %223 = vmatpush1.msra.mxu0 %v7320_v32  ;;  %297 = vmatpush1.msra.mxu1 %v7322_v33 }
  0x82   :  { %257 = vmatmul.mubr.f32.vlgmr.msra.gmra.mxu0 %v7131_v1  ;;  %6573 = vmatmul.mubr.msk.f32.vlgmr.msra.gmra.mxu1 %vm188_vm0, %v155_v34 }
  0x83   :  { %504 = vmatprep.subr.mxu1 %v7236_v3  ;;  %430 = vmatprep.subr.mxu0 %v7234_v2 }
  0x84   :  { %505 = vmatpush1.msra.mxu1 %v7242_v5  ;;  %431 = vmatpush1.msra.mxu0 %v7238_v4 }
  0x85   :  { %506 = vmatprep.subr.mxu1 %v7246_v7  ;;  %432 = vmatprep.subr.mxu0 %v7244_v6 }
  0x86   :  { %507 = vmatpush1.msra.mxu1 %v7252_v9  ;;  %433 = vmatpush1.msra.mxu0 %v7250_v8 }
  0x87   :  { %508 = vmatprep.subr.mxu1 %v7258_v11  ;;  %434 = vmatprep.subr.mxu0 %v7254_v10 }
  0x88   :  { %509 = vmatpush1.msra.mxu1 %v7262_v13  ;;  %435 = vmatpush1.msra.mxu0 %v7260_v12 }
  0x89   :  { %510 = vmatprep.subr.mxu1 %v7268_v15  ;;  %436 = vmatprep.subr.mxu0 %v7266_v14 }
  0x8a   :  { %511 = vmatpush1.msra.mxu1 %v7274_v17  ;;  %437 = vmatpush1.msra.mxu0 %v7272_v16 }
  0x8b   :  { %512 = vmatprep.subr.mxu1 %v7280_v19  ;;  %438 = vmatprep.subr.mxu0 %v7278_v18 }
  0x8c   :  { %513 = vmatpush1.msra.mxu1 %v7286_v21  ;;  %439 = vmatpush1.msra.mxu0 %v7284_v20 }
  0x8d   :  { %514 = vmatprep.subr.mxu1 %v7292_v23  ;;  %440 = vmatprep.subr.mxu0 %v7290_v22 }
  0x8e   :  { %515 = vmatpush1.msra.mxu1 %v7298_v25  ;;  %441 = vmatpush1.msra.mxu0 %v7296_v24 }
  0x8f   :  { %516 = vmatprep.subr.mxu1 %v7304_v27  ;;  %442 = vmatprep.subr.mxu0 %v7302_v26 }
  0x90   :  { %517 = vmatpush1.msra.mxu1 %v7310_v29  ;;  %443 = vmatpush1.msra.mxu0 %v7308_v28 }
  0x91   :  { %518 = vmatprep.subr.mxu1 %v7316_v31  ;;  %552 = vmatprep.mubr.f32.mxu1 %v7131_v1 }
  0x92   :  { %519 = vmatpush1.msra.mxu1 %v7322_v33  ;;  %444 = vmatprep.subr.mxu0 %v7314_v30 }
  0x93   :  { %445 = vmatpush1.msra.mxu0 %v7320_v32  ;;  %478 = vmatprep.mubr.f32.mxu0 %v7131_v1 }
  0x94   :  { %726 = vmatprep.subr.mxu1 %v7236_v3  ;;  %652 = vmatprep.subr.mxu0 %v7234_v2 }
  0x95   :  { %6577 = vmatmul.mubr.msk.f32.vlgmr.msra.gmra.mxu1 %vm188_vm0, %v379_v56  ;;  %v598_v56 = vld [vmem:[#allocation4 + $0x10] sm:$0xff] }
  0x96   :  { %727 = vmatpush1.msra.mxu1 %v7242_v5  ;;  %774 = vmatprep.mubr.f32.mxu1 %v7131_v1 }
  0x97   :  { %728 = vmatprep.subr.mxu1 %v7246_v7 }
  0x98   :  { %729 = vmatpush1.msra.mxu1 %v7252_v9 }
  0x99   :  { %730 = vmatprep.subr.mxu1 %v7258_v11 }
  0x9a   :  { %731 = vmatpush1.msra.mxu1 %v7262_v13 }
  0x9b   :  { %732 = vmatprep.subr.mxu1 %v7268_v15 }
  0x9c   :  { %733 = vmatpush1.msra.mxu1 %v7274_v17 }
  0x9d   :  { %734 = vmatprep.subr.mxu1 %v7280_v19 }
  0x9e   :  { %735 = vmatpush1.msra.mxu1 %v7286_v21 }
  0x9f   :  { %736 = vmatprep.subr.mxu1 %v7292_v23 }
  0xa0   :  { %737 = vmatpush1.msra.mxu1 %v7298_v25 }
  0xa1   :  { %738 = vmatprep.subr.mxu1 %v7304_v27 }
  0xa2   :  { %739 = vmatpush1.msra.mxu1 %v7310_v29 }
  0xa3   :  { %740 = vmatprep.subr.mxu1 %v7316_v31 }
  0xa4   :  { %741 = vmatpush1.msra.mxu1 %v7322_v33 }
  0xa5   :  { %948 = vmatprep.subr.mxu1 %v7236_v3  ;;  %6581 = vmatmul.mubr.msk.f32.vlgmr.msra.gmra.mxu1 %vm188_vm0, %v598_v56  ;;  %v823_v56 = vld [vmem:[#allocation4 + $0x18] sm:$0xff] }
  0xa6   :  { %949 = vmatpush1.msra.mxu1 %v7242_v5  ;;  %996 = vmatprep.mubr.f32.mxu1 %v7131_v1 }
  0xa7   :  { %950 = vmatprep.subr.mxu1 %v7246_v7 }
  0xa8   :  { %951 = vmatpush1.msra.mxu1 %v7252_v9 }
  0xa9   :  { %952 = vmatprep.subr.mxu1 %v7258_v11 }
  0xaa   :  { %953 = vmatpush1.msra.mxu1 %v7262_v13 }
  0xab   :  { %954 = vmatprep.subr.mxu1 %v7268_v15 }
  0xac   :  { %955 = vmatpush1.msra.mxu1 %v7274_v17 }
  0xad   :  { %956 = vmatprep.subr.mxu1 %v7280_v19 }
  0xae   :  { %957 = vmatpush1.msra.mxu1 %v7286_v21 }
  0xaf   :  { %958 = vmatprep.subr.mxu1 %v7292_v23 }
  0xb0   :  { %959 = vmatpush1.msra.mxu1 %v7298_v25 }
  0xb1   :  { %960 = vmatprep.subr.mxu1 %v7304_v27 }
  0xb2   :  { %961 = vmatpush1.msra.mxu1 %v7310_v29 }
  0xb3   :  { %962 = vmatprep.subr.mxu1 %v7316_v31 }
  0xb4   :  { %963 = vmatpush1.msra.mxu1 %v7322_v33 }
  0xb5   :  { %1169 = vmatprep.subr.mxu1 %v7236_v3  ;;  %6585 = vmatmul.mubr.msk.f32.vlgmr.msra.gmra.mxu1 %vm188_vm0, %v823_v56 }
  0xb6   :  { %1170 = vmatpush1.msra.mxu1 %v7242_v5  ;;  %1217 = vmatprep.mubr.f32.mxu1 %v7131_v1 }
  0xb7   :  { %1171 = vmatprep.subr.mxu1 %v7246_v7 }
  0xb8   :  { %1172 = vmatpush1.msra.mxu1 %v7252_v9 }
  0xb9   :  { %1173 = vmatprep.subr.mxu1 %v7258_v11 }
  0xba   :  { %1174 = vmatpush1.msra.mxu1 %v7262_v13 }
  0xbb   :  { %1175 = vmatprep.subr.mxu1 %v7268_v15 }
  0xbc   :  { %1176 = vmatpush1.msra.mxu1 %v7274_v17 }
  0xbd   :  { %1177 = vmatprep.subr.mxu1 %v7280_v19 }
  0xbe   :  { %1178 = vmatpush1.msra.mxu1 %v7286_v21 }
  0xbf   :  { %1179 = vmatprep.subr.mxu1 %v7292_v23 }
  0xc0   :  { %1180 = vmatpush1.msra.mxu1 %v7298_v25 }
  0xc1   :  { %1181 = vmatprep.subr.mxu1 %v7304_v27 }
  0xc2   :  { %1182 = vmatpush1.msra.mxu1 %v7310_v29 }
  0xc3   :  { %1183 = vmatprep.subr.mxu1 %v7316_v31 }
  0xc4   :  { %1184 = vmatpush1.msra.mxu1 %v7322_v33 }
  0xc5   :  { %1391 = vmatprep.subr.mxu1 %v7236_v3  ;;  %v1003_v3 = vld [vmem:[#allocation10] sm:$0x3] }
 0x142   :  { %v258_v40 = vpop.f32.mrf.mxu0  ;;  %v332_v41 = vpop.f32.mrf.mxu1 }
 0x143   :  { %v333_v42 = vadd.f32 %v332_v41, %v258_v40 }
 0x144   :  { %v260_v46 = vpop.f32.mrf.mxu0  ;;  %v334_v47 = vpop.f32.mrf.mxu1 }
 0x145   :  { %v349_v43 = vadd.f32 %v342_v39, %v333_v42  ;;  %v335_v48 = vadd.f32 %v334_v47, %v260_v46  ;;  %v564_v39 = vrot.slane %v559_v38, %v7371_v37 }
 0x147   :  { %v6574_v44 = vmul.f32 -1.442695, %v349_v43  ;;  %v350_v50 = vadd.f32 %v346_v49, %v335_v48  ;;  %v568_v49 = vrot.slane %v559_v38, %v7375_v45 }
 0x149   :  { %6774 = vpow2.f32 %v6574_v44  ;;  %v6575_v57 = vmul.f32 -1.442695, %v350_v50 }
 0x14a   :  { %6776 = vtanh.f32 %v350_v50 }
 0x155   :  { %v554_v40 = vpop.f32.mrf.mxu1 }
 0x156   :  { %v6775_v51 = vpop.eup %6774 }
 0x157   :  { %v354_v52 = vadd.f32 1.0, %v6775_v51  ;;  %v6777_v53 = vpop.eup %6776  ;;  %v556_v47 = vpop.f32.mrf.mxu1 }
 0x159   :  { %6778 = vrcp.f32 %v354_v52 }
 0x15a   :  { %6780 = vpow2.f32 %v6575_v57 }
 0x166   :  { %v6779_v54 = vpop.eup %6778 }
 0x167   :  { %v365_v55 = vmul.f32 %v6779_v54, %v6777_v53  ;;  %v6781_v58 = vpop.eup %6780  ;;  %v364_v60 = vmul.f32 0.0, %v6779_v54 }
 0x168   :  { %v361_v59 = vadd.f32 1.0, %v6781_v58 }
 0x169   :  { %367 = vrot.lane.b32.xlu0 %v365_v55, %s7128_s1 }
 0x16a   :  { %6782 = vrcp.f32 %v361_v59 }
 0x177   :  { %v6783_v63 = vpop.eup %6782 }
 0x1db   :  { %v368_v61 = vpop.permute.xlu0 %367 }
 0x1dc   :  { %v7397_v62 = vadd.f32 %v368_v61, %v364_v60 }
 0x1de   :  { %6784 = vtanh.f32 %v7397_v62 }
 0x1eb   :  { %v6785_v0 = vpop.eup %6784 }
 0x1ec   :  { %v372_v34 = vmul.f32 %v6785_v0, %v6783_v63 }
 0x1ee   :  { %374 = vrot.lane.b32.xlu0 %v372_v34, %s7128_s1 }
 0x260   :  { %v375_v35 = vpop.permute.xlu0 %374 }
 0x261   :  { %377 = vst.msk [vmem:[#allocation2] sm:$0xff] %vm188_vm0, %v375_v35  ;;  %6576 = vmatmul.mubr.msk.f32.vlgmr.msra.gmra.mxu0 %vm188_vm0, %v375_v35 }
 0x262   :  { %653 = vmatpush1.msra.mxu0 %v7238_v4  ;;  %700 = vmatprep.mubr.f32.mxu0 %v7131_v1 }
 0x263   :  { %654 = vmatprep.subr.mxu0 %v7244_v6 }
 0x264   :  { %655 = vmatpush1.msra.mxu0 %v7250_v8 }
 0x265   :  { %656 = vmatprep.subr.mxu0 %v7254_v10 }
 0x266   :  { %657 = vmatpush1.msra.mxu0 %v7260_v12 }
 0x267   :  { %658 = vmatprep.subr.mxu0 %v7266_v14 }
 0x268   :  { %659 = vmatpush1.msra.mxu0 %v7272_v16 }
 0x269   :  { %660 = vmatprep.subr.mxu0 %v7278_v18 }
 0x26a   :  { %661 = vmatpush1.msra.mxu0 %v7284_v20 }
 0x26b   :  { %662 = vmatprep.subr.mxu0 %v7290_v22 }
 0x26c   :  { %663 = vmatpush1.msra.mxu0 %v7296_v24 }
 0x26d   :  { %664 = vmatprep.subr.mxu0 %v7302_v26 }
 0x26e   :  { %665 = vmatpush1.msra.mxu0 %v7308_v28 }
 0x26f   :  { %666 = vmatprep.subr.mxu0 %v7314_v30 }
 0x270   :  { %667 = vmatpush1.msra.mxu0 %v7320_v32 }
 0x271   :  { %874 = vmatprep.subr.mxu0 %v7234_v2 }
 0x321   :  { %v480_v41 = vpop.f32.mrf.mxu0 }
 0x322   :  { %v555_v42 = vadd.f32 %v554_v40, %v480_v41  ;;  %v776_v40 = vpop.f32.mrf.mxu1 }
 0x323   :  { %v482_v46 = vpop.f32.mrf.mxu0 }
 0x324   :  { %v571_v43 = vadd.f32 %v564_v39, %v555_v42  ;;  %v557_v48 = vadd.f32 %v556_v47, %v482_v46  ;;  %v778_v47 = vpop.f32.mrf.mxu1 }
 0x326   :  { %v6578_v44 = vmul.f32 -1.442695, %v571_v43  ;;  %v572_v50 = vadd.f32 %v568_v49, %v557_v48 }
 0x328   :  { %6786 = vpow2.f32 %v6578_v44  ;;  %v6579_v57 = vmul.f32 -1.442695, %v572_v50 }
 0x329   :  { %6788 = vtanh.f32 %v572_v50 }
 0x335   :  { %v6787_v51 = vpop.eup %6786 }
 0x336   :  { %v576_v52 = vadd.f32 1.0, %v6787_v51  ;;  %v6789_v53 = vpop.eup %6788 }
 0x338   :  { %6790 = vrcp.f32 %v576_v52 }
 0x339   :  { %6792 = vpow2.f32 %v6579_v57 }
 0x345   :  { %v6791_v54 = vpop.eup %6790 }
 0x346   :  { %v587_v55 = vmul.f32 %v6791_v54, %v6789_v53  ;;  %v6793_v58 = vpop.eup %6792  ;;  %v586_v60 = vmul.f32 %v6791_v54, %v7397_v62  ;;  %v781_v62 = vld [vmem:[#allocation10] sm:$0x3] }
 0x347   :  { %v583_v59 = vadd.f32 1.0, %v6793_v58  ;;  %v786_v39 = vrot.slane %v781_v62, %v7371_v37  ;;  %v790_v49 = vrot.slane %v781_v62, %v7375_v45 }
 0x348   :  { %589 = vrot.lane.b32.xlu1 %v587_v55, %s7128_s1 }
 0x349   :  { %6794 = vrcp.f32 %v583_v59 }
 0x356   :  { %v6795_v0 = vpop.eup %6794 }
 0x3ba   :  { %v590_v61 = vpop.permute.xlu1 %589 }
 0x3bb   :  { %v7442_v63 = vadd.f32 %v590_v61, %v586_v60 }
 0x3bd   :  { %6796 = vtanh.f32 %v7442_v63 }
 0x3ca   :  { %v6797_v34 = vpop.eup %6796 }
 0x3cb   :  { %v594_v35 = vmul.f32 %v6797_v34, %v6795_v0 }
 0x3cd   :  { %632 = vrot.lane.b32.xlu1 %v594_v35, %s7128_s1  ;;  %596 = vst.msk [vmem:[#allocation2] sm:$0xff] %vm595_vm1, %v594_v35 }
 0x43f   :  { %v633_v38 = vpop.permute.xlu1 %632 }
 0x440   :  { %6580 = vmatmul.mubr.msk.f32.vlgmr.msra.gmra.mxu0 %vm188_vm0, %v633_v38 }
 0x441   :  { %875 = vmatpush1.msra.mxu0 %v7238_v4  ;;  %922 = vmatprep.mubr.f32.mxu0 %v7131_v1 }
 0x442   :  { %876 = vmatprep.subr.mxu0 %v7244_v6 }
 0x443   :  { %877 = vmatpush1.msra.mxu0 %v7250_v8 }
 0x444   :  { %878 = vmatprep.subr.mxu0 %v7254_v10 }
 0x445   :  { %879 = vmatpush1.msra.mxu0 %v7260_v12 }
 0x446   :  { %880 = vmatprep.subr.mxu0 %v7266_v14 }
 0x447   :  { %881 = vmatpush1.msra.mxu0 %v7272_v16 }
 0x448   :  { %882 = vmatprep.subr.mxu0 %v7278_v18 }
 0x449   :  { %883 = vmatpush1.msra.mxu0 %v7284_v20 }
 0x44a   :  { %884 = vmatprep.subr.mxu0 %v7290_v22 }
 0x44b   :  { %885 = vmatpush1.msra.mxu0 %v7296_v24 }
 0x44c   :  { %886 = vmatprep.subr.mxu0 %v7302_v26 }
 0x44d   :  { %887 = vmatpush1.msra.mxu0 %v7308_v28 }
 0x44e   :  { %888 = vmatprep.subr.mxu0 %v7314_v30 }
 0x44f   :  { %889 = vmatpush1.msra.mxu0 %v7320_v32 }
 0x450   :  { %1095 = vmatprep.subr.mxu0 %v7234_v2 }
 0x500   :  { %v702_v41 = vpop.f32.mrf.mxu0 }
 0x501   :  { %v777_v42 = vadd.f32 %v776_v40, %v702_v41 }
 0x502   :  { %v704_v46 = vpop.f32.mrf.mxu0 }
 0x503   :  { %v793_v43 = vadd.f32 %v786_v39, %v777_v42  ;;  %v779_v48 = vadd.f32 %v778_v47, %v704_v46  ;;  %v998_v39 = vpop.f32.mrf.mxu1 }
 0x505   :  { %v6582_v44 = vmul.f32 -1.442695, %v793_v43  ;;  %v794_v50 = vadd.f32 %v790_v49, %v779_v48  ;;  %v1000_v46 = vpop.f32.mrf.mxu1  ;;  %v1012_v48 = vrot.slane %v1003_v3, %v7375_v45 }
 0x507   :  { %6798 = vpow2.f32 %v6582_v44  ;;  %v6583_v57 = vmul.f32 -1.442695, %v794_v50 }
 0x508   :  { %6800 = vtanh.f32 %v794_v50 }
 0x514   :  { %v6799_v51 = vpop.eup %6798 }
 0x515   :  { %v798_v52 = vadd.f32 1.0, %v6799_v51  ;;  %v6801_v53 = vpop.eup %6800 }
 0x517   :  { %6802 = vrcp.f32 %v798_v52 }
 0x518   :  { %6804 = vpow2.f32 %v6583_v57 }
 0x524   :  { %v6803_v54 = vpop.eup %6802 }
 0x525   :  { %v809_v55 = vmul.f32 %v6803_v54, %v6801_v53  ;;  %v6805_v58 = vpop.eup %6804  ;;  %v808_v60 = vmul.f32 %v6803_v54, %v7442_v63  ;;  %v1008_v63 = vrot.slane %v1003_v3, %v7371_v37  ;;  %v1041_v54 = vld [vmem:[#allocation4 + $0x20] sm:$0xff] }
 0x526   :  { %v805_v59 = vadd.f32 1.0, %v6805_v58  ;;  %6589 = vmatmul.mubr.msk.f32.vlgmr.msra.gmra.mxu1 %vm188_vm0, %v1041_v54  ;;  %v7581_v54 = vld [vmem:[#allocation9 + $0x70] sm:$0xff] }
 0x527   :  { %811 = vrot.lane.b32.xlu0 %v809_v55, %s7128_s1  ;;  %1392 = vmatpush1.msra.mxu1 %v7242_v5 }
 0x528   :  { %6806 = vrcp.f32 %v805_v59  ;;  %1439 = vmatprep.mubr.f32.mxu1 %v7131_v1  ;;  %1393 = vmatprep.subr.mxu1 %v7246_v7 }
 0x529   :  { %1394 = vmatpush1.msra.mxu1 %v7252_v9 }
 0x52a   :  { %1395 = vmatprep.subr.mxu1 %v7258_v11 }
 0x52b   :  { %1396 = vmatpush1.msra.mxu1 %v7262_v13 }
 0x52c   :  { %1397 = vmatprep.subr.mxu1 %v7268_v15 }
 0x52d   :  { %1398 = vmatpush1.msra.mxu1 %v7274_v17 }
 0x52e   :  { %1399 = vmatprep.subr.mxu1 %v7280_v19 }
 0x52f   :  { %1400 = vmatpush1.msra.mxu1 %v7286_v21 }
 0x530   :  { %1401 = vmatprep.subr.mxu1 %v7292_v23 }
 0x531   :  { %1402 = vmatpush1.msra.mxu1 %v7298_v25 }
 0x532   :  { %1403 = vmatprep.subr.mxu1 %v7304_v27 }
 0x533   :  { %1404 = vmatpush1.msra.mxu1 %v7310_v29 }
 0x534   :  { %1405 = vmatprep.subr.mxu1 %v7316_v31  ;;  %v1266_v31 = vld [vmem:[#allocation4 + $0x28] sm:$0xff] }
 0x535   :  { %v6807_v34 = vpop.eup %6806  ;;  %1406 = vmatpush1.msra.mxu1 %v7322_v33 }
 0x536   :  { %6593 = vmatmul.mubr.msk.f32.vlgmr.msra.gmra.mxu1 %vm188_vm0, %v1266_v31  ;;  %v1484_v31 = vld [vmem:[#allocation4 + $0x30] sm:$0xff] }
 0x537   :  { %1660 = vmatprep.mubr.f32.mxu1 %v7131_v1 }
 0x599   :  { %v812_v61 = vpop.permute.xlu0 %811 }
 0x59a   :  { %v7487_v0 = vadd.f32 %v812_v61, %v808_v60 }
 0x59c   :  { %6808 = vtanh.f32 %v7487_v0 }
 0x5a9   :  { %v6809_v35 = vpop.eup %6808 }
 0x5aa   :  { %v816_v38 = vmul.f32 %v6809_v35, %v6807_v34  ;;  %v1446_v34 = vld [vmem:[#allocation10] sm:$0x3] }
 0x5ab   :  { %v1451_v35 = vrot.slane %v1446_v34, %v7371_v37 }
 0x5ac   :  { %818 = vrot.lane.b32.xlu1 %v816_v38, %s7128_s1 }
 0x61e   :  { %v819_v62 = vpop.permute.xlu1 %818 }
 0x61f   :  { %821 = vst.msk [vmem:[#allocation2 + $0x8] sm:$0xff] %vm188_vm0, %v819_v62  ;;  %6584 = vmatmul.mubr.msk.f32.vlgmr.msra.gmra.mxu0 %vm188_vm0, %v819_v62 }
 0x620   :  { %1096 = vmatpush1.msra.mxu0 %v7238_v4  ;;  %1143 = vmatprep.mubr.f32.mxu0 %v7131_v1 }
 0x621   :  { %1097 = vmatprep.subr.mxu0 %v7244_v6 }
 0x622   :  { %1098 = vmatpush1.msra.mxu0 %v7250_v8 }
 0x623   :  { %1099 = vmatprep.subr.mxu0 %v7254_v10 }
 0x624   :  { %1100 = vmatpush1.msra.mxu0 %v7260_v12 }
 0x625   :  { %1101 = vmatprep.subr.mxu0 %v7266_v14 }
 0x626   :  { %1102 = vmatpush1.msra.mxu0 %v7272_v16 }
 0x627   :  { %1103 = vmatprep.subr.mxu0 %v7278_v18 }
 0x628   :  { %1104 = vmatpush1.msra.mxu0 %v7284_v20 }
 0x629   :  { %1105 = vmatprep.subr.mxu0 %v7290_v22 }
 0x62a   :  { %1106 = vmatpush1.msra.mxu0 %v7296_v24 }
 0x62b   :  { %1107 = vmatprep.subr.mxu0 %v7302_v26 }
 0x62c   :  { %1108 = vmatpush1.msra.mxu0 %v7308_v28 }
 0x62d   :  { %1109 = vmatprep.subr.mxu0 %v7314_v30 }
 0x62e   :  { %1110 = vmatpush1.msra.mxu0 %v7320_v32 }
 0x62f   :  { %1317 = vmatprep.subr.mxu0 %v7234_v2 }
 0x6df   :  { %v924_v40 = vpop.f32.mrf.mxu0 }
 0x6e0   :  { %v999_v41 = vadd.f32 %v998_v39, %v924_v40 }
 0x6e1   :  { %v926_v44 = vpop.f32.mrf.mxu0 }
 0x6e2   :  { %v1015_v42 = vadd.f32 %v1008_v63, %v999_v41  ;;  %v1001_v47 = vadd.f32 %v1000_v46, %v926_v44 }
 0x6e4   :  { %v6586_v43 = vmul.f32 -1.442695, %v1015_v42  ;;  %v1016_v49 = vadd.f32 %v1012_v48, %v1001_v47 }
 0x6e6   :  { %6810 = vpow2.f32 %v6586_v43  ;;  %v6587_v5 = vmul.f32 -1.442695, %v1016_v49  ;;  %v1455_v43 = vrot.slane %v1446_v34, %v7375_v45 }
 0x6e7   :  { %6812 = vtanh.f32 %v1016_v49 }
 0x6f3   :  { %v6811_v50 = vpop.eup %6810 }
 0x6f4   :  { %v1020_v51 = vadd.f32 1.0, %v6811_v50  ;;  %v6813_v2 = vpop.eup %6812 }
 0x6f6   :  { %6814 = vrcp.f32 %v1020_v51  ;;  %v7571_v51 = vld [vmem:[#allocation7 + $0x78] sm:$0xff] }
 0x6f7   :  { %6816 = vpow2.f32 %v6587_v5  ;;  %1612 = vmatprep.subr.mxu1 %v7571_v51  ;;  %v7583_v5 = vld [vmem:[#allocation7 + $0x60] sm:$0xff] }
 0x703   :  { %v6815_v52 = vpop.eup %6814 }
 0x704   :  { %v1031_v53 = vmul.f32 %v6815_v52, %v6813_v2  ;;  %v6817_v7 = vpop.eup %6816  ;;  %v1030_v11 = vmul.f32 %v6815_v52, %v7487_v0  ;;  %v7573_v2 = vld [vmem:[#allocation7 + $0x70] sm:$0xff]  ;;  %v7575_v52 = vld [vmem:[#allocation9 + $0x78] sm:$0xff] }
 0x705   :  { %v1027_v9 = vadd.f32 1.0, %v6817_v7  ;;  %1613 = vmatpush1.msra.mxu1 %v7573_v2  ;;  %v7587_v7 = vld [vmem:[#allocation9 + $0x68] sm:$0xff] }
 0x706   :  { %1033 = vrot.lane.b32.xlu0 %v1031_v53, %s7128_s1  ;;  %v7579_v53 = vld [vmem:[#allocation7 + $0x68] sm:$0xff] }
 0x707   :  { %6818 = vrcp.f32 %v1027_v9  ;;  %v7589_v9 = vld [vmem:[#allocation7 + $0x58] sm:$0xff]  ;;  %1614 = vmatprep.subr.mxu1 %v7579_v53 }
 0x708   :  { %1615 = vmatpush1.msra.mxu1 %v7583_v5 }
 0x709   :  { %1616 = vmatprep.subr.mxu1 %v7589_v9 }
 0x714   :  { %v6819_v17 = vpop.eup %6818 }
 0x778   :  { %v1034_v13 = vpop.permute.xlu0 %1033 }
 0x779   :  { %v1036_v15 = vadd.f32 %v1034_v13, %v1030_v11  ;;  %v7591_v11 = vld [vmem:[#allocation9 + $0x60] sm:$0xff]  ;;  %v7595_v13 = vld [vmem:[#allocation7 + $0x50] sm:$0xff] }
 0x77a   :  { %1617 = vmatpush1.msra.mxu1 %v7595_v13 }
 0x77b   :  { %6820 = vtanh.f32 %v1036_v15 }
 0x788   :  { %v6821_v19 = vpop.eup %6820 }
 0x789   :  { %v1038_v21 = vmul.f32 %v6821_v19, %v6819_v17  ;;  %v7601_v17 = vld [vmem:[#allocation7 + $0x48] sm:$0xff]  ;;  %v7603_v19 = vld [vmem:[#allocation9 + $0x50] sm:$0xff] }
 0x78a   :  { %1618 = vmatprep.subr.mxu1 %v7601_v17 }
 0x78b   :  { %1075 = vrot.lane.b32.xlu1 %v1038_v21, %s7128_s1  ;;  %1039 = vst.msk [vmem:[#allocation2 + $0x8] sm:$0xff] %vm595_vm1, %v1038_v21  ;;  %v7605_v21 = vld [vmem:[#allocation9 + $0x48] sm:$0xff] }
 0x7fd   :  { %v1076_v23 = vpop.permute.xlu1 %1075 }
 0x7fe   :  { %6588 = vmatmul.mubr.msk.f32.vlgmr.msra.gmra.mxu0 %vm188_vm0, %v1076_v23  ;;  %v7609_v23 = vld [vmem:[#allocation7 + $0x40] sm:$0xff] }
 0x7ff   :  { %1318 = vmatpush1.msra.mxu0 %v7238_v4  ;;  %1365 = vmatprep.mubr.f32.mxu0 %v7131_v1  ;;  %v1224_v4 = vld [vmem:[#allocation10] sm:$0x3] }
 0x800   :  { %1319 = vmatprep.subr.mxu0 %v7244_v6  ;;  %v1229_v6 = vrot.slane %v1224_v4, %v7371_v37  ;;  %1619 = vmatpush1.msra.mxu1 %v7609_v23 }
 0x801   :  { %1320 = vmatpush1.msra.mxu0 %v7250_v8  ;;  %v1219_v8 = vpop.f32.mrf.mxu1 }
 0x802   :  { %1321 = vmatprep.subr.mxu0 %v7254_v10 }
 0x803   :  { %1322 = vmatpush1.msra.mxu0 %v7260_v12 }
 0x804   :  { %1323 = vmatprep.subr.mxu0 %v7266_v14 }
 0x805   :  { %1324 = vmatpush1.msra.mxu0 %v7272_v16 }
 0x806   :  { %1325 = vmatprep.subr.mxu0 %v7278_v18 }
 0x807   :  { %1326 = vmatpush1.msra.mxu0 %v7284_v20  ;;  %v1221_v20 = vpop.f32.mrf.mxu1 }
 0x808   :  { %1327 = vmatprep.subr.mxu0 %v7290_v22 }
 0x809   :  { %1328 = vmatpush1.msra.mxu0 %v7296_v24  ;;  %v1233_v24 = vrot.slane %v1224_v4, %v7375_v45  ;;  %v1441_v38 = vpop.f32.mrf.mxu1  ;;  %v7611_v4 = vld [vmem:[#allocation9 + $0x40] sm:$0xff] }
 0x80a   :  { %1329 = vmatprep.subr.mxu0 %v7302_v26 }
 0x80b   :  { %1330 = vmatpush1.msra.mxu0 %v7308_v28  ;;  %v1443_v41 = vpop.f32.mrf.mxu1 }
 0x80c   :  { %1331 = vmatprep.subr.mxu0 %v7314_v30 }
 0x80d   :  { %1332 = vmatpush1.msra.mxu0 %v7320_v32 }
 0x80e   :  { %1538 = vmatprep.subr.mxu0 %v7575_v52 }
 0x8be   :  { %v1145_v10 = vpop.f32.mrf.mxu0 }
 0x8bf   :  { %v1220_v12 = vadd.f32 %v1219_v8, %v1145_v10  ;;  %v7617_v8 = vld [vmem:[#allocation9 + $0x38] sm:$0xff]  ;;  %v7621_v10 = vld [vmem:[#allocation7 + $0x30] sm:$0xff] }
 0x8c0   :  { %v1147_v18 = vpop.f32.mrf.mxu0 }
 0x8c1   :  { %v1236_v14 = vadd.f32 %v1229_v6, %v1220_v12  ;;  %v1222_v22 = vadd.f32 %v1221_v20, %v1147_v18  ;;  %v7615_v6 = vld [vmem:[#allocation7 + $0x38] sm:$0xff]  ;;  %v7623_v12 = vld [vmem:[#allocation9 + $0x30] sm:$0xff]  ;;  %v7633_v18 = vld [vmem:[#allocation7 + $0x20] sm:$0xff] }
 0x8c2   :  { %1620 = vmatprep.subr.mxu1 %v7615_v6  ;;  %v7635_v20 = vld [vmem:[#allocation9 + $0x20] sm:$0xff] }
 0x8c3   :  { %v6590_v16 = vmul.f32 -1.442695, %v1236_v14  ;;  %v1237_v25 = vadd.f32 %v1233_v24, %v1222_v22  ;;  %v7627_v14 = vld [vmem:[#allocation7 + $0x28] sm:$0xff]  ;;  %1621 = vmatpush1.msra.mxu1 %v7621_v10  ;;  %v7639_v22 = vld [vmem:[#allocation7 + $0x18] sm:$0xff] }
 0x8c4   :  { %v7641_v24 = vld [vmem:[#allocation9 + $0x18] sm:$0xff]  ;;  %1622 = vmatprep.subr.mxu1 %v7627_v14 }
 0x8c5   :  { %6822 = vpow2.f32 %v6590_v16  ;;  %v6591_v32 = vmul.f32 -1.442695, %v1237_v25  ;;  %v7629_v16 = vld [vmem:[#allocation9 + $0x28] sm:$0xff]  ;;  %1623 = vmatpush1.msra.mxu1 %v7633_v18 }
 0x8c6   :  { %6824 = vtanh.f32 %v1237_v25  ;;  %v7645_v25 = vld [vmem:[#allocation7 + $0x10] sm:$0xff]  ;;  %1624 = vmatprep.subr.mxu1 %v7639_v22 }
 0x8c7   :  { %1625 = vmatpush1.msra.mxu1 %v7645_v25 }
 0x8d2   :  { %v6823_v26 = vpop.eup %6822 }
 0x8d3   :  { %v1241_v27 = vadd.f32 1.0, %v6823_v26  ;;  %v6825_v28 = vpop.eup %6824  ;;  %v7647_v26 = vld [vmem:[#allocation9 + $0x10] sm:$0xff] }
 0x8d5   :  { %6826 = vrcp.f32 %v1241_v27  ;;  %v7651_v27 = vld [vmem:[#allocation7 + $0x8] sm:$0xff] }
 0x8d6   :  { %6828 = vpow2.f32 %v6591_v32  ;;  %1626 = vmatprep.subr.mxu1 %v7651_v27 }
 0x8e2   :  { %v6827_v29 = vpop.eup %6826 }
 0x8e3   :  { %v1252_v30 = vmul.f32 %v6827_v29, %v6825_v28  ;;  %v6829_v33 = vpop.eup %6828  ;;  %v1251_v56 = vmul.f32 %v6827_v29, %v1036_v15  ;;  %v7597_v15 = vld [vmem:[#allocation9 + $0x58] sm:$0xff]  ;;  %v7653_v28 = vld [vmem:[#allocation9 + $0x8] sm:$0xff]  ;;  %v7657_v29 = vld [vmem:[#allocation7] sm:$0xff] }
 0x8e4   :  { %v1248_v55 = vadd.f32 1.0, %v6829_v33  ;;  %1627 = vmatpush1.msra.mxu1 %v7657_v29 }
 0x8e5   :  { %1254 = vrot.lane.b32.xlu0 %v1252_v30, %s7128_s1  ;;  %v7659_v30 = vld [vmem:[#allocation9] sm:$0xff]  ;;  %6597 = vmatmul.mubr.msk.f32.vlgmr.msra.gmra.mxu1 %vm188_vm0, %v1484_v31 }
 0x8e6   :  { %6830 = vrcp.f32 %v1248_v55  ;;  %1834 = vmatprep.subr.mxu1 %v7571_v51  ;;  %1882 = vmatprep.mubr.f32.mxu1 %v7131_v1 }
 0x8e7   :  { %1835 = vmatpush1.msra.mxu1 %v7573_v2 }
 0x8e8   :  { %1836 = vmatprep.subr.mxu1 %v7579_v53 }
 0x8e9   :  { %1837 = vmatpush1.msra.mxu1 %v7583_v5 }
 0x8ea   :  { %1838 = vmatprep.subr.mxu1 %v7589_v9 }
 0x8eb   :  { %1839 = vmatpush1.msra.mxu1 %v7595_v13 }
 0x8ec   :  { %1840 = vmatprep.subr.mxu1 %v7601_v17 }
 0x8ed   :  { %1841 = vmatpush1.msra.mxu1 %v7609_v23 }
 0x8ee   :  { %1842 = vmatprep.subr.mxu1 %v7615_v6 }
 0x8ef   :  { %1843 = vmatpush1.msra.mxu1 %v7621_v10 }
 0x8f0   :  { %1844 = vmatprep.subr.mxu1 %v7627_v14 }
 0x8f1   :  { %1845 = vmatpush1.msra.mxu1 %v7633_v18 }
 0x8f2   :  { %1846 = vmatprep.subr.mxu1 %v7639_v22 }
 0x8f3   :  { %v6831_v59 = vpop.eup %6830  ;;  %1847 = vmatpush1.msra.mxu1 %v7645_v25 }
 0x8f4   :  { %1848 = vmatprep.subr.mxu1 %v7651_v27 }
 0x8f5   :  { %1849 = vmatpush1.msra.mxu1 %v7657_v29 }
 0x8f6   :  { %2055 = vmatprep.subr.mxu1 %v7571_v51 }
 0x957   :  { %v1255_v57 = vpop.permute.xlu0 %1254 }
 0x958   :  { %v7555_v58 = vadd.f32 %v1255_v57, %v1251_v56 }
 0x95a   :  { %6832 = vtanh.f32 %v7555_v58 }
 0x967   :  { %v6833_v60 = vpop.eup %6832 }
 0x968   :  { %v1259_v61 = vmul.f32 %v6833_v60, %v6831_v59 }
 0x96a   :  { %1261 = vrot.lane.b32.xlu1 %v1259_v61, %s7128_s1 }
 0x9dc   :  { %v1262_v0 = vpop.permute.xlu1 %1261 }
 0x9dd   :  { %1264 = vst.msk [vmem:[#allocation2 + $0x10] sm:$0xff] %vm188_vm0, %v1262_v0  ;;  %6592 = vmatmul.mubr.msk.f32.vlgmr.msra.gmra.mxu0 %vm188_vm0, %v1262_v0 }
 0x9de   :  { %1586 = vmatprep.mubr.f32.mxu0 %v7131_v1  ;;  %1539 = vmatpush1.msra.mxu0 %v7581_v54 }
 0x9df   :  { %1540 = vmatprep.subr.mxu0 %v7587_v7 }
 0x9e0   :  { %1541 = vmatpush1.msra.mxu0 %v7591_v11 }
 0x9e1   :  { %1542 = vmatprep.subr.mxu0 %v7597_v15 }
 0x9e2   :  { %1543 = vmatpush1.msra.mxu0 %v7603_v19 }
 0x9e3   :  { %1544 = vmatprep.subr.mxu0 %v7605_v21 }
 0x9e4   :  { %1545 = vmatpush1.msra.mxu0 %v7611_v4 }
 0x9e5   :  { %1546 = vmatprep.subr.mxu0 %v7617_v8 }
 0x9e6   :  { %1547 = vmatpush1.msra.mxu0 %v7623_v12 }
 0x9e7   :  { %1548 = vmatprep.subr.mxu0 %v7629_v16 }
 0x9e8   :  { %1549 = vmatpush1.msra.mxu0 %v7635_v20 }
 0x9e9   :  { %1550 = vmatprep.subr.mxu0 %v7641_v24 }
 0x9ea   :  { %1551 = vmatpush1.msra.mxu0 %v7647_v26 }
 0x9eb   :  { %1552 = vmatprep.subr.mxu0 %v7653_v28 }
 0x9ec   :  { %1553 = vmatpush1.msra.mxu0 %v7659_v30 }
 0x9ed   :  { %1760 = vmatprep.subr.mxu0 %v7575_v52  ;;  %v1709_v52 = vld [vmem:[#allocation4 + $0x38] sm:$0xff] }
 0x9ee   :  { %6601 = vmatmul.mubr.msk.f32.vlgmr.msra.gmra.mxu1 %vm188_vm0, %v1709_v52 }
 0x9ef   :  { %2056 = vmatpush1.msra.mxu1 %v7573_v2  ;;  %2103 = vmatprep.mubr.f32.mxu1 %v7131_v1 }
 0x9f0   :  { %2057 = vmatprep.subr.mxu1 %v7579_v53 }
 0x9f1   :  { %2058 = vmatpush1.msra.mxu1 %v7583_v5 }
 0x9f2   :  { %2059 = vmatprep.subr.mxu1 %v7589_v9 }
 0x9f3   :  { %2060 = vmatpush1.msra.mxu1 %v7595_v13 }
 0x9f4   :  { %2061 = vmatprep.subr.mxu1 %v7601_v17 }
 0x9f5   :  { %2062 = vmatpush1.msra.mxu1 %v7609_v23 }
 0x9f6   :  { %2063 = vmatprep.subr.mxu1 %v7615_v6 }
 0x9f7   :  { %2064 = vmatpush1.msra.mxu1 %v7621_v10 }
 0x9f8   :  { %2065 = vmatprep.subr.mxu1 %v7627_v14 }
 0x9f9   :  { %2066 = vmatpush1.msra.mxu1 %v7633_v18 }
 0x9fa   :  { %2067 = vmatprep.subr.mxu1 %v7639_v22 }
 0x9fb   :  { %2068 = vmatpush1.msra.mxu1 %v7645_v25 }
 0x9fc   :  { %2069 = vmatprep.subr.mxu1 %v7651_v27 }
 0x9fd   :  { %2070 = vmatpush1.msra.mxu1 %v7657_v29 }
 0x9fe   :  { %2277 = vmatprep.subr.mxu1 %v7571_v51  ;;  %v1927_v51 = vld [vmem:[#allocation4 + $0x40] sm:$0xff] }
 0x9ff   :  { %6605 = vmatmul.mubr.msk.f32.vlgmr.msra.gmra.mxu1 %vm188_vm0, %v1927_v51 }
 0xa00   :  { %2278 = vmatpush1.msra.mxu1 %v7573_v2  ;;  %2325 = vmatprep.mubr.f32.mxu1 %v7131_v1  ;;  %v2751_v2 = vld [vmem:[#allocation12 + $0xbc8] sm:$0xff] }
 0xa01   :  { %2279 = vmatprep.subr.mxu1 %v7579_v53  ;;  %v2152_v53 = vld [vmem:[#allocation4 + $0x48] sm:$0xff] }
 0xa02   :  { %2280 = vmatpush1.msra.mxu1 %v7583_v5  ;;  %v2750_v5 = vld [vmem:[#allocation12 + $0xbc0] sm:$0xff] }
 0xa03   :  { %2281 = vmatprep.subr.mxu1 %v7589_v9  ;;  %v2743_v9 = vld [vmem:[#allocation12 + $0xb88] sm:$0xff] }
 0xa04   :  { %2282 = vmatpush1.msra.mxu1 %v7595_v13  ;;  %v2742_v13 = vld [vmem:[#allocation12 + $0xb80] sm:$0xff] }
 0xa05   :  { %2283 = vmatprep.subr.mxu1 %v7601_v17  ;;  %v2735_v17 = vld [vmem:[#allocation12 + $0xb48] sm:$0xff] }
 0xa06   :  { %2284 = vmatpush1.msra.mxu1 %v7609_v23  ;;  %v2734_v23 = vld [vmem:[#allocation12 + $0xb40] sm:$0xff] }
 0xa07   :  { %2285 = vmatprep.subr.mxu1 %v7615_v6  ;;  %v2727_v6 = vld [vmem:[#allocation12 + $0xb08] sm:$0xff] }
 0xa08   :  { %2286 = vmatpush1.msra.mxu1 %v7621_v10  ;;  %v2726_v10 = vld [vmem:[#allocation12 + $0xb00] sm:$0xff] }
 0xa09   :  { %2287 = vmatprep.subr.mxu1 %v7627_v14  ;;  %v2719_v14 = vld [vmem:[#allocation12 + $0xac8] sm:$0xff] }
 0xa0a   :  { %2288 = vmatpush1.msra.mxu1 %v7633_v18  ;;  %v2718_v18 = vld [vmem:[#allocation12 + $0xac0] sm:$0xff] }
 0xa0b   :  { %2289 = vmatprep.subr.mxu1 %v7639_v22  ;;  %v2711_v22 = vld [vmem:[#allocation12 + $0xa88] sm:$0xff] }
 0xa0c   :  { %2290 = vmatpush1.msra.mxu1 %v7645_v25  ;;  %v2710_v25 = vld [vmem:[#allocation12 + $0xa80] sm:$0xff] }
 0xa0d   :  { %2291 = vmatprep.subr.mxu1 %v7651_v27  ;;  %v2703_v27 = vld [vmem:[#allocation12 + $0xa48] sm:$0xff] }
 0xa0e   :  { %2292 = vmatpush1.msra.mxu1 %v7657_v29  ;;  %v2702_v29 = vld [vmem:[#allocation12 + $0xa40] sm:$0xff] }
 0xa0f   :  { %3127 = vmatprep.subr.mxu1 %v2751_v2  ;;  %6609 = vmatmul.mubr.msk.f32.vlgmr.msra.gmra.mxu1 %vm188_vm0, %v2152_v53 }
 0xa10   :  { %3128 = vmatpush1.msra.mxu1 %v2750_v5  ;;  %v2855_v5 = vld [vmem:[#allocation12 + $0xf08] sm:$0xff] }
 0xa11   :  { %3129 = vmatprep.subr.mxu1 %v2743_v9  ;;  %v2854_v9 = vld [vmem:[#allocation12 + $0xf00] sm:$0xff] }
 0xa12   :  { %3130 = vmatpush1.msra.mxu1 %v2742_v13  ;;  %v2847_v13 = vld [vmem:[#allocation12 + $0xec8] sm:$0xff] }
 0xa13   :  { %3131 = vmatprep.subr.mxu1 %v2735_v17  ;;  %v2846_v17 = vld [vmem:[#allocation12 + $0xec0] sm:$0xff] }
 0xa14   :  { %3132 = vmatpush1.msra.mxu1 %v2734_v23  ;;  %v2839_v23 = vld [vmem:[#allocation12 + $0xe88] sm:$0xff] }
 0xa15   :  { %3133 = vmatprep.subr.mxu1 %v2727_v6  ;;  %v2838_v6 = vld [vmem:[#allocation12 + $0xe80] sm:$0xff] }
 0xa16   :  { %3134 = vmatpush1.msra.mxu1 %v2726_v10  ;;  %v2831_v10 = vld [vmem:[#allocation12 + $0xe48] sm:$0xff] }
 0xa17   :  { %3135 = vmatprep.subr.mxu1 %v2719_v14  ;;  %v2830_v14 = vld [vmem:[#allocation12 + $0xe40] sm:$0xff] }
 0xa18   :  { %3136 = vmatpush1.msra.mxu1 %v2718_v18  ;;  %v2823_v18 = vld [vmem:[#allocation12 + $0xe08] sm:$0xff] }
 0xa19   :  { %3137 = vmatprep.subr.mxu1 %v2711_v22  ;;  %v2822_v22 = vld [vmem:[#allocation12 + $0xe00] sm:$0xff] }
 0xa1a   :  { %3138 = vmatpush1.msra.mxu1 %v2710_v25  ;;  %v2815_v25 = vld [vmem:[#allocation12 + $0xdc8] sm:$0xff] }
 0xa1b   :  { %3139 = vmatprep.subr.mxu1 %v2703_v27 }
 0xa1c   :  { %3140 = vmatpush1.msra.mxu1 %v2702_v29  ;;  %v2814_v29 = vld [vmem:[#allocation12 + $0xdc0] sm:$0xff] }
 0xa9d   :  { %v1367_v62 = vpop.f32.mrf.mxu0 }
 0xa9e   :  { %v1442_v3 = vadd.f32 %v1441_v38, %v1367_v62  ;;  %v1662_v38 = vpop.f32.mrf.mxu1 }
 0xa9f   :  { %v1369_v40 = vpop.f32.mrf.mxu0 }
 0xaa0   :  { %v1458_v63 = vadd.f32 %v1451_v35, %v1442_v3  ;;  %v1444_v42 = vadd.f32 %v1443_v41, %v1369_v40  ;;  %v1664_v41 = vpop.f32.mrf.mxu1 }
 0xaa2   :  { %v6594_v39 = vmul.f32 -1.442695, %v1458_v63  ;;  %v7564_v44 = vadd.f32 %v1455_v43, %v1444_v42 }
 0xaa4   :  { %6834 = vpow2.f32 %v6594_v39  ;;  %v6595_v32 = vmul.f32 -1.442695, %v7564_v44 }
 0xaa5   :  { %6836 = vtanh.f32 %v7564_v44 }
 0xab1   :  { %v6835_v46 = vpop.eup %6834 }
 0xab2   :  { %v1463_v47 = vadd.f32 1.0, %v6835_v46  ;;  %v6837_v48 = vpop.eup %6836 }
 0xab4   :  { %6838 = vrcp.f32 %v1463_v47 }
 0xab5   :  { %6840 = vpow2.f32 %v6595_v32 }
 0xac1   :  { %v7567_v49 = vpop.eup %6838 }
 0xac2   :  { %v1474_v50 = vmul.f32 %v7567_v49, %v6837_v48  ;;  %v6841_v33 = vpop.eup %6840  ;;  %v1473_v56 = vmul.f32 %v7567_v49, %v7555_v58  ;;  %v1667_v58 = vld [vmem:[#allocation10] sm:$0x3] }
 0xac3   :  { %v1470_v55 = vadd.f32 1.0, %v6841_v33  ;;  %v1672_v35 = vrot.slane %v1667_v58, %v7371_v37  ;;  %v1676_v43 = vrot.slane %v1667_v58, %v7375_v45  ;;  %v2663_v58 = vld [vmem:[#allocation12 + $0x908] sm:$0xff] }
 0xac4   :  { %1476 = vrot.lane.b32.xlu0 %v1474_v50, %s7128_s1 }
 0xac5   :  { %6842 = vrcp.f32 %v1470_v55  ;;  %v2695_v55 = vld [vmem:[#allocation12 + $0xa08] sm:$0xff] }
 0xac6   :  { %3141 = vmatprep.subr.mxu1 %v2695_v55 }
 0xad2   :  { %v6843_v60 = vpop.eup %6842 }
 0xb36   :  { %v1477_v57 = vpop.permute.xlu0 %1476 }
 0xb37   :  { %v7690_v59 = vadd.f32 %v1477_v57, %v1473_v56  ;;  %v2694_v56 = vld [vmem:[#allocation12 + $0xa00] sm:$0xff]  ;;  %v2687_v57 = vld [vmem:[#allocation12 + $0x9c8] sm:$0xff] }
 0xb38   :  { %3142 = vmatpush1.msra.mxu1 %v2694_v56  ;;  %v2807_v56 = vld [vmem:[#allocation12 + $0xd88] sm:$0xff] }
 0xb39   :  { %6844 = vtanh.f32 %v7690_v59  ;;  %3143 = vmatprep.subr.mxu1 %v2687_v57 }
 0xb46   :  { %v6845_v61 = vpop.eup %6844 }
 0xb47   :  { %v1481_v0 = vmul.f32 %v6845_v61, %v6843_v60  ;;  %v2679_v60 = vld [vmem:[#allocation12 + $0x988] sm:$0xff]  ;;  %v2678_v61 = vld [vmem:[#allocation12 + $0x980] sm:$0xff] }
 0xb49   :  { %1518 = vrot.lane.b32.xlu1 %v1481_v0, %s7128_s1  ;;  %1482 = vst.msk [vmem:[#allocation2 + $0x10] sm:$0xff] %vm595_vm1, %v1481_v0  ;;  %v2671_v0 = vld [vmem:[#allocation12 + $0x948] sm:$0xff] }
 0xbbb   :  { %v1519_v34 = vpop.permute.xlu1 %1518 }
 0xbbc   :  { %6596 = vmatmul.mubr.msk.f32.vlgmr.msra.gmra.mxu0 %vm188_vm0, %v1519_v34  ;;  %v2670_v34 = vld [vmem:[#allocation12 + $0x940] sm:$0xff] }
 0xbbd   :  { %1761 = vmatpush1.msra.mxu0 %v7581_v54  ;;  %1808 = vmatprep.mubr.f32.mxu0 %v7131_v1 }
 0xbbe   :  { %1762 = vmatprep.subr.mxu0 %v7587_v7 }
 0xbbf   :  { %1763 = vmatpush1.msra.mxu0 %v7591_v11 }
 0xbc0   :  { %1764 = vmatprep.subr.mxu0 %v7597_v15 }
 0xbc1   :  { %1765 = vmatpush1.msra.mxu0 %v7603_v19 }
 0xbc2   :  { %1766 = vmatprep.subr.mxu0 %v7605_v21 }
 0xbc3   :  { %1767 = vmatpush1.msra.mxu0 %v7611_v4 }
 0xbc4   :  { %1768 = vmatprep.subr.mxu0 %v7617_v8 }
 0xbc5   :  { %1769 = vmatpush1.msra.mxu0 %v7623_v12 }
 0xbc6   :  { %1770 = vmatprep.subr.mxu0 %v7629_v16 }
 0xbc7   :  { %1771 = vmatpush1.msra.mxu0 %v7635_v20 }
 0xbc8   :  { %1772 = vmatprep.subr.mxu0 %v7641_v24 }
 0xbc9   :  { %1773 = vmatpush1.msra.mxu0 %v7647_v26 }
 0xbca   :  { %1774 = vmatprep.subr.mxu0 %v7653_v28 }
 0xbcb   :  { %1775 = vmatpush1.msra.mxu0 %v7659_v30 }
 0xc7c   :  { %v1588_v62 = vpop.f32.mrf.mxu0 }
 0xc7d   :  { %v1663_v3 = vadd.f32 %v1662_v38, %v1588_v62  ;;  %v2655_v38 = vld [vmem:[#allocation12 + $0x8c8] sm:$0xff]  ;;  %v2654_v62 = vld [vmem:[#allocation12 + $0x8c0] sm:$0xff] }
 0xc7e   :  { %v1590_v40 = vpop.f32.mrf.mxu0 }
 0xc7f   :  { %v1679_v63 = vadd.f32 %v1672_v35, %v1663_v3  ;;  %v1665_v42 = vadd.f32 %v1664_v41, %v1590_v40  ;;  %v2662_v35 = vld [vmem:[#allocation12 + $0x900] sm:$0xff]  ;;  %v2647_v3 = vld [vmem:[#allocation12 + $0x888] sm:$0xff] }
 0xc80   :  { %v2638_v40 = vld [vmem:[#allocation12 + $0x840] sm:$0xff]  ;;  %v2631_v41 = vld [vmem:[#allocation12 + $0x808] sm:$0xff] }
 0xc81   :  { %v6598_v39 = vmul.f32 -1.442695, %v1679_v63  ;;  %v1680_v44 = vadd.f32 %v1676_v43, %v1665_v42  ;;  %v2646_v63 = vld [vmem:[#allocation12 + $0x880] sm:$0xff]  ;;  %v2879_v43 = vld [vmem:[#allocation12 + $0xfc8] sm:$0xff] }
 0xc82   :  { %v2630_v42 = vld [vmem:[#allocation12 + $0x800] sm:$0xff] }
 0xc83   :  { %6846 = vpow2.f32 %v6598_v39  ;;  %v6599_v54 = vmul.f32 -1.442695, %v1680_v44  ;;  %v2639_v39 = vld [vmem:[#allocation12 + $0x848] sm:$0xff] }
 0xc84   :  { %6848 = vtanh.f32 %v1680_v44  ;;  %v2878_v44 = vld [vmem:[#allocation12 + $0xfc0] sm:$0xff] }
 0xc90   :  { %v6847_v46 = vpop.eup %6846 }
 0xc91   :  { %v1684_v47 = vadd.f32 1.0, %v6847_v46  ;;  %v6849_v48 = vpop.eup %6848  ;;  %v2871_v46 = vld [vmem:[#allocation12 + $0xf88] sm:$0xff] }
 0xc93   :  { %6850 = vrcp.f32 %v1684_v47  ;;  %v2870_v47 = vld [vmem:[#allocation12 + $0xf80] sm:$0xff] }
 0xc94   :  { %6852 = vpow2.f32 %v6599_v54  ;;  %v1884_v54 = vpop.f32.mrf.mxu1 }
 0xca0   :  { %v6851_v49 = vpop.eup %6850 }
 0xca1   :  { %v1695_v50 = vmul.f32 %v6851_v49, %v6849_v48  ;;  %v6853_v7 = vpop.eup %6852  ;;  %v1694_v15 = vmul.f32 %v6851_v49, %v7690_v59  ;;  %v2686_v59 = vld [vmem:[#allocation12 + $0x9c0] sm:$0xff]  ;;  %v2863_v48 = vld [vmem:[#allocation12 + $0xf48] sm:$0xff] }
 0xca2   :  { %v1691_v11 = vadd.f32 1.0, %v6853_v7  ;;  %3144 = vmatpush1.msra.mxu1 %v2686_v59  ;;  %v2862_v49 = vld [vmem:[#allocation12 + $0xf40] sm:$0xff] }
 0xca3   :  { %1697 = vrot.lane.b32.xlu0 %v1695_v50, %s7128_s1  ;;  %3145 = vmatprep.subr.mxu1 %v2679_v60  ;;  %v1889_v50 = vld [vmem:[#allocation10] sm:$0x3]  ;;  %v2806_v59 = vld [vmem:[#allocation12 + $0xd80] sm:$0xff]  ;;  %v2799_v60 = vld [vmem:[#allocation12 + $0xd48] sm:$0xff] }
 0xca4   :  { %6854 = vrcp.f32 %v1691_v11  ;;  %3146 = vmatpush1.msra.mxu1 %v2678_v61  ;;  %v1894_v52 = vrot.slane %v1889_v50, %v7371_v37  ;;  %v2798_v61 = vld [vmem:[#allocation12 + $0xd40] sm:$0xff] }
 0xca5   :  { %3147 = vmatprep.subr.mxu1 %v2671_v0  ;;  %v2791_v0 = vld [vmem:[#allocation12 + $0xd08] sm:$0xff] }
 0xca6   :  { %3148 = vmatpush1.msra.mxu1 %v2670_v34  ;;  %v2790_v34 = vld [vmem:[#allocation12 + $0xd00] sm:$0xff] }
 0xca7   :  { %3149 = vmatprep.subr.mxu1 %v2663_v58  ;;  %v2783_v58 = vld [vmem:[#allocation12 + $0xcc8] sm:$0xff] }
 0xca8   :  { %3150 = vmatpush1.msra.mxu1 %v2662_v35  ;;  %v2782_v35 = vld [vmem:[#allocation12 + $0xcc0] sm:$0xff] }
 0xca9   :  { %3151 = vmatprep.subr.mxu1 %v2655_v38  ;;  %v2775_v38 = vld [vmem:[#allocation12 + $0xc88] sm:$0xff] }
 0xcaa   :  { %3152 = vmatpush1.msra.mxu1 %v2654_v62  ;;  %v2774_v62 = vld [vmem:[#allocation12 + $0xc80] sm:$0xff] }
 0xcab   :  { %3153 = vmatprep.subr.mxu1 %v2647_v3  ;;  %v2767_v3 = vld [vmem:[#allocation12 + $0xc48] sm:$0xff] }
 0xcac   :  { %3154 = vmatpush1.msra.mxu1 %v2646_v63  ;;  %v2766_v63 = vld [vmem:[#allocation12 + $0xc40] sm:$0xff] }
 0xcad   :  { %3155 = vmatprep.subr.mxu1 %v2639_v39  ;;  %v2759_v39 = vld [vmem:[#allocation12 + $0xc08] sm:$0xff] }
 0xcae   :  { %3156 = vmatpush1.msra.mxu1 %v2638_v40  ;;  %v2758_v40 = vld [vmem:[#allocation12 + $0xc00] sm:$0xff] }
 0xcaf   :  { %3157 = vmatprep.subr.mxu1 %v2631_v41  ;;  %v2497_v41 = vld [vmem:[#allocation12 + $0x3d8] sm:$0xff] }
 0xcb0   :  { %3158 = vmatpush1.msra.mxu1 %v2630_v42  ;;  %v1959_v42 = vld [vmem:[#allocation9 + $0x78] sm:$0xff] }
 0xcb1   :  { %v6855_v4 = vpop.eup %6854  ;;  %3159 = vmatprep.subr.mxu1 %v2879_v43  ;;  %v7768_v43 = vld [vmem:[#allocation9 + $0x70] sm:$0xff]  ;;  %1981 = vmatprep.subr.mxu0 %v1959_v42 }
 0xcb2   :  { %3160 = vmatpush2.msra.mxu1 %v2878_v44  ;;  %v7770_v44 = vld [vmem:[#allocation9 + $0x68] sm:$0xff] }
 0xcb3   :  { %3161 = vmatprep.subr.mxu1 %v2871_v46  ;;  %v7772_v46 = vld [vmem:[#allocation9 + $0x60] sm:$0xff] }
 0xcb4   :  { %3162 = vmatpush2.msra.mxu1 %v2870_v47  ;;  %v7775_v47 = vld [vmem:[#allocation9 + $0x58] sm:$0xff] }
 0xcb5   :  { %3163 = vmatprep.subr.mxu1 %v2863_v48  ;;  %v7778_v48 = vld [vmem:[#allocation9 + $0x50] sm:$0xff] }
 0xcb6   :  { %3164 = vmatpush2.msra.mxu1 %v2862_v49  ;;  %v7781_v49 = vld [vmem:[#allocation9 + $0x48] sm:$0xff] }
 0xcb7   :  { %3165 = vmatprep.subr.mxu1 %v2855_v5  ;;  %v2456_v5 = vld [vmem:[#allocation12 + $0x290] sm:$0xff] }
 0xcb8   :  { %3166 = vmatpush2.msra.mxu1 %v2854_v9  ;;  %v2449_v9 = vld [vmem:[#allocation12 + $0x258] sm:$0xff] }
 0xcb9   :  { %3167 = vmatprep.subr.mxu1 %v2847_v13  ;;  %v2448_v13 = vld [vmem:[#allocation12 + $0x250] sm:$0xff] }
 0xcba   :  { %3168 = vmatpush2.msra.mxu1 %v2846_v17  ;;  %v2441_v17 = vld [vmem:[#allocation12 + $0x218] sm:$0xff] }
 0xcbb   :  { %3169 = vmatprep.subr.mxu1 %v2839_v23  ;;  %v2440_v23 = vld [vmem:[#allocation12 + $0x210] sm:$0xff] }
 0xcbc   :  { %3170 = vmatpush2.msra.mxu1 %v2838_v6  ;;  %v2433_v6 = vld [vmem:[#allocation12 + $0x1d8] sm:$0xff] }
 0xcbd   :  { %3171 = vmatprep.subr.mxu1 %v2831_v10  ;;  %v2432_v10 = vld [vmem:[#allocation12 + $0x1d0] sm:$0xff] }
 0xcbe   :  { %3172 = vmatpush2.msra.mxu1 %v2830_v14  ;;  %v2425_v14 = vld [vmem:[#allocation12 + $0x198] sm:$0xff] }
 0xcbf   :  { %3173 = vmatprep.subr.mxu1 %v2823_v18  ;;  %v2424_v18 = vld [vmem:[#allocation12 + $0x190] sm:$0xff] }
 0xcc0   :  { %3174 = vmatpush2.msra.mxu1 %v2822_v22  ;;  %v2417_v22 = vld [vmem:[#allocation12 + $0x158] sm:$0xff] }
 0xcc1   :  { %3175 = vmatprep.subr.mxu1 %v2815_v25  ;;  %v2416_v25 = vld [vmem:[#allocation12 + $0x150] sm:$0xff] }
 0xcc2   :  { %3176 = vmatpush2.msra.mxu1 %v2814_v29  ;;  %v2408_v29 = vld [vmem:[#allocation12 + $0x110] sm:$0xff] }
 0xcc3   :  { %3177 = vmatprep.subr.mxu1 %v2807_v56  ;;  %v2400_v56 = vld [vmem:[#allocation12 + $0xd0] sm:$0xff] }
 0xcc4   :  { %3178 = vmatpush2.msra.mxu1 %v2806_v59  ;;  %v2392_v59 = vld [vmem:[#allocation12 + $0x90] sm:$0xff] }
 0xcc5   :  { %3179 = vmatprep.subr.mxu1 %v2799_v60  ;;  %v2385_v60 = vld [vmem:[#allocation12 + $0x58] sm:$0xff] }
 0xcc6   :  { %3180 = vmatpush2.msra.mxu1 %v2798_v61  ;;  %v2384_v61 = vld [vmem:[#allocation12 + $0x50] sm:$0xff] }
 0xcc7   :  { %3181 = vmatprep.subr.mxu1 %v2791_v0  ;;  %v2377_v0 = vld [vmem:[#allocation12 + $0x18] sm:$0xff] }
 0xcc8   :  { %3182 = vmatpush2.msra.mxu1 %v2790_v34  ;;  %v2376_v34 = vld [vmem:[#allocation12 + $0x10] sm:$0xff] }
 0xcc9   :  { %3183 = vmatprep.subr.mxu1 %v2783_v58  ;;  %v2625_v58 = vld [vmem:[#allocation12 + $0x7d8] sm:$0xff] }
 0xcca   :  { %3184 = vmatpush2.msra.mxu1 %v2782_v35  ;;  %v2624_v35 = vld [vmem:[#allocation12 + $0x7d0] sm:$0xff] }
 0xccb   :  { %3185 = vmatprep.subr.mxu1 %v2775_v38  ;;  %v2617_v38 = vld [vmem:[#allocation12 + $0x798] sm:$0xff] }
 0xccc   :  { %3186 = vmatpush2.msra.mxu1 %v2774_v62  ;;  %v2616_v62 = vld [vmem:[#allocation12 + $0x790] sm:$0xff] }
 0xccd   :  { %3187 = vmatprep.subr.mxu1 %v2767_v3  ;;  %v2609_v3 = vld [vmem:[#allocation12 + $0x758] sm:$0xff] }
 0xcce   :  { %3188 = vmatpush2.msra.mxu1 %v2766_v63  ;;  %v2608_v63 = vld [vmem:[#allocation12 + $0x750] sm:$0xff] }
 0xccf   :  { %3189 = vmatprep.subr.mxu1 %v2759_v39  ;;  %v2601_v39 = vld [vmem:[#allocation12 + $0x718] sm:$0xff] }
 0xcd0   :  { %3190 = vmatpush2.msra.mxu1 %v2758_v40  ;;  %v2600_v40 = vld [vmem:[#allocation12 + $0x710] sm:$0xff] }
 0xcd1   :  { %3269 = vmatprep.subr.mxu1 %v2497_v41  ;;  %v2593_v41 = vld [vmem:[#allocation12 + $0x6d8] sm:$0xff] }
 0xd15   :  { %v1698_v19 = vpop.permute.xlu0 %1697 }
 0xd16   :  { %v7734_v21 = vadd.f32 %v1698_v19, %v1694_v15 }
 0xd18   :  { %6856 = vtanh.f32 %v7734_v21 }
 0xd25   :  { %v6857_v31 = vpop.eup %6856 }
 0xd26   :  { %v1702_v32 = vmul.f32 %v6857_v31, %v6855_v4  ;;  %v1886_v31 = vpop.f32.mrf.mxu1 }
 0xd28   :  { %1704 = vrot.lane.b32.xlu1 %v1702_v32, %s7128_s1 }
 0xd9a   :  { %v1705_v33 = vpop.permute.xlu1 %1704 }
 0xd9b   :  { %1707 = vst.msk [vmem:[#allocation2 + $0x18] sm:$0xff] %vm188_vm0, %v1705_v33  ;;  %6600 = vmatmul.mubr.msk.f32.vlgmr.msra.gmra.mxu0 %vm188_vm0, %v1705_v33  ;;  %v1898_v33 = vrot.slane %v1889_v50, %v7375_v45  ;;  %v7784_v50 = vld [vmem:[#allocation9 + $0x40] sm:$0xff] }
 0xd9c   :  { %2029 = vmatprep.mubr.f32.mxu0 %v7131_v1  ;;  %1982 = vmatpush1.msra.mxu0 %v7768_v43 }
 0xd9d   :  { %1983 = vmatprep.subr.mxu0 %v7770_v44 }
 0xd9e   :  { %1984 = vmatpush1.msra.mxu0 %v7772_v46 }
 0xd9f   :  { %1985 = vmatprep.subr.mxu0 %v7775_v47 }
 0xda0   :  { %1986 = vmatpush1.msra.mxu0 %v7778_v48 }
 0xda1   :  { %1987 = vmatprep.subr.mxu0 %v7781_v49 }
 0xda2   :  { %1988 = vmatpush1.msra.mxu0 %v7784_v50 }
 0xda3   :  { %1989 = vmatprep.subr.mxu0 %v7617_v8 }
 0xda4   :  { %1990 = vmatpush1.msra.mxu0 %v7623_v12 }
 0xda5   :  { %1991 = vmatprep.subr.mxu0 %v7629_v16 }
 0xda6   :  { %1992 = vmatpush1.msra.mxu0 %v7635_v20 }
 0xda7   :  { %1993 = vmatprep.subr.mxu0 %v7641_v24 }
 0xda8   :  { %1994 = vmatpush1.msra.mxu0 %v7647_v26 }
 0xda9   :  { %1995 = vmatprep.subr.mxu0 %v7653_v28 }
 0xdaa   :  { %1996 = vmatpush1.msra.mxu0 %v7659_v30  ;;  %v2496_v30 = vld [vmem:[#allocation12 + $0x3d0] sm:$0xff] }
 0xdab   :  { %2203 = vmatprep.subr.mxu0 %v1959_v42  ;;  %v2592_v42 = vld [vmem:[#allocation12 + $0x6d0] sm:$0xff] }
 0xe5b   :  { %v1810_v7 = vpop.f32.mrf.mxu0 }
 0xe5c   :  { %v1885_v11 = vadd.f32 %v1884_v54, %v1810_v7 }
 0xe5d   :  { %v1812_v4 = vpop.f32.mrf.mxu0 }
 0xe5e   :  { %v1901_v15 = vadd.f32 %v1894_v52, %v1885_v11  ;;  %v1887_v32 = vadd.f32 %v1886_v31, %v1812_v4  ;;  %v2371_v11 = vld [vmem:[#allocation2 + $0x10] sm:$0xff] }
 0xe5f   :  { %v2481_v4 = vld [vmem:[#allocation12 + $0x358] sm:$0xff]  ;;  %v2480_v31 = vld [vmem:[#allocation12 + $0x350] sm:$0xff] }
 0xe60   :  { %v6602_v19 = vmul.f32 -1.442695, %v1901_v15  ;;  %v7761_v51 = vadd.f32 %v1898_v33, %v1887_v32  ;;  %v2489_v15 = vld [vmem:[#allocation12 + $0x398] sm:$0xff]  ;;  %v2472_v33 = vld [vmem:[#allocation12 + $0x310] sm:$0xff] }
 0xe61   :  { %v2473_v32 = vld [vmem:[#allocation12 + $0x318] sm:$0xff] }
 0xe62   :  { %6858 = vpow2.f32 %v6602_v19  ;;  %v6603_v52 = vmul.f32 -1.442695, %v7761_v51  ;;  %v2488_v19 = vld [vmem:[#allocation12 + $0x390] sm:$0xff] }
 0xe63   :  { %6860 = vtanh.f32 %v7761_v51  ;;  %v2465_v51 = vld [vmem:[#allocation12 + $0x2d8] sm:$0xff] }
 0xe6f   :  { %v6859_v2 = vpop.eup %6858 }
 0xe70   :  { %v1906_v53 = vadd.f32 1.0, %v6859_v2  ;;  %v6861_v27 = vpop.eup %6860  ;;  %v2464_v2 = vld [vmem:[#allocation12 + $0x2d0] sm:$0xff] }
 0xe72   :  { %6862 = vrcp.f32 %v1906_v53  ;;  %v2457_v53 = vld [vmem:[#allocation12 + $0x298] sm:$0xff] }
 0xe73   :  { %6864 = vpow2.f32 %v6603_v52  ;;  %v2585_v52 = vld [vmem:[#allocation12 + $0x698] sm:$0xff] }
 0xe7f   :  { %v7764_v55 = vpop.eup %6862 }
 0xe80   :  { %v1917_v57 = vmul.f32 %v7764_v55, %v6861_v27  ;;  %v6865_v54 = vpop.eup %6864  ;;  %v1916_v12 = vmul.f32 %v7764_v55, %v7734_v21  ;;  %v7805_v21 = vld [vmem:[#allocation2 + $0x8] sm:$0xff]  ;;  %v2409_v27 = vld [vmem:[#allocation12 + $0x118] sm:$0xff] }
 0xe81   :  { %v1913_v8 = vadd.f32 1.0, %v6865_v54  ;;  %v2401_v55 = vld [vmem:[#allocation12 + $0xd8] sm:$0xff]  ;;  %v2584_v54 = vld [vmem:[#allocation12 + $0x690] sm:$0xff] }
 0xe82   :  { %1919 = vrot.lane.b32.xlu0 %v1917_v57, %s7128_s1  ;;  %v2393_v57 = vld [vmem:[#allocation12 + $0x98] sm:$0xff] }
 0xe83   :  { %6866 = vrcp.f32 %v1913_v8  ;;  %v2577_v8 = vld [vmem:[#allocation12 + $0x658] sm:$0xff] }
 0xe90   :  { %v6867_v20 = vpop.eup %6866 }
 0xef4   :  { %v1920_v16 = vpop.permute.xlu0 %1919 }
 0xef5   :  { %v7800_v7 = vadd.f32 %v1920_v16, %v1916_v12  ;;  %v2576_v12 = vld [vmem:[#allocation12 + $0x650] sm:$0xff]  ;;  %v2569_v16 = vld [vmem:[#allocation12 + $0x618] sm:$0xff] }
 0xef7   :  { %6868 = vtanh.f32 %v7800_v7 }
 0xf04   :  { %v6869_v24 = vpop.eup %6868 }
 0xf05   :  { %v1924_v26 = vmul.f32 %v6869_v24, %v6867_v20  ;;  %v2568_v20 = vld [vmem:[#allocation12 + $0x610] sm:$0xff]  ;;  %v2561_v24 = vld [vmem:[#allocation12 + $0x5d8] sm:$0xff] }
 0xf07   :  { %1961 = vrot.lane.b32.xlu1 %v1924_v26, %s7128_s1  ;;  %1925 = vst.msk [vmem:[#allocation2 + $0x18] sm:$0xff] %vm595_vm1, %v1924_v26  ;;  %v2560_v26 = vld [vmem:[#allocation12 + $0x5d0] sm:$0xff] }
 0xf0e   :  { %v2372_v28 = vld [vmem:[#allocation2 + $0x18] sm:$0xff] }
 0xf0f   :  { %3191 = vmatprep.mubr.f32.mxu1 %v2372_v28  ;;  %v2553_v28 = vld [vmem:[#allocation12 + $0x598] sm:$0xff] }
 0xf10   :  { %3192 = vmatmul.mubr.f32.vlgmr.msra.gmra.mxu1 %v2371_v11  ;;  %v2545_v11 = vld [vmem:[#allocation12 + $0x558] sm:$0xff] }
 0xf11   :  { %3270 = vmatpush1.msra.mxu1 %v2496_v30  ;;  %3333 = vmatprep.mubr.f32.mxu1 %v7805_v21  ;;  %v2552_v30 = vld [vmem:[#allocation12 + $0x590] sm:$0xff] }
 0xf12   :  { %3271 = vmatprep.subr.mxu1 %v2489_v15  ;;  %v2544_v15 = vld [vmem:[#allocation12 + $0x550] sm:$0xff] }
 0xf13   :  { %3272 = vmatpush1.msra.mxu1 %v2488_v19  ;;  %v2537_v19 = vld [vmem:[#allocation12 + $0x518] sm:$0xff] }
 0xf14   :  { %3273 = vmatprep.subr.mxu1 %v2481_v4  ;;  %v2536_v4 = vld [vmem:[#allocation12 + $0x510] sm:$0xff] }
 0xf15   :  { %3274 = vmatpush1.msra.mxu1 %v2480_v31  ;;  %v2529_v31 = vld [vmem:[#allocation12 + $0x4d8] sm:$0xff] }
 0xf16   :  { %3275 = vmatprep.subr.mxu1 %v2473_v32  ;;  %v2528_v32 = vld [vmem:[#allocation12 + $0x4d0] sm:$0xff] }
 0xf17   :  { %3276 = vmatpush1.msra.mxu1 %v2472_v33  ;;  %v2521_v33 = vld [vmem:[#allocation12 + $0x498] sm:$0xff] }
 0xf18   :  { %3277 = vmatprep.subr.mxu1 %v2465_v51  ;;  %v2520_v51 = vld [vmem:[#allocation12 + $0x490] sm:$0xff] }
 0xf19   :  { %3278 = vmatpush1.msra.mxu1 %v2464_v2  ;;  %v2513_v2 = vld [vmem:[#allocation12 + $0x458] sm:$0xff] }
 0xf1a   :  { %3279 = vmatprep.subr.mxu1 %v2457_v53  ;;  %v2512_v53 = vld [vmem:[#allocation12 + $0x450] sm:$0xff] }
 0xf1b   :  { %3280 = vmatpush1.msra.mxu1 %v2456_v5  ;;  %v2505_v5 = vld [vmem:[#allocation12 + $0x418] sm:$0xff] }
 0xf1c   :  { %3281 = vmatprep.subr.mxu1 %v2449_v9  ;;  %v2504_v9 = vld [vmem:[#allocation12 + $0x410] sm:$0xff] }
 0xf1d   :  { %3282 = vmatpush1.msra.mxu1 %v2448_v13  ;;  %v7808_v13 = vld [vmem:[#allocation2] sm:$0xff] }
 0xf1e   :  { %3283 = vmatprep.subr.mxu1 %v2441_v17 }
 0xf1f   :  { %3284 = vmatpush1.msra.mxu1 %v2440_v23  ;;  %v2110_v23 = vld [vmem:[#allocation10] sm:$0x3] }
 0xf20   :  { %3285 = vmatprep.subr.mxu1 %v2433_v6  ;;  %v2115_v6 = vrot.slane %v2110_v23, %v7371_v37 }
 0xf21   :  { %3286 = vmatpush1.msra.mxu1 %v2432_v10  ;;  %v2105_v10 = vpop.f32.mrf.mxu1 }
 0xf22   :  { %3287 = vmatprep.subr.mxu1 %v2425_v14 }
 0xf23   :  { %3288 = vmatpush1.msra.mxu1 %v2424_v18 }
 0xf24   :  { %3289 = vmatprep.subr.mxu1 %v2417_v22 }
 0xf25   :  { %3290 = vmatpush1.msra.mxu1 %v2416_v25  ;;  %v2107_v25 = vpop.f32.mrf.mxu1 }
 0xf26   :  { %3291 = vmatprep.subr.mxu1 %v2409_v27 }
 0xf27   :  { %3292 = vmatpush1.msra.mxu1 %v2408_v29 }
 0xf28   :  { %3293 = vmatprep.subr.mxu1 %v2401_v55 }
 0xf29   :  { %3294 = vmatpush1.msra.mxu1 %v2400_v56  ;;  %v2176_v56 = vld [vmem:[#allocation9 + $0x38] sm:$0xff] }
 0xf2a   :  { %3295 = vmatprep.subr.mxu1 %v2393_v57  ;;  %v2175_v57 = vld [vmem:[#allocation9 + $0x30] sm:$0xff] }
 0xf2b   :  { %3296 = vmatpush1.msra.mxu1 %v2392_v59  ;;  %v2174_v59 = vld [vmem:[#allocation9 + $0x28] sm:$0xff] }
 0xf2c   :  { %3297 = vmatprep.subr.mxu1 %v2385_v60  ;;  %v2173_v60 = vld [vmem:[#allocation9 + $0x20] sm:$0xff] }
 0xf2d   :  { %3298 = vmatpush1.msra.mxu1 %v2384_v61  ;;  %v2172_v61 = vld [vmem:[#allocation9 + $0x18] sm:$0xff] }
 0xf2e   :  { %3299 = vmatprep.subr.mxu1 %v2377_v0  ;;  %v2171_v0 = vld [vmem:[#allocation9 + $0x10] sm:$0xff] }
 0xf2f   :  { %3300 = vmatpush1.msra.mxu1 %v2376_v34  ;;  %v2170_v34 = vld [vmem:[#allocation9 + $0x8] sm:$0xff] }
 0xf30   :  { %3301 = vmatprep.subr.mxu1 %v2625_v58  ;;  %v2169_v58 = vld [vmem:[#allocation9] sm:$0xff] }
 0xf31   :  { %3302 = vmatpush2.msra.mxu1 %v2624_v35  ;;  %v2495_v35 = vld [vmem:[#allocation12 + $0x3c8] sm:$0xff] }
 0xf32   :  { %3303 = vmatprep.subr.mxu1 %v2617_v38 }
 0xf33   :  { %3304 = vmatpush2.msra.mxu1 %v2616_v62 }
 0xf34   :  { %3305 = vmatprep.subr.mxu1 %v2609_v3 }
 0xf35   :  { %3306 = vmatpush2.msra.mxu1 %v2608_v63 }
 0xf36   :  { %3307 = vmatprep.subr.mxu1 %v2601_v39 }
 0xf37   :  { %3308 = vmatpush2.msra.mxu1 %v2600_v40 }
 0xf38   :  { %3309 = vmatprep.subr.mxu1 %v2593_v41 }
 0xf39   :  { %3310 = vmatpush2.msra.mxu1 %v2592_v42 }
 0xf3a   :  { %3311 = vmatprep.subr.mxu1 %v2585_v52 }
 0xf3b   :  { %3312 = vmatpush2.msra.mxu1 %v2584_v54  ;;  %v2494_v54 = vld [vmem:[#allocation12 + $0x3c0] sm:$0xff] }
 0xf3c   :  { %3313 = vmatprep.subr.mxu1 %v2577_v8 }
 0xf3d   :  { %3314 = vmatpush2.msra.mxu1 %v2576_v12  ;;  %v2487_v12 = vld [vmem:[#allocation12 + $0x388] sm:$0xff] }
 0xf3e   :  { %3315 = vmatprep.subr.mxu1 %v2569_v16  ;;  %v2486_v16 = vld [vmem:[#allocation12 + $0x380] sm:$0xff] }
 0xf3f   :  { %3316 = vmatpush2.msra.mxu1 %v2568_v20  ;;  %v2478_v20 = vld [vmem:[#allocation12 + $0x340] sm:$0xff] }
 0xf40   :  { %3317 = vmatprep.subr.mxu1 %v2561_v24  ;;  %v2471_v24 = vld [vmem:[#allocation12 + $0x308] sm:$0xff] }
 0xf41   :  { %3318 = vmatpush2.msra.mxu1 %v2560_v26  ;;  %v2470_v26 = vld [vmem:[#allocation12 + $0x300] sm:$0xff] }
 0xf42   :  { %3319 = vmatprep.subr.mxu1 %v2553_v28  ;;  %v2463_v28 = vld [vmem:[#allocation12 + $0x2c8] sm:$0xff] }
 0xf43   :  { %3320 = vmatpush2.msra.mxu1 %v2552_v30  ;;  %v2462_v30 = vld [vmem:[#allocation12 + $0x2c0] sm:$0xff] }
 0xf44   :  { %3321 = vmatprep.subr.mxu1 %v2545_v11  ;;  %v2455_v11 = vld [vmem:[#allocation12 + $0x288] sm:$0xff] }
 0xf45   :  { %3322 = vmatpush2.msra.mxu1 %v2544_v15  ;;  %v2454_v15 = vld [vmem:[#allocation12 + $0x280] sm:$0xff] }
 0xf46   :  { %3323 = vmatprep.subr.mxu1 %v2537_v19  ;;  %v2447_v19 = vld [vmem:[#allocation12 + $0x248] sm:$0xff] }
 0xf47   :  { %3324 = vmatpush2.msra.mxu1 %v2536_v4  ;;  %v2446_v4 = vld [vmem:[#allocation12 + $0x240] sm:$0xff] }
 0xf48   :  { %3325 = vmatprep.subr.mxu1 %v2529_v31  ;;  %v2438_v31 = vld [vmem:[#allocation12 + $0x200] sm:$0xff] }
 0xf49   :  { %3326 = vmatpush2.msra.mxu1 %v2528_v32  ;;  %v2431_v32 = vld [vmem:[#allocation12 + $0x1c8] sm:$0xff] }
 0xf4a   :  { %3327 = vmatprep.subr.mxu1 %v2521_v33  ;;  %v2430_v33 = vld [vmem:[#allocation12 + $0x1c0] sm:$0xff] }
 0xf4b   :  { %3328 = vmatpush2.msra.mxu1 %v2520_v51  ;;  %v2423_v51 = vld [vmem:[#allocation12 + $0x188] sm:$0xff] }
 0xf4c   :  { %3329 = vmatprep.subr.mxu1 %v2513_v2  ;;  %v2422_v2 = vld [vmem:[#allocation12 + $0x180] sm:$0xff] }
 0xf4d   :  { %3330 = vmatpush2.msra.mxu1 %v2512_v53  ;;  %v2415_v53 = vld [vmem:[#allocation12 + $0x148] sm:$0xff] }
 0xf4e   :  { %3331 = vmatprep.subr.mxu1 %v2505_v5  ;;  %v2414_v5 = vld [vmem:[#allocation12 + $0x140] sm:$0xff] }
 0xf4f   :  { %3332 = vmatpush2.msra.mxu1 %v2504_v9  ;;  %v2407_v9 = vld [vmem:[#allocation12 + $0x108] sm:$0xff] }
 0xf50   :  { %3334 = vmatmul.mubr.f32.vlgmr.msra.gmra.mxu1 %v7808_v13 }
 0xf51   :  { %3475 = vmatprep.mubr.f32.mxu1 %v7131_v1 }
 0xf79   :  { %v1962_v17 = vpop.permute.xlu1 %1961 }
 0xf7a   :  { %6604 = vmatmul.mubr.msk.f32.vlgmr.msra.gmra.mxu0 %vm188_vm0, %v1962_v17  ;;  %v2406_v17 = vld [vmem:[#allocation12 + $0x100] sm:$0xff] }
 0xf7b   :  { %2204 = vmatpush1.msra.mxu0 %v7768_v43  ;;  %2251 = vmatprep.mubr.f32.mxu0 %v7131_v1 }
 0xf7c   :  { %2205 = vmatprep.subr.mxu0 %v7770_v44 }
 0xf7d   :  { %2206 = vmatpush1.msra.mxu0 %v7772_v46 }
 0xf7e   :  { %2207 = vmatprep.subr.mxu0 %v7775_v47  ;;  %v2119_v47 = vrot.slane %v2110_v23, %v7375_v45  ;;  %v2399_v23 = vld [vmem:[#allocation12 + $0xc8] sm:$0xff] }
 0xf7f   :  { %2208 = vmatpush1.msra.mxu0 %v7778_v48 }
 0xf80   :  { %2209 = vmatprep.subr.mxu0 %v7781_v49 }
 0xf81   :  { %2210 = vmatpush1.msra.mxu0 %v7784_v50 }
 0xf82   :  { %2211 = vmatprep.subr.mxu0 %v2176_v56  ;;  %v2590_v56 = vld [vmem:[#allocation12 + $0x6c0] sm:$0xff] }
 0xf83   :  { %2212 = vmatpush1.msra.mxu0 %v2175_v57  ;;  %v2583_v57 = vld [vmem:[#allocation12 + $0x688] sm:$0xff] }
 0xf84   :  { %2213 = vmatprep.subr.mxu0 %v2174_v59  ;;  %v2582_v59 = vld [vmem:[#allocation12 + $0x680] sm:$0xff] }
 0xf85   :  { %2214 = vmatpush1.msra.mxu0 %v2173_v60  ;;  %v2575_v60 = vld [vmem:[#allocation12 + $0x648] sm:$0xff] }
 0xf86   :  { %2215 = vmatprep.subr.mxu0 %v2172_v61  ;;  %v2574_v61 = vld [vmem:[#allocation12 + $0x640] sm:$0xff] }
 0xf87   :  { %2216 = vmatpush1.msra.mxu0 %v2171_v0  ;;  %v2567_v0 = vld [vmem:[#allocation12 + $0x608] sm:$0xff] }
 0xf88   :  { %2217 = vmatprep.subr.mxu0 %v2170_v34  ;;  %v2566_v34 = vld [vmem:[#allocation12 + $0x600] sm:$0xff] }
 0xf89   :  { %2218 = vmatpush1.msra.mxu0 %v2169_v58  ;;  %v2559_v58 = vld [vmem:[#allocation12 + $0x5c8] sm:$0xff] }
 0xf8a   :  { %3056 = vmatprep.subr.mxu0 %v2495_v35  ;;  %v2558_v35 = vld [vmem:[#allocation12 + $0x5c0] sm:$0xff] }
0x103a   :  { %v2031_v14 = vpop.f32.mrf.mxu0 }
0x103b   :  { %v2106_v43 = vadd.f32 %v2105_v10, %v2031_v14  ;;  %v2391_v10 = vld [vmem:[#allocation12 + $0x88] sm:$0xff]  ;;  %v2390_v14 = vld [vmem:[#allocation12 + $0x80] sm:$0xff] }
0x103c   :  { %v2033_v44 = vpop.f32.mrf.mxu0 }
0x103d   :  { %v2122_v18 = vadd.f32 %v2115_v6, %v2106_v43  ;;  %v2108_v46 = vadd.f32 %v2107_v25, %v2033_v44  ;;  %v2398_v6 = vld [vmem:[#allocation12 + $0xc0] sm:$0xff]  ;;  %v2383_v43 = vld [vmem:[#allocation12 + $0x48] sm:$0xff] }
0x103e   :  { %v2374_v44 = vld [vmem:[#allocation12] sm:$0xff]  ;;  %v2623_v25 = vld [vmem:[#allocation12 + $0x7c8] sm:$0xff] }
0x103f   :  { %v6606_v22 = vmul.f32 -1.442695, %v2122_v18  ;;  %v2123_v27 = vadd.f32 %v2119_v47, %v2108_v46  ;;  %v2382_v18 = vld [vmem:[#allocation12 + $0x40] sm:$0xff]  ;;  %v2615_v47 = vld [vmem:[#allocation12 + $0x788] sm:$0xff] }
0x1040   :  { %v2622_v46 = vld [vmem:[#allocation12 + $0x7c0] sm:$0xff] }
0x1041   :  { %6870 = vpow2.f32 %v6606_v22  ;;  %v6607_v38 = vmul.f32 -1.442695, %v2123_v27  ;;  %v2375_v22 = vld [vmem:[#allocation12 + $0x8] sm:$0xff] }
0x1042   :  { %6872 = vtanh.f32 %v2123_v27  ;;  %v2614_v27 = vld [vmem:[#allocation12 + $0x780] sm:$0xff] }
0x104e   :  { %v6871_v48 = vpop.eup %6870 }
0x104f   :  { %v2127_v29 = vadd.f32 1.0, %v6871_v48  ;;  %v6873_v49 = vpop.eup %6872  ;;  %v2607_v48 = vld [vmem:[#allocation12 + $0x748] sm:$0xff] }
0x1051   :  { %6874 = vrcp.f32 %v2127_v29  ;;  %v2606_v29 = vld [vmem:[#allocation12 + $0x740] sm:$0xff] }
0x1052   :  { %6876 = vpow2.f32 %v6607_v38  ;;  %v2551_v38 = vld [vmem:[#allocation12 + $0x588] sm:$0xff] }
0x105e   :  { %v6875_v50 = vpop.eup %6874 }
0x105f   :  { %v2138_v55 = vmul.f32 %v6875_v50, %v6873_v49  ;;  %v6877_v62 = vpop.eup %6876  ;;  %v2137_v63 = vmul.f32 %v6875_v50, %v7800_v7  ;;  %v2479_v7 = vld [vmem:[#allocation12 + $0x348] sm:$0xff]  ;;  %v2598_v50 = vld [vmem:[#allocation12 + $0x700] sm:$0xff] }
0x1060   :  { %v2134_v3 = vadd.f32 1.0, %v6877_v62  ;;  %v2599_v49 = vld [vmem:[#allocation12 + $0x708] sm:$0xff]  ;;  %v2550_v62 = vld [vmem:[#allocation12 + $0x580] sm:$0xff] }
0x1061   :  { %2140 = vrot.lane.b32.xlu0 %v2138_v55, %s7128_s1  ;;  %v2591_v55 = vld [vmem:[#allocation12 + $0x6c8] sm:$0xff] }
0x1062   :  { %6878 = vrcp.f32 %v2134_v3  ;;  %v2543_v3 = vld [vmem:[#allocation12 + $0x548] sm:$0xff] }
0x106f   :  { %v6879_v41 = vpop.eup %6878 }
0x10d3   :  { %v2141_v39 = vpop.permute.xlu0 %2140 }
0x10d4   :  { %v7825_v40 = vadd.f32 %v2141_v39, %v2137_v63  ;;  %v2542_v63 = vld [vmem:[#allocation12 + $0x540] sm:$0xff]  ;;  %v2535_v39 = vld [vmem:[#allocation12 + $0x508] sm:$0xff] }
0x10d6   :  { %6880 = vtanh.f32 %v7825_v40 }
0x10e3   :  { %v6881_v42 = vpop.eup %6880 }
0x10e4   :  { %v2145_v52 = vmul.f32 %v6881_v42, %v6879_v41  ;;  %v2534_v41 = vld [vmem:[#allocation12 + $0x500] sm:$0xff]  ;;  %v2527_v42 = vld [vmem:[#allocation12 + $0x4c8] sm:$0xff] }
0x10e6   :  { %2147 = vrot.lane.b32.xlu1 %v2145_v52, %s7128_s1  ;;  %v2526_v52 = vld [vmem:[#allocation12 + $0x4c0] sm:$0xff] }
0x1158   :  { %v2148_v8 = vpop.permute.xlu1 %2147 }
0x1159   :  { %2150 = vst.msk [vmem:[#allocation2 + $0x20] sm:$0xff] %vm188_vm0, %v2148_v8  ;;  %6608 = vmatmul.mubr.msk.f32.vlgmr.msra.gmra.mxu0 %vm188_vm0, %v2148_v8  ;;  %v2518_v8 = vld [vmem:[#allocation12 + $0x480] sm:$0xff] }
0x115a   :  { %3057 = vmatpush1.msra.mxu0 %v2494_v54  ;;  %3120 = vmatprep.mubr.f32.mxu0 %v7805_v21  ;;  %v2439_v21 = vld [vmem:[#allocation12 + $0x208] sm:$0xff] }
0x115b   :  { %3058 = vmatprep.subr.mxu0 %v2487_v12  ;;  %v2519_v54 = vld [vmem:[#allocation12 + $0x488] sm:$0xff] }
0x115c   :  { %3059 = vmatpush1.msra.mxu0 %v2486_v16  ;;  %v2511_v12 = vld [vmem:[#allocation12 + $0x448] sm:$0xff]  ;;  %v2510_v16 = vld [vmem:[#allocation12 + $0x440] sm:$0xff] }
0x115d   :  { %3060 = vmatprep.subr.mxu0 %v2479_v7  ;;  %v2503_v7 = vld [vmem:[#allocation12 + $0x408] sm:$0xff] }
0x115e   :  { %3061 = vmatpush1.msra.mxu0 %v2478_v20  ;;  %v2502_v20 = vld [vmem:[#allocation12 + $0x400] sm:$0xff] }
0x115f   :  { %3062 = vmatprep.subr.mxu0 %v2471_v24  ;;  %v3007_v24 = vld [vmem:[#allocation12 + $0x13c8] sm:$0xff] }
0x1160   :  { %3063 = vmatpush1.msra.mxu0 %v2470_v26  ;;  %v3009_v26 = vld [vmem:[#allocation12 + $0x13d8] sm:$0xff] }
0x1161   :  { %3064 = vmatprep.subr.mxu0 %v2463_v28  ;;  %v3006_v28 = vld [vmem:[#allocation12 + $0x13c0] sm:$0xff]  ;;  %3411 = vmatprep.subr.mxu1 %v3009_v26  ;;  %v2928_v26 = vld [vmem:[#allocation12 + $0x1150] sm:$0xff] }
0x1162   :  { %3065 = vmatpush1.msra.mxu0 %v2462_v30  ;;  %v3008_v30 = vld [vmem:[#allocation12 + $0x13d0] sm:$0xff] }
0x1163   :  { %3066 = vmatprep.subr.mxu0 %v2455_v11  ;;  %v2999_v11 = vld [vmem:[#allocation12 + $0x1388] sm:$0xff]  ;;  %3412 = vmatpush1.msra.mxu1 %v3008_v30  ;;  %v2921_v30 = vld [vmem:[#allocation12 + $0x1118] sm:$0xff] }
0x1164   :  { %3067 = vmatpush1.msra.mxu0 %v2454_v15  ;;  %v3001_v15 = vld [vmem:[#allocation12 + $0x1398] sm:$0xff] }
0x1165   :  { %3068 = vmatprep.subr.mxu0 %v2447_v19  ;;  %v2998_v19 = vld [vmem:[#allocation12 + $0x1380] sm:$0xff]  ;;  %3413 = vmatprep.subr.mxu1 %v3001_v15  ;;  %v2920_v15 = vld [vmem:[#allocation12 + $0x1110] sm:$0xff] }
0x1166   :  { %3069 = vmatpush1.msra.mxu0 %v2446_v4  ;;  %v3000_v4 = vld [vmem:[#allocation12 + $0x1390] sm:$0xff] }
0x1167   :  { %3070 = vmatprep.subr.mxu0 %v2439_v21  ;;  %v2991_v21 = vld [vmem:[#allocation12 + $0x1348] sm:$0xff]  ;;  %3414 = vmatpush1.msra.mxu1 %v3000_v4  ;;  %v2913_v4 = vld [vmem:[#allocation12 + $0x10d8] sm:$0xff] }
0x1168   :  { %3071 = vmatpush1.msra.mxu0 %v2438_v31  ;;  %v2993_v31 = vld [vmem:[#allocation12 + $0x1358] sm:$0xff] }
0x1169   :  { %3072 = vmatprep.subr.mxu0 %v2431_v32  ;;  %v2990_v32 = vld [vmem:[#allocation12 + $0x1340] sm:$0xff]  ;;  %3415 = vmatprep.subr.mxu1 %v2993_v31  ;;  %v2912_v31 = vld [vmem:[#allocation12 + $0x10d0] sm:$0xff] }
0x116a   :  { %3073 = vmatpush1.msra.mxu0 %v2430_v33  ;;  %v2332_v33 = vld [vmem:[#allocation10] sm:$0x3] }
0x116b   :  { %3074 = vmatprep.subr.mxu0 %v2423_v51  ;;  %v2337_v51 = vrot.slane %v2332_v33, %v7371_v37 }
0x116c   :  { %3075 = vmatpush1.msra.mxu0 %v2422_v2  ;;  %v2327_v2 = vpop.f32.mrf.mxu1 }
0x116d   :  { %3076 = vmatprep.subr.mxu0 %v2415_v53 }
0x116e   :  { %3077 = vmatpush1.msra.mxu0 %v2414_v5 }
0x116f   :  { %3078 = vmatprep.subr.mxu0 %v2407_v9 }
0x1170   :  { %3079 = vmatpush1.msra.mxu0 %v2406_v17 }
0x1171   :  { %3080 = vmatprep.subr.mxu0 %v2399_v23 }
0x1172   :  { %3081 = vmatpush1.msra.mxu0 %v2398_v6  ;;  %v2329_v6 = vpop.f32.mrf.mxu1 }
0x1173   :  { %3082 = vmatprep.subr.mxu0 %v2391_v10 }
0x1174   :  { %3083 = vmatpush1.msra.mxu0 %v2390_v14  ;;  %v2341_v14 = vrot.slane %v2332_v33, %v7375_v45  ;;  %v2902_v33 = vld [vmem:[#allocation12 + $0x1080] sm:$0xff] }
0x1175   :  { %3084 = vmatprep.subr.mxu0 %v2383_v43 }
0x1176   :  { %3085 = vmatpush1.msra.mxu0 %v2382_v18 }
0x1177   :  { %3086 = vmatprep.subr.mxu0 %v2375_v22 }
0x1178   :  { %3087 = vmatpush1.msra.mxu0 %v2374_v44  ;;  %v2983_v44 = vld [vmem:[#allocation12 + $0x1308] sm:$0xff] }
0x1179   :  { %3088 = vmatprep.subr.mxu0 %v2623_v25  ;;  %v2985_v25 = vld [vmem:[#allocation12 + $0x1318] sm:$0xff] }
0x117a   :  { %3089 = vmatpush2.msra.mxu0 %v2622_v46  ;;  %v2982_v46 = vld [vmem:[#allocation12 + $0x1300] sm:$0xff] }
0x117b   :  { %3090 = vmatprep.subr.mxu0 %v2615_v47  ;;  %v2984_v47 = vld [vmem:[#allocation12 + $0x1310] sm:$0xff] }
0x117c   :  { %3091 = vmatpush2.msra.mxu0 %v2614_v27  ;;  %v2975_v27 = vld [vmem:[#allocation12 + $0x12c8] sm:$0xff] }
0x117d   :  { %3092 = vmatprep.subr.mxu0 %v2607_v48  ;;  %v2977_v48 = vld [vmem:[#allocation12 + $0x12d8] sm:$0xff] }
0x117e   :  { %3093 = vmatpush2.msra.mxu0 %v2606_v29  ;;  %v2974_v29 = vld [vmem:[#allocation12 + $0x12c0] sm:$0xff] }
0x117f   :  { %3094 = vmatprep.subr.mxu0 %v2599_v49  ;;  %v2976_v49 = vld [vmem:[#allocation12 + $0x12d0] sm:$0xff] }
0x1180   :  { %3095 = vmatpush2.msra.mxu0 %v2598_v50  ;;  %v2967_v50 = vld [vmem:[#allocation12 + $0x1288] sm:$0xff] }
0x1181   :  { %3096 = vmatprep.subr.mxu0 %v2591_v55  ;;  %v2969_v55 = vld [vmem:[#allocation12 + $0x1298] sm:$0xff] }
0x1182   :  { %3097 = vmatpush2.msra.mxu0 %v2590_v56  ;;  %v2966_v56 = vld [vmem:[#allocation12 + $0x1280] sm:$0xff] }
0x1183   :  { %3098 = vmatprep.subr.mxu0 %v2583_v57  ;;  %v2968_v57 = vld [vmem:[#allocation12 + $0x1290] sm:$0xff] }
0x1184   :  { %3099 = vmatpush2.msra.mxu0 %v2582_v59  ;;  %v2959_v59 = vld [vmem:[#allocation12 + $0x1248] sm:$0xff] }
0x1185   :  { %3100 = vmatprep.subr.mxu0 %v2575_v60  ;;  %v2961_v60 = vld [vmem:[#allocation12 + $0x1258] sm:$0xff] }
0x1186   :  { %3101 = vmatpush2.msra.mxu0 %v2574_v61  ;;  %v2958_v61 = vld [vmem:[#allocation12 + $0x1240] sm:$0xff] }
0x1187   :  { %3102 = vmatprep.subr.mxu0 %v2567_v0  ;;  %v2960_v0 = vld [vmem:[#allocation12 + $0x1250] sm:$0xff] }
0x1188   :  { %3103 = vmatpush2.msra.mxu0 %v2566_v34  ;;  %v2951_v34 = vld [vmem:[#allocation12 + $0x1208] sm:$0xff] }
0x1189   :  { %3104 = vmatprep.subr.mxu0 %v2559_v58  ;;  %v2953_v58 = vld [vmem:[#allocation12 + $0x1218] sm:$0xff] }
0x118a   :  { %3105 = vmatpush2.msra.mxu0 %v2558_v35  ;;  %v2950_v35 = vld [vmem:[#allocation12 + $0x1200] sm:$0xff] }
0x118b   :  { %3106 = vmatprep.subr.mxu0 %v2551_v38  ;;  %v2952_v38 = vld [vmem:[#allocation12 + $0x1210] sm:$0xff] }
0x118c   :  { %3107 = vmatpush2.msra.mxu0 %v2550_v62 }
0x118d   :  { %3108 = vmatprep.subr.mxu0 %v2543_v3  ;;  %v2943_v3 = vld [vmem:[#allocation12 + $0x11c8] sm:$0xff] }
0x118e   :  { %3109 = vmatpush2.msra.mxu0 %v2542_v63  ;;  %v2945_v63 = vld [vmem:[#allocation12 + $0x11d8] sm:$0xff] }
0x118f   :  { %3110 = vmatprep.subr.mxu0 %v2535_v39 }
0x1190   :  { %3111 = vmatpush2.msra.mxu0 %v2534_v41  ;;  %v2942_v41 = vld [vmem:[#allocation12 + $0x11c0] sm:$0xff] }
0x1191   :  { %3112 = vmatprep.subr.mxu0 %v2527_v42  ;;  %v2944_v42 = vld [vmem:[#allocation12 + $0x11d0] sm:$0xff] }
0x1192   :  { %3113 = vmatpush2.msra.mxu0 %v2526_v52 }
0x1193   :  { %3114 = vmatprep.subr.mxu0 %v2519_v54  ;;  %v2935_v54 = vld [vmem:[#allocation12 + $0x1188] sm:$0xff] }
0x1194   :  { %3115 = vmatpush2.msra.mxu0 %v2518_v8  ;;  %v2937_v8 = vld [vmem:[#allocation12 + $0x1198] sm:$0xff] }
0x1195   :  { %3116 = vmatprep.subr.mxu0 %v2511_v12  ;;  %v2934_v12 = vld [vmem:[#allocation12 + $0x1180] sm:$0xff] }
0x1196   :  { %3117 = vmatpush2.msra.mxu0 %v2510_v16  ;;  %v2936_v16 = vld [vmem:[#allocation12 + $0x1190] sm:$0xff] }
0x1197   :  { %3118 = vmatprep.subr.mxu0 %v2503_v7  ;;  %v2927_v7 = vld [vmem:[#allocation12 + $0x1148] sm:$0xff] }
0x1198   :  { %3119 = vmatpush2.msra.mxu0 %v2502_v20  ;;  %v2929_v20 = vld [vmem:[#allocation12 + $0x1158] sm:$0xff] }
0x1199   :  { %3121 = vmatmul.mubr.f32.vlgmr.msra.gmra.mxu0 %v7808_v13  ;;  %3198 = vmatprep.subr.mxu0 %v3007_v24  ;;  %v2992_v13 = vld [vmem:[#allocation12 + $0x1350] sm:$0xff]  ;;  %v2926_v24 = vld [vmem:[#allocation12 + $0x1140] sm:$0xff] }
0x119a   :  { %3262 = vmatprep.mubr.f32.mxu0 %v7131_v1  ;;  %3199 = vmatpush1.msra.mxu0 %v3006_v28  ;;  %v2919_v28 = vld [vmem:[#allocation12 + $0x1108] sm:$0xff] }
0x119b   :  { %3200 = vmatprep.subr.mxu0 %v2999_v11  ;;  %3416 = vmatpush1.msra.mxu1 %v2992_v13  ;;  %v2918_v11 = vld [vmem:[#allocation12 + $0x1100] sm:$0xff]  ;;  %v2905_v13 = vld [vmem:[#allocation12 + $0x1098] sm:$0xff] }
0x119c   :  { %3201 = vmatpush1.msra.mxu0 %v2998_v19  ;;  %3417 = vmatprep.subr.mxu1 %v2985_v25  ;;  %v2911_v19 = vld [vmem:[#allocation12 + $0x10c8] sm:$0xff] }
0x119d   :  { %3202 = vmatprep.subr.mxu0 %v2991_v21  ;;  %3418 = vmatpush1.msra.mxu1 %v2984_v47  ;;  %v2910_v21 = vld [vmem:[#allocation12 + $0x10c0] sm:$0xff]  ;;  %v3193_v47 = vpop.f32.mrf.mxu1 }
0x119e   :  { %3203 = vmatpush1.msra.mxu0 %v2990_v32  ;;  %3419 = vmatprep.subr.mxu1 %v2977_v48  ;;  %v2903_v32 = vld [vmem:[#allocation12 + $0x1088] sm:$0xff] }
0x119f   :  { %3204 = vmatprep.subr.mxu0 %v2983_v44  ;;  %3420 = vmatpush1.msra.mxu1 %v2976_v49 }
0x11a0   :  { %3205 = vmatpush1.msra.mxu0 %v2982_v46  ;;  %3421 = vmatprep.subr.mxu1 %v2969_v55 }
0x11a1   :  { %3206 = vmatprep.subr.mxu0 %v2975_v27  ;;  %3422 = vmatpush1.msra.mxu1 %v2968_v57 }
0x11a2   :  { %3207 = vmatpush1.msra.mxu0 %v2974_v29  ;;  %3423 = vmatprep.subr.mxu1 %v2961_v60 }
0x11a3   :  { %3208 = vmatprep.subr.mxu0 %v2967_v50  ;;  %3424 = vmatpush1.msra.mxu1 %v2960_v0  ;;  %v2754_v0 = vld [vmem:[#allocation12 + $0xbe0] sm:$0xff] }
0x11a4   :  { %3209 = vmatpush1.msra.mxu0 %v2966_v56  ;;  %3425 = vmatprep.subr.mxu1 %v2953_v58  ;;  %v2745_v58 = vld [vmem:[#allocation12 + $0xb98] sm:$0xff] }
0x11a5   :  { %3210 = vmatprep.subr.mxu0 %v2959_v59  ;;  %3426 = vmatpush1.msra.mxu1 %v2952_v38  ;;  %v6894_v38 = vld [vmem:[#allocation2 + $0x18] sm:$0xff] }
0x11a6   :  { %3211 = vmatpush1.msra.mxu0 %v2958_v61  ;;  %3427 = vmatprep.subr.mxu1 %v2945_v63  ;;  %v2752_v61 = vld [vmem:[#allocation12 + $0xbd0] sm:$0xff] }
0x11a7   :  { %3212 = vmatprep.subr.mxu0 %v2951_v34  ;;  %3428 = vmatpush1.msra.mxu1 %v2944_v42  ;;  %v2736_v63 = vld [vmem:[#allocation12 + $0xb50] sm:$0xff]  ;;  %v2731_v42 = vld [vmem:[#allocation12 + $0xb28] sm:$0xff] }
0x11a8   :  { %3213 = vmatpush1.msra.mxu0 %v2950_v35  ;;  %3429 = vmatprep.subr.mxu1 %v2937_v8  ;;  %v2744_v35 = vld [vmem:[#allocation12 + $0xb90] sm:$0xff]  ;;  %v2721_v8 = vld [vmem:[#allocation12 + $0xad8] sm:$0xff] }
0x11a9   :  { %3214 = vmatprep.subr.mxu0 %v2943_v3  ;;  %3430 = vmatpush1.msra.mxu1 %v2936_v16  ;;  %v2739_v3 = vld [vmem:[#allocation12 + $0xb68] sm:$0xff]  ;;  %v2720_v16 = vld [vmem:[#allocation12 + $0xad0] sm:$0xff] }
0x11aa   :  { %3215 = vmatpush1.msra.mxu0 %v2942_v41  ;;  %3431 = vmatprep.subr.mxu1 %v2929_v20  ;;  %v2729_v41 = vld [vmem:[#allocation12 + $0xb18] sm:$0xff] }
0x11ab   :  { %3216 = vmatprep.subr.mxu0 %v2935_v54  ;;  %3432 = vmatpush1.msra.mxu1 %v2928_v26  ;;  %v2730_v54 = vld [vmem:[#allocation12 + $0xb20] sm:$0xff]  ;;  %v2713_v20 = vld [vmem:[#allocation12 + $0xa98] sm:$0xff]  ;;  %v2712_v26 = vld [vmem:[#allocation12 + $0xa90] sm:$0xff] }
0x11ac   :  { %3217 = vmatpush1.msra.mxu0 %v2934_v12  ;;  %3433 = vmatprep.subr.mxu1 %v2921_v30  ;;  %v2723_v12 = vld [vmem:[#allocation12 + $0xae8] sm:$0xff]  ;;  %v2705_v30 = vld [vmem:[#allocation12 + $0xa58] sm:$0xff] }
0x11ad   :  { %3218 = vmatprep.subr.mxu0 %v2927_v7  ;;  %3434 = vmatpush1.msra.mxu1 %v2920_v15  ;;  %v2722_v7 = vld [vmem:[#allocation12 + $0xae0] sm:$0xff]  ;;  %v2704_v15 = vld [vmem:[#allocation12 + $0xa50] sm:$0xff] }
0x11ae   :  { %3219 = vmatpush1.msra.mxu0 %v2926_v24  ;;  %3435 = vmatprep.subr.mxu1 %v2913_v4  ;;  %v2715_v24 = vld [vmem:[#allocation12 + $0xaa8] sm:$0xff]  ;;  %v2697_v4 = vld [vmem:[#allocation12 + $0xa18] sm:$0xff] }
0x11af   :  { %3220 = vmatprep.subr.mxu0 %v2919_v28  ;;  %3436 = vmatpush1.msra.mxu1 %v2912_v31  ;;  %v2714_v28 = vld [vmem:[#allocation12 + $0xaa0] sm:$0xff]  ;;  %v2696_v31 = vld [vmem:[#allocation12 + $0xa10] sm:$0xff] }
0x11b0   :  { %3221 = vmatpush1.msra.mxu0 %v2918_v11  ;;  %3437 = vmatprep.subr.mxu1 %v2905_v13  ;;  %v2707_v11 = vld [vmem:[#allocation12 + $0xa68] sm:$0xff]  ;;  %v2689_v13 = vld [vmem:[#allocation12 + $0x9d8] sm:$0xff] }
0x11b1   :  { %3222 = vmatprep.subr.mxu0 %v2911_v19  ;;  %v2706_v19 = vld [vmem:[#allocation12 + $0xa60] sm:$0xff] }
0x11b2   :  { %3223 = vmatpush1.msra.mxu0 %v2910_v21  ;;  %v2699_v21 = vld [vmem:[#allocation12 + $0xa28] sm:$0xff] }
0x11b3   :  { %3224 = vmatprep.subr.mxu0 %v2903_v32  ;;  %v2698_v32 = vld [vmem:[#allocation12 + $0xa20] sm:$0xff] }
0x11b4   :  { %3225 = vmatpush1.msra.mxu0 %v2902_v33  ;;  %v2691_v33 = vld [vmem:[#allocation12 + $0x9e8] sm:$0xff] }
0x1219   :  { %v2253_v53 = vpop.f32.mrf.mxu0 }
0x121a   :  { %v2328_v5 = vadd.f32 %v2327_v2, %v2253_v53  ;;  %v2895_v2 = vld [vmem:[#allocation12 + $0x1048] sm:$0xff]  ;;  %v2897_v53 = vld [vmem:[#allocation12 + $0x1058] sm:$0xff] }
0x121b   :  { %v2255_v23 = vpop.f32.mrf.mxu0  ;;  %3226 = vmatprep.subr.mxu0 %v2895_v2  ;;  %v2690_v2 = vld [vmem:[#allocation12 + $0x9e0] sm:$0xff] }
0x121c   :  { %v2344_v9 = vadd.f32 %v2337_v51, %v2328_v5  ;;  %v2330_v10 = vadd.f32 %v2329_v6, %v2255_v23  ;;  %v2904_v51 = vld [vmem:[#allocation12 + $0x1090] sm:$0xff]  ;;  %v2894_v5 = vld [vmem:[#allocation12 + $0x1040] sm:$0xff]  ;;  %v2889_v23 = vld [vmem:[#allocation12 + $0x1018] sm:$0xff] }
0x121d   :  { %3438 = vmatpush1.msra.mxu1 %v2904_v51  ;;  %v2886_v6 = vld [vmem:[#allocation12 + $0x1000] sm:$0xff]  ;;  %3227 = vmatpush1.msra.mxu0 %v2894_v5  ;;  %v2688_v51 = vld [vmem:[#allocation12 + $0x9d0] sm:$0xff]  ;;  %v2683_v5 = vld [vmem:[#allocation12 + $0x9a8] sm:$0xff] }
0x121e   :  { %v6610_v17 = vmul.f32 -1.442695, %v2344_v9  ;;  %v7836_v43 = vadd.f32 %v2341_v14, %v2330_v10  ;;  %v2896_v9 = vld [vmem:[#allocation12 + $0x1050] sm:$0xff]  ;;  %3439 = vmatprep.subr.mxu1 %v2897_v53  ;;  %v2753_v14 = vld [vmem:[#allocation12 + $0xbd8] sm:$0xff] }
0x121f   :  { %v2888_v10 = vld [vmem:[#allocation12 + $0x1010] sm:$0xff]  ;;  %3440 = vmatpush1.msra.mxu1 %v2896_v9  ;;  %v2681_v53 = vld [vmem:[#allocation12 + $0x998] sm:$0xff] }
0x1220   :  { %6882 = vpow2.f32 %v6610_v17  ;;  %v2887_v17 = vld [vmem:[#allocation12 + $0x1008] sm:$0xff]  ;;  %3441 = vmatprep.subr.mxu1 %v2889_v23  ;;  %v6611_v48 = vmul.f32 -1.442695, %v7836_v43  ;;  %v2680_v9 = vld [vmem:[#allocation12 + $0x990] sm:$0xff]  ;;  %v2673_v23 = vld [vmem:[#allocation12 + $0x958] sm:$0xff] }
0x1221   :  { %6884 = vtanh.f32 %v7836_v43  ;;  %3228 = vmatprep.subr.mxu0 %v2887_v17  ;;  %3442 = vmatpush1.msra.mxu1 %v2888_v10  ;;  %v2747_v43 = vld [vmem:[#allocation12 + $0xba8] sm:$0xff]  ;;  %v2682_v17 = vld [vmem:[#allocation12 + $0x9a0] sm:$0xff]  ;;  %v2672_v10 = vld [vmem:[#allocation12 + $0x950] sm:$0xff] }
0x1222   :  { %3229 = vmatpush1.msra.mxu0 %v2886_v6  ;;  %v2675_v6 = vld [vmem:[#allocation12 + $0x968] sm:$0xff] }
0x1223   :  { %3340 = vmatprep.subr.mxu0 %v2753_v14  ;;  %v2674_v14 = vld [vmem:[#allocation12 + $0x960] sm:$0xff] }
0x122d   :  { %v6883_v18 = vpop.eup %6882 }
0x122e   :  { %v2349_v22 = vadd.f32 1.0, %v6883_v18  ;;  %v6885_v62 = vpop.eup %6884  ;;  %v2755_v18 = vld [vmem:[#allocation12 + $0xbe8] sm:$0xff] }
0x122f   :  { %3553 = vmatprep.subr.mxu1 %v2755_v18  ;;  %v2665_v18 = vld [vmem:[#allocation12 + $0x918] sm:$0xff] }
0x1230   :  { %6886 = vrcp.f32 %v2349_v22  ;;  %v3014_v22 = vld [vmem:[#allocation13] sm:$0xff] }
0x1231   :  { %v3019_v44 = vrot.slane %v3014_v22, %v7371_v37  ;;  %6888 = vpow2.f32 %v6611_v48  ;;  %v2667_v22 = vld [vmem:[#allocation12 + $0x928] sm:$0xff]  ;;  %v2656_v48 = vld [vmem:[#allocation12 + $0x8d0] sm:$0xff] }
0x123d   :  { %v7839_v39 = vpop.eup %6886 }
0x123e   :  { %v2360_v52 = vmul.f32 %v7839_v39, %v6885_v62  ;;  %v6889_v29 = vpop.eup %6888  ;;  %v2359_v50 = vmul.f32 %v7839_v39, %v7825_v40  ;;  %v2746_v40 = vld [vmem:[#allocation12 + $0xba0] sm:$0xff]  ;;  %v2737_v62 = vld [vmem:[#allocation12 + $0xb58] sm:$0xff] }
0x123f   :  { %v2356_v49 = vadd.f32 1.0, %v6889_v29  ;;  %v2738_v39 = vld [vmem:[#allocation12 + $0xb60] sm:$0xff] }
0x1240   :  { %2362 = vrot.lane.b32.xlu0 %v2360_v52, %s7128_s1  ;;  %v2728_v52 = vld [vmem:[#allocation12 + $0xb10] sm:$0xff]  ;;  %v2658_v29 = vld [vmem:[#allocation12 + $0x8e0] sm:$0xff] }
0x1241   :  { %6890 = vrcp.f32 %v2356_v49  ;;  %v2649_v49 = vld [vmem:[#allocation12 + $0x898] sm:$0xff] }
0x124e   :  { %v6891_v57 = vpop.eup %6890 }
0x1259   :  { %v3122_v25 = vpop.f32.mrf.mxu0 }
0x125a   :  { %v3123_v46 = vadd.f32 %v3122_v25, %v3019_v44  ;;  %v2664_v44 = vld [vmem:[#allocation12 + $0x910] sm:$0xff]  ;;  %v2666_v25 = vld [vmem:[#allocation12 + $0x920] sm:$0xff] }
0x125c   :  { %v7844_v27 = vadd.f32 %v3193_v47, %v3123_v46  ;;  %v2657_v46 = vld [vmem:[#allocation12 + $0x8d8] sm:$0xff]  ;;  %v2659_v47 = vld [vmem:[#allocation12 + $0x8e8] sm:$0xff] }
0x12b2   :  { %v2363_v55 = vpop.permute.xlu0 %2362 }
0x12b3   :  { %v2365_v56 = vadd.f32 %v2363_v55, %v2359_v50  ;;  %v2651_v50 = vld [vmem:[#allocation12 + $0x8a8] sm:$0xff]  ;;  %v2648_v55 = vld [vmem:[#allocation12 + $0x890] sm:$0xff] }
0x12b5   :  { %6892 = vtanh.f32 %v2365_v56  ;;  %v2650_v56 = vld [vmem:[#allocation12 + $0x8a0] sm:$0xff] }
0x12c2   :  { %v6893_v59 = vpop.eup %6892 }
0x12c3   :  { %v2367_v60 = vmul.f32 %v6893_v59, %v6891_v57  ;;  %v2641_v57 = vld [vmem:[#allocation12 + $0x858] sm:$0xff]  ;;  %v2643_v59 = vld [vmem:[#allocation12 + $0x868] sm:$0xff] }
0x12c5   :  { %2368 = vst.msk [vmem:[#allocation2 + $0x20] sm:$0xff] %vm595_vm1, %v2367_v60  ;;  %v2640_v60 = vld [vmem:[#allocation12 + $0x850] sm:$0xff] }
0x12cc   :  { %v2373_v34 = vld [vmem:[#allocation2 + $0x20] sm:$0xff] }
0x12cd   :  { %3263 = vmatmul.mubr.f32.vlgmr.msra.gmra.mxu0 %v2373_v34  ;;  %3476 = vmatmul.mubr.f32.vlgmr.msra.gmra.mxu1 %v2373_v34  ;;  %v2635_v34 = vld [vmem:[#allocation12 + $0x828] sm:$0xff] }
0x12ce   :  { %3341 = vmatpush1.msra.mxu0 %v2752_v61  ;;  %3554 = vmatpush1.msra.mxu1 %v2754_v0  ;;  %v2642_v61 = vld [vmem:[#allocation12 + $0x860] sm:$0xff]  ;;  %v2633_v0 = vld [vmem:[#allocation12 + $0x818] sm:$0xff] }
0x12cf   :  { %3342 = vmatprep.subr.mxu0 %v2745_v58  ;;  %3404 = vmatprep.mubr.f32.mxu0 %v6894_v38  ;;  %v2632_v58 = vld [vmem:[#allocation12 + $0x810] sm:$0xff] }
0x12d0   :  { %3555 = vmatprep.subr.mxu1 %v2747_v43  ;;  %3617 = vmatprep.mubr.f32.mxu1 %v6894_v38  ;;  %v2634_v43 = vld [vmem:[#allocation12 + $0x820] sm:$0xff]  ;;  %v2880_v38 = vld [vmem:[#allocation12 + $0xfd0] sm:$0xff] }
0x12d1   :  { %3343 = vmatpush1.msra.mxu0 %v2744_v35  ;;  %3556 = vmatpush1.msra.mxu1 %v2746_v40  ;;  %v2881_v35 = vld [vmem:[#allocation12 + $0xfd8] sm:$0xff]  ;;  %v2883_v40 = vld [vmem:[#allocation12 + $0xfe8] sm:$0xff] }
0x12d2   :  { %3344 = vmatprep.subr.mxu0 %v2737_v62  ;;  %3557 = vmatprep.subr.mxu1 %v2739_v3  ;;  %v2882_v62 = vld [vmem:[#allocation12 + $0xfe0] sm:$0xff]  ;;  %v2873_v3 = vld [vmem:[#allocation12 + $0xf98] sm:$0xff] }
0x12d3   :  { %3345 = vmatpush1.msra.mxu0 %v2736_v63  ;;  %3558 = vmatpush1.msra.mxu1 %v2738_v39  ;;  %v2875_v63 = vld [vmem:[#allocation12 + $0xfa8] sm:$0xff]  ;;  %v2872_v39 = vld [vmem:[#allocation12 + $0xf90] sm:$0xff] }
0x12d4   :  { %3346 = vmatprep.subr.mxu0 %v2729_v41  ;;  %3559 = vmatprep.subr.mxu1 %v2731_v42  ;;  %v2874_v41 = vld [vmem:[#allocation12 + $0xfa0] sm:$0xff]  ;;  %v2865_v42 = vld [vmem:[#allocation12 + $0xf58] sm:$0xff] }
0x12d5   :  { %3347 = vmatpush1.msra.mxu0 %v2728_v52  ;;  %3560 = vmatpush1.msra.mxu1 %v2730_v54  ;;  %v2867_v52 = vld [vmem:[#allocation12 + $0xf68] sm:$0xff]  ;;  %v2864_v54 = vld [vmem:[#allocation12 + $0xf50] sm:$0xff] }
0x12d6   :  { %3348 = vmatprep.subr.mxu0 %v2721_v8  ;;  %3561 = vmatprep.subr.mxu1 %v2723_v12  ;;  %v2866_v8 = vld [vmem:[#allocation12 + $0xf60] sm:$0xff]  ;;  %v2857_v12 = vld [vmem:[#allocation12 + $0xf18] sm:$0xff] }
0x12d7   :  { %3349 = vmatpush1.msra.mxu0 %v2720_v16  ;;  %3562 = vmatpush1.msra.mxu1 %v2722_v7  ;;  %v2859_v16 = vld [vmem:[#allocation12 + $0xf28] sm:$0xff]  ;;  %v2856_v7 = vld [vmem:[#allocation12 + $0xf10] sm:$0xff] }
0x12d8   :  { %3350 = vmatprep.subr.mxu0 %v2713_v20  ;;  %3563 = vmatprep.subr.mxu1 %v2715_v24  ;;  %v2858_v20 = vld [vmem:[#allocation12 + $0xf20] sm:$0xff]  ;;  %v2849_v24 = vld [vmem:[#allocation12 + $0xed8] sm:$0xff] }
0x12d9   :  { %3351 = vmatpush1.msra.mxu0 %v2712_v26  ;;  %3564 = vmatpush1.msra.mxu1 %v2714_v28  ;;  %v2851_v26 = vld [vmem:[#allocation12 + $0xee8] sm:$0xff]  ;;  %v2848_v28 = vld [vmem:[#allocation12 + $0xed0] sm:$0xff] }
0x12da   :  { %3352 = vmatprep.subr.mxu0 %v2705_v30  ;;  %3565 = vmatprep.subr.mxu1 %v2707_v11  ;;  %v2850_v30 = vld [vmem:[#allocation12 + $0xee0] sm:$0xff]  ;;  %v2841_v11 = vld [vmem:[#allocation12 + $0xe98] sm:$0xff] }
0x12db   :  { %3353 = vmatpush1.msra.mxu0 %v2704_v15  ;;  %3566 = vmatpush1.msra.mxu1 %v2706_v19  ;;  %v2843_v15 = vld [vmem:[#allocation12 + $0xea8] sm:$0xff]  ;;  %v2840_v19 = vld [vmem:[#allocation12 + $0xe90] sm:$0xff] }
0x12dc   :  { %3354 = vmatprep.subr.mxu0 %v2697_v4  ;;  %3567 = vmatprep.subr.mxu1 %v2699_v21  ;;  %v2842_v4 = vld [vmem:[#allocation12 + $0xea0] sm:$0xff]  ;;  %v2833_v21 = vld [vmem:[#allocation12 + $0xe58] sm:$0xff] }
0x12dd   :  { %3355 = vmatpush1.msra.mxu0 %v2696_v31  ;;  %3568 = vmatpush1.msra.mxu1 %v2698_v32  ;;  %v2835_v31 = vld [vmem:[#allocation12 + $0xe68] sm:$0xff]  ;;  %v2832_v32 = vld [vmem:[#allocation12 + $0xe50] sm:$0xff] }
0x12de   :  { %3356 = vmatprep.subr.mxu0 %v2689_v13  ;;  %3569 = vmatprep.subr.mxu1 %v2691_v33  ;;  %v2834_v13 = vld [vmem:[#allocation12 + $0xe60] sm:$0xff]  ;;  %v2825_v33 = vld [vmem:[#allocation12 + $0xe18] sm:$0xff] }
0x12df   :  { %3357 = vmatpush1.msra.mxu0 %v2688_v51  ;;  %3570 = vmatpush1.msra.mxu1 %v2690_v2  ;;  %v2827_v51 = vld [vmem:[#allocation12 + $0xe28] sm:$0xff]  ;;  %v2824_v2 = vld [vmem:[#allocation12 + $0xe10] sm:$0xff] }
0x12e0   :  { %3358 = vmatprep.subr.mxu0 %v2681_v53  ;;  %3571 = vmatprep.subr.mxu1 %v2683_v5  ;;  %v2826_v53 = vld [vmem:[#allocation12 + $0xe20] sm:$0xff]  ;;  %v2817_v5 = vld [vmem:[#allocation12 + $0xdd8] sm:$0xff] }
0x12e1   :  { %3359 = vmatpush1.msra.mxu0 %v2680_v9  ;;  %3572 = vmatpush1.msra.mxu1 %v2682_v17  ;;  %v2819_v9 = vld [vmem:[#allocation12 + $0xde8] sm:$0xff]  ;;  %v2816_v17 = vld [vmem:[#allocation12 + $0xdd0] sm:$0xff] }
0x12e2   :  { %3360 = vmatprep.subr.mxu0 %v2673_v23  ;;  %3573 = vmatprep.subr.mxu1 %v2675_v6  ;;  %v2818_v23 = vld [vmem:[#allocation12 + $0xde0] sm:$0xff]  ;;  %v2809_v6 = vld [vmem:[#allocation12 + $0xd98] sm:$0xff] }
0x12e3   :  { %3361 = vmatpush1.msra.mxu0 %v2672_v10  ;;  %3574 = vmatpush1.msra.mxu1 %v2674_v14  ;;  %v2811_v10 = vld [vmem:[#allocation12 + $0xda8] sm:$0xff]  ;;  %v2808_v14 = vld [vmem:[#allocation12 + $0xd90] sm:$0xff] }
0x12e4   :  { %3362 = vmatprep.subr.mxu0 %v2665_v18  ;;  %3575 = vmatprep.subr.mxu1 %v2667_v22  ;;  %v2810_v18 = vld [vmem:[#allocation12 + $0xda0] sm:$0xff]  ;;  %v2801_v22 = vld [vmem:[#allocation12 + $0xd58] sm:$0xff] }
0x12e5   :  { %3363 = vmatpush1.msra.mxu0 %v2664_v44  ;;  %3576 = vmatpush1.msra.mxu1 %v2666_v25  ;;  %v2803_v44 = vld [vmem:[#allocation12 + $0xd68] sm:$0xff]  ;;  %v2800_v25 = vld [vmem:[#allocation12 + $0xd50] sm:$0xff] }
0x12e6   :  { %3364 = vmatprep.subr.mxu0 %v2657_v46  ;;  %3577 = vmatprep.subr.mxu1 %v2659_v47  ;;  %v2802_v46 = vld [vmem:[#allocation12 + $0xd60] sm:$0xff]  ;;  %v2793_v47 = vld [vmem:[#allocation12 + $0xd18] sm:$0xff] }
0x12e7   :  { %3365 = vmatpush1.msra.mxu0 %v2656_v48  ;;  %3578 = vmatpush1.msra.mxu1 %v2658_v29  ;;  %v2795_v48 = vld [vmem:[#allocation12 + $0xd28] sm:$0xff]  ;;  %v2792_v29 = vld [vmem:[#allocation12 + $0xd10] sm:$0xff] }
0x12e8   :  { %3366 = vmatprep.subr.mxu0 %v2649_v49  ;;  %3579 = vmatprep.subr.mxu1 %v2651_v50  ;;  %v2794_v49 = vld [vmem:[#allocation12 + $0xd20] sm:$0xff]  ;;  %v2785_v50 = vld [vmem:[#allocation12 + $0xcd8] sm:$0xff] }
0x12e9   :  { %3367 = vmatpush1.msra.mxu0 %v2648_v55  ;;  %3580 = vmatpush1.msra.mxu1 %v2650_v56  ;;  %v2787_v55 = vld [vmem:[#allocation12 + $0xce8] sm:$0xff]  ;;  %v2784_v56 = vld [vmem:[#allocation12 + $0xcd0] sm:$0xff] }
0x12ea   :  { %3368 = vmatprep.subr.mxu0 %v2641_v57  ;;  %3581 = vmatprep.subr.mxu1 %v2643_v59  ;;  %v2786_v57 = vld [vmem:[#allocation12 + $0xce0] sm:$0xff]  ;;  %v2777_v59 = vld [vmem:[#allocation12 + $0xc98] sm:$0xff] }
0x12eb   :  { %3369 = vmatpush1.msra.mxu0 %v2640_v60  ;;  %3582 = vmatpush1.msra.mxu1 %v2642_v61  ;;  %v2779_v60 = vld [vmem:[#allocation12 + $0xca8] sm:$0xff]  ;;  %v2776_v61 = vld [vmem:[#allocation12 + $0xc90] sm:$0xff] }
0x12ec   :  { %3370 = vmatprep.subr.mxu0 %v2633_v0  ;;  %3583 = vmatprep.subr.mxu1 %v2635_v34  ;;  %v2778_v0 = vld [vmem:[#allocation12 + $0xca0] sm:$0xff]  ;;  %v2769_v34 = vld [vmem:[#allocation12 + $0xc58] sm:$0xff] }
0x12ed   :  { %3371 = vmatpush1.msra.mxu0 %v2632_v58  ;;  %3584 = vmatpush1.msra.mxu1 %v2634_v43  ;;  %v2771_v58 = vld [vmem:[#allocation12 + $0xc68] sm:$0xff]  ;;  %v2768_v43 = vld [vmem:[#allocation12 + $0xc50] sm:$0xff] }
0x12ee   :  { %3372 = vmatprep.subr.mxu0 %v2881_v35  ;;  %3585 = vmatprep.subr.mxu1 %v2883_v40  ;;  %v2770_v35 = vld [vmem:[#allocation12 + $0xc60] sm:$0xff]  ;;  %v2761_v40 = vld [vmem:[#allocation12 + $0xc18] sm:$0xff] }
0x12ef   :  { %3373 = vmatpush2.msra.mxu0 %v2880_v38  ;;  %3586 = vmatpush2.msra.mxu1 %v2882_v62  ;;  %v2763_v38 = vld [vmem:[#allocation12 + $0xc28] sm:$0xff]  ;;  %v2760_v62 = vld [vmem:[#allocation12 + $0xc10] sm:$0xff] }
0x12f0   :  { %3374 = vmatprep.subr.mxu0 %v2873_v3  ;;  %3587 = vmatprep.subr.mxu1 %v2875_v63  ;;  %v2762_v3 = vld [vmem:[#allocation12 + $0xc20] sm:$0xff]  ;;  %v2499_v63 = vld [vmem:[#allocation12 + $0x3e8] sm:$0xff] }
0x12f1   :  { %3375 = vmatpush2.msra.mxu0 %v2872_v39  ;;  %3588 = vmatpush2.msra.mxu1 %v2874_v41  ;;  %v2501_v39 = vld [vmem:[#allocation12 + $0x3f8] sm:$0xff]  ;;  %v2498_v41 = vld [vmem:[#allocation12 + $0x3e0] sm:$0xff] }
0x12f2   :  { %3376 = vmatprep.subr.mxu0 %v2865_v42  ;;  %3589 = vmatprep.subr.mxu1 %v2867_v52  ;;  %v6895_v42 = vld [vmem:[#allocation2 + $0x10] sm:$0xff] }
0x12f3   :  { %3377 = vmatpush2.msra.mxu0 %v2864_v54  ;;  %3590 = vmatpush2.msra.mxu1 %v2866_v8  ;;  %v2500_v52 = vld [vmem:[#allocation12 + $0x3f0] sm:$0xff]  ;;  %v2491_v54 = vld [vmem:[#allocation12 + $0x3a8] sm:$0xff]  ;;  %v2493_v8 = vld [vmem:[#allocation12 + $0x3b8] sm:$0xff] }
0x12f4   :  { %3378 = vmatprep.subr.mxu0 %v2857_v12  ;;  %3591 = vmatprep.subr.mxu1 %v2859_v16  ;;  %v6896_v12 = vld [vmem:[#allocation2 + $0x8] sm:$0xff]  ;;  %v2490_v16 = vld [vmem:[#allocation12 + $0x3a0] sm:$0xff] }
0x12f5   :  { %3379 = vmatpush2.msra.mxu0 %v2856_v7  ;;  %3592 = vmatpush2.msra.mxu1 %v2858_v20  ;;  %v2492_v7 = vld [vmem:[#allocation12 + $0x3b0] sm:$0xff]  ;;  %v2483_v20 = vld [vmem:[#allocation12 + $0x368] sm:$0xff] }
0x12f6   :  { %3380 = vmatprep.subr.mxu0 %v2849_v24  ;;  %3593 = vmatprep.subr.mxu1 %v2851_v26  ;;  %v2485_v24 = vld [vmem:[#allocation12 + $0x378] sm:$0xff]  ;;  %v2482_v26 = vld [vmem:[#allocation12 + $0x360] sm:$0xff] }
0x12f7   :  { %3381 = vmatpush2.msra.mxu0 %v2848_v28  ;;  %3594 = vmatpush2.msra.mxu1 %v2850_v30  ;;  %v2484_v28 = vld [vmem:[#allocation12 + $0x370] sm:$0xff]  ;;  %v2475_v30 = vld [vmem:[#allocation12 + $0x328] sm:$0xff] }
0x12f8   :  { %3382 = vmatprep.subr.mxu0 %v2841_v11  ;;  %3595 = vmatprep.subr.mxu1 %v2843_v15  ;;  %v2477_v11 = vld [vmem:[#allocation12 + $0x338] sm:$0xff]  ;;  %v2474_v15 = vld [vmem:[#allocation12 + $0x320] sm:$0xff] }
0x12f9   :  { %3383 = vmatpush2.msra.mxu0 %v2840_v19  ;;  %3596 = vmatpush2.msra.mxu1 %v2842_v4  ;;  %v2476_v19 = vld [vmem:[#allocation12 + $0x330] sm:$0xff]  ;;  %v2467_v4 = vld [vmem:[#allocation12 + $0x2e8] sm:$0xff] }
0x12fa   :  { %3384 = vmatprep.subr.mxu0 %v2833_v21  ;;  %3597 = vmatprep.subr.mxu1 %v2835_v31  ;;  %v2469_v21 = vld [vmem:[#allocation12 + $0x2f8] sm:$0xff]  ;;  %v2466_v31 = vld [vmem:[#allocation12 + $0x2e0] sm:$0xff] }
0x12fb   :  { %3385 = vmatpush2.msra.mxu0 %v2832_v32  ;;  %3598 = vmatpush2.msra.mxu1 %v2834_v13  ;;  %v2468_v32 = vld [vmem:[#allocation12 + $0x2f0] sm:$0xff]  ;;  %v2459_v13 = vld [vmem:[#allocation12 + $0x2a8] sm:$0xff] }
0x12fc   :  { %3386 = vmatprep.subr.mxu0 %v2825_v33  ;;  %3599 = vmatprep.subr.mxu1 %v2827_v51  ;;  %v2461_v33 = vld [vmem:[#allocation12 + $0x2b8] sm:$0xff]  ;;  %v2458_v51 = vld [vmem:[#allocation12 + $0x2a0] sm:$0xff] }
0x12fd   :  { %3387 = vmatpush2.msra.mxu0 %v2824_v2  ;;  %3600 = vmatpush2.msra.mxu1 %v2826_v53  ;;  %v2460_v2 = vld [vmem:[#allocation12 + $0x2b0] sm:$0xff]  ;;  %v2451_v53 = vld [vmem:[#allocation12 + $0x268] sm:$0xff] }
0x12fe   :  { %3388 = vmatprep.subr.mxu0 %v2817_v5  ;;  %3601 = vmatprep.subr.mxu1 %v2819_v9  ;;  %v2453_v5 = vld [vmem:[#allocation12 + $0x278] sm:$0xff]  ;;  %v2450_v9 = vld [vmem:[#allocation12 + $0x260] sm:$0xff] }
0x12ff   :  { %3389 = vmatpush2.msra.mxu0 %v2816_v17  ;;  %3602 = vmatpush2.msra.mxu1 %v2818_v23  ;;  %v2452_v17 = vld [vmem:[#allocation12 + $0x270] sm:$0xff]  ;;  %v2443_v23 = vld [vmem:[#allocation12 + $0x228] sm:$0xff] }
0x1300   :  { %3390 = vmatprep.subr.mxu0 %v2809_v6  ;;  %3603 = vmatprep.subr.mxu1 %v2811_v10  ;;  %v2445_v6 = vld [vmem:[#allocation12 + $0x238] sm:$0xff]  ;;  %v2442_v10 = vld [vmem:[#allocation12 + $0x220] sm:$0xff] }
0x1301   :  { %3391 = vmatpush2.msra.mxu0 %v2808_v14  ;;  %3604 = vmatpush2.msra.mxu1 %v2810_v18  ;;  %v2444_v14 = vld [vmem:[#allocation12 + $0x230] sm:$0xff]  ;;  %v2435_v18 = vld [vmem:[#allocation12 + $0x1e8] sm:$0xff] }
0x1302   :  { %3392 = vmatprep.subr.mxu0 %v2801_v22  ;;  %3605 = vmatprep.subr.mxu1 %v2803_v44  ;;  %v2437_v22 = vld [vmem:[#allocation12 + $0x1f8] sm:$0xff]  ;;  %v2434_v44 = vld [vmem:[#allocation12 + $0x1e0] sm:$0xff] }
0x1303   :  { %3393 = vmatpush2.msra.mxu0 %v2800_v25  ;;  %3606 = vmatpush2.msra.mxu1 %v2802_v46  ;;  %v2436_v25 = vld [vmem:[#allocation12 + $0x1f0] sm:$0xff]  ;;  %v2427_v46 = vld [vmem:[#allocation12 + $0x1a8] sm:$0xff] }
0x1304   :  { %3394 = vmatprep.subr.mxu0 %v2793_v47  ;;  %3607 = vmatprep.subr.mxu1 %v2795_v48  ;;  %v2429_v47 = vld [vmem:[#allocation12 + $0x1b8] sm:$0xff]  ;;  %v2426_v48 = vld [vmem:[#allocation12 + $0x1a0] sm:$0xff] }
0x1305   :  { %3395 = vmatpush2.msra.mxu0 %v2792_v29  ;;  %3608 = vmatpush2.msra.mxu1 %v2794_v49  ;;  %v2428_v29 = vld [vmem:[#allocation12 + $0x1b0] sm:$0xff]  ;;  %v2419_v49 = vld [vmem:[#allocation12 + $0x168] sm:$0xff] }
0x1306   :  { %3396 = vmatprep.subr.mxu0 %v2785_v50  ;;  %3609 = vmatprep.subr.mxu1 %v2787_v55  ;;  %v2421_v50 = vld [vmem:[#allocation12 + $0x178] sm:$0xff]  ;;  %v2418_v55 = vld [vmem:[#allocation12 + $0x160] sm:$0xff] }
0x1307   :  { %3397 = vmatpush2.msra.mxu0 %v2784_v56  ;;  %3610 = vmatpush2.msra.mxu1 %v2786_v57  ;;  %v2420_v56 = vld [vmem:[#allocation12 + $0x170] sm:$0xff]  ;;  %v2411_v57 = vld [vmem:[#allocation12 + $0x128] sm:$0xff] }
0x1308   :  { %3398 = vmatprep.subr.mxu0 %v2777_v59  ;;  %3611 = vmatprep.subr.mxu1 %v2779_v60  ;;  %v2413_v59 = vld [vmem:[#allocation12 + $0x138] sm:$0xff]  ;;  %v2410_v60 = vld [vmem:[#allocation12 + $0x120] sm:$0xff] }
0x1309   :  { %3399 = vmatpush2.msra.mxu0 %v2776_v61  ;;  %3612 = vmatpush2.msra.mxu1 %v2778_v0  ;;  %v2412_v61 = vld [vmem:[#allocation12 + $0x130] sm:$0xff]  ;;  %v2403_v0 = vld [vmem:[#allocation12 + $0xe8] sm:$0xff] }
0x130a   :  { %3400 = vmatprep.subr.mxu0 %v2769_v34  ;;  %3613 = vmatprep.subr.mxu1 %v2771_v58  ;;  %v2405_v34 = vld [vmem:[#allocation12 + $0xf8] sm:$0xff]  ;;  %v2402_v58 = vld [vmem:[#allocation12 + $0xe0] sm:$0xff] }
0x130b   :  { %3401 = vmatpush2.msra.mxu0 %v2768_v43  ;;  %3614 = vmatpush2.msra.mxu1 %v2770_v35  ;;  %v2404_v43 = vld [vmem:[#allocation12 + $0xf0] sm:$0xff]  ;;  %v2395_v35 = vld [vmem:[#allocation12 + $0xa8] sm:$0xff] }
0x130c   :  { %3402 = vmatprep.subr.mxu0 %v2761_v40  ;;  %3615 = vmatprep.subr.mxu1 %v2763_v38  ;;  %v2397_v40 = vld [vmem:[#allocation12 + $0xb8] sm:$0xff]  ;;  %v2394_v38 = vld [vmem:[#allocation12 + $0xa0] sm:$0xff] }
0x130d   :  { %3403 = vmatpush2.msra.mxu0 %v2760_v62  ;;  %3616 = vmatpush2.msra.mxu1 %v2762_v3  ;;  %v2396_v62 = vld [vmem:[#allocation12 + $0xb0] sm:$0xff]  ;;  %v2387_v3 = vld [vmem:[#allocation12 + $0x68] sm:$0xff] }
0x130e   :  { %3405 = vmatmul.mubr.f32.vlgmr.msra.gmra.mxu0 %v6895_v42  ;;  %3482 = vmatprep.subr.mxu0 %v2499_v63  ;;  %v2389_v63 = vld [vmem:[#allocation12 + $0x78] sm:$0xff] }
0x130f   :  { %3618 = vmatmul.mubr.f32.vlgmr.msra.gmra.mxu1 %v6895_v42  ;;  %3695 = vmatprep.subr.mxu1 %v2501_v39  ;;  %v2386_v39 = vld [vmem:[#allocation12 + $0x60] sm:$0xff]  ;;  %v2379_v42 = vld [vmem:[#allocation12 + $0x28] sm:$0xff] }
0x1310   :  { %3483 = vmatpush1.msra.mxu0 %v2498_v41  ;;  %3546 = vmatprep.mubr.f32.mxu0 %v6896_v12  ;;  %v2388_v41 = vld [vmem:[#allocation12 + $0x70] sm:$0xff] }
0x1311   :  { %3696 = vmatpush1.msra.mxu1 %v2500_v52  ;;  %3759 = vmatprep.mubr.f32.mxu1 %v6896_v12  ;;  %v2381_v52 = vld [vmem:[#allocation12 + $0x38] sm:$0xff]  ;;  %v2627_v12 = vld [vmem:[#allocation12 + $0x7e8] sm:$0xff] }
0x1312   :  { %3484 = vmatprep.subr.mxu0 %v2491_v54  ;;  %3697 = vmatprep.subr.mxu1 %v2493_v8  ;;  %v2378_v54 = vld [vmem:[#allocation12 + $0x20] sm:$0xff]  ;;  %v2380_v8 = vld [vmem:[#allocation12 + $0x30] sm:$0xff] }
0x1313   :  { %3485 = vmatpush1.msra.mxu0 %v2490_v16  ;;  %3698 = vmatpush1.msra.mxu1 %v2492_v7  ;;  %v2629_v16 = vld [vmem:[#allocation12 + $0x7f8] sm:$0xff]  ;;  %v2626_v7 = vld [vmem:[#allocation12 + $0x7e0] sm:$0xff] }
0x1314   :  { %3486 = vmatprep.subr.mxu0 %v2483_v20  ;;  %3699 = vmatprep.subr.mxu1 %v2485_v24  ;;  %v2628_v20 = vld [vmem:[#allocation12 + $0x7f0] sm:$0xff]  ;;  %v2619_v24 = vld [vmem:[#allocation12 + $0x7a8] sm:$0xff] }
0x1315   :  { %3487 = vmatpush1.msra.mxu0 %v2482_v26  ;;  %3700 = vmatpush1.msra.mxu1 %v2484_v28  ;;  %v2621_v26 = vld [vmem:[#allocation12 + $0x7b8] sm:$0xff]  ;;  %v2618_v28 = vld [vmem:[#allocation12 + $0x7a0] sm:$0xff] }
0x1316   :  { %3488 = vmatprep.subr.mxu0 %v2475_v30  ;;  %3701 = vmatprep.subr.mxu1 %v2477_v11  ;;  %v2620_v30 = vld [vmem:[#allocation12 + $0x7b0] sm:$0xff]  ;;  %v2611_v11 = vld [vmem:[#allocation12 + $0x768] sm:$0xff] }
0x1317   :  { %3489 = vmatpush1.msra.mxu0 %v2474_v15  ;;  %3702 = vmatpush1.msra.mxu1 %v2476_v19  ;;  %v2613_v15 = vld [vmem:[#allocation12 + $0x778] sm:$0xff]  ;;  %v2610_v19 = vld [vmem:[#allocation12 + $0x760] sm:$0xff] }
0x1318   :  { %3490 = vmatprep.subr.mxu0 %v2467_v4  ;;  %3703 = vmatprep.subr.mxu1 %v2469_v21  ;;  %v2612_v4 = vld [vmem:[#allocation12 + $0x770] sm:$0xff]  ;;  %v2603_v21 = vld [vmem:[#allocation12 + $0x728] sm:$0xff] }
0x1319   :  { %3491 = vmatpush1.msra.mxu0 %v2466_v31  ;;  %3704 = vmatpush1.msra.mxu1 %v2468_v32  ;;  %v2605_v31 = vld [vmem:[#allocation12 + $0x738] sm:$0xff]  ;;  %v2602_v32 = vld [vmem:[#allocation12 + $0x720] sm:$0xff] }
0x131a   :  { %3492 = vmatprep.subr.mxu0 %v2459_v13  ;;  %3705 = vmatprep.subr.mxu1 %v2461_v33  ;;  %v2604_v13 = vld [vmem:[#allocation12 + $0x730] sm:$0xff]  ;;  %v2595_v33 = vld [vmem:[#allocation12 + $0x6e8] sm:$0xff] }
0x131b   :  { %3493 = vmatpush1.msra.mxu0 %v2458_v51  ;;  %3706 = vmatpush1.msra.mxu1 %v2460_v2  ;;  %v2597_v51 = vld [vmem:[#allocation12 + $0x6f8] sm:$0xff]  ;;  %v2594_v2 = vld [vmem:[#allocation12 + $0x6e0] sm:$0xff] }
0x131c   :  { %3494 = vmatprep.subr.mxu0 %v2451_v53  ;;  %3707 = vmatprep.subr.mxu1 %v2453_v5  ;;  %v2596_v53 = vld [vmem:[#allocation12 + $0x6f0] sm:$0xff]  ;;  %v2587_v5 = vld [vmem:[#allocation12 + $0x6a8] sm:$0xff] }
0x131d   :  { %3495 = vmatpush1.msra.mxu0 %v2450_v9  ;;  %3708 = vmatpush1.msra.mxu1 %v2452_v17  ;;  %v2589_v9 = vld [vmem:[#allocation12 + $0x6b8] sm:$0xff]  ;;  %v2586_v17 = vld [vmem:[#allocation12 + $0x6a0] sm:$0xff] }
0x131e   :  { %3496 = vmatprep.subr.mxu0 %v2443_v23  ;;  %3709 = vmatprep.subr.mxu1 %v2445_v6  ;;  %v2588_v23 = vld [vmem:[#allocation12 + $0x6b0] sm:$0xff]  ;;  %v2579_v6 = vld [vmem:[#allocation12 + $0x668] sm:$0xff] }
0x131f   :  { %3497 = vmatpush1.msra.mxu0 %v2442_v10  ;;  %3710 = vmatpush1.msra.mxu1 %v2444_v14  ;;  %v2581_v10 = vld [vmem:[#allocation12 + $0x678] sm:$0xff]  ;;  %v2578_v14 = vld [vmem:[#allocation12 + $0x660] sm:$0xff] }
0x1320   :  { %3498 = vmatprep.subr.mxu0 %v2435_v18  ;;  %3711 = vmatprep.subr.mxu1 %v2437_v22  ;;  %v2580_v18 = vld [vmem:[#allocation12 + $0x670] sm:$0xff]  ;;  %v2571_v22 = vld [vmem:[#allocation12 + $0x628] sm:$0xff] }
0x1321   :  { %3499 = vmatpush1.msra.mxu0 %v2434_v44  ;;  %3712 = vmatpush1.msra.mxu1 %v2436_v25  ;;  %v2573_v44 = vld [vmem:[#allocation12 + $0x638] sm:$0xff]  ;;  %v2570_v25 = vld [vmem:[#allocation12 + $0x620] sm:$0xff] }
0x1322   :  { %3500 = vmatprep.subr.mxu0 %v2427_v46  ;;  %3713 = vmatprep.subr.mxu1 %v2429_v47  ;;  %v2572_v46 = vld [vmem:[#allocation12 + $0x630] sm:$0xff]  ;;  %v2563_v47 = vld [vmem:[#allocation12 + $0x5e8] sm:$0xff] }
0x1323   :  { %3501 = vmatpush1.msra.mxu0 %v2426_v48  ;;  %3714 = vmatpush1.msra.mxu1 %v2428_v29  ;;  %v2565_v48 = vld [vmem:[#allocation12 + $0x5f8] sm:$0xff]  ;;  %v2562_v29 = vld [vmem:[#allocation12 + $0x5e0] sm:$0xff] }
0x1324   :  { %3502 = vmatprep.subr.mxu0 %v2419_v49  ;;  %3715 = vmatprep.subr.mxu1 %v2421_v50  ;;  %v2564_v49 = vld [vmem:[#allocation12 + $0x5f0] sm:$0xff]  ;;  %v2555_v50 = vld [vmem:[#allocation12 + $0x5a8] sm:$0xff] }
0x1325   :  { %3503 = vmatpush1.msra.mxu0 %v2418_v55  ;;  %3716 = vmatpush1.msra.mxu1 %v2420_v56  ;;  %v2557_v55 = vld [vmem:[#allocation12 + $0x5b8] sm:$0xff]  ;;  %v2554_v56 = vld [vmem:[#allocation12 + $0x5a0] sm:$0xff] }
0x1326   :  { %3504 = vmatprep.subr.mxu0 %v2411_v57  ;;  %3717 = vmatprep.subr.mxu1 %v2413_v59  ;;  %v2556_v57 = vld [vmem:[#allocation12 + $0x5b0] sm:$0xff]  ;;  %v2547_v59 = vld [vmem:[#allocation12 + $0x568] sm:$0xff] }
0x1327   :  { %3505 = vmatpush1.msra.mxu0 %v2410_v60  ;;  %3718 = vmatpush1.msra.mxu1 %v2412_v61  ;;  %v2549_v60 = vld [vmem:[#allocation12 + $0x578] sm:$0xff]  ;;  %v2546_v61 = vld [vmem:[#allocation12 + $0x560] sm:$0xff] }
0x1328   :  { %3506 = vmatprep.subr.mxu0 %v2403_v0  ;;  %3719 = vmatprep.subr.mxu1 %v2405_v34  ;;  %v2548_v0 = vld [vmem:[#allocation12 + $0x570] sm:$0xff]  ;;  %v2539_v34 = vld [vmem:[#allocation12 + $0x528] sm:$0xff] }
0x1329   :  { %3507 = vmatpush1.msra.mxu0 %v2402_v58  ;;  %3720 = vmatpush1.msra.mxu1 %v2404_v43  ;;  %v2541_v58 = vld [vmem:[#allocation12 + $0x538] sm:$0xff]  ;;  %v2538_v43 = vld [vmem:[#allocation12 + $0x520] sm:$0xff] }
0x132a   :  { %3508 = vmatprep.subr.mxu0 %v2395_v35  ;;  %3721 = vmatprep.subr.mxu1 %v2397_v40  ;;  %v2540_v35 = vld [vmem:[#allocation12 + $0x530] sm:$0xff]  ;;  %v2531_v40 = vld [vmem:[#allocation12 + $0x4e8] sm:$0xff] }
0x132b   :  { %3509 = vmatpush1.msra.mxu0 %v2394_v38  ;;  %3722 = vmatpush1.msra.mxu1 %v2396_v62  ;;  %v2533_v38 = vld [vmem:[#allocation12 + $0x4f8] sm:$0xff]  ;;  %v2530_v62 = vld [vmem:[#allocation12 + $0x4e0] sm:$0xff] }
0x132c   :  { %3510 = vmatprep.subr.mxu0 %v2387_v3  ;;  %3723 = vmatprep.subr.mxu1 %v2389_v63  ;;  %v2532_v3 = vld [vmem:[#allocation12 + $0x4f0] sm:$0xff]  ;;  %v2523_v63 = vld [vmem:[#allocation12 + $0x4a8] sm:$0xff] }
0x132d   :  { %3511 = vmatpush1.msra.mxu0 %v2386_v39  ;;  %3724 = vmatpush1.msra.mxu1 %v2388_v41  ;;  %v2525_v39 = vld [vmem:[#allocation12 + $0x4b8] sm:$0xff]  ;;  %v2522_v41 = vld [vmem:[#allocation12 + $0x4a0] sm:$0xff] }
0x132e   :  { %3512 = vmatprep.subr.mxu0 %v2379_v42  ;;  %3725 = vmatprep.subr.mxu1 %v2381_v52  ;;  %v2524_v42 = vld [vmem:[#allocation12 + $0x4b0] sm:$0xff]  ;;  %v2515_v52 = vld [vmem:[#allocation12 + $0x468] sm:$0xff] }
0x132f   :  { %3513 = vmatpush1.msra.mxu0 %v2378_v54  ;;  %3726 = vmatpush1.msra.mxu1 %v2380_v8  ;;  %v2517_v54 = vld [vmem:[#allocation12 + $0x478] sm:$0xff]  ;;  %v2514_v8 = vld [vmem:[#allocation12 + $0x460] sm:$0xff] }
0x1330   :  { %3514 = vmatprep.subr.mxu0 %v2627_v12  ;;  %3727 = vmatprep.subr.mxu1 %v2629_v16  ;;  %v2516_v12 = vld [vmem:[#allocation12 + $0x470] sm:$0xff]  ;;  %v2507_v16 = vld [vmem:[#allocation12 + $0x428] sm:$0xff] }
0x1331   :  { %3515 = vmatpush2.msra.mxu0 %v2626_v7  ;;  %3728 = vmatpush2.msra.mxu1 %v2628_v20  ;;  %v2509_v7 = vld [vmem:[#allocation12 + $0x438] sm:$0xff]  ;;  %v2506_v20 = vld [vmem:[#allocation12 + $0x420] sm:$0xff] }
0x1332   :  { %3516 = vmatprep.subr.mxu0 %v2619_v24  ;;  %3729 = vmatprep.subr.mxu1 %v2621_v26  ;;  %v2508_v24 = vld [vmem:[#allocation12 + $0x430] sm:$0xff]  ;;  %v3011_v26 = vld [vmem:[#allocation12 + $0x13e8] sm:$0xff] }
0x1333   :  { %3517 = vmatpush2.msra.mxu0 %v2618_v28  ;;  %3730 = vmatpush2.msra.mxu1 %v2620_v30  ;;  %v3013_v28 = vld [vmem:[#allocation12 + $0x13f8] sm:$0xff]  ;;  %v3010_v30 = vld [vmem:[#allocation12 + $0x13e0] sm:$0xff] }
0x1334   :  { %3518 = vmatprep.subr.mxu0 %v2611_v11  ;;  %3731 = vmatprep.subr.mxu1 %v2613_v15  ;;  %v3012_v11 = vld [vmem:[#allocation12 + $0x13f0] sm:$0xff]  ;;  %v6897_v15 = vld [vmem:[#allocation2] sm:$0xff] }
0x1335   :  { %3519 = vmatpush2.msra.mxu0 %v2610_v19  ;;  %3732 = vmatpush2.msra.mxu1 %v2612_v4  ;;  %v3003_v19 = vld [vmem:[#allocation12 + $0x13a8] sm:$0xff]  ;;  %v3005_v4 = vld [vmem:[#allocation12 + $0x13b8] sm:$0xff] }
0x1336   :  { %3520 = vmatprep.subr.mxu0 %v2603_v21  ;;  %3733 = vmatprep.subr.mxu1 %v2605_v31  ;;  %v3002_v21 = vld [vmem:[#allocation12 + $0x13a0] sm:$0xff]  ;;  %v3004_v31 = vld [vmem:[#allocation12 + $0x13b0] sm:$0xff] }
0x1337   :  { %3521 = vmatpush2.msra.mxu0 %v2602_v32  ;;  %3734 = vmatpush2.msra.mxu1 %v2604_v13  ;;  %v2995_v32 = vld [vmem:[#allocation12 + $0x1368] sm:$0xff]  ;;  %v2997_v13 = vld [vmem:[#allocation12 + $0x1378] sm:$0xff] }
0x1338   :  { %3522 = vmatprep.subr.mxu0 %v2595_v33  ;;  %3735 = vmatprep.subr.mxu1 %v2597_v51  ;;  %v2994_v33 = vld [vmem:[#allocation12 + $0x1360] sm:$0xff]  ;;  %v2996_v51 = vld [vmem:[#allocation12 + $0x1370] sm:$0xff] }
0x1339   :  { %3523 = vmatpush2.msra.mxu0 %v2594_v2  ;;  %3736 = vmatpush2.msra.mxu1 %v2596_v53  ;;  %v2987_v2 = vld [vmem:[#allocation12 + $0x1328] sm:$0xff]  ;;  %v2989_v53 = vld [vmem:[#allocation12 + $0x1338] sm:$0xff] }
0x133a   :  { %3524 = vmatprep.subr.mxu0 %v2587_v5  ;;  %3737 = vmatprep.subr.mxu1 %v2589_v9  ;;  %v2986_v5 = vld [vmem:[#allocation12 + $0x1320] sm:$0xff]  ;;  %v2988_v9 = vld [vmem:[#allocation12 + $0x1330] sm:$0xff] }
0x133b   :  { %3525 = vmatpush2.msra.mxu0 %v2586_v17  ;;  %3738 = vmatpush2.msra.mxu1 %v2588_v23  ;;  %v2979_v17 = vld [vmem:[#allocation12 + $0x12e8] sm:$0xff]  ;;  %v2981_v23 = vld [vmem:[#allocation12 + $0x12f8] sm:$0xff] }
0x133c   :  { %3526 = vmatprep.subr.mxu0 %v2579_v6  ;;  %3739 = vmatprep.subr.mxu1 %v2581_v10  ;;  %v2978_v6 = vld [vmem:[#allocation12 + $0x12e0] sm:$0xff]  ;;  %v2980_v10 = vld [vmem:[#allocation12 + $0x12f0] sm:$0xff] }
0x133d   :  { %3527 = vmatpush2.msra.mxu0 %v2578_v14  ;;  %3740 = vmatpush2.msra.mxu1 %v2580_v18  ;;  %v2971_v14 = vld [vmem:[#allocation12 + $0x12a8] sm:$0xff]  ;;  %v2973_v18 = vld [vmem:[#allocation12 + $0x12b8] sm:$0xff] }
0x133e   :  { %3528 = vmatprep.subr.mxu0 %v2571_v22  ;;  %3741 = vmatprep.subr.mxu1 %v2573_v44  ;;  %v2970_v22 = vld [vmem:[#allocation12 + $0x12a0] sm:$0xff]  ;;  %v2972_v44 = vld [vmem:[#allocation12 + $0x12b0] sm:$0xff] }
0x133f   :  { %3529 = vmatpush2.msra.mxu0 %v2570_v25  ;;  %3742 = vmatpush2.msra.mxu1 %v2572_v46  ;;  %v2963_v25 = vld [vmem:[#allocation12 + $0x1268] sm:$0xff]  ;;  %v2965_v46 = vld [vmem:[#allocation12 + $0x1278] sm:$0xff] }
0x1340   :  { %3530 = vmatprep.subr.mxu0 %v2563_v47  ;;  %3743 = vmatprep.subr.mxu1 %v2565_v48  ;;  %v2962_v47 = vld [vmem:[#allocation12 + $0x1260] sm:$0xff]  ;;  %v2964_v48 = vld [vmem:[#allocation12 + $0x1270] sm:$0xff] }
0x1341   :  { %3531 = vmatpush2.msra.mxu0 %v2562_v29  ;;  %3744 = vmatpush2.msra.mxu1 %v2564_v49  ;;  %v2955_v29 = vld [vmem:[#allocation12 + $0x1228] sm:$0xff]  ;;  %v2957_v49 = vld [vmem:[#allocation12 + $0x1238] sm:$0xff] }
0x1342   :  { %3532 = vmatprep.subr.mxu0 %v2555_v50  ;;  %3745 = vmatprep.subr.mxu1 %v2557_v55  ;;  %v2954_v50 = vld [vmem:[#allocation12 + $0x1220] sm:$0xff]  ;;  %v2956_v55 = vld [vmem:[#allocation12 + $0x1230] sm:$0xff] }
0x1343   :  { %3533 = vmatpush2.msra.mxu0 %v2554_v56  ;;  %3746 = vmatpush2.msra.mxu1 %v2556_v57  ;;  %v2947_v56 = vld [vmem:[#allocation12 + $0x11e8] sm:$0xff]  ;;  %v2949_v57 = vld [vmem:[#allocation12 + $0x11f8] sm:$0xff] }
0x1344   :  { %3534 = vmatprep.subr.mxu0 %v2547_v59  ;;  %3747 = vmatprep.subr.mxu1 %v2549_v60  ;;  %v2946_v59 = vld [vmem:[#allocation12 + $0x11e0] sm:$0xff]  ;;  %v2948_v60 = vld [vmem:[#allocation12 + $0x11f0] sm:$0xff] }
0x1345   :  { %3535 = vmatpush2.msra.mxu0 %v2546_v61  ;;  %3748 = vmatpush2.msra.mxu1 %v2548_v0  ;;  %v2939_v61 = vld [vmem:[#allocation12 + $0x11a8] sm:$0xff]  ;;  %v2941_v0 = vld [vmem:[#allocation12 + $0x11b8] sm:$0xff] }
0x1346   :  { %3536 = vmatprep.subr.mxu0 %v2539_v34  ;;  %3749 = vmatprep.subr.mxu1 %v2541_v58  ;;  %v2938_v34 = vld [vmem:[#allocation12 + $0x11a0] sm:$0xff]  ;;  %v2940_v58 = vld [vmem:[#allocation12 + $0x11b0] sm:$0xff] }
0x1347   :  { %3537 = vmatpush2.msra.mxu0 %v2538_v43  ;;  %3750 = vmatpush2.msra.mxu1 %v2540_v35  ;;  %v2931_v43 = vld [vmem:[#allocation12 + $0x1168] sm:$0xff]  ;;  %v2933_v35 = vld [vmem:[#allocation12 + $0x1178] sm:$0xff] }
0x1348   :  { %3538 = vmatprep.subr.mxu0 %v2531_v40  ;;  %3751 = vmatprep.subr.mxu1 %v2533_v38  ;;  %v2930_v40 = vld [vmem:[#allocation12 + $0x1160] sm:$0xff]  ;;  %v2932_v38 = vld [vmem:[#allocation12 + $0x1170] sm:$0xff] }
0x1349   :  { %3539 = vmatpush2.msra.mxu0 %v2530_v62  ;;  %3752 = vmatpush2.msra.mxu1 %v2532_v3  ;;  %v2923_v62 = vld [vmem:[#allocation12 + $0x1128] sm:$0xff]  ;;  %v2925_v3 = vld [vmem:[#allocation12 + $0x1138] sm:$0xff] }
0x134a   :  { %3540 = vmatprep.subr.mxu0 %v2523_v63  ;;  %3753 = vmatprep.subr.mxu1 %v2525_v39  ;;  %v2922_v63 = vld [vmem:[#allocation12 + $0x1120] sm:$0xff]  ;;  %v2924_v39 = vld [vmem:[#allocation12 + $0x1130] sm:$0xff] }
0x134b   :  { %3541 = vmatpush2.msra.mxu0 %v2522_v41  ;;  %3754 = vmatpush2.msra.mxu1 %v2524_v42  ;;  %v2915_v41 = vld [vmem:[#allocation12 + $0x10e8] sm:$0xff]  ;;  %v2917_v42 = vld [vmem:[#allocation12 + $0x10f8] sm:$0xff] }
0x134c   :  { %3542 = vmatprep.subr.mxu0 %v2515_v52  ;;  %3755 = vmatprep.subr.mxu1 %v2517_v54  ;;  %v2914_v52 = vld [vmem:[#allocation12 + $0x10e0] sm:$0xff]  ;;  %v2916_v54 = vld [vmem:[#allocation12 + $0x10f0] sm:$0xff] }
0x134d   :  { %3543 = vmatpush2.msra.mxu0 %v2514_v8  ;;  %3756 = vmatpush2.msra.mxu1 %v2516_v12  ;;  %v2907_v8 = vld [vmem:[#allocation12 + $0x10a8] sm:$0xff]  ;;  %v2909_v12 = vld [vmem:[#allocation12 + $0x10b8] sm:$0xff] }
0x134e   :  { %3544 = vmatprep.subr.mxu0 %v2507_v16  ;;  %3757 = vmatprep.subr.mxu1 %v2509_v7  ;;  %v2906_v16 = vld [vmem:[#allocation12 + $0x10a0] sm:$0xff]  ;;  %v2908_v7 = vld [vmem:[#allocation12 + $0x10b0] sm:$0xff] }
0x134f   :  { %3545 = vmatpush2.msra.mxu0 %v2506_v20  ;;  %3758 = vmatpush2.msra.mxu1 %v2508_v24  ;;  %v2899_v20 = vld [vmem:[#allocation12 + $0x1068] sm:$0xff]  ;;  %v2901_v24 = vld [vmem:[#allocation12 + $0x1078] sm:$0xff] }
0x1350   :  { %3547 = vmatmul.mubr.f32.vlgmr.msra.gmra.mxu0 %v6897_v15  ;;  %3624 = vmatprep.subr.mxu0 %v3011_v26  ;;  %v2898_v26 = vld [vmem:[#allocation12 + $0x1060] sm:$0xff] }
0x1351   :  { %3760 = vmatmul.mubr.f32.vlgmr.msra.gmra.mxu1 %v6897_v15  ;;  %3837 = vmatprep.subr.mxu1 %v3013_v28  ;;  %v2900_v28 = vld [vmem:[#allocation12 + $0x1070] sm:$0xff]  ;;  %v2890_v15 = vld [vmem:[#allocation12 + $0x1020] sm:$0xff] }
0x1352   :  { %3625 = vmatpush1.msra.mxu0 %v3010_v30  ;;  %3838 = vmatpush1.msra.mxu1 %v3012_v11  ;;  %v2891_v30 = vld [vmem:[#allocation12 + $0x1028] sm:$0xff]  ;;  %v2893_v11 = vld [vmem:[#allocation12 + $0x1038] sm:$0xff] }
0x1353   :  { %3626 = vmatprep.subr.mxu0 %v3003_v19  ;;  %3839 = vmatprep.subr.mxu1 %v3005_v4  ;;  %v2892_v19 = vld [vmem:[#allocation12 + $0x1030] sm:$0xff]  ;;  %v2757_v4 = vld [vmem:[#allocation12 + $0xbf8] sm:$0xff] }
0x1354   :  { %3627 = vmatpush1.msra.mxu0 %v3002_v21  ;;  %3840 = vmatpush1.msra.mxu1 %v3004_v31  ;;  %v2756_v21 = vld [vmem:[#allocation12 + $0xbf0] sm:$0xff]  ;;  %v2749_v31 = vld [vmem:[#allocation12 + $0xbb8] sm:$0xff] }
0x1355   :  { %3628 = vmatprep.subr.mxu0 %v2995_v32  ;;  %3841 = vmatprep.subr.mxu1 %v2997_v13  ;;  %v6898_v32 = vld [vmem:[#allocation2 + $0x20] sm:$0xff]  ;;  %v2748_v13 = vld [vmem:[#allocation12 + $0xbb0] sm:$0xff] }
0x1356   :  { %3629 = vmatpush1.msra.mxu0 %v2994_v33  ;;  %3842 = vmatpush1.msra.mxu1 %v2996_v51  ;;  %v4293_v33 = vld [vmem:[#allocation15 + $0xbc8] sm:$0xff]  ;;  %v2741_v51 = vld [vmem:[#allocation12 + $0xb78] sm:$0xff] }
0x1357   :  { %3630 = vmatprep.subr.mxu0 %v2987_v2  ;;  %3843 = vmatprep.subr.mxu1 %v2989_v53  ;;  %v4292_v2 = vld [vmem:[#allocation15 + $0xbc0] sm:$0xff]  ;;  %v6899_v53 = vld [vmem:[#allocation2 + $0x18] sm:$0xff] }
0x1358   :  { %3631 = vmatpush1.msra.mxu0 %v2986_v5  ;;  %3844 = vmatpush1.msra.mxu1 %v2988_v9  ;;  %v2740_v5 = vld [vmem:[#allocation12 + $0xb70] sm:$0xff] }
0x1359   :  { %3632 = vmatprep.subr.mxu0 %v2979_v17  ;;  %3845 = vmatprep.subr.mxu1 %v2981_v23  ;;  %v4285_v9 = vld [vmem:[#allocation15 + $0xb88] sm:$0xff]  ;;  %v2733_v17 = vld [vmem:[#allocation12 + $0xb38] sm:$0xff]  ;;  %v4284_v23 = vld [vmem:[#allocation15 + $0xb80] sm:$0xff] }
0x135a   :  { %3633 = vmatpush1.msra.mxu0 %v2978_v6  ;;  %3846 = vmatpush1.msra.mxu1 %v2980_v10  ;;  %v4277_v6 = vld [vmem:[#allocation15 + $0xb48] sm:$0xff]  ;;  %v2725_v10 = vld [vmem:[#allocation12 + $0xaf8] sm:$0xff] }
0x135b   :  { %3634 = vmatprep.subr.mxu0 %v2971_v14  ;;  %3847 = vmatprep.subr.mxu1 %v2973_v18  ;;  %v4276_v14 = vld [vmem:[#allocation15 + $0xb40] sm:$0xff]  ;;  %v2724_v18 = vld [vmem:[#allocation12 + $0xaf0] sm:$0xff] }
0x135c   :  { %3635 = vmatpush1.msra.mxu0 %v2970_v22  ;;  %3848 = vmatpush1.msra.mxu1 %v2972_v44  ;;  %v4269_v22 = vld [vmem:[#allocation15 + $0xb08] sm:$0xff]  ;;  %v2717_v44 = vld [vmem:[#allocation12 + $0xab8] sm:$0xff] }
0x135d   :  { %3636 = vmatprep.subr.mxu0 %v2963_v25  ;;  %3849 = vmatprep.subr.mxu1 %v2965_v46  ;;  %v4268_v25 = vld [vmem:[#allocation15 + $0xb00] sm:$0xff]  ;;  %v2716_v46 = vld [vmem:[#allocation12 + $0xab0] sm:$0xff] }
0x135e   :  { %3637 = vmatpush1.msra.mxu0 %v2962_v47  ;;  %3850 = vmatpush1.msra.mxu1 %v2964_v48  ;;  %v4261_v47 = vld [vmem:[#allocation15 + $0xac8] sm:$0xff]  ;;  %v2709_v48 = vld [vmem:[#allocation12 + $0xa78] sm:$0xff] }
0x135f   :  { %3638 = vmatprep.subr.mxu0 %v2955_v29  ;;  %3851 = vmatprep.subr.mxu1 %v2957_v49  ;;  %v4260_v29 = vld [vmem:[#allocation15 + $0xac0] sm:$0xff]  ;;  %v2708_v49 = vld [vmem:[#allocation12 + $0xa70] sm:$0xff] }
0x1360   :  { %3639 = vmatpush1.msra.mxu0 %v2954_v50  ;;  %3852 = vmatpush1.msra.mxu1 %v2956_v55  ;;  %v4253_v50 = vld [vmem:[#allocation15 + $0xa88] sm:$0xff]  ;;  %v2701_v55 = vld [vmem:[#allocation12 + $0xa38] sm:$0xff] }
0x1361   :  { %3640 = vmatprep.subr.mxu0 %v2947_v56  ;;  %3853 = vmatprep.subr.mxu1 %v2949_v57  ;;  %v4252_v56 = vld [vmem:[#allocation15 + $0xa80] sm:$0xff]  ;;  %v2700_v57 = vld [vmem:[#allocation12 + $0xa30] sm:$0xff] }
0x1362   :  { %3641 = vmatpush1.msra.mxu0 %v2946_v59  ;;  %3854 = vmatpush1.msra.mxu1 %v2948_v60  ;;  %v4245_v59 = vld [vmem:[#allocation15 + $0xa48] sm:$0xff]  ;;  %v2693_v60 = vld [vmem:[#allocation12 + $0x9f8] sm:$0xff] }
0x1363   :  { %3642 = vmatprep.subr.mxu0 %v2939_v61  ;;  %3855 = vmatprep.subr.mxu1 %v2941_v0  ;;  %v4244_v61 = vld [vmem:[#allocation15 + $0xa40] sm:$0xff]  ;;  %v2692_v0 = vld [vmem:[#allocation12 + $0x9f0] sm:$0xff] }
0x1364   :  { %3643 = vmatpush1.msra.mxu0 %v2938_v34  ;;  %3856 = vmatpush1.msra.mxu1 %v2940_v58  ;;  %v4237_v34 = vld [vmem:[#allocation15 + $0xa08] sm:$0xff]  ;;  %v2685_v58 = vld [vmem:[#allocation12 + $0x9b8] sm:$0xff] }
0x1365   :  { %3644 = vmatprep.subr.mxu0 %v2931_v43  ;;  %3857 = vmatprep.subr.mxu1 %v2933_v35  ;;  %v4236_v43 = vld [vmem:[#allocation15 + $0xa00] sm:$0xff]  ;;  %v2684_v35 = vld [vmem:[#allocation12 + $0x9b0] sm:$0xff] }
0x1366   :  { %3645 = vmatpush1.msra.mxu0 %v2930_v40  ;;  %3858 = vmatpush1.msra.mxu1 %v2932_v38  ;;  %v4229_v40 = vld [vmem:[#allocation15 + $0x9c8] sm:$0xff]  ;;  %v2677_v38 = vld [vmem:[#allocation12 + $0x978] sm:$0xff] }
0x1367   :  { %3646 = vmatprep.subr.mxu0 %v2923_v62  ;;  %3859 = vmatprep.subr.mxu1 %v2925_v3  ;;  %v4228_v62 = vld [vmem:[#allocation15 + $0x9c0] sm:$0xff]  ;;  %v2676_v3 = vld [vmem:[#allocation12 + $0x970] sm:$0xff] }
0x1368   :  { %3647 = vmatpush1.msra.mxu0 %v2922_v63  ;;  %3860 = vmatpush1.msra.mxu1 %v2924_v39  ;;  %v4221_v63 = vld [vmem:[#allocation15 + $0x988] sm:$0xff]  ;;  %v2669_v39 = vld [vmem:[#allocation12 + $0x938] sm:$0xff] }
0x1369   :  { %3648 = vmatprep.subr.mxu0 %v2915_v41  ;;  %3861 = vmatprep.subr.mxu1 %v2917_v42  ;;  %v4220_v41 = vld [vmem:[#allocation15 + $0x980] sm:$0xff]  ;;  %v2668_v42 = vld [vmem:[#allocation12 + $0x930] sm:$0xff] }
0x136a   :  { %3649 = vmatpush1.msra.mxu0 %v2914_v52  ;;  %3862 = vmatpush1.msra.mxu1 %v2916_v54  ;;  %v4213_v52 = vld [vmem:[#allocation15 + $0x948] sm:$0xff]  ;;  %v2661_v54 = vld [vmem:[#allocation12 + $0x8f8] sm:$0xff] }
0x136b   :  { %3650 = vmatprep.subr.mxu0 %v2907_v8  ;;  %3863 = vmatprep.subr.mxu1 %v2909_v12  ;;  %v4212_v8 = vld [vmem:[#allocation15 + $0x940] sm:$0xff]  ;;  %v2660_v12 = vld [vmem:[#allocation12 + $0x8f0] sm:$0xff] }
0x136c   :  { %3651 = vmatpush1.msra.mxu0 %v2906_v16  ;;  %3864 = vmatpush1.msra.mxu1 %v2908_v7  ;;  %v4205_v16 = vld [vmem:[#allocation15 + $0x908] sm:$0xff]  ;;  %v2653_v7 = vld [vmem:[#allocation12 + $0x8b8] sm:$0xff] }
0x136d   :  { %3652 = vmatprep.subr.mxu0 %v2899_v20  ;;  %3865 = vmatprep.subr.mxu1 %v2901_v24  ;;  %v4204_v20 = vld [vmem:[#allocation15 + $0x900] sm:$0xff]  ;;  %v2652_v24 = vld [vmem:[#allocation12 + $0x8b0] sm:$0xff] }
0x136e   :  { %3653 = vmatpush1.msra.mxu0 %v2898_v26  ;;  %3866 = vmatpush1.msra.mxu1 %v2900_v28  ;;  %v4197_v26 = vld [vmem:[#allocation15 + $0x8c8] sm:$0xff]  ;;  %v7852_v28 = vpop.f32.mrf.mxu0 }
0x136f   :  { %3654 = vmatprep.subr.mxu0 %v2891_v30  ;;  %3867 = vmatprep.subr.mxu1 %v2893_v11  ;;  %v2645_v30 = vld [vmem:[#allocation12 + $0x878] sm:$0xff]  ;;  %v4196_v11 = vld [vmem:[#allocation15 + $0x8c0] sm:$0xff] }
0x1370   :  { %3655 = vmatpush1.msra.mxu0 %v2890_v15  ;;  %3688 = vmatprep.mubr.f32.mxu0 %v7131_v1  ;;  %v2644_v15 = vld [vmem:[#allocation12 + $0x870] sm:$0xff] }
0x1371   :  { %3868 = vmatpush1.msra.mxu1 %v2892_v19  ;;  %3901 = vmatprep.mubr.f32.mxu1 %v7131_v1  ;;  %v2732_v1 = vld [vmem:[#allocation12 + $0xb30] sm:$0xff] }
0x1372   :  { %3689 = vmatmul.mubr.f32.vlgmr.msra.gmra.mxu0 %v6898_v32  ;;  %3766 = vmatprep.subr.mxu0 %v2757_v4  ;;  %v4189_v19 = vld [vmem:[#allocation15 + $0x888] sm:$0xff]  ;;  %v2637_v4 = vld [vmem:[#allocation12 + $0x838] sm:$0xff] }
0x1373   :  { %3902 = vmatmul.mubr.f32.vlgmr.msra.gmra.mxu1 %v6898_v32  ;;  %3767 = vmatpush1.msra.mxu0 %v2756_v21  ;;  %v2636_v32 = vld [vmem:[#allocation12 + $0x830] sm:$0xff] }
0x1374   :  { %3830 = vmatprep.mubr.f32.mxu0 %v6899_v53  ;;  %3768 = vmatprep.subr.mxu0 %v2749_v31  ;;  %v4188_v31 = vld [vmem:[#allocation15 + $0x880] sm:$0xff]  ;;  %v2884_v53 = vld [vmem:[#allocation12 + $0xff0] sm:$0xff] }
0x1375   :  { %3769 = vmatpush1.msra.mxu0 %v2748_v13  ;;  %5053 = vmatprep.subr.mxu1 %v4293_v33  ;;  %v4181_v33 = vld [vmem:[#allocation15 + $0x848] sm:$0xff] }
0x1376   :  { %3770 = vmatprep.subr.mxu0 %v2741_v51  ;;  %5054 = vmatpush1.msra.mxu1 %v4292_v2  ;;  %v2885_v51 = vld [vmem:[#allocation12 + $0xff8] sm:$0xff]  ;;  %v4180_v2 = vld [vmem:[#allocation15 + $0x840] sm:$0xff] }
0x1377   :  { %3771 = vmatpush1.msra.mxu0 %v2740_v5  ;;  %5055 = vmatprep.subr.mxu1 %v4285_v9  ;;  %v4173_v5 = vld [vmem:[#allocation15 + $0x808] sm:$0xff]  ;;  %v2877_v9 = vld [vmem:[#allocation12 + $0xfb8] sm:$0xff] }
0x1378   :  { %3772 = vmatprep.subr.mxu0 %v2733_v17  ;;  %5056 = vmatpush1.msra.mxu1 %v4284_v23  ;;  %v4172_v17 = vld [vmem:[#allocation15 + $0x800] sm:$0xff]  ;;  %v2876_v23 = vld [vmem:[#allocation12 + $0xfb0] sm:$0xff] }
0x1379   :  { %3773 = vmatpush1.msra.mxu0 %v2732_v1  ;;  %5057 = vmatprep.subr.mxu1 %v4277_v6  ;;  %v4421_v1 = vld [vmem:[#allocation15 + $0xfc8] sm:$0xff]  ;;  %v4420_v6 = vld [vmem:[#allocation15 + $0xfc0] sm:$0xff] }
0x137a   :  { %3774 = vmatprep.subr.mxu0 %v2725_v10  ;;  %5058 = vmatpush1.msra.mxu1 %v4276_v14  ;;  %v2868_v10 = vld [vmem:[#allocation12 + $0xf70] sm:$0xff] }
0x137b   :  { %3775 = vmatpush1.msra.mxu0 %v2724_v18  ;;  %5059 = vmatprep.subr.mxu1 %v4269_v22  ;;  %v4413_v14 = vld [vmem:[#allocation15 + $0xf88] sm:$0xff]  ;;  %v2861_v18 = vld [vmem:[#allocation12 + $0xf38] sm:$0xff]  ;;  %v4412_v22 = vld [vmem:[#allocation15 + $0xf80] sm:$0xff] }
0x137c   :  { %3776 = vmatprep.subr.mxu0 %v2717_v44  ;;  %5060 = vmatpush1.msra.mxu1 %v4268_v25  ;;  %v2860_v44 = vld [vmem:[#allocation12 + $0xf30] sm:$0xff] }
0x137d   :  { %3777 = vmatpush1.msra.mxu0 %v2716_v46  ;;  %5061 = vmatprep.subr.mxu1 %v4261_v47  ;;  %v4405_v25 = vld [vmem:[#allocation15 + $0xf48] sm:$0xff]  ;;  %v2853_v46 = vld [vmem:[#allocation12 + $0xef8] sm:$0xff]  ;;  %v4404_v47 = vld [vmem:[#allocation15 + $0xf40] sm:$0xff] }
0x137e   :  { %3778 = vmatprep.subr.mxu0 %v2709_v48  ;;  %5062 = vmatpush1.msra.mxu1 %v4260_v29  ;;  %v2852_v48 = vld [vmem:[#allocation12 + $0xef0] sm:$0xff] }
0x137f   :  { %3779 = vmatpush1.msra.mxu0 %v2708_v49  ;;  %5063 = vmatprep.subr.mxu1 %v4253_v50  ;;  %v4397_v29 = vld [vmem:[#allocation15 + $0xf08] sm:$0xff]  ;;  %v2845_v49 = vld [vmem:[#allocation12 + $0xeb8] sm:$0xff]  ;;  %v4396_v50 = vld [vmem:[#allocation15 + $0xf00] sm:$0xff] }
0x1380   :  { %3780 = vmatprep.subr.mxu0 %v2701_v55  ;;  %5064 = vmatpush1.msra.mxu1 %v4252_v56  ;;  %v2844_v55 = vld [vmem:[#allocation12 + $0xeb0] sm:$0xff] }
0x1381   :  { %3781 = vmatpush1.msra.mxu0 %v2700_v57  ;;  %5065 = vmatprep.subr.mxu1 %v4245_v59  ;;  %v4389_v56 = vld [vmem:[#allocation15 + $0xec8] sm:$0xff]  ;;  %v2837_v57 = vld [vmem:[#allocation12 + $0xe78] sm:$0xff]  ;;  %v4388_v59 = vld [vmem:[#allocation15 + $0xec0] sm:$0xff] }
0x1382   :  { %3782 = vmatprep.subr.mxu0 %v2693_v60  ;;  %5066 = vmatpush1.msra.mxu1 %v4244_v61  ;;  %v2836_v60 = vld [vmem:[#allocation12 + $0xe70] sm:$0xff] }
0x1383   :  { %3783 = vmatpush1.msra.mxu0 %v2692_v0  ;;  %5067 = vmatprep.subr.mxu1 %v4237_v34  ;;  %v4381_v61 = vld [vmem:[#allocation15 + $0xe88] sm:$0xff]  ;;  %v2829_v0 = vld [vmem:[#allocation12 + $0xe38] sm:$0xff]  ;;  %v4380_v34 = vld [vmem:[#allocation15 + $0xe80] sm:$0xff] }
0x1384   :  { %3784 = vmatprep.subr.mxu0 %v2685_v58  ;;  %5068 = vmatpush1.msra.mxu1 %v4236_v43  ;;  %v2828_v58 = vld [vmem:[#allocation12 + $0xe30] sm:$0xff] }
0x1385   :  { %3785 = vmatpush1.msra.mxu0 %v2684_v35  ;;  %5069 = vmatprep.subr.mxu1 %v4229_v40  ;;  %v4373_v43 = vld [vmem:[#allocation15 + $0xe48] sm:$0xff]  ;;  %v2821_v35 = vld [vmem:[#allocation12 + $0xdf8] sm:$0xff]  ;;  %v4372_v40 = vld [vmem:[#allocation15 + $0xe40] sm:$0xff] }
0x1386   :  { %3786 = vmatprep.subr.mxu0 %v2677_v38  ;;  %5070 = vmatpush1.msra.mxu1 %v4228_v62  ;;  %v2820_v38 = vld [vmem:[#allocation12 + $0xdf0] sm:$0xff] }
0x1387   :  { %3787 = vmatpush1.msra.mxu0 %v2676_v3  ;;  %5071 = vmatprep.subr.mxu1 %v4221_v63  ;;  %v4365_v62 = vld [vmem:[#allocation15 + $0xe08] sm:$0xff]  ;;  %v2813_v3 = vld [vmem:[#allocation12 + $0xdb8] sm:$0xff]  ;;  %v4364_v63 = vld [vmem:[#allocation15 + $0xe00] sm:$0xff] }
0x1388   :  { %3788 = vmatprep.subr.mxu0 %v2669_v39  ;;  %5072 = vmatpush1.msra.mxu1 %v4220_v41  ;;  %v2812_v39 = vld [vmem:[#allocation12 + $0xdb0] sm:$0xff] }
0x1389   :  { %3789 = vmatpush1.msra.mxu0 %v2668_v42  ;;  %5073 = vmatprep.subr.mxu1 %v4213_v52  ;;  %v4357_v41 = vld [vmem:[#allocation15 + $0xdc8] sm:$0xff]  ;;  %v7857_v42 = vld [vmem:[#allocation13] sm:$0xff] }
0x138a   :  { %3790 = vmatprep.subr.mxu0 %v2661_v54  ;;  %5074 = vmatpush1.msra.mxu1 %v4212_v8  ;;  %v3023_v52 = vrot.slane %v7857_v42, %v7375_v45  ;;  %v2805_v54 = vld [vmem:[#allocation12 + $0xd78] sm:$0xff]  ;;  %v4356_v8 = vld [vmem:[#allocation15 + $0xdc0] sm:$0xff] }
0x138b   :  { %3791 = vmatpush1.msra.mxu0 %v2660_v12  ;;  %5075 = vmatprep.subr.mxu1 %v4205_v16  ;;  %v2804_v12 = vld [vmem:[#allocation12 + $0xd70] sm:$0xff] }
0x138c   :  { %3792 = vmatprep.subr.mxu0 %v2653_v7  ;;  %5076 = vmatpush1.msra.mxu1 %v4204_v20  ;;  %v4349_v16 = vld [vmem:[#allocation15 + $0xd88] sm:$0xff]  ;;  %v2797_v7 = vld [vmem:[#allocation12 + $0xd38] sm:$0xff]  ;;  %v4348_v20 = vld [vmem:[#allocation15 + $0xd80] sm:$0xff] }
0x138d   :  { %3793 = vmatpush1.msra.mxu0 %v2652_v24  ;;  %v3264_v21 = vpop.f32.mrf.mxu0  ;;  %5077 = vmatprep.subr.mxu1 %v4197_v26  ;;  %v2796_v24 = vld [vmem:[#allocation12 + $0xd30] sm:$0xff] }
0x138e   :  { %3794 = vmatprep.subr.mxu0 %v2645_v30  ;;  %v7855_v13 = vadd.f32 %v3264_v21, %v7844_v27  ;;  %5078 = vmatpush1.msra.mxu1 %v4196_v11  ;;  %v2869_v27 = vld [vmem:[#allocation12 + $0xf78] sm:$0xff]  ;;  %v4341_v26 = vld [vmem:[#allocation15 + $0xd48] sm:$0xff]  ;;  %v3125_v30 = vadd.f32 %v7852_v28, %v3023_v52 }
0x138f   :  { %3795 = vmatpush1.msra.mxu0 %v2644_v15  ;;  %5079 = vmatprep.subr.mxu1 %v4189_v19  ;;  %v2789_v11 = vld [vmem:[#allocation12 + $0xcf8] sm:$0xff]  ;;  %v4340_v15 = vld [vmem:[#allocation15 + $0xd40] sm:$0xff]  ;;  %v2788_v19 = vld [vmem:[#allocation12 + $0xcf0] sm:$0xff] }
0x1390   :  { %3796 = vmatprep.subr.mxu0 %v2637_v4  ;;  %5080 = vmatpush1.msra.mxu1 %v4188_v31  ;;  %v4333_v4 = vld [vmem:[#allocation15 + $0xd08] sm:$0xff]  ;;  %v2781_v21 = vld [vmem:[#allocation12 + $0xcb8] sm:$0xff]  ;;  %v4332_v31 = vld [vmem:[#allocation15 + $0xd00] sm:$0xff] }
0x1391   :  { %3797 = vmatpush1.msra.mxu0 %v2636_v32  ;;  %5081 = vmatprep.subr.mxu1 %v4181_v33  ;;  %v3195_v32 = vpop.f32.mrf.mxu1  ;;  %v3266_v33 = vpop.f32.mrf.mxu0  ;;  %v2773_v28 = vld [vmem:[#allocation12 + $0xc78] sm:$0xff]  ;;  %v3949_v52 = vld [vmem:[#allocation15 + $0x108] sm:$0xff] }
0x1392   :  { %3798 = vmatprep.subr.mxu0 %v2885_v51  ;;  %5082 = vmatpush1.msra.mxu1 %v4180_v2  ;;  %v2780_v51 = vld [vmem:[#allocation12 + $0xcb0] sm:$0xff] }
0x1393   :  { %3799 = vmatpush2.msra.mxu0 %v2884_v53  ;;  %5083 = vmatprep.subr.mxu1 %v4173_v5  ;;  %v4325_v2 = vld [vmem:[#allocation15 + $0xcc8] sm:$0xff]  ;;  %v3196_v53 = vadd.f32 %v3195_v32, %v3125_v30  ;;  %v4324_v5 = vld [vmem:[#allocation15 + $0xcc0] sm:$0xff] }
0x1394   :  { %3800 = vmatprep.subr.mxu0 %v2877_v9  ;;  %5084 = vmatpush1.msra.mxu1 %v4172_v17  ;;  %v2772_v9 = vld [vmem:[#allocation12 + $0xc70] sm:$0xff]  ;;  %v3916_v32 = vld [vmem:[#allocation15] sm:$0xff] }
0x1395   :  { %3801 = vmatpush2.msra.mxu0 %v2876_v23  ;;  %5085 = vmatprep.subr.mxu1 %v4421_v1  ;;  %v4317_v17 = vld [vmem:[#allocation15 + $0xc88] sm:$0xff]  ;;  %v3267_v23 = vadd.f32 %v3266_v33, %v3196_v53  ;;  %v2765_v1 = vld [vmem:[#allocation12 + $0xc38] sm:$0xff] }
0x1396   :  { %3802 = vmatprep.subr.mxu0 %v2869_v27  ;;  %5086 = vmatpush2.msra.mxu1 %v4420_v6  ;;  %v4316_v27 = vld [vmem:[#allocation15 + $0xc80] sm:$0xff]  ;;  %v2764_v6 = vld [vmem:[#allocation12 + $0xc30] sm:$0xff] }
0x1397   :  { %3803 = vmatpush2.msra.mxu0 %v2868_v10  ;;  %5087 = vmatprep.subr.mxu1 %v4413_v14  ;;  %v4309_v10 = vld [vmem:[#allocation15 + $0xc48] sm:$0xff] }
0x1398   :  { %3804 = vmatprep.subr.mxu0 %v2861_v18  ;;  %5088 = vmatpush2.msra.mxu1 %v4412_v22  ;;  %v4037_v14 = vld [vmem:[#allocation15 + $0x3c8] sm:$0xff]  ;;  %v4036_v18 = vld [vmem:[#allocation15 + $0x3c0] sm:$0xff]  ;;  %v7862_v22 = vmax.f32 %v3267_v23, 0.0 }
0x1399   :  { %3805 = vmatpush2.msra.mxu0 %v2860_v44  ;;  %5089 = vmatprep.subr.mxu1 %v4405_v25  ;;  %v4029_v44 = vld [vmem:[#allocation15 + $0x388] sm:$0xff]  ;;  %v4308_v25 = vld [vmem:[#allocation15 + $0xc40] sm:$0xff] }
0x139a   :  { %3806 = vmatprep.subr.mxu0 %v2853_v46  ;;  %5090 = vmatpush2.msra.mxu1 %v4404_v47  ;;  %v6901_v46 = vld [vmem:[#allocation2 + $0x10] sm:$0xff]  ;;  %v4028_v47 = vld [vmem:[#allocation15 + $0x380] sm:$0xff] }
0x139b   :  { %3807 = vmatpush2.msra.mxu0 %v2852_v48  ;;  %5091 = vmatprep.subr.mxu1 %v4397_v29  ;;  %v4301_v48 = vld [vmem:[#allocation15 + $0xc08] sm:$0xff] }
0x139c   :  { %3808 = vmatprep.subr.mxu0 %v2845_v49  ;;  %5092 = vmatpush2.msra.mxu1 %v4396_v50  ;;  %v4021_v29 = vld [vmem:[#allocation15 + $0x348] sm:$0xff]  ;;  %v4300_v49 = vld [vmem:[#allocation15 + $0xc00] sm:$0xff] }
0x139d   :  { %3809 = vmatpush2.msra.mxu0 %v2844_v55  ;;  %5093 = vmatprep.subr.mxu1 %v4389_v56  ;;  %v4020_v50 = vld [vmem:[#allocation15 + $0x340] sm:$0xff]  ;;  %v4013_v55 = vld [vmem:[#allocation15 + $0x308] sm:$0xff] }
0x139e   :  { %3810 = vmatprep.subr.mxu0 %v2837_v57  ;;  %5094 = vmatpush2.msra.mxu1 %v4388_v59  ;;  %v4012_v56 = vld [vmem:[#allocation15 + $0x300] sm:$0xff]  ;;  %v4005_v57 = vld [vmem:[#allocation15 + $0x2c8] sm:$0xff] }
0x139f   :  { %3811 = vmatpush2.msra.mxu0 %v2836_v60  ;;  %5095 = vmatprep.subr.mxu1 %v4381_v61  ;;  %v4004_v59 = vld [vmem:[#allocation15 + $0x2c0] sm:$0xff]  ;;  %v3997_v60 = vld [vmem:[#allocation15 + $0x288] sm:$0xff] }
0x13a0   :  { %3812 = vmatprep.subr.mxu0 %v2829_v0  ;;  %5096 = vmatpush2.msra.mxu1 %v4380_v34  ;;  %v3996_v61 = vld [vmem:[#allocation15 + $0x280] sm:$0xff]  ;;  %v3989_v0 = vld [vmem:[#allocation15 + $0x248] sm:$0xff] }
0x13a1   :  { %3813 = vmatpush2.msra.mxu0 %v2828_v58  ;;  %5097 = vmatprep.subr.mxu1 %v4373_v43  ;;  %v4805_v34 = vld [vmem:[#allocation15 + $0x1bc8] sm:$0xff]  ;;  %v3988_v58 = vld [vmem:[#allocation15 + $0x240] sm:$0xff] }
0x13a2   :  { %3814 = vmatprep.subr.mxu0 %v2821_v35  ;;  %5098 = vmatpush2.msra.mxu1 %v4372_v40  ;;  %v3981_v43 = vld [vmem:[#allocation15 + $0x208] sm:$0xff]  ;;  %v3980_v35 = vld [vmem:[#allocation15 + $0x200] sm:$0xff] }
0x13a3   :  { %3815 = vmatpush2.msra.mxu0 %v2820_v38  ;;  %5099 = vmatprep.subr.mxu1 %v4365_v62  ;;  %v3973_v40 = vld [vmem:[#allocation15 + $0x1c8] sm:$0xff]  ;;  %v3972_v38 = vld [vmem:[#allocation15 + $0x1c0] sm:$0xff] }
0x13a4   :  { %3816 = vmatprep.subr.mxu0 %v2813_v3  ;;  %5100 = vmatpush2.msra.mxu1 %v4364_v63  ;;  %v3965_v62 = vld [vmem:[#allocation15 + $0x188] sm:$0xff]  ;;  %v3964_v3 = vld [vmem:[#allocation15 + $0x180] sm:$0xff] }
0x13a5   :  { %3817 = vmatpush2.msra.mxu0 %v2812_v39  ;;  %5101 = vmatprep.subr.mxu1 %v4357_v41  ;;  %v3957_v63 = vld [vmem:[#allocation15 + $0x148] sm:$0xff]  ;;  %v3956_v39 = vld [vmem:[#allocation15 + $0x140] sm:$0xff]  ;;  %v3026_v41 = vsub.s32 2, %v7368_v36 }
0x13a6   :  { %3818 = vmatprep.subr.mxu0 %v2805_v54  ;;  %5102 = vmatpush2.msra.mxu1 %v4356_v8  ;;  %v3948_v54 = vld [vmem:[#allocation15 + $0x100] sm:$0xff]  ;;  %v3030_v8 = vsub.s32 3, %v7368_v36  ;;  %v4165_v53 = vld [vmem:[#allocation15 + $0x7c8] sm:$0xff] }
0x13a7   :  { %3819 = vmatpush2.msra.mxu0 %v2804_v12  ;;  %5103 = vmatprep.subr.mxu1 %v4349_v16  ;;  %v3941_v12 = vld [vmem:[#allocation15 + $0xc8] sm:$0xff]  ;;  %v3335_v16 = vpop.f32.mrf.mxu1 }
0x13a8   :  { %3820 = vmatprep.subr.mxu0 %v2797_v7  ;;  %5104 = vmatpush2.msra.mxu1 %v4348_v20  ;;  %v3940_v7 = vld [vmem:[#allocation15 + $0xc0] sm:$0xff]  ;;  %v3027_v20 = vrot.slane %v7857_v42, %v3026_v41  ;;  %v3031_v30 = vrot.slane %v7857_v42, %v3030_v8 }
0x13a9   :  { %3821 = vmatpush2.msra.mxu0 %v2796_v24  ;;  %5105 = vmatprep.subr.mxu1 %v4341_v26  ;;  %v3933_v24 = vld [vmem:[#allocation15 + $0x88] sm:$0xff]  ;;  %v3932_v26 = vld [vmem:[#allocation15 + $0x80] sm:$0xff] }
0x13aa   :  { %3822 = vmatprep.subr.mxu0 %v2789_v11  ;;  %5106 = vmatpush2.msra.mxu1 %v4340_v15  ;;  %v3925_v11 = vld [vmem:[#allocation15 + $0x48] sm:$0xff]  ;;  %v3337_v15 = vpop.f32.mrf.mxu1 }
0x13ab   :  { %3823 = vmatpush2.msra.mxu0 %v2788_v19  ;;  %5107 = vmatprep.subr.mxu1 %v4333_v4  ;;  %v3924_v19 = vld [vmem:[#allocation15 + $0x40] sm:$0xff]  ;;  %v3336_v4 = vadd.f32 %v3335_v16, %v3027_v20  ;;  %v4085_v16 = vld [vmem:[#allocation15 + $0x548] sm:$0xff] }
0x13ac   :  { %3824 = vmatprep.subr.mxu0 %v2781_v21  ;;  %5108 = vmatpush2.msra.mxu1 %v4332_v31  ;;  %v3917_v21 = vld [vmem:[#allocation15 + $0x8] sm:$0xff]  ;;  %v3477_v31 = vpop.f32.mrf.mxu1  ;;  %v4084_v20 = vld [vmem:[#allocation15 + $0x540] sm:$0xff] }
0x13ad   :  { %3825 = vmatpush2.msra.mxu0 %v2780_v51  ;;  %5109 = vmatprep.subr.mxu1 %v4325_v2  ;;  %v3338_v51 = vadd.f32 %v3337_v15, %v3031_v30  ;;  %v4741_v30 = vld [vmem:[#allocation15 + $0x19c8] sm:$0xff]  ;;  %v4740_v15 = vld [vmem:[#allocation15 + $0x19c0] sm:$0xff] }
0x13ae   :  { %3826 = vmatprep.subr.mxu0 %v2773_v28  ;;  %5110 = vmatpush2.msra.mxu1 %v4324_v5  ;;  %v4164_v28 = vld [vmem:[#allocation15 + $0x7c0] sm:$0xff]  ;;  %v3479_v23 = vpop.f32.mrf.mxu1 }
0x13af   :  { %3827 = vmatpush2.msra.mxu0 %v2772_v9  ;;  %5111 = vmatprep.subr.mxu1 %v4317_v17  ;;  %v4157_v17 = vld [vmem:[#allocation15 + $0x788] sm:$0xff] }
0x13b0   :  { %3828 = vmatprep.subr.mxu0 %v2765_v1  ;;  %5112 = vmatpush2.msra.mxu1 %v4316_v27  ;;  %v4156_v27 = vld [vmem:[#allocation15 + $0x780] sm:$0xff] }
0x13b1   :  { %3829 = vmatpush2.msra.mxu0 %v2764_v6  ;;  %5113 = vmatprep.subr.mxu1 %v4309_v10  ;;  %v4149_v10 = vld [vmem:[#allocation15 + $0x748] sm:$0xff] }
0x13b2   :  { %3831 = vmatmul.mubr.f32.vlgmr.msra.gmra.mxu0 %v6901_v46  ;;  %4982 = vmatprep.subr.mxu0 %v4037_v14  ;;  %v4148_v14 = vld [vmem:[#allocation15 + $0x740] sm:$0xff] }
0x13b3   :  { %4983 = vmatpush1.msra.mxu0 %v4036_v18  ;;  %5046 = vmatprep.mubr.f32.mxu0 %v7862_v22  ;;  %v4140_v46 = vld [vmem:[#allocation15 + $0x700] sm:$0xff] }
0x13b4   :  { %4984 = vmatprep.subr.mxu0 %v4029_v44  ;;  %5114 = vmatpush2.msra.mxu1 %v4308_v25  ;;  %v4141_v44 = vld [vmem:[#allocation15 + $0x708] sm:$0xff] }
0x13b5   :  { %4985 = vmatpush1.msra.mxu0 %v4028_v47  ;;  %5115 = vmatprep.subr.mxu1 %v4301_v48  ;;  %v4804_v47 = vld [vmem:[#allocation15 + $0x1bc0] sm:$0xff]  ;;  %v4133_v48 = vld [vmem:[#allocation15 + $0x6c8] sm:$0xff] }
0x13b6   :  { %4986 = vmatprep.subr.mxu0 %v4021_v29  ;;  %5116 = vmatpush2.msra.mxu1 %v4300_v49  ;;  %v4797_v29 = vld [vmem:[#allocation15 + $0x1b88] sm:$0xff]  ;;  %v4132_v49 = vld [vmem:[#allocation15 + $0x6c0] sm:$0xff] }
0x13b7   :  { %4987 = vmatpush1.msra.mxu0 %v4020_v50  ;;  %5195 = vmatprep.subr.mxu1 %v4805_v34  ;;  %v4796_v50 = vld [vmem:[#allocation15 + $0x1b80] sm:$0xff] }
0x13b8   :  { %4988 = vmatprep.subr.mxu0 %v4013_v55  ;;  %v4125_v55 = vld [vmem:[#allocation15 + $0x688] sm:$0xff]  ;;  %v4780_v34 = vld [vmem:[#allocation15 + $0x1b00] sm:$0xff] }
0x13b9   :  { %4989 = vmatpush1.msra.mxu0 %v4012_v56  ;;  %v4789_v56 = vld [vmem:[#allocation15 + $0x1b48] sm:$0xff] }
0x13ba   :  { %4990 = vmatprep.subr.mxu0 %v4005_v57  ;;  %v4124_v57 = vld [vmem:[#allocation15 + $0x680] sm:$0xff] }
0x13bb   :  { %4991 = vmatpush1.msra.mxu0 %v4004_v59  ;;  %v4788_v59 = vld [vmem:[#allocation15 + $0x1b40] sm:$0xff] }
0x13bc   :  { %4992 = vmatprep.subr.mxu0 %v3997_v60  ;;  %v4117_v60 = vld [vmem:[#allocation15 + $0x648] sm:$0xff] }
0x13bd   :  { %4993 = vmatpush1.msra.mxu0 %v3996_v61  ;;  %v4781_v61 = vld [vmem:[#allocation15 + $0x1b08] sm:$0xff] }
0x13be   :  { %4994 = vmatprep.subr.mxu0 %v3989_v0  ;;  %v4116_v0 = vld [vmem:[#allocation15 + $0x640] sm:$0xff] }
0x13bf   :  { %4995 = vmatpush1.msra.mxu0 %v3988_v58  ;;  %v4109_v58 = vld [vmem:[#allocation15 + $0x608] sm:$0xff] }
0x13c0   :  { %4996 = vmatprep.subr.mxu0 %v3981_v43  ;;  %v4773_v43 = vld [vmem:[#allocation15 + $0x1ac8] sm:$0xff] }
0x13c1   :  { %4997 = vmatpush1.msra.mxu0 %v3980_v35  ;;  %v4108_v35 = vld [vmem:[#allocation15 + $0x600] sm:$0xff] }
0x13c2   :  { %4998 = vmatprep.subr.mxu0 %v3973_v40  ;;  %v4772_v40 = vld [vmem:[#allocation15 + $0x1ac0] sm:$0xff] }
0x13c3   :  { %4999 = vmatpush1.msra.mxu0 %v3972_v38  ;;  %v4101_v38 = vld [vmem:[#allocation15 + $0x5c8] sm:$0xff] }
0x13c4   :  { %5000 = vmatprep.subr.mxu0 %v3965_v62  ;;  %v4765_v62 = vld [vmem:[#allocation15 + $0x1a88] sm:$0xff] }
0x13c5   :  { %5001 = vmatpush1.msra.mxu0 %v3964_v3  ;;  %v4100_v3 = vld [vmem:[#allocation15 + $0x5c0] sm:$0xff] }
0x13c6   :  { %5002 = vmatprep.subr.mxu0 %v3957_v63  ;;  %v4764_v63 = vld [vmem:[#allocation15 + $0x1a80] sm:$0xff] }
0x13c7   :  { %5003 = vmatpush1.msra.mxu0 %v3956_v39  ;;  %v4093_v39 = vld [vmem:[#allocation15 + $0x588] sm:$0xff] }
0x13c8   :  { %5004 = vmatprep.subr.mxu0 %v3949_v52  ;;  %v4757_v52 = vld [vmem:[#allocation15 + $0x1a48] sm:$0xff] }
0x13c9   :  { %5005 = vmatpush1.msra.mxu0 %v3948_v54  ;;  %v4092_v54 = vld [vmem:[#allocation15 + $0x580] sm:$0xff] }
0x13ca   :  { %5006 = vmatprep.subr.mxu0 %v3941_v12  ;;  %v4756_v12 = vld [vmem:[#allocation15 + $0x1a40] sm:$0xff] }
0x13cb   :  { %5007 = vmatpush1.msra.mxu0 %v3940_v7  ;;  %v4749_v7 = vld [vmem:[#allocation15 + $0x1a08] sm:$0xff] }
0x13cc   :  { %5008 = vmatprep.subr.mxu0 %v3933_v24  ;;  %v4748_v24 = vld [vmem:[#allocation15 + $0x1a00] sm:$0xff] }
0x13cd   :  { %5009 = vmatpush1.msra.mxu0 %v3932_v26  ;;  %v4077_v26 = vld [vmem:[#allocation15 + $0x508] sm:$0xff] }
0x13ce   :  { %5010 = vmatprep.subr.mxu0 %v3925_v11  ;;  %v3406_v33 = vpop.f32.mrf.mxu0  ;;  %v4076_v11 = vld [vmem:[#allocation15 + $0x500] sm:$0xff] }
0x13cf   :  { %5011 = vmatpush1.msra.mxu0 %v3924_v19  ;;  %v3407_v2 = vadd.f32 %v3406_v33, %v3336_v4  ;;  %v4069_v19 = vld [vmem:[#allocation15 + $0x4c8] sm:$0xff] }
0x13d0   :  { %5012 = vmatprep.subr.mxu0 %v3917_v21  ;;  %v3408_v5 = vpop.f32.mrf.mxu0  ;;  %v4733_v4 = vld [vmem:[#allocation15 + $0x1988] sm:$0xff]  ;;  %v4068_v21 = vld [vmem:[#allocation15 + $0x4c0] sm:$0xff] }
0x13d1   :  { %5013 = vmatpush1.msra.mxu0 %v3916_v32  ;;  %v3409_v9 = vadd.f32 %v3408_v5, %v3338_v51  ;;  %v3478_v1 = vadd.f32 %v3477_v31, %v3407_v2  ;;  %v4732_v31 = vld [vmem:[#allocation15 + $0x1980] sm:$0xff]  ;;  %v4061_v32 = vld [vmem:[#allocation15 + $0x488] sm:$0xff] }
0x13d2   :  { %5014 = vmatprep.subr.mxu0 %v4165_v53  ;;  %v4725_v33 = vld [vmem:[#allocation15 + $0x1948] sm:$0xff]  ;;  %v4060_v51 = vld [vmem:[#allocation15 + $0x480] sm:$0xff] }
0x13d3   :  { %5015 = vmatpush2.msra.mxu0 %v4164_v28  ;;  %v3480_v6 = vadd.f32 %v3479_v23, %v3409_v9  ;;  %v7875_v25 = vmax.f32 %v3478_v1, 0.0  ;;  %v4724_v2 = vld [vmem:[#allocation15 + $0x1940] sm:$0xff]  ;;  %v4053_v53 = vld [vmem:[#allocation15 + $0x448] sm:$0xff] }
0x13d4   :  { %5016 = vmatprep.subr.mxu0 %v4157_v17  ;;  %v4717_v28 = vld [vmem:[#allocation15 + $0x1908] sm:$0xff]  ;;  %v4052_v5 = vld [vmem:[#allocation15 + $0x440] sm:$0xff] }
0x13d5   :  { %v7873_v18 = vmax.f32 %v3480_v6, 0.0  ;;  %5017 = vmatpush2.msra.mxu0 %v4156_v27  ;;  %v4716_v9 = vld [vmem:[#allocation15 + $0x1900] sm:$0xff]  ;;  %v4045_v17 = vld [vmem:[#allocation15 + $0x408] sm:$0xff] }
0x13d6   :  { %5018 = vmatprep.subr.mxu0 %v4149_v10  ;;  %v4709_v23 = vld [vmem:[#allocation15 + $0x18c8] sm:$0xff]  ;;  %v4044_v1 = vld [vmem:[#allocation15 + $0x400] sm:$0xff]  ;;  %v7880_v10 = vmax.f32 %v7855_v13, 0.0 }
0x13d7   :  { %5019 = vmatpush2.msra.mxu0 %v4148_v14  ;;  %5117 = vmatprep.mubr.f32.mxu1 %v7873_v18  ;;  %v4708_v27 = vld [vmem:[#allocation15 + $0x18c0] sm:$0xff]  ;;  %v4549_v6 = vld [vmem:[#allocation15 + $0x13c8] sm:$0xff] }
0x13d8   :  { %5020 = vmatprep.subr.mxu0 %v4141_v44  ;;  %5118 = vmatmul.mubr.f32.vlgmr.msra.gmra.mxu1 %v7875_v25  ;;  %v4548_v14 = vld [vmem:[#allocation15 + $0x13c0] sm:$0xff]  ;;  %v4701_v44 = vld [vmem:[#allocation15 + $0x1888] sm:$0xff] }
0x13d9   :  { %5021 = vmatpush2.msra.mxu0 %v4140_v46  ;;  %5196 = vmatpush1.msra.mxu1 %v4804_v47  ;;  %v4541_v46 = vld [vmem:[#allocation15 + $0x1388] sm:$0xff]  ;;  %v4700_v47 = vld [vmem:[#allocation15 + $0x1880] sm:$0xff] }
0x13da   :  { %5022 = vmatprep.subr.mxu0 %v4133_v48  ;;  %5197 = vmatprep.subr.mxu1 %v4797_v29  ;;  %v4540_v48 = vld [vmem:[#allocation15 + $0x1380] sm:$0xff]  ;;  %v4693_v29 = vld [vmem:[#allocation15 + $0x1848] sm:$0xff] }
0x13db   :  { %5023 = vmatpush2.msra.mxu0 %v4132_v49  ;;  %5198 = vmatpush1.msra.mxu1 %v4796_v50  ;;  %v4533_v49 = vld [vmem:[#allocation15 + $0x1348] sm:$0xff]  ;;  %v4692_v50 = vld [vmem:[#allocation15 + $0x1840] sm:$0xff] }
0x13dc   :  { %5024 = vmatprep.subr.mxu0 %v4125_v55  ;;  %5199 = vmatprep.subr.mxu1 %v4789_v56  ;;  %v4532_v13 = vld [vmem:[#allocation15 + $0x1340] sm:$0xff]  ;;  %v4685_v55 = vld [vmem:[#allocation15 + $0x1808] sm:$0xff] }
0x13dd   :  { %5025 = vmatpush2.msra.mxu0 %v4124_v57  ;;  %5200 = vmatpush1.msra.mxu1 %v4788_v59  ;;  %v4525_v56 = vld [vmem:[#allocation15 + $0x1308] sm:$0xff]  ;;  %v4684_v57 = vld [vmem:[#allocation15 + $0x1800] sm:$0xff] }
0x13de   :  { %5026 = vmatprep.subr.mxu0 %v4117_v60  ;;  %5201 = vmatprep.subr.mxu1 %v4781_v61  ;;  %v4524_v59 = vld [vmem:[#allocation15 + $0x1300] sm:$0xff]  ;;  %v4933_v60 = vld [vmem:[#allocation15 + $0x1fc8] sm:$0xff] }
0x13df   :  { %5027 = vmatpush2.msra.mxu0 %v4116_v0  ;;  %5202 = vmatpush1.msra.mxu1 %v4780_v34  ;;  %v4517_v61 = vld [vmem:[#allocation15 + $0x12c8] sm:$0xff]  ;;  %v4932_v0 = vld [vmem:[#allocation15 + $0x1fc0] sm:$0xff] }
0x13e0   :  { %5028 = vmatprep.subr.mxu0 %v4109_v58  ;;  %5203 = vmatprep.subr.mxu1 %v4773_v43  ;;  %v4516_v34 = vld [vmem:[#allocation15 + $0x12c0] sm:$0xff]  ;;  %v4925_v58 = vld [vmem:[#allocation15 + $0x1f88] sm:$0xff] }
0x13e1   :  { %5029 = vmatpush2.msra.mxu0 %v4108_v35  ;;  %5204 = vmatpush1.msra.mxu1 %v4772_v40  ;;  %v4509_v43 = vld [vmem:[#allocation15 + $0x1288] sm:$0xff]  ;;  %v4924_v35 = vld [vmem:[#allocation15 + $0x1f80] sm:$0xff] }
0x13e2   :  { %5030 = vmatprep.subr.mxu0 %v4101_v38  ;;  %5205 = vmatprep.subr.mxu1 %v4765_v62  ;;  %v4508_v40 = vld [vmem:[#allocation15 + $0x1280] sm:$0xff]  ;;  %v4917_v38 = vld [vmem:[#allocation15 + $0x1f48] sm:$0xff] }
0x13e3   :  { %5031 = vmatpush2.msra.mxu0 %v4100_v3  ;;  %5206 = vmatpush1.msra.mxu1 %v4764_v63  ;;  %v4501_v62 = vld [vmem:[#allocation15 + $0x1248] sm:$0xff]  ;;  %v4916_v3 = vld [vmem:[#allocation15 + $0x1f40] sm:$0xff] }
0x13e4   :  { %5032 = vmatprep.subr.mxu0 %v4093_v39  ;;  %5207 = vmatprep.subr.mxu1 %v4757_v52  ;;  %v4500_v63 = vld [vmem:[#allocation15 + $0x1240] sm:$0xff]  ;;  %v4909_v39 = vld [vmem:[#allocation15 + $0x1f08] sm:$0xff] }
0x13e5   :  { %5033 = vmatpush2.msra.mxu0 %v4092_v54  ;;  %5208 = vmatpush1.msra.mxu1 %v4756_v12  ;;  %v4493_v52 = vld [vmem:[#allocation15 + $0x1208] sm:$0xff]  ;;  %v4908_v54 = vld [vmem:[#allocation15 + $0x1f00] sm:$0xff] }
0x13e6   :  { %5034 = vmatprep.subr.mxu0 %v4085_v16  ;;  %5209 = vmatprep.subr.mxu1 %v4749_v7  ;;  %v4492_v12 = vld [vmem:[#allocation15 + $0x1200] sm:$0xff]  ;;  %v4901_v16 = vld [vmem:[#allocation15 + $0x1ec8] sm:$0xff] }
0x13e7   :  { %5035 = vmatpush2.msra.mxu0 %v4084_v20  ;;  %5210 = vmatpush1.msra.mxu1 %v4748_v24  ;;  %v4485_v7 = vld [vmem:[#allocation15 + $0x11c8] sm:$0xff]  ;;  %v4900_v20 = vld [vmem:[#allocation15 + $0x1ec0] sm:$0xff] }
0x13e8   :  { %5036 = vmatprep.subr.mxu0 %v4077_v26  ;;  %5211 = vmatprep.subr.mxu1 %v4741_v30  ;;  %v4484_v24 = vld [vmem:[#allocation15 + $0x11c0] sm:$0xff]  ;;  %v4893_v26 = vld [vmem:[#allocation15 + $0x1e88] sm:$0xff] }
0x13e9   :  { %5037 = vmatpush2.msra.mxu0 %v4076_v11  ;;  %5212 = vmatpush1.msra.mxu1 %v4740_v15  ;;  %v4477_v30 = vld [vmem:[#allocation15 + $0x1188] sm:$0xff]  ;;  %v4892_v11 = vld [vmem:[#allocation15 + $0x1e80] sm:$0xff] }
0x13ea   :  { %5038 = vmatprep.subr.mxu0 %v4069_v19  ;;  %5213 = vmatprep.subr.mxu1 %v4733_v4  ;;  %v4476_v15 = vld [vmem:[#allocation15 + $0x1180] sm:$0xff]  ;;  %v4885_v19 = vld [vmem:[#allocation15 + $0x1e48] sm:$0xff] }
0x13eb   :  { %5039 = vmatpush2.msra.mxu0 %v4068_v21  ;;  %5214 = vmatpush1.msra.mxu1 %v4732_v31  ;;  %v4469_v4 = vld [vmem:[#allocation15 + $0x1148] sm:$0xff]  ;;  %v4884_v21 = vld [vmem:[#allocation15 + $0x1e40] sm:$0xff] }
0x13ec   :  { %5040 = vmatprep.subr.mxu0 %v4061_v32  ;;  %5215 = vmatprep.subr.mxu1 %v4725_v33  ;;  %v4468_v31 = vld [vmem:[#allocation15 + $0x1140] sm:$0xff]  ;;  %v4877_v32 = vld [vmem:[#allocation15 + $0x1e08] sm:$0xff] }
0x13ed   :  { %5041 = vmatpush2.msra.mxu0 %v4060_v51  ;;  %5216 = vmatpush1.msra.mxu1 %v4724_v2  ;;  %v4461_v33 = vld [vmem:[#allocation15 + $0x1108] sm:$0xff]  ;;  %v4876_v51 = vld [vmem:[#allocation15 + $0x1e00] sm:$0xff] }
0x13ee   :  { %5042 = vmatprep.subr.mxu0 %v4053_v53  ;;  %5217 = vmatprep.subr.mxu1 %v4717_v28  ;;  %v4460_v2 = vld [vmem:[#allocation15 + $0x1100] sm:$0xff]  ;;  %v4869_v53 = vld [vmem:[#allocation15 + $0x1dc8] sm:$0xff] }
0x13ef   :  { %5043 = vmatpush2.msra.mxu0 %v4052_v5  ;;  %5218 = vmatpush1.msra.mxu1 %v4716_v9  ;;  %v4453_v28 = vld [vmem:[#allocation15 + $0x10c8] sm:$0xff]  ;;  %v4868_v5 = vld [vmem:[#allocation15 + $0x1dc0] sm:$0xff] }
0x13f0   :  { %5044 = vmatprep.subr.mxu0 %v4045_v17  ;;  %5219 = vmatprep.subr.mxu1 %v4709_v23  ;;  %v4452_v9 = vld [vmem:[#allocation15 + $0x10c0] sm:$0xff]  ;;  %v4861_v17 = vld [vmem:[#allocation15 + $0x1d88] sm:$0xff] }
0x13f1   :  { %5045 = vmatpush2.msra.mxu0 %v4044_v1  ;;  %5220 = vmatpush1.msra.mxu1 %v4708_v27  ;;  %v4445_v23 = vld [vmem:[#allocation15 + $0x1088] sm:$0xff]  ;;  %v4860_v1 = vld [vmem:[#allocation15 + $0x1d80] sm:$0xff] }
0x13f2   :  { %5047 = vmatmul.mubr.f32.vlgmr.msra.gmra.mxu0 %v7880_v10  ;;  %5124 = vmatprep.subr.mxu0 %v4549_v6  ;;  %v4444_v27 = vld [vmem:[#allocation15 + $0x1080] sm:$0xff]  ;;  %v4853_v6 = vld [vmem:[#allocation15 + $0x1d48] sm:$0xff] }
0x13f3   :  { %5125 = vmatpush1.msra.mxu0 %v4548_v14  ;;  %5221 = vmatprep.subr.mxu1 %v4701_v44  ;;  %v4437_v14 = vld [vmem:[#allocation15 + $0x1048] sm:$0xff]  ;;  %v4852_v44 = vld [vmem:[#allocation15 + $0x1d40] sm:$0xff] }
0x13f4   :  { %5126 = vmatprep.subr.mxu0 %v4541_v46  ;;  %5222 = vmatpush1.msra.mxu1 %v4700_v47  ;;  %v4436_v46 = vld [vmem:[#allocation15 + $0x1040] sm:$0xff]  ;;  %v4845_v47 = vld [vmem:[#allocation15 + $0x1d08] sm:$0xff] }
0x13f5   :  { %5127 = vmatpush1.msra.mxu0 %v4540_v48  ;;  %5223 = vmatprep.subr.mxu1 %v4693_v29  ;;  %v4429_v48 = vld [vmem:[#allocation15 + $0x1008] sm:$0xff]  ;;  %v4844_v29 = vld [vmem:[#allocation15 + $0x1d00] sm:$0xff] }
0x13f6   :  { %5128 = vmatprep.subr.mxu0 %v4533_v49  ;;  %5224 = vmatpush1.msra.mxu1 %v4692_v50  ;;  %v4428_v49 = vld [vmem:[#allocation15 + $0x1000] sm:$0xff]  ;;  %v4837_v50 = vld [vmem:[#allocation15 + $0x1cc8] sm:$0xff] }
0x13f7   :  { %5129 = vmatpush1.msra.mxu0 %v4532_v13  ;;  %5225 = vmatprep.subr.mxu1 %v4685_v55  ;;  %v4677_v13 = vld [vmem:[#allocation15 + $0x17c8] sm:$0xff]  ;;  %v4836_v55 = vld [vmem:[#allocation15 + $0x1cc0] sm:$0xff] }
0x13f8   :  { %5130 = vmatprep.subr.mxu0 %v4525_v56  ;;  %5226 = vmatpush1.msra.mxu1 %v4684_v57  ;;  %v4676_v56 = vld [vmem:[#allocation15 + $0x17c0] sm:$0xff]  ;;  %v4829_v57 = vld [vmem:[#allocation15 + $0x1c88] sm:$0xff] }
0x13f9   :  { %5131 = vmatpush1.msra.mxu0 %v4524_v59  ;;  %5227 = vmatprep.subr.mxu1 %v4933_v60  ;;  %v4669_v59 = vld [vmem:[#allocation15 + $0x1788] sm:$0xff]  ;;  %v4828_v60 = vld [vmem:[#allocation15 + $0x1c80] sm:$0xff] }
0x13fa   :  { %5132 = vmatprep.subr.mxu0 %v4517_v61  ;;  %5228 = vmatpush2.msra.mxu1 %v4932_v0  ;;  %v4668_v61 = vld [vmem:[#allocation15 + $0x1780] sm:$0xff]  ;;  %v4821_v0 = vld [vmem:[#allocation15 + $0x1c48] sm:$0xff] }
0x13fb   :  { %5133 = vmatpush1.msra.mxu0 %v4516_v34  ;;  %5229 = vmatprep.subr.mxu1 %v4925_v58  ;;  %v4661_v34 = vld [vmem:[#allocation15 + $0x1748] sm:$0xff]  ;;  %v4820_v58 = vld [vmem:[#allocation15 + $0x1c40] sm:$0xff] }
0x13fc   :  { %5134 = vmatprep.subr.mxu0 %v4509_v43  ;;  %5230 = vmatpush2.msra.mxu1 %v4924_v35  ;;  %v4660_v43 = vld [vmem:[#allocation15 + $0x1740] sm:$0xff]  ;;  %v4813_v35 = vld [vmem:[#allocation15 + $0x1c08] sm:$0xff] }
0x13fd   :  { %5135 = vmatpush1.msra.mxu0 %v4508_v40  ;;  %5231 = vmatprep.subr.mxu1 %v4917_v38  ;;  %v4653_v40 = vld [vmem:[#allocation15 + $0x1708] sm:$0xff]  ;;  %v4812_v38 = vld [vmem:[#allocation15 + $0x1c00] sm:$0xff] }
0x13fe   :  { %5136 = vmatprep.subr.mxu0 %v4501_v62  ;;  %5232 = vmatpush2.msra.mxu1 %v4916_v3  ;;  %v4652_v62 = vld [vmem:[#allocation15 + $0x1700] sm:$0xff]  ;;  %v4295_v3 = vld [vmem:[#allocation15 + $0xbd8] sm:$0xff] }
0x13ff   :  { %5137 = vmatpush1.msra.mxu0 %v4500_v63  ;;  %5233 = vmatprep.subr.mxu1 %v4909_v39  ;;  %v4645_v63 = vld [vmem:[#allocation15 + $0x16c8] sm:$0xff]  ;;  %v4644_v39 = vld [vmem:[#allocation15 + $0x16c0] sm:$0xff] }
0x1400   :  { %5138 = vmatprep.subr.mxu0 %v4493_v52  ;;  %5234 = vmatpush2.msra.mxu1 %v4908_v54  ;;  %v4637_v52 = vld [vmem:[#allocation15 + $0x1688] sm:$0xff]  ;;  %v4636_v54 = vld [vmem:[#allocation15 + $0x1680] sm:$0xff] }
0x1401   :  { %5139 = vmatpush1.msra.mxu0 %v4492_v12  ;;  %5235 = vmatprep.subr.mxu1 %v4901_v16  ;;  %v4629_v12 = vld [vmem:[#allocation15 + $0x1648] sm:$0xff]  ;;  %v4628_v16 = vld [vmem:[#allocation15 + $0x1640] sm:$0xff] }
0x1402   :  { %5140 = vmatprep.subr.mxu0 %v4485_v7  ;;  %5236 = vmatpush2.msra.mxu1 %v4900_v20  ;;  %v4621_v7 = vld [vmem:[#allocation15 + $0x1608] sm:$0xff]  ;;  %v4620_v20 = vld [vmem:[#allocation15 + $0x1600] sm:$0xff] }
0x1403   :  { %5141 = vmatpush1.msra.mxu0 %v4484_v24  ;;  %5237 = vmatprep.subr.mxu1 %v4893_v26  ;;  %v4613_v24 = vld [vmem:[#allocation15 + $0x15c8] sm:$0xff]  ;;  %v4612_v26 = vld [vmem:[#allocation15 + $0x15c0] sm:$0xff] }
0x1404   :  { %5142 = vmatprep.subr.mxu0 %v4477_v30  ;;  %5238 = vmatpush2.msra.mxu1 %v4892_v11  ;;  %v4605_v30 = vld [vmem:[#allocation15 + $0x1588] sm:$0xff]  ;;  %v4604_v11 = vld [vmem:[#allocation15 + $0x1580] sm:$0xff] }
0x1405   :  { %5143 = vmatpush1.msra.mxu0 %v4476_v15  ;;  %5239 = vmatprep.subr.mxu1 %v4885_v19  ;;  %v4597_v15 = vld [vmem:[#allocation15 + $0x1548] sm:$0xff]  ;;  %v4596_v19 = vld [vmem:[#allocation15 + $0x1540] sm:$0xff] }
0x1406   :  { %5144 = vmatprep.subr.mxu0 %v4469_v4  ;;  %5240 = vmatpush2.msra.mxu1 %v4884_v21  ;;  %v4589_v4 = vld [vmem:[#allocation15 + $0x1508] sm:$0xff]  ;;  %v3034_v21 = vsub.s32 4, %v7368_v36 }
0x1407   :  { %5145 = vmatpush1.msra.mxu0 %v4468_v31  ;;  %5241 = vmatprep.subr.mxu1 %v4877_v32  ;;  %v4588_v31 = vld [vmem:[#allocation15 + $0x1500] sm:$0xff]  ;;  %v3038_v32 = vsub.s32 5, %v7368_v36 }
0x1408   :  { %5146 = vmatprep.subr.mxu0 %v4461_v33  ;;  %5242 = vmatpush2.msra.mxu1 %v4876_v51  ;;  %v4581_v33 = vld [vmem:[#allocation15 + $0x14c8] sm:$0xff] }
0x1409   :  { %5147 = vmatpush1.msra.mxu0 %v4460_v2  ;;  %5243 = vmatprep.subr.mxu1 %v4869_v53  ;;  %v4580_v2 = vld [vmem:[#allocation15 + $0x14c0] sm:$0xff]  ;;  %v4573_v53 = vld [vmem:[#allocation15 + $0x1488] sm:$0xff] }
0x140a   :  { %5148 = vmatprep.subr.mxu0 %v4453_v28  ;;  %5244 = vmatpush2.msra.mxu1 %v4868_v5  ;;  %v3035_v28 = vrot.slane %v7857_v42, %v3034_v21  ;;  %v4572_v5 = vld [vmem:[#allocation15 + $0x1480] sm:$0xff] }
0x140b   :  { %5149 = vmatpush1.msra.mxu0 %v4452_v9  ;;  %5245 = vmatprep.subr.mxu1 %v4861_v17  ;;  %v3039_v9 = vrot.slane %v7857_v42, %v3038_v32  ;;  %v4565_v17 = vld [vmem:[#allocation15 + $0x1448] sm:$0xff] }
0x140c   :  { %5150 = vmatprep.subr.mxu0 %v4445_v23  ;;  %5246 = vmatpush2.msra.mxu1 %v4860_v1  ;;  %v4564_v1 = vld [vmem:[#allocation15 + $0x1440] sm:$0xff] }
0x140d   :  { %5151 = vmatpush1.msra.mxu0 %v4444_v27  ;;  %5247 = vmatprep.subr.mxu1 %v4853_v6  ;;  %v4557_v27 = vld [vmem:[#allocation15 + $0x1408] sm:$0xff]  ;;  %v3619_v6 = vpop.f32.mrf.mxu1 }
0x140e   :  { %5152 = vmatprep.subr.mxu0 %v4437_v14  ;;  %5248 = vmatpush2.msra.mxu1 %v4852_v44  ;;  %v4556_v44 = vld [vmem:[#allocation15 + $0x1400] sm:$0xff] }
0x140f   :  { %5153 = vmatpush1.msra.mxu0 %v4436_v46  ;;  %5249 = vmatprep.subr.mxu1 %v4845_v47  ;;  %v4039_v47 = vld [vmem:[#allocation15 + $0x3d8] sm:$0xff] }
0x1410   :  { %5154 = vmatprep.subr.mxu0 %v4429_v48  ;;  %5250 = vmatpush2.msra.mxu1 %v4844_v29  ;;  %v3548_v51 = vpop.f32.mrf.mxu0  ;;  %v3621_v48 = vpop.f32.mrf.mxu1 }
0x1411   :  { %5155 = vmatpush1.msra.mxu0 %v4428_v49  ;;  %5251 = vmatprep.subr.mxu1 %v4837_v50  ;;  %v3549_v14 = vadd.f32 %v3548_v51, %v3035_v28  ;;  %v3919_v51 = vld [vmem:[#allocation15 + $0x18] sm:$0xff]  ;;  %v4166_v28 = vld [vmem:[#allocation15 + $0x7d0] sm:$0xff] }
0x1412   :  { %5156 = vmatprep.subr.mxu0 %v4677_v13  ;;  %5252 = vmatpush2.msra.mxu1 %v4836_v55  ;;  %v3550_v23 = vpop.f32.mrf.mxu0 }
0x1413   :  { %5157 = vmatpush2.msra.mxu0 %v4676_v56  ;;  %5253 = vmatprep.subr.mxu1 %v4829_v57  ;;  %v3551_v46 = vadd.f32 %v3550_v23, %v3039_v9  ;;  %v3620_v29 = vadd.f32 %v3619_v6, %v3549_v14  ;;  %v4158_v9 = vld [vmem:[#allocation15 + $0x790] sm:$0xff]  ;;  %v4135_v6 = vld [vmem:[#allocation15 + $0x6d8] sm:$0xff] }
0x1414   :  { %5158 = vmatprep.subr.mxu0 %v4669_v59  ;;  %5254 = vmatpush2.msra.mxu1 %v4828_v60  ;;  %v4038_v59 = vld [vmem:[#allocation15 + $0x3d0] sm:$0xff]  ;;  %v4031_v60 = vld [vmem:[#allocation15 + $0x398] sm:$0xff] }
0x1415   :  { %5159 = vmatpush2.msra.mxu0 %v4668_v61  ;;  %5255 = vmatprep.subr.mxu1 %v4821_v0  ;;  %v3622_v42 = vadd.f32 %v3621_v48, %v3551_v46  ;;  %v4030_v61 = vld [vmem:[#allocation15 + $0x390] sm:$0xff]  ;;  %v4023_v0 = vld [vmem:[#allocation15 + $0x358] sm:$0xff] }
0x1416   :  { %5160 = vmatprep.subr.mxu0 %v4661_v34  ;;  %5256 = vmatpush2.msra.mxu1 %v4820_v58  ;;  %v4022_v34 = vld [vmem:[#allocation15 + $0x350] sm:$0xff]  ;;  %v4015_v58 = vld [vmem:[#allocation15 + $0x318] sm:$0xff] }
0x1417   :  { %5161 = vmatpush2.msra.mxu0 %v4660_v43  ;;  %5257 = vmatprep.subr.mxu1 %v4813_v35  ;;  %v4014_v43 = vld [vmem:[#allocation15 + $0x310] sm:$0xff]  ;;  %v4007_v35 = vld [vmem:[#allocation15 + $0x2d8] sm:$0xff] }
0x1418   :  { %5162 = vmatprep.subr.mxu0 %v4653_v40  ;;  %5258 = vmatpush2.msra.mxu1 %v4812_v38  ;;  %v4006_v40 = vld [vmem:[#allocation15 + $0x2d0] sm:$0xff]  ;;  %v3999_v38 = vld [vmem:[#allocation15 + $0x298] sm:$0xff] }
0x1419   :  { %5163 = vmatpush2.msra.mxu0 %v4652_v62  ;;  %5337 = vmatprep.subr.mxu1 %v4295_v3  ;;  %v3998_v62 = vld [vmem:[#allocation15 + $0x290] sm:$0xff]  ;;  %v3991_v3 = vld [vmem:[#allocation15 + $0x258] sm:$0xff] }
0x141a   :  { %5164 = vmatprep.subr.mxu0 %v4645_v63  ;;  %v3990_v63 = vld [vmem:[#allocation15 + $0x250] sm:$0xff] }
0x141b   :  { %5165 = vmatpush2.msra.mxu0 %v4644_v39  ;;  %v3983_v39 = vld [vmem:[#allocation15 + $0x218] sm:$0xff]  ;;  %v4150_v23 = vld [vmem:[#allocation15 + $0x750] sm:$0xff] }
0x141c   :  { %5166 = vmatprep.subr.mxu0 %v4637_v52  ;;  %v3982_v52 = vld [vmem:[#allocation15 + $0x210] sm:$0xff] }
0x141d   :  { %5167 = vmatpush2.msra.mxu0 %v4636_v54  ;;  %v3975_v54 = vld [vmem:[#allocation15 + $0x1d8] sm:$0xff]  ;;  %v4134_v14 = vld [vmem:[#allocation15 + $0x6d0] sm:$0xff] }
0x141e   :  { %5168 = vmatprep.subr.mxu0 %v4629_v12  ;;  %v3974_v12 = vld [vmem:[#allocation15 + $0x1d0] sm:$0xff] }
0x141f   :  { %5169 = vmatpush2.msra.mxu0 %v4628_v16  ;;  %v3967_v16 = vld [vmem:[#allocation15 + $0x198] sm:$0xff]  ;;  %v4126_v46 = vld [vmem:[#allocation15 + $0x690] sm:$0xff] }
0x1420   :  { %5170 = vmatprep.subr.mxu0 %v4621_v7  ;;  %v3966_v7 = vld [vmem:[#allocation15 + $0x190] sm:$0xff] }
0x1421   :  { %5171 = vmatpush2.msra.mxu0 %v4620_v20  ;;  %v3959_v20 = vld [vmem:[#allocation15 + $0x158] sm:$0xff]  ;;  %v4118_v48 = vld [vmem:[#allocation15 + $0x650] sm:$0xff] }
0x1422   :  { %5172 = vmatprep.subr.mxu0 %v4613_v24  ;;  %v3958_v24 = vld [vmem:[#allocation15 + $0x150] sm:$0xff] }
0x1423   :  { %5173 = vmatpush2.msra.mxu0 %v4612_v26  ;;  %v3951_v26 = vld [vmem:[#allocation15 + $0x118] sm:$0xff] }
0x1424   :  { %5174 = vmatprep.subr.mxu0 %v4605_v30  ;;  %v3950_v30 = vld [vmem:[#allocation15 + $0x110] sm:$0xff] }
0x1425   :  { %5175 = vmatpush2.msra.mxu0 %v4604_v11  ;;  %v3943_v11 = vld [vmem:[#allocation15 + $0xd8] sm:$0xff] }
0x1426   :  { %5176 = vmatprep.subr.mxu0 %v4597_v15  ;;  %v3942_v15 = vld [vmem:[#allocation15 + $0xd0] sm:$0xff] }
0x1427   :  { %5177 = vmatpush2.msra.mxu0 %v4596_v19  ;;  %v3935_v19 = vld [vmem:[#allocation15 + $0x98] sm:$0xff] }
0x1428   :  { %5178 = vmatprep.subr.mxu0 %v4589_v4  ;;  %v3934_v4 = vld [vmem:[#allocation15 + $0x90] sm:$0xff] }
0x1429   :  { %5179 = vmatpush2.msra.mxu0 %v4588_v31  ;;  %v3927_v31 = vld [vmem:[#allocation15 + $0x58] sm:$0xff] }
0x142a   :  { %5180 = vmatprep.subr.mxu0 %v4581_v33  ;;  %v3926_v33 = vld [vmem:[#allocation15 + $0x50] sm:$0xff] }
0x142b   :  { %5181 = vmatpush2.msra.mxu0 %v4580_v2  ;;  %v3918_v2 = vld [vmem:[#allocation15 + $0x10] sm:$0xff] }
0x142c   :  { %5182 = vmatprep.subr.mxu0 %v4573_v53  ;;  %v4167_v53 = vld [vmem:[#allocation15 + $0x7d8] sm:$0xff] }
0x142d   :  { %5183 = vmatpush2.msra.mxu0 %v4572_v5  ;;  %v4159_v5 = vld [vmem:[#allocation15 + $0x798] sm:$0xff] }
0x142e   :  { %5184 = vmatprep.subr.mxu0 %v4565_v17  ;;  %v4151_v17 = vld [vmem:[#allocation15 + $0x758] sm:$0xff] }
0x142f   :  { %5185 = vmatpush2.msra.mxu0 %v4564_v1  ;;  %v4143_v1 = vld [vmem:[#allocation15 + $0x718] sm:$0xff] }
0x1430   :  { %5186 = vmatprep.subr.mxu0 %v4557_v27  ;;  %v4142_v27 = vld [vmem:[#allocation15 + $0x710] sm:$0xff] }
0x1431   :  { %5187 = vmatpush2.msra.mxu0 %v4556_v44  ;;  %v4127_v44 = vld [vmem:[#allocation15 + $0x698] sm:$0xff] }
0x1432   :  { %v3690_v49 = vpop.f32.mrf.mxu0  ;;  %5266 = vmatprep.subr.mxu0 %v4039_v47  ;;  %v4119_v47 = vld [vmem:[#allocation15 + $0x658] sm:$0xff] }
0x1433   :  { %v3691_v50 = vadd.f32 %v3690_v49, %v3620_v29  ;;  %v4111_v29 = vld [vmem:[#allocation15 + $0x618] sm:$0xff]  ;;  %v4110_v49 = vld [vmem:[#allocation15 + $0x610] sm:$0xff] }
0x1434   :  { %v3692_v13 = vpop.f32.mrf.mxu0 }
0x1435   :  { %v3693_v55 = vadd.f32 %v3692_v13, %v3622_v42  ;;  %v7893_v57 = vmax.f32 %v3691_v50, 0.0  ;;  %v4103_v42 = vld [vmem:[#allocation15 + $0x5d8] sm:$0xff]  ;;  %v4102_v50 = vld [vmem:[#allocation15 + $0x5d0] sm:$0xff]  ;;  %v3042_v13 = vsub.s32 6, %v7368_v36 }
0x1437   :  { %v7891_v56 = vmax.f32 %v3693_v55, 0.0  ;;  %v4095_v55 = vld [vmem:[#allocation15 + $0x598] sm:$0xff] }
0x1439   :  { %5188 = vmatprep.mubr.f32.mxu0 %v7891_v56 }
0x143a   :  { %5189 = vmatmul.mubr.f32.vlgmr.msra.gmra.mxu0 %v7893_v57 }
0x143b   :  { %5267 = vmatpush1.msra.mxu0 %v4038_v59  ;;  %5330 = vmatprep.mubr.f32.mxu0 %v7862_v22  ;;  %v4094_v59 = vld [vmem:[#allocation15 + $0x590] sm:$0xff] }
0x143c   :  { %5268 = vmatprep.subr.mxu0 %v4031_v60  ;;  %v3046_v60 = vsub.s32 7, %v7368_v36 }
0x143d   :  { %5269 = vmatpush1.msra.mxu0 %v4030_v61  ;;  %v4087_v61 = vld [vmem:[#allocation15 + $0x558] sm:$0xff] }
0x143e   :  { %5270 = vmatprep.subr.mxu0 %v4023_v0  ;;  %v3761_v0 = vpop.f32.mrf.mxu1 }
0x143f   :  { %5271 = vmatpush1.msra.mxu0 %v4022_v34  ;;  %v4086_v34 = vld [vmem:[#allocation15 + $0x550] sm:$0xff] }
0x1440   :  { %5272 = vmatprep.subr.mxu0 %v4015_v58  ;;  %v6902_v58 = vld [vmem:[#allocation13] sm:$0xff] }
0x1441   :  { %5273 = vmatpush1.msra.mxu0 %v4014_v43  ;;  %v3043_v43 = vrot.slane %v6902_v58, %v3042_v13 }
0x1442   :  { %5274 = vmatprep.subr.mxu0 %v4007_v35  ;;  %v4079_v35 = vld [vmem:[#allocation15 + $0x518] sm:$0xff] }
0x1443   :  { %5275 = vmatpush1.msra.mxu0 %v4006_v40  ;;  %v4078_v40 = vld [vmem:[#allocation15 + $0x510] sm:$0xff] }
0x1444   :  { %5276 = vmatprep.subr.mxu0 %v3999_v38  ;;  %v3047_v38 = vrot.slane %v6902_v58, %v3046_v60  ;;  %v4254_v58 = vld [vmem:[#allocation15 + $0xa90] sm:$0xff] }
0x1445   :  { %5277 = vmatpush1.msra.mxu0 %v3998_v62  ;;  %v4071_v62 = vld [vmem:[#allocation15 + $0x4d8] sm:$0xff] }
0x1446   :  { %5278 = vmatprep.subr.mxu0 %v3991_v3  ;;  %v3763_v3 = vpop.f32.mrf.mxu1 }
0x1447   :  { %5279 = vmatpush1.msra.mxu0 %v3990_v63  ;;  %v4070_v63 = vld [vmem:[#allocation15 + $0x4d0] sm:$0xff] }
0x1448   :  { %5280 = vmatprep.subr.mxu0 %v3983_v39  ;;  %v3762_v39 = vadd.f32 %v3761_v0, %v3043_v43  ;;  %v4255_v0 = vld [vmem:[#allocation15 + $0xa98] sm:$0xff]  ;;  %v4502_v43 = vld [vmem:[#allocation15 + $0x1250] sm:$0xff] }
0x1449   :  { %5281 = vmatpush1.msra.mxu0 %v3982_v52  ;;  %v4063_v52 = vld [vmem:[#allocation15 + $0x498] sm:$0xff] }
0x144a   :  { %5282 = vmatprep.subr.mxu0 %v3975_v54  ;;  %v3903_v54 = vpop.f32.mrf.mxu1 }
0x144b   :  { %5283 = vmatpush1.msra.mxu0 %v3974_v12 }
0x144c   :  { %5284 = vmatprep.subr.mxu0 %v3967_v16  ;;  %v4062_v16 = vld [vmem:[#allocation15 + $0x490] sm:$0xff] }
0x144d   :  { %5285 = vmatpush1.msra.mxu0 %v3966_v7  ;;  %v3764_v7 = vadd.f32 %v3763_v3, %v3047_v38  ;;  %v4246_v38 = vld [vmem:[#allocation15 + $0xa50] sm:$0xff]  ;;  %v4239_v3 = vld [vmem:[#allocation15 + $0xa18] sm:$0xff] }
0x144e   :  { %5286 = vmatprep.subr.mxu0 %v3959_v20 }
0x144f   :  { %5287 = vmatpush1.msra.mxu0 %v3958_v24  ;;  %v4055_v24 = vld [vmem:[#allocation15 + $0x458] sm:$0xff] }
0x1450   :  { %5288 = vmatprep.subr.mxu0 %v3951_v26 }
0x1451   :  { %5289 = vmatpush1.msra.mxu0 %v3950_v30  ;;  %v4054_v30 = vld [vmem:[#allocation15 + $0x450] sm:$0xff] }
0x1452   :  { %5290 = vmatprep.subr.mxu0 %v3943_v11 }
0x1453   :  { %5291 = vmatpush1.msra.mxu0 %v3942_v15  ;;  %v4047_v15 = vld [vmem:[#allocation15 + $0x418] sm:$0xff] }
0x1454   :  { %5292 = vmatprep.subr.mxu0 %v3935_v19  ;;  %v3905_v19 = vpop.f32.mrf.mxu1 }
0x1455   :  { %5293 = vmatpush1.msra.mxu0 %v3934_v4  ;;  %v4046_v4 = vld [vmem:[#allocation15 + $0x410] sm:$0xff] }
0x1456   :  { %5294 = vmatprep.subr.mxu0 %v3927_v31 }
0x1457   :  { %5295 = vmatpush1.msra.mxu0 %v3926_v33 }
0x1458   :  { %5296 = vmatprep.subr.mxu0 %v3919_v51  ;;  %v4551_v51 = vld [vmem:[#allocation15 + $0x13d8] sm:$0xff] }
0x1459   :  { %5297 = vmatpush1.msra.mxu0 %v3918_v2  ;;  %v4550_v2 = vld [vmem:[#allocation15 + $0x13d0] sm:$0xff] }
0x145a   :  { %5298 = vmatprep.subr.mxu0 %v4167_v53 }
0x145b   :  { %5299 = vmatpush2.msra.mxu0 %v4166_v28  ;;  %v4543_v28 = vld [vmem:[#allocation15 + $0x1398] sm:$0xff] }
0x145c   :  { %5300 = vmatprep.subr.mxu0 %v4159_v5  ;;  %v4542_v5 = vld [vmem:[#allocation15 + $0x1390] sm:$0xff] }
0x145d   :  { %5301 = vmatpush2.msra.mxu0 %v4158_v9 }
0x145e   :  { %5302 = vmatprep.subr.mxu0 %v4151_v17  ;;  %v4294_v17 = vld [vmem:[#allocation15 + $0xbd0] sm:$0xff] }
0x145f   :  { %5303 = vmatpush2.msra.mxu0 %v4150_v23  ;;  %v4287_v23 = vld [vmem:[#allocation15 + $0xb98] sm:$0xff] }
0x1460   :  { %5304 = vmatprep.subr.mxu0 %v4143_v1  ;;  %v4535_v1 = vld [vmem:[#allocation15 + $0x1358] sm:$0xff] }
0x1461   :  { %5305 = vmatpush2.msra.mxu0 %v4142_v27  ;;  %v4286_v27 = vld [vmem:[#allocation15 + $0xb90] sm:$0xff] }
0x1462   :  { %5306 = vmatprep.subr.mxu0 %v4135_v6  ;;  %v4534_v6 = vld [vmem:[#allocation15 + $0x1350] sm:$0xff] }
0x1463   :  { %5307 = vmatpush2.msra.mxu0 %v4134_v14  ;;  %v4279_v14 = vld [vmem:[#allocation15 + $0xb58] sm:$0xff] }
0x1464   :  { %5308 = vmatprep.subr.mxu0 %v4127_v44  ;;  %v4527_v44 = vld [vmem:[#allocation15 + $0x1318] sm:$0xff] }
0x1465   :  { %5309 = vmatpush2.msra.mxu0 %v4126_v46  ;;  %v4278_v46 = vld [vmem:[#allocation15 + $0xb50] sm:$0xff] }
0x1466   :  { %5310 = vmatprep.subr.mxu0 %v4119_v47  ;;  %v4526_v47 = vld [vmem:[#allocation15 + $0x1310] sm:$0xff] }
0x1467   :  { %5311 = vmatpush2.msra.mxu0 %v4118_v48  ;;  %v4271_v48 = vld [vmem:[#allocation15 + $0xb18] sm:$0xff] }
0x1468   :  { %5312 = vmatprep.subr.mxu0 %v4111_v29  ;;  %v4519_v29 = vld [vmem:[#allocation15 + $0x12d8] sm:$0xff] }
0x1469   :  { %5313 = vmatpush2.msra.mxu0 %v4110_v49  ;;  %v4270_v49 = vld [vmem:[#allocation15 + $0xb10] sm:$0xff] }
0x146a   :  { %5314 = vmatprep.subr.mxu0 %v4103_v42  ;;  %v4518_v42 = vld [vmem:[#allocation15 + $0x12d0] sm:$0xff] }
0x146b   :  { %5315 = vmatpush2.msra.mxu0 %v4102_v50  ;;  %v4263_v50 = vld [vmem:[#allocation15 + $0xad8] sm:$0xff] }
0x146c   :  { %5316 = vmatprep.subr.mxu0 %v4095_v55  ;;  %v4511_v55 = vld [vmem:[#allocation15 + $0x1298] sm:$0xff] }
0x146d   :  { %5317 = vmatpush2.msra.mxu0 %v4094_v59  ;;  %v4262_v59 = vld [vmem:[#allocation15 + $0xad0] sm:$0xff] }
0x146e   :  { %5318 = vmatprep.subr.mxu0 %v4087_v61  ;;  %v4510_v61 = vld [vmem:[#allocation15 + $0x1290] sm:$0xff] }
0x146f   :  { %5319 = vmatpush2.msra.mxu0 %v4086_v34  ;;  %v4503_v34 = vld [vmem:[#allocation15 + $0x1258] sm:$0xff] }
0x1470   :  { %5320 = vmatprep.subr.mxu0 %v4079_v35  ;;  %v4247_v35 = vld [vmem:[#allocation15 + $0xa58] sm:$0xff] }
0x1471   :  { %5321 = vmatpush2.msra.mxu0 %v4078_v40  ;;  %v4495_v40 = vld [vmem:[#allocation15 + $0x1218] sm:$0xff] }
0x1472   :  { %5322 = vmatprep.subr.mxu0 %v4071_v62  ;;  %v3832_v12 = vpop.f32.mrf.mxu0  ;;  %v4494_v62 = vld [vmem:[#allocation15 + $0x1210] sm:$0xff] }
0x1473   :  { %v3833_v20 = vadd.f32 %v3832_v12, %v3762_v39  ;;  %5323 = vmatpush2.msra.mxu0 %v4070_v63  ;;  %v4487_v63 = vld [vmem:[#allocation15 + $0x11d8] sm:$0xff]  ;;  %v4238_v39 = vld [vmem:[#allocation15 + $0xa10] sm:$0xff] }
0x1474   :  { %5324 = vmatprep.subr.mxu0 %v4063_v52  ;;  %v3834_v26 = vpop.f32.mrf.mxu0  ;;  %v4486_v52 = vld [vmem:[#allocation15 + $0x11d0] sm:$0xff]  ;;  %v4479_v12 = vld [vmem:[#allocation15 + $0x1198] sm:$0xff] }
0x1475   :  { %v3835_v11 = vadd.f32 %v3834_v26, %v3764_v7  ;;  %5325 = vmatpush2.msra.mxu0 %v4062_v16  ;;  %v3904_v31 = vadd.f32 %v3903_v54, %v3833_v20  ;;  %v4231_v54 = vld [vmem:[#allocation15 + $0x9d8] sm:$0xff]  ;;  %v4230_v16 = vld [vmem:[#allocation15 + $0x9d0] sm:$0xff] }
0x1476   :  { %5326 = vmatprep.subr.mxu0 %v4055_v24  ;;  %v4478_v7 = vld [vmem:[#allocation15 + $0x1190] sm:$0xff]  ;;  %v4223_v20 = vld [vmem:[#allocation15 + $0x998] sm:$0xff] }
0x1477   :  { %v3906_v33 = vadd.f32 %v3905_v19, %v3835_v11  ;;  %5327 = vmatpush2.msra.mxu0 %v4054_v30  ;;  %v7907_v9 = vmax.f32 %v3904_v31, 0.0  ;;  %v4471_v24 = vld [vmem:[#allocation15 + $0x1158] sm:$0xff]  ;;  %v4222_v26 = vld [vmem:[#allocation15 + $0x990] sm:$0xff] }
0x1478   :  { %5328 = vmatprep.subr.mxu0 %v4047_v15  ;;  %v4470_v30 = vld [vmem:[#allocation15 + $0x1150] sm:$0xff]  ;;  %v4215_v11 = vld [vmem:[#allocation15 + $0x958] sm:$0xff] }
0x1479   :  { %v7904_v53 = vmax.f32 %v3906_v33, 0.0  ;;  %5329 = vmatpush2.msra.mxu0 %v4046_v4  ;;  %v4463_v15 = vld [vmem:[#allocation15 + $0x1118] sm:$0xff]  ;;  %v4214_v19 = vld [vmem:[#allocation15 + $0x950] sm:$0xff] }
0x147a   :  { %5331 = vmatmul.mubr.f32.vlgmr.msra.gmra.mxu0 %v7880_v10  ;;  %5408 = vmatprep.subr.mxu0 %v4551_v51  ;;  %v4462_v4 = vld [vmem:[#allocation15 + $0x1110] sm:$0xff]  ;;  %v4207_v31 = vld [vmem:[#allocation15 + $0x918] sm:$0xff] }
0x147b   :  { %5409 = vmatpush1.msra.mxu0 %v4550_v2  ;;  %5472 = vmatprep.mubr.f32.mxu0 %v7891_v56  ;;  %v4455_v33 = vld [vmem:[#allocation15 + $0x10d8] sm:$0xff]  ;;  %v4206_v51 = vld [vmem:[#allocation15 + $0x910] sm:$0xff] }
0x147c   :  { %5259 = vmatprep.mubr.f32.mxu1 %v7904_v53  ;;  %5410 = vmatprep.subr.mxu0 %v4543_v28  ;;  %v4454_v2 = vld [vmem:[#allocation15 + $0x10d0] sm:$0xff]  ;;  %v4199_v28 = vld [vmem:[#allocation15 + $0x8d8] sm:$0xff] }
0x147d   :  { %5260 = vmatmul.mubr.f32.vlgmr.msra.gmra.mxu1 %v7907_v9  ;;  %5411 = vmatpush1.msra.mxu0 %v4542_v5  ;;  %v4447_v5 = vld [vmem:[#allocation15 + $0x1098] sm:$0xff] }
0x147e   :  { %5338 = vmatpush1.msra.mxu1 %v4294_v17  ;;  %5401 = vmatprep.mubr.f32.mxu1 %v7873_v18  ;;  %v4198_v17 = vld [vmem:[#allocation15 + $0x8d0] sm:$0xff] }
0x147f   :  { %5339 = vmatprep.subr.mxu1 %v4287_v23  ;;  %5412 = vmatprep.subr.mxu0 %v4535_v1  ;;  %v4446_v23 = vld [vmem:[#allocation15 + $0x1090] sm:$0xff]  ;;  %v4191_v1 = vld [vmem:[#allocation15 + $0x898] sm:$0xff] }
0x1480   :  { %5340 = vmatpush1.msra.mxu1 %v4286_v27  ;;  %5413 = vmatpush1.msra.mxu0 %v4534_v6  ;;  %v4439_v27 = vld [vmem:[#allocation15 + $0x1058] sm:$0xff]  ;;  %v4190_v6 = vld [vmem:[#allocation15 + $0x890] sm:$0xff] }
0x1481   :  { %5341 = vmatprep.subr.mxu1 %v4279_v14  ;;  %5414 = vmatprep.subr.mxu0 %v4527_v44  ;;  %v4438_v14 = vld [vmem:[#allocation15 + $0x1050] sm:$0xff]  ;;  %v4183_v44 = vld [vmem:[#allocation15 + $0x858] sm:$0xff] }
0x1482   :  { %5342 = vmatpush1.msra.mxu1 %v4278_v46  ;;  %5415 = vmatpush1.msra.mxu0 %v4526_v47  ;;  %v4431_v46 = vld [vmem:[#allocation15 + $0x1018] sm:$0xff]  ;;  %v4182_v47 = vld [vmem:[#allocation15 + $0x850] sm:$0xff] }
0x1483   :  { %5343 = vmatprep.subr.mxu1 %v4271_v48  ;;  %5416 = vmatprep.subr.mxu0 %v4519_v29  ;;  %v4430_v48 = vld [vmem:[#allocation15 + $0x1010] sm:$0xff]  ;;  %v4175_v29 = vld [vmem:[#allocation15 + $0x818] sm:$0xff] }
0x1484   :  { %5344 = vmatpush1.msra.mxu1 %v4270_v49  ;;  %5417 = vmatpush1.msra.mxu0 %v4518_v42  ;;  %v4679_v49 = vld [vmem:[#allocation15 + $0x17d8] sm:$0xff]  ;;  %v4174_v42 = vld [vmem:[#allocation15 + $0x810] sm:$0xff] }
0x1485   :  { %5345 = vmatprep.subr.mxu1 %v4263_v50  ;;  %5418 = vmatprep.subr.mxu0 %v4511_v55  ;;  %v4678_v50 = vld [vmem:[#allocation15 + $0x17d0] sm:$0xff]  ;;  %v4423_v55 = vld [vmem:[#allocation15 + $0xfd8] sm:$0xff] }
0x1486   :  { %5346 = vmatpush1.msra.mxu1 %v4262_v59  ;;  %5419 = vmatpush1.msra.mxu0 %v4510_v61  ;;  %v4671_v59 = vld [vmem:[#allocation15 + $0x1798] sm:$0xff]  ;;  %v4422_v61 = vld [vmem:[#allocation15 + $0xfd0] sm:$0xff] }
0x1487   :  { %5347 = vmatprep.subr.mxu1 %v4255_v0  ;;  %5420 = vmatprep.subr.mxu0 %v4503_v34  ;;  %v4670_v0 = vld [vmem:[#allocation15 + $0x1790] sm:$0xff]  ;;  %v4415_v34 = vld [vmem:[#allocation15 + $0xf98] sm:$0xff] }
0x1488   :  { %5348 = vmatpush1.msra.mxu1 %v4254_v58  ;;  %5421 = vmatpush1.msra.mxu0 %v4502_v43  ;;  %v4663_v58 = vld [vmem:[#allocation15 + $0x1758] sm:$0xff]  ;;  %v4414_v43 = vld [vmem:[#allocation15 + $0xf90] sm:$0xff] }
0x1489   :  { %5349 = vmatprep.subr.mxu1 %v4247_v35  ;;  %5422 = vmatprep.subr.mxu0 %v4495_v40  ;;  %v4662_v35 = vld [vmem:[#allocation15 + $0x1750] sm:$0xff]  ;;  %v4407_v40 = vld [vmem:[#allocation15 + $0xf58] sm:$0xff] }
0x148a   :  { %5350 = vmatpush1.msra.mxu1 %v4246_v38  ;;  %5423 = vmatpush1.msra.mxu0 %v4494_v62  ;;  %v4655_v38 = vld [vmem:[#allocation15 + $0x1718] sm:$0xff]  ;;  %v4406_v62 = vld [vmem:[#allocation15 + $0xf50] sm:$0xff] }
0x148b   :  { %5351 = vmatprep.subr.mxu1 %v4239_v3  ;;  %5424 = vmatprep.subr.mxu0 %v4487_v63  ;;  %v4654_v3 = vld [vmem:[#allocation15 + $0x1710] sm:$0xff]  ;;  %v4399_v63 = vld [vmem:[#allocation15 + $0xf18] sm:$0xff] }
0x148c   :  { %5352 = vmatpush1.msra.mxu1 %v4238_v39  ;;  %5425 = vmatpush1.msra.mxu0 %v4486_v52  ;;  %v4647_v39 = vld [vmem:[#allocation15 + $0x16d8] sm:$0xff]  ;;  %v4398_v52 = vld [vmem:[#allocation15 + $0xf10] sm:$0xff] }
0x148d   :  { %5353 = vmatprep.subr.mxu1 %v4231_v54  ;;  %5426 = vmatprep.subr.mxu0 %v4479_v12  ;;  %v4646_v54 = vld [vmem:[#allocation15 + $0x16d0] sm:$0xff]  ;;  %v4391_v12 = vld [vmem:[#allocation15 + $0xed8] sm:$0xff] }
0x148e   :  { %5354 = vmatpush1.msra.mxu1 %v4230_v16  ;;  %5427 = vmatpush1.msra.mxu0 %v4478_v7  ;;  %v4639_v16 = vld [vmem:[#allocation15 + $0x1698] sm:$0xff]  ;;  %v4390_v7 = vld [vmem:[#allocation15 + $0xed0] sm:$0xff] }
0x148f   :  { %5355 = vmatprep.subr.mxu1 %v4223_v20  ;;  %5428 = vmatprep.subr.mxu0 %v4471_v24  ;;  %v4638_v20 = vld [vmem:[#allocation15 + $0x1690] sm:$0xff]  ;;  %v4383_v24 = vld [vmem:[#allocation15 + $0xe98] sm:$0xff] }
0x1490   :  { %5356 = vmatpush1.msra.mxu1 %v4222_v26  ;;  %5429 = vmatpush1.msra.mxu0 %v4470_v30  ;;  %v4631_v26 = vld [vmem:[#allocation15 + $0x1658] sm:$0xff]  ;;  %v4382_v30 = vld [vmem:[#allocation15 + $0xe90] sm:$0xff] }
0x1491   :  { %5357 = vmatprep.subr.mxu1 %v4215_v11  ;;  %5430 = vmatprep.subr.mxu0 %v4463_v15  ;;  %v4630_v11 = vld [vmem:[#allocation15 + $0x1650] sm:$0xff]  ;;  %v4375_v15 = vld [vmem:[#allocation15 + $0xe58] sm:$0xff] }
0x1492   :  { %5358 = vmatpush1.msra.mxu1 %v4214_v19  ;;  %5431 = vmatpush1.msra.mxu0 %v4462_v4  ;;  %v4623_v19 = vld [vmem:[#allocation15 + $0x1618] sm:$0xff]  ;;  %v4374_v4 = vld [vmem:[#allocation15 + $0xe50] sm:$0xff] }
0x1493   :  { %5359 = vmatprep.subr.mxu1 %v4207_v31  ;;  %5432 = vmatprep.subr.mxu0 %v4455_v33  ;;  %v4622_v31 = vld [vmem:[#allocation15 + $0x1610] sm:$0xff]  ;;  %v4367_v33 = vld [vmem:[#allocation15 + $0xe18] sm:$0xff] }
0x1494   :  { %5360 = vmatpush1.msra.mxu1 %v4206_v51  ;;  %5433 = vmatpush1.msra.mxu0 %v4454_v2  ;;  %v4615_v51 = vld [vmem:[#allocation15 + $0x15d8] sm:$0xff]  ;;  %v4366_v2 = vld [vmem:[#allocation15 + $0xe10] sm:$0xff] }
0x1495   :  { %5361 = vmatprep.subr.mxu1 %v4199_v28  ;;  %5434 = vmatprep.subr.mxu0 %v4447_v5  ;;  %v4614_v28 = vld [vmem:[#allocation15 + $0x15d0] sm:$0xff]  ;;  %v4359_v5 = vld [vmem:[#allocation15 + $0xdd8] sm:$0xff] }
0x1496   :  { %5362 = vmatpush1.msra.mxu1 %v4198_v17  ;;  %5435 = vmatpush1.msra.mxu0 %v4446_v23  ;;  %v4607_v17 = vld [vmem:[#allocation15 + $0x1598] sm:$0xff]  ;;  %v4358_v23 = vld [vmem:[#allocation15 + $0xdd0] sm:$0xff] }
0x1497   :  { %5363 = vmatprep.subr.mxu1 %v4191_v1  ;;  %5436 = vmatprep.subr.mxu0 %v4439_v27  ;;  %v4606_v1 = vld [vmem:[#allocation15 + $0x1590] sm:$0xff]  ;;  %v4351_v27 = vld [vmem:[#allocation15 + $0xd98] sm:$0xff] }
0x1498   :  { %5364 = vmatpush1.msra.mxu1 %v4190_v6  ;;  %5437 = vmatpush1.msra.mxu0 %v4438_v14  ;;  %v4599_v6 = vld [vmem:[#allocation15 + $0x1558] sm:$0xff]  ;;  %v4350_v14 = vld [vmem:[#allocation15 + $0xd90] sm:$0xff] }
0x1499   :  { %5365 = vmatprep.subr.mxu1 %v4183_v44  ;;  %5438 = vmatprep.subr.mxu0 %v4431_v46  ;;  %v4598_v44 = vld [vmem:[#allocation15 + $0x1550] sm:$0xff]  ;;  %v4343_v46 = vld [vmem:[#allocation15 + $0xd58] sm:$0xff] }
0x149a   :  { %5366 = vmatpush1.msra.mxu1 %v4182_v47  ;;  %5439 = vmatpush1.msra.mxu0 %v4430_v48  ;;  %v4591_v47 = vld [vmem:[#allocation15 + $0x1518] sm:$0xff]  ;;  %v4342_v48 = vld [vmem:[#allocation15 + $0xd50] sm:$0xff] }
0x149b   :  { %5367 = vmatprep.subr.mxu1 %v4175_v29  ;;  %5440 = vmatprep.subr.mxu0 %v4679_v49  ;;  %v4590_v29 = vld [vmem:[#allocation15 + $0x1510] sm:$0xff]  ;;  %v4335_v49 = vld [vmem:[#allocation15 + $0xd18] sm:$0xff] }
0x149c   :  { %5368 = vmatpush1.msra.mxu1 %v4174_v42  ;;  %5441 = vmatpush2.msra.mxu0 %v4678_v50  ;;  %v4583_v42 = vld [vmem:[#allocation15 + $0x14d8] sm:$0xff]  ;;  %v4334_v50 = vld [vmem:[#allocation15 + $0xd10] sm:$0xff] }
0x149d   :  { %5369 = vmatprep.subr.mxu1 %v4423_v55  ;;  %5442 = vmatprep.subr.mxu0 %v4671_v59  ;;  %v4582_v55 = vld [vmem:[#allocation15 + $0x14d0] sm:$0xff]  ;;  %v4327_v59 = vld [vmem:[#allocation15 + $0xcd8] sm:$0xff] }
0x149e   :  { %5370 = vmatpush2.msra.mxu1 %v4422_v61  ;;  %5443 = vmatpush2.msra.mxu0 %v4670_v0  ;;  %v4575_v61 = vld [vmem:[#allocation15 + $0x1498] sm:$0xff]  ;;  %v4326_v0 = vld [vmem:[#allocation15 + $0xcd0] sm:$0xff] }
0x149f   :  { %5371 = vmatprep.subr.mxu1 %v4415_v34  ;;  %5444 = vmatprep.subr.mxu0 %v4663_v58  ;;  %v4574_v34 = vld [vmem:[#allocation15 + $0x1490] sm:$0xff]  ;;  %v4319_v58 = vld [vmem:[#allocation15 + $0xc98] sm:$0xff] }
0x14a0   :  { %5372 = vmatpush2.msra.mxu1 %v4414_v43  ;;  %5445 = vmatpush2.msra.mxu0 %v4662_v35  ;;  %v4567_v43 = vld [vmem:[#allocation15 + $0x1458] sm:$0xff]  ;;  %v4318_v35 = vld [vmem:[#allocation15 + $0xc90] sm:$0xff] }
0x14a1   :  { %5373 = vmatprep.subr.mxu1 %v4407_v40  ;;  %5446 = vmatprep.subr.mxu0 %v4655_v38  ;;  %v4566_v40 = vld [vmem:[#allocation15 + $0x1450] sm:$0xff]  ;;  %v4311_v38 = vld [vmem:[#allocation15 + $0xc58] sm:$0xff] }
0x14a2   :  { %5374 = vmatpush2.msra.mxu1 %v4406_v62  ;;  %5447 = vmatpush2.msra.mxu0 %v4654_v3  ;;  %v4559_v62 = vld [vmem:[#allocation15 + $0x1418] sm:$0xff]  ;;  %v4310_v3 = vld [vmem:[#allocation15 + $0xc50] sm:$0xff] }
0x14a3   :  { %5375 = vmatprep.subr.mxu1 %v4399_v63  ;;  %5448 = vmatprep.subr.mxu0 %v4647_v39  ;;  %v4558_v63 = vld [vmem:[#allocation15 + $0x1410] sm:$0xff]  ;;  %v4303_v39 = vld [vmem:[#allocation15 + $0xc18] sm:$0xff] }
0x14a4   :  { %5376 = vmatpush2.msra.mxu1 %v4398_v52  ;;  %5449 = vmatpush2.msra.mxu0 %v4646_v54  ;;  %v4041_v52 = vld [vmem:[#allocation15 + $0x3e8] sm:$0xff]  ;;  %v4302_v54 = vld [vmem:[#allocation15 + $0xc10] sm:$0xff] }
0x14a5   :  { %5377 = vmatprep.subr.mxu1 %v4391_v12  ;;  %5450 = vmatprep.subr.mxu0 %v4639_v16  ;;  %v4040_v12 = vld [vmem:[#allocation15 + $0x3e0] sm:$0xff]  ;;  %v4807_v16 = vld [vmem:[#allocation15 + $0x1bd8] sm:$0xff] }
0x14a6   :  { %5378 = vmatpush2.msra.mxu1 %v4390_v7  ;;  %5451 = vmatpush2.msra.mxu0 %v4638_v20  ;;  %v4033_v7 = vld [vmem:[#allocation15 + $0x3a8] sm:$0xff]  ;;  %v4806_v20 = vld [vmem:[#allocation15 + $0x1bd0] sm:$0xff] }
0x14a7   :  { %5379 = vmatprep.subr.mxu1 %v4383_v24  ;;  %5452 = vmatprep.subr.mxu0 %v4631_v26  ;;  %v4032_v24 = vld [vmem:[#allocation15 + $0x3a0] sm:$0xff]  ;;  %v4799_v26 = vld [vmem:[#allocation15 + $0x1b98] sm:$0xff] }
0x14a8   :  { %5380 = vmatpush2.msra.mxu1 %v4382_v30  ;;  %5453 = vmatpush2.msra.mxu0 %v4630_v11  ;;  %v4025_v30 = vld [vmem:[#allocation15 + $0x368] sm:$0xff]  ;;  %v4798_v11 = vld [vmem:[#allocation15 + $0x1b90] sm:$0xff] }
0x14a9   :  { %5381 = vmatprep.subr.mxu1 %v4375_v15  ;;  %5454 = vmatprep.subr.mxu0 %v4623_v19  ;;  %v4024_v15 = vld [vmem:[#allocation15 + $0x360] sm:$0xff]  ;;  %v4791_v19 = vld [vmem:[#allocation15 + $0x1b58] sm:$0xff] }
0x14aa   :  { %5382 = vmatpush2.msra.mxu1 %v4374_v4  ;;  %5455 = vmatpush2.msra.mxu0 %v4622_v31  ;;  %v4017_v4 = vld [vmem:[#allocation15 + $0x328] sm:$0xff]  ;;  %v4790_v31 = vld [vmem:[#allocation15 + $0x1b50] sm:$0xff] }
0x14ab   :  { %5383 = vmatprep.subr.mxu1 %v4367_v33  ;;  %5456 = vmatprep.subr.mxu0 %v4615_v51  ;;  %v4016_v33 = vld [vmem:[#allocation15 + $0x320] sm:$0xff]  ;;  %v4783_v51 = vld [vmem:[#allocation15 + $0x1b18] sm:$0xff] }
0x14ac   :  { %5384 = vmatpush2.msra.mxu1 %v4366_v2  ;;  %5457 = vmatpush2.msra.mxu0 %v4614_v28  ;;  %v4009_v2 = vld [vmem:[#allocation15 + $0x2e8] sm:$0xff]  ;;  %v4782_v28 = vld [vmem:[#allocation15 + $0x1b10] sm:$0xff] }
0x14ad   :  { %5385 = vmatprep.subr.mxu1 %v4359_v5  ;;  %5458 = vmatprep.subr.mxu0 %v4607_v17  ;;  %v4008_v5 = vld [vmem:[#allocation15 + $0x2e0] sm:$0xff]  ;;  %v4775_v17 = vld [vmem:[#allocation15 + $0x1ad8] sm:$0xff] }
0x14ae   :  { %5386 = vmatpush2.msra.mxu1 %v4358_v23  ;;  %5459 = vmatpush2.msra.mxu0 %v4606_v1  ;;  %v4001_v23 = vld [vmem:[#allocation15 + $0x2a8] sm:$0xff]  ;;  %v4774_v1 = vld [vmem:[#allocation15 + $0x1ad0] sm:$0xff] }
0x14af   :  { %5387 = vmatprep.subr.mxu1 %v4351_v27  ;;  %5460 = vmatprep.subr.mxu0 %v4599_v6  ;;  %v4000_v27 = vld [vmem:[#allocation15 + $0x2a0] sm:$0xff]  ;;  %v4767_v6 = vld [vmem:[#allocation15 + $0x1a98] sm:$0xff] }
0x14b0   :  { %5388 = vmatpush2.msra.mxu1 %v4350_v14  ;;  %5461 = vmatpush2.msra.mxu0 %v4598_v44  ;;  %v3993_v14 = vld [vmem:[#allocation15 + $0x268] sm:$0xff]  ;;  %v4766_v44 = vld [vmem:[#allocation15 + $0x1a90] sm:$0xff] }
0x14b1   :  { %5389 = vmatprep.subr.mxu1 %v4343_v46  ;;  %5462 = vmatprep.subr.mxu0 %v4591_v47  ;;  %v3992_v46 = vld [vmem:[#allocation15 + $0x260] sm:$0xff]  ;;  %v4759_v47 = vld [vmem:[#allocation15 + $0x1a58] sm:$0xff] }
0x14b2   :  { %5390 = vmatpush2.msra.mxu1 %v4342_v48  ;;  %5463 = vmatpush2.msra.mxu0 %v4590_v29  ;;  %v3985_v48 = vld [vmem:[#allocation15 + $0x228] sm:$0xff]  ;;  %v4758_v29 = vld [vmem:[#allocation15 + $0x1a50] sm:$0xff] }
0x14b3   :  { %5391 = vmatprep.subr.mxu1 %v4335_v49  ;;  %5464 = vmatprep.subr.mxu0 %v4583_v42  ;;  %v3984_v49 = vld [vmem:[#allocation15 + $0x220] sm:$0xff]  ;;  %v4751_v42 = vld [vmem:[#allocation15 + $0x1a18] sm:$0xff] }
0x14b4   :  { %5392 = vmatpush2.msra.mxu1 %v4334_v50  ;;  %5465 = vmatpush2.msra.mxu0 %v4582_v55  ;;  %v3977_v50 = vld [vmem:[#allocation15 + $0x1e8] sm:$0xff]  ;;  %v4750_v55 = vld [vmem:[#allocation15 + $0x1a10] sm:$0xff] }
0x14b5   :  { %5393 = vmatprep.subr.mxu1 %v4327_v59  ;;  %5466 = vmatprep.subr.mxu0 %v4575_v61  ;;  %v3976_v59 = vld [vmem:[#allocation15 + $0x1e0] sm:$0xff]  ;;  %v4743_v61 = vld [vmem:[#allocation15 + $0x19d8] sm:$0xff] }
0x14b6   :  { %5394 = vmatpush2.msra.mxu1 %v4326_v0  ;;  %5467 = vmatpush2.msra.mxu0 %v4574_v34  ;;  %v3969_v0 = vld [vmem:[#allocation15 + $0x1a8] sm:$0xff]  ;;  %v4742_v34 = vld [vmem:[#allocation15 + $0x19d0] sm:$0xff] }
0x14b7   :  { %5395 = vmatprep.subr.mxu1 %v4319_v58  ;;  %5468 = vmatprep.subr.mxu0 %v4567_v43  ;;  %v3968_v58 = vld [vmem:[#allocation15 + $0x1a0] sm:$0xff]  ;;  %v4735_v43 = vld [vmem:[#allocation15 + $0x1998] sm:$0xff] }
0x14b8   :  { %5396 = vmatpush2.msra.mxu1 %v4318_v35  ;;  %5469 = vmatpush2.msra.mxu0 %v4566_v40  ;;  %v3961_v35 = vld [vmem:[#allocation15 + $0x168] sm:$0xff]  ;;  %v4734_v40 = vld [vmem:[#allocation15 + $0x1990] sm:$0xff] }
0x14b9   :  { %5397 = vmatprep.subr.mxu1 %v4311_v38  ;;  %5470 = vmatprep.subr.mxu0 %v4559_v62  ;;  %v3960_v38 = vld [vmem:[#allocation15 + $0x160] sm:$0xff]  ;;  %v4727_v62 = vld [vmem:[#allocation15 + $0x1958] sm:$0xff] }
0x14ba   :  { %5398 = vmatpush2.msra.mxu1 %v4310_v3  ;;  %5471 = vmatpush2.msra.mxu0 %v4558_v63  ;;  %v3953_v3 = vld [vmem:[#allocation15 + $0x128] sm:$0xff]  ;;  %v4726_v63 = vld [vmem:[#allocation15 + $0x1950] sm:$0xff] }
0x14bb   :  { %5399 = vmatprep.subr.mxu1 %v4303_v39  ;;  %5473 = vmatmul.mubr.f32.vlgmr.msra.gmra.mxu0 %v7893_v57  ;;  %v3952_v39 = vld [vmem:[#allocation15 + $0x120] sm:$0xff] }
0x14bc   :  { %5550 = vmatprep.subr.mxu0 %v4041_v52  ;;  %5400 = vmatpush2.msra.mxu1 %v4302_v54  ;;  %v4719_v52 = vld [vmem:[#allocation15 + $0x1918] sm:$0xff]  ;;  %v3945_v54 = vld [vmem:[#allocation15 + $0xe8] sm:$0xff] }
0x14bd   :  { %5551 = vmatpush1.msra.mxu0 %v4040_v12  ;;  %5614 = vmatprep.mubr.f32.mxu0 %v7862_v22  ;;  %v4718_v12 = vld [vmem:[#allocation15 + $0x1910] sm:$0xff] }
0x14be   :  { %5402 = vmatmul.mubr.f32.vlgmr.msra.gmra.mxu1 %v7875_v25  ;;  %5479 = vmatprep.subr.mxu1 %v4807_v16  ;;  %v3944_v16 = vld [vmem:[#allocation15 + $0xe0] sm:$0xff] }
0x14bf   :  { %5552 = vmatprep.subr.mxu0 %v4033_v7  ;;  %5480 = vmatpush1.msra.mxu1 %v4806_v20  ;;  %v4711_v7 = vld [vmem:[#allocation15 + $0x18d8] sm:$0xff]  ;;  %v3937_v20 = vld [vmem:[#allocation15 + $0xa8] sm:$0xff] }
0x14c0   :  { %5543 = vmatprep.mubr.f32.mxu1 %v7904_v53  ;;  %5553 = vmatpush1.msra.mxu0 %v4032_v24  ;;  %v4710_v24 = vld [vmem:[#allocation15 + $0x18d0] sm:$0xff] }
0x14c1   :  { %5481 = vmatprep.subr.mxu1 %v4799_v26  ;;  %5554 = vmatprep.subr.mxu0 %v4025_v30  ;;  %v3936_v26 = vld [vmem:[#allocation15 + $0xa0] sm:$0xff]  ;;  %v4703_v30 = vld [vmem:[#allocation15 + $0x1898] sm:$0xff] }
0x14c2   :  { %5482 = vmatpush1.msra.mxu1 %v4798_v11  ;;  %5555 = vmatpush1.msra.mxu0 %v4024_v15  ;;  %v3929_v11 = vld [vmem:[#allocation15 + $0x68] sm:$0xff]  ;;  %v4702_v15 = vld [vmem:[#allocation15 + $0x1890] sm:$0xff] }
0x14c3   :  { %5483 = vmatprep.subr.mxu1 %v4791_v19  ;;  %5556 = vmatprep.subr.mxu0 %v4017_v4  ;;  %v3928_v19 = vld [vmem:[#allocation15 + $0x60] sm:$0xff]  ;;  %v4695_v4 = vld [vmem:[#allocation15 + $0x1858] sm:$0xff] }
0x14c4   :  { %5484 = vmatpush1.msra.mxu1 %v4790_v31  ;;  %5557 = vmatpush1.msra.mxu0 %v4016_v33  ;;  %v3921_v31 = vld [vmem:[#allocation15 + $0x28] sm:$0xff]  ;;  %v4694_v33 = vld [vmem:[#allocation15 + $0x1850] sm:$0xff] }
0x14c5   :  { %5485 = vmatprep.subr.mxu1 %v4783_v51  ;;  %5558 = vmatprep.subr.mxu0 %v4009_v2  ;;  %v3920_v51 = vld [vmem:[#allocation15 + $0x20] sm:$0xff]  ;;  %v4687_v2 = vld [vmem:[#allocation15 + $0x1818] sm:$0xff] }
0x14c6   :  { %5486 = vmatpush1.msra.mxu1 %v4782_v28  ;;  %5559 = vmatpush1.msra.mxu0 %v4008_v5  ;;  %v4169_v28 = vld [vmem:[#allocation15 + $0x7e8] sm:$0xff]  ;;  %v4686_v5 = vld [vmem:[#allocation15 + $0x1810] sm:$0xff] }
0x14c7   :  { %5487 = vmatprep.subr.mxu1 %v4775_v17  ;;  %5560 = vmatprep.subr.mxu0 %v4001_v23  ;;  %v4168_v17 = vld [vmem:[#allocation15 + $0x7e0] sm:$0xff]  ;;  %v4935_v23 = vld [vmem:[#allocation15 + $0x1fd8] sm:$0xff] }
0x14c8   :  { %5488 = vmatpush1.msra.mxu1 %v4774_v1  ;;  %5561 = vmatpush1.msra.mxu0 %v4000_v27  ;;  %v4161_v1 = vld [vmem:[#allocation15 + $0x7a8] sm:$0xff]  ;;  %v4934_v27 = vld [vmem:[#allocation15 + $0x1fd0] sm:$0xff] }
0x14c9   :  { %5489 = vmatprep.subr.mxu1 %v4767_v6  ;;  %5562 = vmatprep.subr.mxu0 %v3993_v14  ;;  %v4160_v6 = vld [vmem:[#allocation15 + $0x7a0] sm:$0xff]  ;;  %v4927_v14 = vld [vmem:[#allocation15 + $0x1f98] sm:$0xff] }
0x14ca   :  { %5490 = vmatpush1.msra.mxu1 %v4766_v44  ;;  %5563 = vmatpush1.msra.mxu0 %v3992_v46  ;;  %v4153_v44 = vld [vmem:[#allocation15 + $0x768] sm:$0xff]  ;;  %v4926_v46 = vld [vmem:[#allocation15 + $0x1f90] sm:$0xff] }
0x14cb   :  { %5491 = vmatprep.subr.mxu1 %v4759_v47  ;;  %5564 = vmatprep.subr.mxu0 %v3985_v48  ;;  %v4152_v47 = vld [vmem:[#allocation15 + $0x760] sm:$0xff]  ;;  %v4919_v48 = vld [vmem:[#allocation15 + $0x1f58] sm:$0xff] }
0x14cc   :  { %5492 = vmatpush1.msra.mxu1 %v4758_v29  ;;  %5565 = vmatpush1.msra.mxu0 %v3984_v49  ;;  %v4145_v29 = vld [vmem:[#allocation15 + $0x728] sm:$0xff]  ;;  %v4918_v49 = vld [vmem:[#allocation15 + $0x1f50] sm:$0xff] }
0x14cd   :  { %5493 = vmatprep.subr.mxu1 %v4751_v42  ;;  %5566 = vmatprep.subr.mxu0 %v3977_v50  ;;  %v4144_v42 = vld [vmem:[#allocation15 + $0x720] sm:$0xff]  ;;  %v4911_v50 = vld [vmem:[#allocation15 + $0x1f18] sm:$0xff] }
0x14ce   :  { %5494 = vmatpush1.msra.mxu1 %v4750_v55  ;;  %5567 = vmatpush1.msra.mxu0 %v3976_v59  ;;  %v4137_v55 = vld [vmem:[#allocation15 + $0x6e8] sm:$0xff]  ;;  %v4910_v59 = vld [vmem:[#allocation15 + $0x1f10] sm:$0xff] }
0x14cf   :  { %5495 = vmatprep.subr.mxu1 %v4743_v61  ;;  %5568 = vmatprep.subr.mxu0 %v3969_v0  ;;  %v4136_v61 = vld [vmem:[#allocation15 + $0x6e0] sm:$0xff]  ;;  %v4903_v0 = vld [vmem:[#allocation15 + $0x1ed8] sm:$0xff] }
0x14d0   :  { %5496 = vmatpush1.msra.mxu1 %v4742_v34  ;;  %5569 = vmatpush1.msra.mxu0 %v3968_v58  ;;  %v4129_v34 = vld [vmem:[#allocation15 + $0x6a8] sm:$0xff]  ;;  %v4902_v58 = vld [vmem:[#allocation15 + $0x1ed0] sm:$0xff] }
0x14d1   :  { %5497 = vmatprep.subr.mxu1 %v4735_v43  ;;  %5570 = vmatprep.subr.mxu0 %v3961_v35  ;;  %v4128_v43 = vld [vmem:[#allocation15 + $0x6a0] sm:$0xff]  ;;  %v4895_v35 = vld [vmem:[#allocation15 + $0x1e98] sm:$0xff] }
0x14d2   :  { %5498 = vmatpush1.msra.mxu1 %v4734_v40  ;;  %5571 = vmatpush1.msra.mxu0 %v3960_v38  ;;  %v4121_v40 = vld [vmem:[#allocation15 + $0x668] sm:$0xff]  ;;  %v4894_v38 = vld [vmem:[#allocation15 + $0x1e90] sm:$0xff] }
0x14d3   :  { %5499 = vmatprep.subr.mxu1 %v4727_v62  ;;  %5572 = vmatprep.subr.mxu0 %v3953_v3  ;;  %v4120_v62 = vld [vmem:[#allocation15 + $0x660] sm:$0xff]  ;;  %v4887_v3 = vld [vmem:[#allocation15 + $0x1e58] sm:$0xff] }
0x14d4   :  { %5500 = vmatpush1.msra.mxu1 %v4726_v63  ;;  %5573 = vmatpush1.msra.mxu0 %v3952_v39  ;;  %v4113_v63 = vld [vmem:[#allocation15 + $0x628] sm:$0xff]  ;;  %v4886_v39 = vld [vmem:[#allocation15 + $0x1e50] sm:$0xff] }
0x14d5   :  { %5501 = vmatprep.subr.mxu1 %v4719_v52  ;;  %5574 = vmatprep.subr.mxu0 %v3945_v54  ;;  %v4112_v52 = vld [vmem:[#allocation15 + $0x620] sm:$0xff]  ;;  %v4879_v54 = vld [vmem:[#allocation15 + $0x1e18] sm:$0xff] }
0x14d6   :  { %5502 = vmatpush1.msra.mxu1 %v4718_v12  ;;  %5575 = vmatpush1.msra.mxu0 %v3944_v16  ;;  %v4105_v12 = vld [vmem:[#allocation15 + $0x5e8] sm:$0xff]  ;;  %v4878_v16 = vld [vmem:[#allocation15 + $0x1e10] sm:$0xff] }
0x14d7   :  { %5503 = vmatprep.subr.mxu1 %v4711_v7  ;;  %5576 = vmatprep.subr.mxu0 %v3937_v20  ;;  %v4104_v7 = vld [vmem:[#allocation15 + $0x5e0] sm:$0xff]  ;;  %v4871_v20 = vld [vmem:[#allocation15 + $0x1dd8] sm:$0xff] }
0x14d8   :  { %5504 = vmatpush1.msra.mxu1 %v4710_v24  ;;  %5577 = vmatpush1.msra.mxu0 %v3936_v26  ;;  %v4097_v24 = vld [vmem:[#allocation15 + $0x5a8] sm:$0xff]  ;;  %v4870_v26 = vld [vmem:[#allocation15 + $0x1dd0] sm:$0xff] }
0x14d9   :  { %5505 = vmatprep.subr.mxu1 %v4703_v30  ;;  %5578 = vmatprep.subr.mxu0 %v3929_v11  ;;  %v4096_v30 = vld [vmem:[#allocation15 + $0x5a0] sm:$0xff]  ;;  %v4863_v11 = vld [vmem:[#allocation15 + $0x1d98] sm:$0xff] }
0x14da   :  { %5506 = vmatpush1.msra.mxu1 %v4702_v15  ;;  %5579 = vmatpush1.msra.mxu0 %v3928_v19  ;;  %v4089_v15 = vld [vmem:[#allocation15 + $0x568] sm:$0xff]  ;;  %v4862_v19 = vld [vmem:[#allocation15 + $0x1d90] sm:$0xff] }
0x14db   :  { %5507 = vmatprep.subr.mxu1 %v4695_v4  ;;  %5580 = vmatprep.subr.mxu0 %v3921_v31  ;;  %v4088_v4 = vld [vmem:[#allocation15 + $0x560] sm:$0xff]  ;;  %v4855_v31 = vld [vmem:[#allocation15 + $0x1d58] sm:$0xff] }
0x14dc   :  { %5508 = vmatpush1.msra.mxu1 %v4694_v33  ;;  %5581 = vmatpush1.msra.mxu0 %v3920_v51  ;;  %v4081_v33 = vld [vmem:[#allocation15 + $0x528] sm:$0xff]  ;;  %v4854_v51 = vld [vmem:[#allocation15 + $0x1d50] sm:$0xff] }
0x14dd   :  { %5509 = vmatprep.subr.mxu1 %v4687_v2  ;;  %5582 = vmatprep.subr.mxu0 %v4169_v28  ;;  %v4080_v2 = vld [vmem:[#allocation15 + $0x520] sm:$0xff]  ;;  %v4847_v28 = vld [vmem:[#allocation15 + $0x1d18] sm:$0xff] }
0x14de   :  { %5510 = vmatpush1.msra.mxu1 %v4686_v5  ;;  %5583 = vmatpush2.msra.mxu0 %v4168_v17  ;;  %v4073_v5 = vld [vmem:[#allocation15 + $0x4e8] sm:$0xff]  ;;  %v4846_v17 = vld [vmem:[#allocation15 + $0x1d10] sm:$0xff] }
0x14df   :  { %5511 = vmatprep.subr.mxu1 %v4935_v23  ;;  %5584 = vmatprep.subr.mxu0 %v4161_v1  ;;  %v4072_v23 = vld [vmem:[#allocation15 + $0x4e0] sm:$0xff]  ;;  %v4839_v1 = vld [vmem:[#allocation15 + $0x1cd8] sm:$0xff] }
0x14e0   :  { %5512 = vmatpush2.msra.mxu1 %v4934_v27  ;;  %5585 = vmatpush2.msra.mxu0 %v4160_v6  ;;  %v4065_v27 = vld [vmem:[#allocation15 + $0x4a8] sm:$0xff]  ;;  %v4838_v6 = vld [vmem:[#allocation15 + $0x1cd0] sm:$0xff] }
0x14e1   :  { %5513 = vmatprep.subr.mxu1 %v4927_v14  ;;  %5586 = vmatprep.subr.mxu0 %v4153_v44  ;;  %v4064_v14 = vld [vmem:[#allocation15 + $0x4a0] sm:$0xff]  ;;  %v4831_v44 = vld [vmem:[#allocation15 + $0x1c98] sm:$0xff] }
0x14e2   :  { %5514 = vmatpush2.msra.mxu1 %v4926_v46  ;;  %5587 = vmatpush2.msra.mxu0 %v4152_v47  ;;  %v4057_v46 = vld [vmem:[#allocation15 + $0x468] sm:$0xff]  ;;  %v4830_v47 = vld [vmem:[#allocation15 + $0x1c90] sm:$0xff] }
0x14e3   :  { %5515 = vmatprep.subr.mxu1 %v4919_v48  ;;  %5588 = vmatprep.subr.mxu0 %v4145_v29  ;;  %v4056_v48 = vld [vmem:[#allocation15 + $0x460] sm:$0xff]  ;;  %v4823_v29 = vld [vmem:[#allocation15 + $0x1c58] sm:$0xff] }
0x14e4   :  { %5516 = vmatpush2.msra.mxu1 %v4918_v49  ;;  %5589 = vmatpush2.msra.mxu0 %v4144_v42  ;;  %v4049_v49 = vld [vmem:[#allocation15 + $0x428] sm:$0xff]  ;;  %v4822_v42 = vld [vmem:[#allocation15 + $0x1c50] sm:$0xff] }
0x14e5   :  { %5517 = vmatprep.subr.mxu1 %v4911_v50  ;;  %5590 = vmatprep.subr.mxu0 %v4137_v55  ;;  %v4048_v50 = vld [vmem:[#allocation15 + $0x420] sm:$0xff]  ;;  %v4815_v55 = vld [vmem:[#allocation15 + $0x1c18] sm:$0xff] }
0x14e6   :  { %5518 = vmatpush2.msra.mxu1 %v4910_v59  ;;  %5591 = vmatpush2.msra.mxu0 %v4136_v61  ;;  %v4553_v59 = vld [vmem:[#allocation15 + $0x13e8] sm:$0xff]  ;;  %v4814_v61 = vld [vmem:[#allocation15 + $0x1c10] sm:$0xff] }
0x14e7   :  { %5519 = vmatprep.subr.mxu1 %v4903_v0  ;;  %5592 = vmatprep.subr.mxu0 %v4129_v34  ;;  %v4552_v0 = vld [vmem:[#allocation15 + $0x13e0] sm:$0xff]  ;;  %v4297_v34 = vld [vmem:[#allocation15 + $0xbe8] sm:$0xff] }
0x14e8   :  { %5520 = vmatpush2.msra.mxu1 %v4902_v58  ;;  %5593 = vmatpush2.msra.mxu0 %v4128_v43  ;;  %v4545_v58 = vld [vmem:[#allocation15 + $0x13a8] sm:$0xff]  ;;  %v4296_v43 = vld [vmem:[#allocation15 + $0xbe0] sm:$0xff] }
0x14e9   :  { %5521 = vmatprep.subr.mxu1 %v4895_v35  ;;  %5594 = vmatprep.subr.mxu0 %v4121_v40  ;;  %v4544_v35 = vld [vmem:[#allocation15 + $0x13a0] sm:$0xff]  ;;  %v4289_v40 = vld [vmem:[#allocation15 + $0xba8] sm:$0xff] }
0x14ea   :  { %5522 = vmatpush2.msra.mxu1 %v4894_v38  ;;  %5595 = vmatpush2.msra.mxu0 %v4120_v62  ;;  %v4537_v38 = vld [vmem:[#allocation15 + $0x1368] sm:$0xff]  ;;  %v4288_v62 = vld [vmem:[#allocation15 + $0xba0] sm:$0xff] }
0x14eb   :  { %5523 = vmatprep.subr.mxu1 %v4887_v3  ;;  %5596 = vmatprep.subr.mxu0 %v4113_v63  ;;  %v4536_v3 = vld [vmem:[#allocation15 + $0x1360] sm:$0xff]  ;;  %v4281_v63 = vld [vmem:[#allocation15 + $0xb68] sm:$0xff] }
0x14ec   :  { %5524 = vmatpush2.msra.mxu1 %v4886_v39  ;;  %5597 = vmatpush2.msra.mxu0 %v4112_v52  ;;  %v4529_v39 = vld [vmem:[#allocation15 + $0x1328] sm:$0xff]  ;;  %v4280_v52 = vld [vmem:[#allocation15 + $0xb60] sm:$0xff] }
0x14ed   :  { %5525 = vmatprep.subr.mxu1 %v4879_v54  ;;  %5598 = vmatprep.subr.mxu0 %v4105_v12  ;;  %v4528_v54 = vld [vmem:[#allocation15 + $0x1320] sm:$0xff]  ;;  %v4273_v12 = vld [vmem:[#allocation15 + $0xb28] sm:$0xff] }
0x14ee   :  { %5526 = vmatpush2.msra.mxu1 %v4878_v16  ;;  %5599 = vmatpush2.msra.mxu0 %v4104_v7  ;;  %v4521_v16 = vld [vmem:[#allocation15 + $0x12e8] sm:$0xff]  ;;  %v4272_v7 = vld [vmem:[#allocation15 + $0xb20] sm:$0xff] }
0x14ef   :  { %5527 = vmatprep.subr.mxu1 %v4871_v20  ;;  %5600 = vmatprep.subr.mxu0 %v4097_v24  ;;  %v4520_v20 = vld [vmem:[#allocation15 + $0x12e0] sm:$0xff]  ;;  %v4265_v24 = vld [vmem:[#allocation15 + $0xae8] sm:$0xff] }
0x14f0   :  { %5528 = vmatpush2.msra.mxu1 %v4870_v26  ;;  %5601 = vmatpush2.msra.mxu0 %v4096_v30  ;;  %v4513_v26 = vld [vmem:[#allocation15 + $0x12a8] sm:$0xff]  ;;  %v4264_v30 = vld [vmem:[#allocation15 + $0xae0] sm:$0xff] }
0x14f1   :  { %5529 = vmatprep.subr.mxu1 %v4863_v11  ;;  %5602 = vmatprep.subr.mxu0 %v4089_v15  ;;  %v4512_v11 = vld [vmem:[#allocation15 + $0x12a0] sm:$0xff]  ;;  %v4257_v15 = vld [vmem:[#allocation15 + $0xaa8] sm:$0xff] }
0x14f2   :  { %5530 = vmatpush2.msra.mxu1 %v4862_v19  ;;  %5603 = vmatpush2.msra.mxu0 %v4088_v4  ;;  %v4505_v19 = vld [vmem:[#allocation15 + $0x1268] sm:$0xff]  ;;  %v4256_v4 = vld [vmem:[#allocation15 + $0xaa0] sm:$0xff] }
0x14f3   :  { %5531 = vmatprep.subr.mxu1 %v4855_v31  ;;  %5604 = vmatprep.subr.mxu0 %v4081_v33  ;;  %v4504_v31 = vld [vmem:[#allocation15 + $0x1260] sm:$0xff]  ;;  %v4249_v33 = vld [vmem:[#allocation15 + $0xa68] sm:$0xff] }
0x14f4   :  { %5532 = vmatpush2.msra.mxu1 %v4854_v51  ;;  %5605 = vmatpush2.msra.mxu0 %v4080_v2  ;;  %v4497_v51 = vld [vmem:[#allocation15 + $0x1228] sm:$0xff]  ;;  %v4248_v2 = vld [vmem:[#allocation15 + $0xa60] sm:$0xff] }
0x14f5   :  { %5533 = vmatprep.subr.mxu1 %v4847_v28  ;;  %5606 = vmatprep.subr.mxu0 %v4073_v5  ;;  %v4496_v28 = vld [vmem:[#allocation15 + $0x1220] sm:$0xff]  ;;  %v4241_v5 = vld [vmem:[#allocation15 + $0xa28] sm:$0xff] }
0x14f6   :  { %5534 = vmatpush2.msra.mxu1 %v4846_v17  ;;  %5607 = vmatpush2.msra.mxu0 %v4072_v23  ;;  %v4489_v17 = vld [vmem:[#allocation15 + $0x11e8] sm:$0xff]  ;;  %v4240_v23 = vld [vmem:[#allocation15 + $0xa20] sm:$0xff] }
0x14f7   :  { %5535 = vmatprep.subr.mxu1 %v4839_v1  ;;  %5608 = vmatprep.subr.mxu0 %v4065_v27  ;;  %v4488_v1 = vld [vmem:[#allocation15 + $0x11e0] sm:$0xff]  ;;  %v4233_v27 = vld [vmem:[#allocation15 + $0x9e8] sm:$0xff] }
0x14f8   :  { %5536 = vmatpush2.msra.mxu1 %v4838_v6  ;;  %5609 = vmatpush2.msra.mxu0 %v4064_v14  ;;  %v4481_v6 = vld [vmem:[#allocation15 + $0x11a8] sm:$0xff]  ;;  %v4232_v14 = vld [vmem:[#allocation15 + $0x9e0] sm:$0xff] }
0x14f9   :  { %5537 = vmatprep.subr.mxu1 %v4831_v44  ;;  %5610 = vmatprep.subr.mxu0 %v4057_v46  ;;  %v4480_v44 = vld [vmem:[#allocation15 + $0x11a0] sm:$0xff]  ;;  %v4225_v46 = vld [vmem:[#allocation15 + $0x9a8] sm:$0xff] }
0x14fa   :  { %5538 = vmatpush2.msra.mxu1 %v4830_v47  ;;  %5611 = vmatpush2.msra.mxu0 %v4056_v48  ;;  %v4473_v47 = vld [vmem:[#allocation15 + $0x1168] sm:$0xff]  ;;  %v4224_v48 = vld [vmem:[#allocation15 + $0x9a0] sm:$0xff] }
0x14fb   :  { %5539 = vmatprep.subr.mxu1 %v4823_v29  ;;  %5612 = vmatprep.subr.mxu0 %v4049_v49  ;;  %v4472_v29 = vld [vmem:[#allocation15 + $0x1160] sm:$0xff]  ;;  %v4217_v49 = vld [vmem:[#allocation15 + $0x968] sm:$0xff] }
0x14fc   :  { %5540 = vmatpush2.msra.mxu1 %v4822_v42  ;;  %5613 = vmatpush2.msra.mxu0 %v4048_v50  ;;  %v4465_v42 = vld [vmem:[#allocation15 + $0x1128] sm:$0xff]  ;;  %v4216_v50 = vld [vmem:[#allocation15 + $0x960] sm:$0xff] }
0x14fd   :  { %5541 = vmatprep.subr.mxu1 %v4815_v55  ;;  %5615 = vmatmul.mubr.f32.vlgmr.msra.gmra.mxu0 %v7880_v10  ;;  %v4464_v55 = vld [vmem:[#allocation15 + $0x1120] sm:$0xff] }
0x14fe   :  { %5692 = vmatprep.subr.mxu0 %v4553_v59  ;;  %5542 = vmatpush2.msra.mxu1 %v4814_v61  ;;  %v4209_v59 = vld [vmem:[#allocation15 + $0x928] sm:$0xff] }
0x14ff   :  { %5693 = vmatpush1.msra.mxu0 %v4552_v0  ;;  %5756 = vmatprep.mubr.f32.mxu0 %v7891_v56  ;;  %v4457_v61 = vld [vmem:[#allocation15 + $0x10e8] sm:$0xff]  ;;  %v4208_v0 = vld [vmem:[#allocation15 + $0x920] sm:$0xff] }
0x1500   :  { %5544 = vmatmul.mubr.f32.vlgmr.msra.gmra.mxu1 %v7907_v9  ;;  %5621 = vmatprep.subr.mxu1 %v4297_v34  ;;  %v4456_v34 = vld [vmem:[#allocation15 + $0x10e0] sm:$0xff] }
0x1501   :  { %5694 = vmatprep.subr.mxu0 %v4545_v58  ;;  %5622 = vmatpush1.msra.mxu1 %v4296_v43  ;;  %v4201_v58 = vld [vmem:[#allocation15 + $0x8e8] sm:$0xff] }
0x1502   :  { %5685 = vmatprep.mubr.f32.mxu1 %v7873_v18  ;;  %5695 = vmatpush1.msra.mxu0 %v4544_v35  ;;  %v4449_v43 = vld [vmem:[#allocation15 + $0x10a8] sm:$0xff]  ;;  %v4200_v35 = vld [vmem:[#allocation15 + $0x8e0] sm:$0xff] }
0x1503   :  { %5623 = vmatprep.subr.mxu1 %v4289_v40  ;;  %5696 = vmatprep.subr.mxu0 %v4537_v38  ;;  %v4448_v40 = vld [vmem:[#allocation15 + $0x10a0] sm:$0xff]  ;;  %v4193_v38 = vld [vmem:[#allocation15 + $0x8a8] sm:$0xff] }
0x1504   :  { %5624 = vmatpush1.msra.mxu1 %v4288_v62  ;;  %5697 = vmatpush1.msra.mxu0 %v4536_v3  ;;  %v4441_v62 = vld [vmem:[#allocation15 + $0x1068] sm:$0xff]  ;;  %v4192_v3 = vld [vmem:[#allocation15 + $0x8a0] sm:$0xff] }
0x1505   :  { %5625 = vmatprep.subr.mxu1 %v4281_v63  ;;  %5698 = vmatprep.subr.mxu0 %v4529_v39  ;;  %v4440_v63 = vld [vmem:[#allocation15 + $0x1060] sm:$0xff]  ;;  %v4185_v39 = vld [vmem:[#allocation15 + $0x868] sm:$0xff] }
0x1506   :  { %5626 = vmatpush1.msra.mxu1 %v4280_v52  ;;  %5699 = vmatpush1.msra.mxu0 %v4528_v54  ;;  %v4433_v52 = vld [vmem:[#allocation15 + $0x1028] sm:$0xff]  ;;  %v4184_v54 = vld [vmem:[#allocation15 + $0x860] sm:$0xff] }
0x1507   :  { %5627 = vmatprep.subr.mxu1 %v4273_v12  ;;  %5700 = vmatprep.subr.mxu0 %v4521_v16  ;;  %v4432_v12 = vld [vmem:[#allocation15 + $0x1020] sm:$0xff]  ;;  %v4177_v16 = vld [vmem:[#allocation15 + $0x828] sm:$0xff] }
0x1508   :  { %5628 = vmatpush1.msra.mxu1 %v4272_v7  ;;  %5701 = vmatpush1.msra.mxu0 %v4520_v20  ;;  %v4681_v7 = vld [vmem:[#allocation15 + $0x17e8] sm:$0xff]  ;;  %v4176_v20 = vld [vmem:[#allocation15 + $0x820] sm:$0xff] }
0x1509   :  { %5629 = vmatprep.subr.mxu1 %v4265_v24  ;;  %5702 = vmatprep.subr.mxu0 %v4513_v26  ;;  %v4680_v24 = vld [vmem:[#allocation15 + $0x17e0] sm:$0xff]  ;;  %v4425_v26 = vld [vmem:[#allocation15 + $0xfe8] sm:$0xff] }
0x150a   :  { %5630 = vmatpush1.msra.mxu1 %v4264_v30  ;;  %5703 = vmatpush1.msra.mxu0 %v4512_v11  ;;  %v4673_v30 = vld [vmem:[#allocation15 + $0x17a8] sm:$0xff]  ;;  %v4424_v11 = vld [vmem:[#allocation15 + $0xfe0] sm:$0xff] }
0x150b   :  { %5631 = vmatprep.subr.mxu1 %v4257_v15  ;;  %5704 = vmatprep.subr.mxu0 %v4505_v19  ;;  %v4672_v15 = vld [vmem:[#allocation15 + $0x17a0] sm:$0xff]  ;;  %v4417_v19 = vld [vmem:[#allocation15 + $0xfa8] sm:$0xff] }
0x150c   :  { %5632 = vmatpush1.msra.mxu1 %v4256_v4  ;;  %5705 = vmatpush1.msra.mxu0 %v4504_v31  ;;  %v4665_v4 = vld [vmem:[#allocation15 + $0x1768] sm:$0xff]  ;;  %v4416_v31 = vld [vmem:[#allocation15 + $0xfa0] sm:$0xff] }
0x150d   :  { %5633 = vmatprep.subr.mxu1 %v4249_v33  ;;  %5706 = vmatprep.subr.mxu0 %v4497_v51  ;;  %v4664_v33 = vld [vmem:[#allocation15 + $0x1760] sm:$0xff]  ;;  %v4409_v51 = vld [vmem:[#allocation15 + $0xf68] sm:$0xff] }
0x150e   :  { %5634 = vmatpush1.msra.mxu1 %v4248_v2  ;;  %5707 = vmatpush1.msra.mxu0 %v4496_v28  ;;  %v4657_v2 = vld [vmem:[#allocation15 + $0x1728] sm:$0xff]  ;;  %v4408_v28 = vld [vmem:[#allocation15 + $0xf60] sm:$0xff] }
0x150f   :  { %5635 = vmatprep.subr.mxu1 %v4241_v5  ;;  %5708 = vmatprep.subr.mxu0 %v4489_v17  ;;  %v4656_v5 = vld [vmem:[#allocation15 + $0x1720] sm:$0xff]  ;;  %v4401_v17 = vld [vmem:[#allocation15 + $0xf28] sm:$0xff] }
0x1510   :  { %5636 = vmatpush1.msra.mxu1 %v4240_v23  ;;  %5709 = vmatpush1.msra.mxu0 %v4488_v1  ;;  %v4649_v23 = vld [vmem:[#allocation15 + $0x16e8] sm:$0xff]  ;;  %v4400_v1 = vld [vmem:[#allocation15 + $0xf20] sm:$0xff] }
0x1511   :  { %5637 = vmatprep.subr.mxu1 %v4233_v27  ;;  %5710 = vmatprep.subr.mxu0 %v4481_v6  ;;  %v4648_v27 = vld [vmem:[#allocation15 + $0x16e0] sm:$0xff]  ;;  %v4393_v6 = vld [vmem:[#allocation15 + $0xee8] sm:$0xff] }
0x1512   :  { %5638 = vmatpush1.msra.mxu1 %v4232_v14  ;;  %5711 = vmatpush1.msra.mxu0 %v4480_v44  ;;  %v4641_v14 = vld [vmem:[#allocation15 + $0x16a8] sm:$0xff]  ;;  %v4392_v44 = vld [vmem:[#allocation15 + $0xee0] sm:$0xff] }
0x1513   :  { %5639 = vmatprep.subr.mxu1 %v4225_v46  ;;  %5712 = vmatprep.subr.mxu0 %v4473_v47  ;;  %v4640_v46 = vld [vmem:[#allocation15 + $0x16a0] sm:$0xff]  ;;  %v4385_v47 = vld [vmem:[#allocation15 + $0xea8] sm:$0xff] }
0x1514   :  { %5640 = vmatpush1.msra.mxu1 %v4224_v48  ;;  %5713 = vmatpush1.msra.mxu0 %v4472_v29  ;;  %v4633_v48 = vld [vmem:[#allocation15 + $0x1668] sm:$0xff]  ;;  %v4384_v29 = vld [vmem:[#allocation15 + $0xea0] sm:$0xff] }
0x1515   :  { %5641 = vmatprep.subr.mxu1 %v4217_v49  ;;  %5714 = vmatprep.subr.mxu0 %v4465_v42  ;;  %v4632_v49 = vld [vmem:[#allocation15 + $0x1660] sm:$0xff]  ;;  %v4377_v42 = vld [vmem:[#allocation15 + $0xe68] sm:$0xff] }
0x1516   :  { %5642 = vmatpush1.msra.mxu1 %v4216_v50  ;;  %5715 = vmatpush1.msra.mxu0 %v4464_v55  ;;  %v4625_v50 = vld [vmem:[#allocation15 + $0x1628] sm:$0xff]  ;;  %v4376_v55 = vld [vmem:[#allocation15 + $0xe60] sm:$0xff] }
0x1517   :  { %5643 = vmatprep.subr.mxu1 %v4209_v59  ;;  %5716 = vmatprep.subr.mxu0 %v4457_v61  ;;  %v4624_v59 = vld [vmem:[#allocation15 + $0x1620] sm:$0xff]  ;;  %v4369_v61 = vld [vmem:[#allocation15 + $0xe28] sm:$0xff] }
0x1518   :  { %5644 = vmatpush1.msra.mxu1 %v4208_v0  ;;  %5717 = vmatpush1.msra.mxu0 %v4456_v34  ;;  %v4617_v0 = vld [vmem:[#allocation15 + $0x15e8] sm:$0xff]  ;;  %v4368_v34 = vld [vmem:[#allocation15 + $0xe20] sm:$0xff] }
0x1519   :  { %5645 = vmatprep.subr.mxu1 %v4201_v58  ;;  %5718 = vmatprep.subr.mxu0 %v4449_v43  ;;  %v4616_v58 = vld [vmem:[#allocation15 + $0x15e0] sm:$0xff]  ;;  %v4361_v43 = vld [vmem:[#allocation15 + $0xde8] sm:$0xff] }
0x151a   :  { %5646 = vmatpush1.msra.mxu1 %v4200_v35  ;;  %5719 = vmatpush1.msra.mxu0 %v4448_v40  ;;  %v4609_v35 = vld [vmem:[#allocation15 + $0x15a8] sm:$0xff]  ;;  %v4360_v40 = vld [vmem:[#allocation15 + $0xde0] sm:$0xff] }
0x151b   :  { %5647 = vmatprep.subr.mxu1 %v4193_v38  ;;  %5720 = vmatprep.subr.mxu0 %v4441_v62  ;;  %v4608_v38 = vld [vmem:[#allocation15 + $0x15a0] sm:$0xff]  ;;  %v4353_v62 = vld [vmem:[#allocation15 + $0xda8] sm:$0xff] }
0x151c   :  { %5648 = vmatpush1.msra.mxu1 %v4192_v3  ;;  %5721 = vmatpush1.msra.mxu0 %v4440_v63  ;;  %v4601_v3 = vld [vmem:[#allocation15 + $0x1568] sm:$0xff]  ;;  %v4352_v63 = vld [vmem:[#allocation15 + $0xda0] sm:$0xff] }
0x151d   :  { %5649 = vmatprep.subr.mxu1 %v4185_v39  ;;  %5722 = vmatprep.subr.mxu0 %v4433_v52  ;;  %v4600_v39 = vld [vmem:[#allocation15 + $0x1560] sm:$0xff]  ;;  %v4345_v52 = vld [vmem:[#allocation15 + $0xd68] sm:$0xff] }
0x151e   :  { %5650 = vmatpush1.msra.mxu1 %v4184_v54  ;;  %5723 = vmatpush1.msra.mxu0 %v4432_v12  ;;  %v4593_v54 = vld [vmem:[#allocation15 + $0x1528] sm:$0xff]  ;;  %v4344_v12 = vld [vmem:[#allocation15 + $0xd60] sm:$0xff] }
0x151f   :  { %5651 = vmatprep.subr.mxu1 %v4177_v16  ;;  %5724 = vmatprep.subr.mxu0 %v4681_v7  ;;  %v4592_v16 = vld [vmem:[#allocation15 + $0x1520] sm:$0xff]  ;;  %v4337_v7 = vld [vmem:[#allocation15 + $0xd28] sm:$0xff] }
0x1520   :  { %5652 = vmatpush1.msra.mxu1 %v4176_v20  ;;  %5725 = vmatpush2.msra.mxu0 %v4680_v24  ;;  %v4585_v20 = vld [vmem:[#allocation15 + $0x14e8] sm:$0xff]  ;;  %v4336_v24 = vld [vmem:[#allocation15 + $0xd20] sm:$0xff] }
0x1521   :  { %5653 = vmatprep.subr.mxu1 %v4425_v26  ;;  %5726 = vmatprep.subr.mxu0 %v4673_v30  ;;  %v4584_v26 = vld [vmem:[#allocation15 + $0x14e0] sm:$0xff]  ;;  %v4329_v30 = vld [vmem:[#allocation15 + $0xce8] sm:$0xff] }
0x1522   :  { %5654 = vmatpush2.msra.mxu1 %v4424_v11  ;;  %5727 = vmatpush2.msra.mxu0 %v4672_v15  ;;  %v4577_v11 = vld [vmem:[#allocation15 + $0x14a8] sm:$0xff]  ;;  %v4328_v15 = vld [vmem:[#allocation15 + $0xce0] sm:$0xff] }
0x1523   :  { %5655 = vmatprep.subr.mxu1 %v4417_v19  ;;  %5728 = vmatprep.subr.mxu0 %v4665_v4  ;;  %v4576_v19 = vld [vmem:[#allocation15 + $0x14a0] sm:$0xff]  ;;  %v4321_v4 = vld [vmem:[#allocation15 + $0xca8] sm:$0xff] }
0x1524   :  { %5656 = vmatpush2.msra.mxu1 %v4416_v31  ;;  %5729 = vmatpush2.msra.mxu0 %v4664_v33  ;;  %v4569_v31 = vld [vmem:[#allocation15 + $0x1468] sm:$0xff]  ;;  %v4320_v33 = vld [vmem:[#allocation15 + $0xca0] sm:$0xff] }
0x1525   :  { %5657 = vmatprep.subr.mxu1 %v4409_v51  ;;  %5730 = vmatprep.subr.mxu0 %v4657_v2  ;;  %v4568_v51 = vld [vmem:[#allocation15 + $0x1460] sm:$0xff]  ;;  %v4313_v2 = vld [vmem:[#allocation15 + $0xc68] sm:$0xff] }
0x1526   :  { %5658 = vmatpush2.msra.mxu1 %v4408_v28  ;;  %5731 = vmatpush2.msra.mxu0 %v4656_v5  ;;  %v4561_v28 = vld [vmem:[#allocation15 + $0x1428] sm:$0xff]  ;;  %v4312_v5 = vld [vmem:[#allocation15 + $0xc60] sm:$0xff] }
0x1527   :  { %5659 = vmatprep.subr.mxu1 %v4401_v17  ;;  %5732 = vmatprep.subr.mxu0 %v4649_v23  ;;  %v4560_v17 = vld [vmem:[#allocation15 + $0x1420] sm:$0xff]  ;;  %v4305_v23 = vld [vmem:[#allocation15 + $0xc28] sm:$0xff] }
0x1528   :  { %5660 = vmatpush2.msra.mxu1 %v4400_v1  ;;  %5733 = vmatpush2.msra.mxu0 %v4648_v27  ;;  %v4043_v1 = vld [vmem:[#allocation15 + $0x3f8] sm:$0xff]  ;;  %v4304_v27 = vld [vmem:[#allocation15 + $0xc20] sm:$0xff] }
0x1529   :  { %5661 = vmatprep.subr.mxu1 %v4393_v6  ;;  %5734 = vmatprep.subr.mxu0 %v4641_v14  ;;  %v4042_v6 = vld [vmem:[#allocation15 + $0x3f0] sm:$0xff]  ;;  %v4809_v14 = vld [vmem:[#allocation15 + $0x1be8] sm:$0xff] }
0x152a   :  { %5662 = vmatpush2.msra.mxu1 %v4392_v44  ;;  %5735 = vmatpush2.msra.mxu0 %v4640_v46  ;;  %v4035_v44 = vld [vmem:[#allocation15 + $0x3b8] sm:$0xff]  ;;  %v4808_v46 = vld [vmem:[#allocation15 + $0x1be0] sm:$0xff] }
0x152b   :  { %5663 = vmatprep.subr.mxu1 %v4385_v47  ;;  %5736 = vmatprep.subr.mxu0 %v4633_v48  ;;  %v4034_v47 = vld [vmem:[#allocation15 + $0x3b0] sm:$0xff]  ;;  %v4801_v48 = vld [vmem:[#allocation15 + $0x1ba8] sm:$0xff] }
0x152c   :  { %5664 = vmatpush2.msra.mxu1 %v4384_v29  ;;  %5737 = vmatpush2.msra.mxu0 %v4632_v49  ;;  %v4027_v29 = vld [vmem:[#allocation15 + $0x378] sm:$0xff]  ;;  %v4800_v49 = vld [vmem:[#allocation15 + $0x1ba0] sm:$0xff] }
0x152d   :  { %5665 = vmatprep.subr.mxu1 %v4377_v42  ;;  %5738 = vmatprep.subr.mxu0 %v4625_v50  ;;  %v4026_v42 = vld [vmem:[#allocation15 + $0x370] sm:$0xff]  ;;  %v4793_v50 = vld [vmem:[#allocation15 + $0x1b68] sm:$0xff] }
0x152e   :  { %5666 = vmatpush2.msra.mxu1 %v4376_v55  ;;  %5739 = vmatpush2.msra.mxu0 %v4624_v59  ;;  %v4019_v55 = vld [vmem:[#allocation15 + $0x338] sm:$0xff]  ;;  %v4792_v59 = vld [vmem:[#allocation15 + $0x1b60] sm:$0xff] }
0x152f   :  { %5667 = vmatprep.subr.mxu1 %v4369_v61  ;;  %5740 = vmatprep.subr.mxu0 %v4617_v0  ;;  %v4018_v61 = vld [vmem:[#allocation15 + $0x330] sm:$0xff]  ;;  %v4011_v0 = vld [vmem:[#allocation15 + $0x2f8] sm:$0xff] }
0x1530   :  { %5668 = vmatpush2.msra.mxu1 %v4368_v34  ;;  %5741 = vmatpush2.msra.mxu0 %v4616_v58  ;;  %v4784_v34 = vld [vmem:[#allocation15 + $0x1b20] sm:$0xff]  ;;  %v4010_v58 = vld [vmem:[#allocation15 + $0x2f0] sm:$0xff] }
0x1531   :  { %5669 = vmatprep.subr.mxu1 %v4361_v43  ;;  %5742 = vmatprep.subr.mxu0 %v4609_v35  ;;  %v4777_v43 = vld [vmem:[#allocation15 + $0x1ae8] sm:$0xff]  ;;  %v4003_v35 = vld [vmem:[#allocation15 + $0x2b8] sm:$0xff] }
0x1532   :  { %5670 = vmatpush2.msra.mxu1 %v4360_v40  ;;  %5743 = vmatpush2.msra.mxu0 %v4608_v38  ;;  %v4776_v40 = vld [vmem:[#allocation15 + $0x1ae0] sm:$0xff]  ;;  %v4002_v38 = vld [vmem:[#allocation15 + $0x2b0] sm:$0xff] }
0x1533   :  { %5671 = vmatprep.subr.mxu1 %v4353_v62  ;;  %5744 = vmatprep.subr.mxu0 %v4601_v3  ;;  %v4769_v62 = vld [vmem:[#allocation15 + $0x1aa8] sm:$0xff]  ;;  %v3995_v3 = vld [vmem:[#allocation15 + $0x278] sm:$0xff] }
0x1534   :  { %5672 = vmatpush2.msra.mxu1 %v4352_v63  ;;  %5745 = vmatpush2.msra.mxu0 %v4600_v39  ;;  %v4768_v63 = vld [vmem:[#allocation15 + $0x1aa0] sm:$0xff]  ;;  %v3994_v39 = vld [vmem:[#allocation15 + $0x270] sm:$0xff] }
0x1535   :  { %5673 = vmatprep.subr.mxu1 %v4345_v52  ;;  %5746 = vmatprep.subr.mxu0 %v4593_v54  ;;  %v4761_v52 = vld [vmem:[#allocation15 + $0x1a68] sm:$0xff]  ;;  %v3987_v54 = vld [vmem:[#allocation15 + $0x238] sm:$0xff] }
0x1536   :  { %5674 = vmatpush2.msra.mxu1 %v4344_v12  ;;  %5747 = vmatpush2.msra.mxu0 %v4592_v16  ;;  %v4760_v12 = vld [vmem:[#allocation15 + $0x1a60] sm:$0xff]  ;;  %v3986_v16 = vld [vmem:[#allocation15 + $0x230] sm:$0xff] }
0x1537   :  { %5675 = vmatprep.subr.mxu1 %v4337_v7  ;;  %5748 = vmatprep.subr.mxu0 %v4585_v20  ;;  %v4753_v7 = vld [vmem:[#allocation15 + $0x1a28] sm:$0xff]  ;;  %v3979_v20 = vld [vmem:[#allocation15 + $0x1f8] sm:$0xff] }
0x1538   :  { %5676 = vmatpush2.msra.mxu1 %v4336_v24  ;;  %5749 = vmatpush2.msra.mxu0 %v4584_v26  ;;  %v4752_v24 = vld [vmem:[#allocation15 + $0x1a20] sm:$0xff]  ;;  %v3978_v26 = vld [vmem:[#allocation15 + $0x1f0] sm:$0xff] }
0x1539   :  { %5677 = vmatprep.subr.mxu1 %v4329_v30  ;;  %5750 = vmatprep.subr.mxu0 %v4577_v11  ;;  %v4745_v30 = vld [vmem:[#allocation15 + $0x19e8] sm:$0xff]  ;;  %v3971_v11 = vld [vmem:[#allocation15 + $0x1b8] sm:$0xff] }
0x153a   :  { %5678 = vmatpush2.msra.mxu1 %v4328_v15  ;;  %5751 = vmatpush2.msra.mxu0 %v4576_v19  ;;  %v4744_v15 = vld [vmem:[#allocation15 + $0x19e0] sm:$0xff]  ;;  %v3970_v19 = vld [vmem:[#allocation15 + $0x1b0] sm:$0xff] }
0x153b   :  { %5679 = vmatprep.subr.mxu1 %v4321_v4  ;;  %5752 = vmatprep.subr.mxu0 %v4569_v31  ;;  %v4737_v4 = vld [vmem:[#allocation15 + $0x19a8] sm:$0xff]  ;;  %v3963_v31 = vld [vmem:[#allocation15 + $0x178] sm:$0xff] }
0x153c   :  { %5680 = vmatpush2.msra.mxu1 %v4320_v33  ;;  %5753 = vmatpush2.msra.mxu0 %v4568_v51  ;;  %v4736_v33 = vld [vmem:[#allocation15 + $0x19a0] sm:$0xff]  ;;  %v3962_v51 = vld [vmem:[#allocation15 + $0x170] sm:$0xff] }
0x153d   :  { %5681 = vmatprep.subr.mxu1 %v4313_v2  ;;  %5754 = vmatprep.subr.mxu0 %v4561_v28  ;;  %v4729_v2 = vld [vmem:[#allocation15 + $0x1968] sm:$0xff]  ;;  %v3955_v28 = vld [vmem:[#allocation15 + $0x138] sm:$0xff] }
0x153e   :  { %5682 = vmatpush2.msra.mxu1 %v4312_v5  ;;  %5755 = vmatpush2.msra.mxu0 %v4560_v17  ;;  %v4728_v5 = vld [vmem:[#allocation15 + $0x1960] sm:$0xff]  ;;  %v3954_v17 = vld [vmem:[#allocation15 + $0x130] sm:$0xff] }
0x153f   :  { %5683 = vmatprep.subr.mxu1 %v4305_v23  ;;  %5757 = vmatmul.mubr.f32.vlgmr.msra.gmra.mxu0 %v7893_v57  ;;  %v4721_v23 = vld [vmem:[#allocation15 + $0x1928] sm:$0xff] }
0x1540   :  { %5834 = vmatprep.subr.mxu0 %v4043_v1  ;;  %5684 = vmatpush2.msra.mxu1 %v4304_v27  ;;  %v3947_v1 = vld [vmem:[#allocation15 + $0xf8] sm:$0xff]  ;;  %v4720_v27 = vld [vmem:[#allocation15 + $0x1920] sm:$0xff] }
0x1541   :  { %5835 = vmatpush1.msra.mxu0 %v4042_v6  ;;  %5898 = vmatprep.mubr.f32.mxu0 %v7862_v22  ;;  %v4785_v22 = vld [vmem:[#allocation15 + $0x1b28] sm:$0xff]  ;;  %v3946_v6 = vld [vmem:[#allocation15 + $0xf0] sm:$0xff] }
0x1542   :  { %5686 = vmatmul.mubr.f32.vlgmr.msra.gmra.mxu1 %v7875_v25  ;;  %5763 = vmatprep.subr.mxu1 %v4809_v14  ;;  %v4713_v14 = vld [vmem:[#allocation15 + $0x18e8] sm:$0xff] }
0x1543   :  { %5836 = vmatprep.subr.mxu0 %v4035_v44  ;;  %5764 = vmatpush1.msra.mxu1 %v4808_v46  ;;  %v3939_v44 = vld [vmem:[#allocation15 + $0xb8] sm:$0xff]  ;;  %v4712_v46 = vld [vmem:[#allocation15 + $0x18e0] sm:$0xff] }
0x1544   :  { %5827 = vmatprep.mubr.f32.mxu1 %v7904_v53  ;;  %5837 = vmatpush1.msra.mxu0 %v4034_v47  ;;  %v3938_v47 = vld [vmem:[#allocation15 + $0xb0] sm:$0xff] }
0x1545   :  { %5765 = vmatprep.subr.mxu1 %v4801_v48  ;;  %5838 = vmatprep.subr.mxu0 %v4027_v29  ;;  %v4705_v48 = vld [vmem:[#allocation15 + $0x18a8] sm:$0xff]  ;;  %v3931_v29 = vld [vmem:[#allocation15 + $0x78] sm:$0xff] }
0x1546   :  { %5766 = vmatpush1.msra.mxu1 %v4800_v49  ;;  %5839 = vmatpush1.msra.mxu0 %v4026_v42  ;;  %v4704_v49 = vld [vmem:[#allocation15 + $0x18a0] sm:$0xff]  ;;  %v3930_v42 = vld [vmem:[#allocation15 + $0x70] sm:$0xff] }
0x1547   :  { %5767 = vmatprep.subr.mxu1 %v4793_v50  ;;  %5840 = vmatprep.subr.mxu0 %v4019_v55  ;;  %v4697_v50 = vld [vmem:[#allocation15 + $0x1868] sm:$0xff]  ;;  %v3923_v55 = vld [vmem:[#allocation15 + $0x38] sm:$0xff] }
0x1548   :  { %5768 = vmatpush1.msra.mxu1 %v4792_v59  ;;  %5841 = vmatpush1.msra.mxu0 %v4018_v61  ;;  %v4696_v59 = vld [vmem:[#allocation15 + $0x1860] sm:$0xff]  ;;  %v3922_v61 = vld [vmem:[#allocation15 + $0x30] sm:$0xff] }
0x1549   :  { %5769 = vmatprep.subr.mxu1 %v4785_v22  ;;  %5842 = vmatprep.subr.mxu0 %v4011_v0  ;;  %v4689_v22 = vld [vmem:[#allocation15 + $0x1828] sm:$0xff]  ;;  %v4171_v0 = vld [vmem:[#allocation15 + $0x7f8] sm:$0xff] }
0x154a   :  { %5770 = vmatpush1.msra.mxu1 %v4784_v34  ;;  %5843 = vmatpush1.msra.mxu0 %v4010_v58  ;;  %v4688_v34 = vld [vmem:[#allocation15 + $0x1820] sm:$0xff]  ;;  %v4170_v58 = vld [vmem:[#allocation15 + $0x7f0] sm:$0xff] }
0x154b   :  { %5771 = vmatprep.subr.mxu1 %v4777_v43  ;;  %5844 = vmatprep.subr.mxu0 %v4003_v35  ;;  %v4937_v43 = vld [vmem:[#allocation15 + $0x1fe8] sm:$0xff]  ;;  %v4163_v35 = vld [vmem:[#allocation15 + $0x7b8] sm:$0xff] }
0x154c   :  { %5772 = vmatpush1.msra.mxu1 %v4776_v40  ;;  %5845 = vmatpush1.msra.mxu0 %v4002_v38  ;;  %v4936_v40 = vld [vmem:[#allocation15 + $0x1fe0] sm:$0xff]  ;;  %v4162_v38 = vld [vmem:[#allocation15 + $0x7b0] sm:$0xff] }
0x154d   :  { %5773 = vmatprep.subr.mxu1 %v4769_v62  ;;  %5846 = vmatprep.subr.mxu0 %v3995_v3  ;;  %v4929_v62 = vld [vmem:[#allocation15 + $0x1fa8] sm:$0xff]  ;;  %v4155_v3 = vld [vmem:[#allocation15 + $0x778] sm:$0xff] }
0x154e   :  { %5774 = vmatpush1.msra.mxu1 %v4768_v63  ;;  %5847 = vmatpush1.msra.mxu0 %v3994_v39  ;;  %v4928_v63 = vld [vmem:[#allocation15 + $0x1fa0] sm:$0xff]  ;;  %v4154_v39 = vld [vmem:[#allocation15 + $0x770] sm:$0xff] }
0x154f   :  { %5775 = vmatprep.subr.mxu1 %v4761_v52  ;;  %5848 = vmatprep.subr.mxu0 %v3987_v54  ;;  %v4921_v52 = vld [vmem:[#allocation15 + $0x1f68] sm:$0xff]  ;;  %v4147_v54 = vld [vmem:[#allocation15 + $0x738] sm:$0xff] }
0x1550   :  { %5776 = vmatpush1.msra.mxu1 %v4760_v12  ;;  %5849 = vmatpush1.msra.mxu0 %v3986_v16  ;;  %v4920_v12 = vld [vmem:[#allocation15 + $0x1f60] sm:$0xff]  ;;  %v4146_v16 = vld [vmem:[#allocation15 + $0x730] sm:$0xff] }
0x1551   :  { %5777 = vmatprep.subr.mxu1 %v4753_v7  ;;  %5850 = vmatprep.subr.mxu0 %v3979_v20  ;;  %v4913_v7 = vld [vmem:[#allocation15 + $0x1f28] sm:$0xff]  ;;  %v4139_v20 = vld [vmem:[#allocation15 + $0x6f8] sm:$0xff] }
0x1552   :  { %5778 = vmatpush1.msra.mxu1 %v4752_v24  ;;  %5851 = vmatpush1.msra.mxu0 %v3978_v26  ;;  %v4912_v24 = vld [vmem:[#allocation15 + $0x1f20] sm:$0xff]  ;;  %v4138_v26 = vld [vmem:[#allocation15 + $0x6f0] sm:$0xff] }
0x1553   :  { %5779 = vmatprep.subr.mxu1 %v4745_v30  ;;  %5852 = vmatprep.subr.mxu0 %v3971_v11  ;;  %v4905_v30 = vld [vmem:[#allocation15 + $0x1ee8] sm:$0xff]  ;;  %v4131_v11 = vld [vmem:[#allocation15 + $0x6b8] sm:$0xff] }
0x1554   :  { %5780 = vmatpush1.msra.mxu1 %v4744_v15  ;;  %5853 = vmatpush1.msra.mxu0 %v3970_v19  ;;  %v4904_v15 = vld [vmem:[#allocation15 + $0x1ee0] sm:$0xff]  ;;  %v4130_v19 = vld [vmem:[#allocation15 + $0x6b0] sm:$0xff] }
0x1555   :  { %5781 = vmatprep.subr.mxu1 %v4737_v4  ;;  %5854 = vmatprep.subr.mxu0 %v3963_v31  ;;  %v4897_v4 = vld [vmem:[#allocation15 + $0x1ea8] sm:$0xff]  ;;  %v4123_v31 = vld [vmem:[#allocation15 + $0x678] sm:$0xff] }
0x1556   :  { %5782 = vmatpush1.msra.mxu1 %v4736_v33  ;;  %5855 = vmatpush1.msra.mxu0 %v3962_v51  ;;  %v4896_v33 = vld [vmem:[#allocation15 + $0x1ea0] sm:$0xff]  ;;  %v4122_v51 = vld [vmem:[#allocation15 + $0x670] sm:$0xff] }
0x1557   :  { %5783 = vmatprep.subr.mxu1 %v4729_v2  ;;  %5856 = vmatprep.subr.mxu0 %v3955_v28  ;;  %v4889_v2 = vld [vmem:[#allocation15 + $0x1e68] sm:$0xff]  ;;  %v4115_v28 = vld [vmem:[#allocation15 + $0x638] sm:$0xff] }
0x1558   :  { %5784 = vmatpush1.msra.mxu1 %v4728_v5  ;;  %5857 = vmatpush1.msra.mxu0 %v3954_v17  ;;  %v4888_v5 = vld [vmem:[#allocation15 + $0x1e60] sm:$0xff]  ;;  %v4114_v17 = vld [vmem:[#allocation15 + $0x630] sm:$0xff] }
0x1559   :  { %5785 = vmatprep.subr.mxu1 %v4721_v23  ;;  %5858 = vmatprep.subr.mxu0 %v3947_v1  ;;  %v4881_v23 = vld [vmem:[#allocation15 + $0x1e28] sm:$0xff]  ;;  %v4107_v1 = vld [vmem:[#allocation15 + $0x5f8] sm:$0xff] }
0x155a   :  { %5786 = vmatpush1.msra.mxu1 %v4720_v27  ;;  %5859 = vmatpush1.msra.mxu0 %v3946_v6  ;;  %v4880_v27 = vld [vmem:[#allocation15 + $0x1e20] sm:$0xff]  ;;  %v4106_v6 = vld [vmem:[#allocation15 + $0x5f0] sm:$0xff] }
0x155b   :  { %5787 = vmatprep.subr.mxu1 %v4713_v14  ;;  %5860 = vmatprep.subr.mxu0 %v3939_v44  ;;  %v4873_v14 = vld [vmem:[#allocation15 + $0x1de8] sm:$0xff]  ;;  %v4099_v44 = vld [vmem:[#allocation15 + $0x5b8] sm:$0xff] }
0x155c   :  { %5788 = vmatpush1.msra.mxu1 %v4712_v46  ;;  %5861 = vmatpush1.msra.mxu0 %v3938_v47  ;;  %v4872_v46 = vld [vmem:[#allocation15 + $0x1de0] sm:$0xff]  ;;  %v4098_v47 = vld [vmem:[#allocation15 + $0x5b0] sm:$0xff] }
0x155d   :  { %5789 = vmatprep.subr.mxu1 %v4705_v48  ;;  %5862 = vmatprep.subr.mxu0 %v3931_v29  ;;  %v4865_v48 = vld [vmem:[#allocation15 + $0x1da8] sm:$0xff]  ;;  %v4091_v29 = vld [vmem:[#allocation15 + $0x578] sm:$0xff] }
0x155e   :  { %5790 = vmatpush1.msra.mxu1 %v4704_v49  ;;  %5863 = vmatpush1.msra.mxu0 %v3930_v42  ;;  %v4864_v49 = vld [vmem:[#allocation15 + $0x1da0] sm:$0xff]  ;;  %v4090_v42 = vld [vmem:[#allocation15 + $0x570] sm:$0xff] }
0x155f   :  { %5791 = vmatprep.subr.mxu1 %v4697_v50  ;;  %5864 = vmatprep.subr.mxu0 %v3923_v55  ;;  %v4857_v50 = vld [vmem:[#allocation15 + $0x1d68] sm:$0xff]  ;;  %v4083_v55 = vld [vmem:[#allocation15 + $0x538] sm:$0xff] }
0x1560   :  { %5792 = vmatpush1.msra.mxu1 %v4696_v59  ;;  %5865 = vmatpush1.msra.mxu0 %v3922_v61  ;;  %v4856_v59 = vld [vmem:[#allocation15 + $0x1d60] sm:$0xff]  ;;  %v4082_v61 = vld [vmem:[#allocation15 + $0x530] sm:$0xff] }
0x1561   :  { %5793 = vmatprep.subr.mxu1 %v4689_v22  ;;  %5866 = vmatprep.subr.mxu0 %v4171_v0  ;;  %v4849_v22 = vld [vmem:[#allocation15 + $0x1d28] sm:$0xff]  ;;  %v4075_v0 = vld [vmem:[#allocation15 + $0x4f8] sm:$0xff] }
0x1562   :  { %5794 = vmatpush1.msra.mxu1 %v4688_v34  ;;  %5867 = vmatpush2.msra.mxu0 %v4170_v58  ;;  %v4848_v34 = vld [vmem:[#allocation15 + $0x1d20] sm:$0xff]  ;;  %v4074_v58 = vld [vmem:[#allocation15 + $0x4f0] sm:$0xff] }
0x1563   :  { %5795 = vmatprep.subr.mxu1 %v4937_v43  ;;  %5868 = vmatprep.subr.mxu0 %v4163_v35  ;;  %v4841_v43 = vld [vmem:[#allocation15 + $0x1ce8] sm:$0xff]  ;;  %v4067_v35 = vld [vmem:[#allocation15 + $0x4b8] sm:$0xff] }
0x1564   :  { %5796 = vmatpush2.msra.mxu1 %v4936_v40  ;;  %5869 = vmatpush2.msra.mxu0 %v4162_v38  ;;  %v4840_v40 = vld [vmem:[#allocation15 + $0x1ce0] sm:$0xff]  ;;  %v4066_v38 = vld [vmem:[#allocation15 + $0x4b0] sm:$0xff] }
0x1565   :  { %5797 = vmatprep.subr.mxu1 %v4929_v62  ;;  %5870 = vmatprep.subr.mxu0 %v4155_v3  ;;  %v4833_v62 = vld [vmem:[#allocation15 + $0x1ca8] sm:$0xff]  ;;  %v4059_v3 = vld [vmem:[#allocation15 + $0x478] sm:$0xff] }
0x1566   :  { %5798 = vmatpush2.msra.mxu1 %v4928_v63  ;;  %5871 = vmatpush2.msra.mxu0 %v4154_v39  ;;  %v4832_v63 = vld [vmem:[#allocation15 + $0x1ca0] sm:$0xff]  ;;  %v4058_v39 = vld [vmem:[#allocation15 + $0x470] sm:$0xff] }
0x1567   :  { %5799 = vmatprep.subr.mxu1 %v4921_v52  ;;  %5872 = vmatprep.subr.mxu0 %v4147_v54  ;;  %v4825_v52 = vld [vmem:[#allocation15 + $0x1c68] sm:$0xff]  ;;  %v4051_v54 = vld [vmem:[#allocation15 + $0x438] sm:$0xff] }
0x1568   :  { %5800 = vmatpush2.msra.mxu1 %v4920_v12  ;;  %5873 = vmatpush2.msra.mxu0 %v4146_v16  ;;  %v4824_v12 = vld [vmem:[#allocation15 + $0x1c60] sm:$0xff]  ;;  %v4050_v16 = vld [vmem:[#allocation15 + $0x430] sm:$0xff] }
0x1569   :  { %5801 = vmatprep.subr.mxu1 %v4913_v7  ;;  %5874 = vmatprep.subr.mxu0 %v4139_v20  ;;  %v4817_v7 = vld [vmem:[#allocation15 + $0x1c28] sm:$0xff]  ;;  %v4555_v20 = vld [vmem:[#allocation15 + $0x13f8] sm:$0xff] }
0x156a   :  { %5802 = vmatpush2.msra.mxu1 %v4912_v24  ;;  %5875 = vmatpush2.msra.mxu0 %v4138_v26  ;;  %v4816_v24 = vld [vmem:[#allocation15 + $0x1c20] sm:$0xff]  ;;  %v4554_v26 = vld [vmem:[#allocation15 + $0x13f0] sm:$0xff] }
0x156b   :  { %5803 = vmatprep.subr.mxu1 %v4905_v30  ;;  %5876 = vmatprep.subr.mxu0 %v4131_v11  ;;  %v4299_v30 = vld [vmem:[#allocation15 + $0xbf8] sm:$0xff] }
0x156c   :  { %5804 = vmatpush2.msra.mxu1 %v4904_v15  ;;  %5877 = vmatpush2.msra.mxu0 %v4130_v19  ;;  %v4547_v11 = vld [vmem:[#allocation15 + $0x13b8] sm:$0xff]  ;;  %v4298_v15 = vld [vmem:[#allocation15 + $0xbf0] sm:$0xff] }
0x156d   :  { %5805 = vmatprep.subr.mxu1 %v4897_v4  ;;  %5878 = vmatprep.subr.mxu0 %v4123_v31  ;;  %v4546_v19 = vld [vmem:[#allocation15 + $0x13b0] sm:$0xff]  ;;  %v4291_v4 = vld [vmem:[#allocation15 + $0xbb8] sm:$0xff] }
0x156e   :  { %5806 = vmatpush2.msra.mxu1 %v4896_v33  ;;  %5879 = vmatpush2.msra.mxu0 %v4122_v51  ;;  %v4539_v31 = vld [vmem:[#allocation15 + $0x1378] sm:$0xff]  ;;  %v4290_v33 = vld [vmem:[#allocation15 + $0xbb0] sm:$0xff] }
0x156f   :  { %5807 = vmatprep.subr.mxu1 %v4889_v2  ;;  %5880 = vmatprep.subr.mxu0 %v4115_v28  ;;  %v4538_v51 = vld [vmem:[#allocation15 + $0x1370] sm:$0xff]  ;;  %v4531_v2 = vld [vmem:[#allocation15 + $0x1338] sm:$0xff] }
0x1570   :  { %5808 = vmatpush2.msra.mxu1 %v4888_v5  ;;  %5881 = vmatpush2.msra.mxu0 %v4114_v17  ;;  %v4282_v28 = vld [vmem:[#allocation15 + $0xb70] sm:$0xff]  ;;  %v4523_v17 = vld [vmem:[#allocation15 + $0x12f8] sm:$0xff] }
0x1571   :  { %5809 = vmatprep.subr.mxu1 %v4881_v23  ;;  %5882 = vmatprep.subr.mxu0 %v4107_v1  ;;  %v4530_v5 = vld [vmem:[#allocation15 + $0x1330] sm:$0xff] }
0x1572   :  { %5810 = vmatpush2.msra.mxu1 %v4880_v27  ;;  %5883 = vmatpush2.msra.mxu0 %v4106_v6  ;;  %v4274_v23 = vld [vmem:[#allocation15 + $0xb30] sm:$0xff]  ;;  %v4267_v27 = vld [vmem:[#allocation15 + $0xaf8] sm:$0xff] }
0x1573   :  { %5811 = vmatprep.subr.mxu1 %v4873_v14  ;;  %5884 = vmatprep.subr.mxu0 %v4099_v44  ;;  %v4522_v1 = vld [vmem:[#allocation15 + $0x12f0] sm:$0xff]  ;;  %v4515_v6 = vld [vmem:[#allocation15 + $0x12b8] sm:$0xff] }
0x1574   :  { %5812 = vmatpush2.msra.mxu1 %v4872_v46  ;;  %5885 = vmatpush2.msra.mxu0 %v4098_v47  ;;  %v4514_v14 = vld [vmem:[#allocation15 + $0x12b0] sm:$0xff]  ;;  %v4259_v44 = vld [vmem:[#allocation15 + $0xab8] sm:$0xff] }
0x1575   :  { %5813 = vmatprep.subr.mxu1 %v4865_v48  ;;  %5886 = vmatprep.subr.mxu0 %v4091_v29  ;;  %v4507_v46 = vld [vmem:[#allocation15 + $0x1278] sm:$0xff]  ;;  %v4258_v47 = vld [vmem:[#allocation15 + $0xab0] sm:$0xff] }
0x1576   :  { %5814 = vmatpush2.msra.mxu1 %v4864_v49  ;;  %5887 = vmatpush2.msra.mxu0 %v4090_v42  ;;  %v4506_v48 = vld [vmem:[#allocation15 + $0x1270] sm:$0xff]  ;;  %v4251_v29 = vld [vmem:[#allocation15 + $0xa78] sm:$0xff] }
0x1577   :  { %5815 = vmatprep.subr.mxu1 %v4857_v50  ;;  %5888 = vmatprep.subr.mxu0 %v4083_v55  ;;  %v4499_v49 = vld [vmem:[#allocation15 + $0x1238] sm:$0xff]  ;;  %v4250_v42 = vld [vmem:[#allocation15 + $0xa70] sm:$0xff] }
0x1578   :  { %5816 = vmatpush2.msra.mxu1 %v4856_v59  ;;  %5889 = vmatpush2.msra.mxu0 %v4082_v61  ;;  %v4498_v50 = vld [vmem:[#allocation15 + $0x1230] sm:$0xff]  ;;  %v4243_v55 = vld [vmem:[#allocation15 + $0xa38] sm:$0xff] }
0x1579   :  { %5817 = vmatprep.subr.mxu1 %v4849_v22  ;;  %5890 = vmatprep.subr.mxu0 %v4075_v0  ;;  %v4491_v59 = vld [vmem:[#allocation15 + $0x11f8] sm:$0xff]  ;;  %v4242_v61 = vld [vmem:[#allocation15 + $0xa30] sm:$0xff] }
0x157a   :  { %5818 = vmatpush2.msra.mxu1 %v4848_v34  ;;  %5891 = vmatpush2.msra.mxu0 %v4074_v58  ;;  %v4490_v22 = vld [vmem:[#allocation15 + $0x11f0] sm:$0xff]  ;;  %v4235_v0 = vld [vmem:[#allocation15 + $0x9f8] sm:$0xff] }
0x157b   :  { %5819 = vmatprep.subr.mxu1 %v4841_v43  ;;  %5892 = vmatprep.subr.mxu0 %v4067_v35  ;;  %v4483_v34 = vld [vmem:[#allocation15 + $0x11b8] sm:$0xff]  ;;  %v4234_v58 = vld [vmem:[#allocation15 + $0x9f0] sm:$0xff] }
0x157c   :  { %5820 = vmatpush2.msra.mxu1 %v4840_v40  ;;  %5893 = vmatpush2.msra.mxu0 %v4066_v38  ;;  %v4482_v43 = vld [vmem:[#allocation15 + $0x11b0] sm:$0xff]  ;;  %v4227_v35 = vld [vmem:[#allocation15 + $0x9b8] sm:$0xff] }
0x157d   :  { %5821 = vmatprep.subr.mxu1 %v4833_v62  ;;  %5894 = vmatprep.subr.mxu0 %v4059_v3  ;;  %v4475_v40 = vld [vmem:[#allocation15 + $0x1178] sm:$0xff]  ;;  %v4226_v38 = vld [vmem:[#allocation15 + $0x9b0] sm:$0xff] }
0x157e   :  { %5822 = vmatpush2.msra.mxu1 %v4832_v63  ;;  %5895 = vmatpush2.msra.mxu0 %v4058_v39  ;;  %v4474_v62 = vld [vmem:[#allocation15 + $0x1170] sm:$0xff]  ;;  %v4219_v3 = vld [vmem:[#allocation15 + $0x978] sm:$0xff] }
0x157f   :  { %5823 = vmatprep.subr.mxu1 %v4825_v52  ;;  %5896 = vmatprep.subr.mxu0 %v4051_v54  ;;  %v4467_v63 = vld [vmem:[#allocation15 + $0x1138] sm:$0xff]  ;;  %v4218_v39 = vld [vmem:[#allocation15 + $0x970] sm:$0xff] }
0x1580   :  { %5824 = vmatpush2.msra.mxu1 %v4824_v12  ;;  %5897 = vmatpush2.msra.mxu0 %v4050_v16  ;;  %v4466_v52 = vld [vmem:[#allocation15 + $0x1130] sm:$0xff]  ;;  %v4211_v54 = vld [vmem:[#allocation15 + $0x938] sm:$0xff] }
0x1581   :  { %5825 = vmatprep.subr.mxu1 %v4817_v7  ;;  %5899 = vmatmul.mubr.f32.vlgmr.msra.gmra.mxu0 %v7880_v10  ;;  %v4283_v10 = vld [vmem:[#allocation15 + $0xb78] sm:$0xff]  ;;  %v4210_v16 = vld [vmem:[#allocation15 + $0x930] sm:$0xff] }
0x1582   :  { %5976 = vmatprep.subr.mxu0 %v4555_v20  ;;  %5826 = vmatpush2.msra.mxu1 %v4816_v24  ;;  %v4459_v12 = vld [vmem:[#allocation15 + $0x10f8] sm:$0xff]  ;;  %v4458_v7 = vld [vmem:[#allocation15 + $0x10f0] sm:$0xff] }
0x1583   :  { %5977 = vmatpush1.msra.mxu0 %v4554_v26  ;;  %6040 = vmatprep.mubr.f32.mxu0 %v7891_v56  ;;  %v4275_v56 = vld [vmem:[#allocation15 + $0xb38] sm:$0xff]  ;;  %v4202_v26 = vld [vmem:[#allocation15 + $0x8f0] sm:$0xff] }
0x1584   :  { %5828 = vmatmul.mubr.f32.vlgmr.msra.gmra.mxu1 %v7907_v9  ;;  %5905 = vmatprep.subr.mxu1 %v4299_v30  ;;  %v4203_v20 = vld [vmem:[#allocation15 + $0x8f8] sm:$0xff]  ;;  %v4450_v30 = vld [vmem:[#allocation15 + $0x10b0] sm:$0xff] }
0x1585   :  { %5978 = vmatprep.subr.mxu0 %v4547_v11  ;;  %5906 = vmatpush1.msra.mxu1 %v4298_v15  ;;  %v4451_v24 = vld [vmem:[#allocation15 + $0x10b8] sm:$0xff] }
0x1586   :  { %5969 = vmatprep.mubr.f32.mxu1 %v7873_v18  ;;  %5979 = vmatpush1.msra.mxu0 %v4546_v19  ;;  %v4266_v18 = vld [vmem:[#allocation15 + $0xaf0] sm:$0xff]  ;;  %v4195_v11 = vld [vmem:[#allocation15 + $0x8b8] sm:$0xff] }
0x1587   :  { %5907 = vmatprep.subr.mxu1 %v4291_v4  ;;  %5980 = vmatprep.subr.mxu0 %v4539_v31  ;;  %v4443_v15 = vld [vmem:[#allocation15 + $0x1078] sm:$0xff]  ;;  %v4194_v19 = vld [vmem:[#allocation15 + $0x8b0] sm:$0xff] }
0x1588   :  { %5908 = vmatpush1.msra.mxu1 %v4290_v33  ;;  %5981 = vmatpush1.msra.mxu0 %v4538_v51  ;;  %v4442_v4 = vld [vmem:[#allocation15 + $0x1070] sm:$0xff]  ;;  %v4187_v31 = vld [vmem:[#allocation15 + $0x878] sm:$0xff] }
0x1589   :  { %5909 = vmatprep.subr.mxu1 %v4283_v10  ;;  %5982 = vmatprep.subr.mxu0 %v4531_v2  ;;  %v4435_v33 = vld [vmem:[#allocation15 + $0x1038] sm:$0xff]  ;;  %v4186_v51 = vld [vmem:[#allocation15 + $0x870] sm:$0xff] }
0x158a   :  { %5910 = vmatpush1.msra.mxu1 %v4282_v28  ;;  %5983 = vmatpush1.msra.mxu0 %v4530_v5  ;;  %v4434_v10 = vld [vmem:[#allocation15 + $0x1030] sm:$0xff]  ;;  %v4179_v2 = vld [vmem:[#allocation15 + $0x838] sm:$0xff] }
0x158b   :  { %5911 = vmatprep.subr.mxu1 %v4275_v56  ;;  %5984 = vmatprep.subr.mxu0 %v4523_v17  ;;  %v4683_v28 = vld [vmem:[#allocation15 + $0x17f8] sm:$0xff]  ;;  %v4178_v5 = vld [vmem:[#allocation15 + $0x830] sm:$0xff] }
0x158c   :  { %5912 = vmatpush1.msra.mxu1 %v4274_v23  ;;  %5985 = vmatpush1.msra.mxu0 %v4522_v1  ;;  %v4682_v56 = vld [vmem:[#allocation15 + $0x17f0] sm:$0xff]  ;;  %v4427_v17 = vld [vmem:[#allocation15 + $0xff8] sm:$0xff] }
0x158d   :  { %5913 = vmatprep.subr.mxu1 %v4267_v27  ;;  %5986 = vmatprep.subr.mxu0 %v4515_v6  ;;  %v4675_v23 = vld [vmem:[#allocation15 + $0x17b8] sm:$0xff]  ;;  %v4426_v1 = vld [vmem:[#allocation15 + $0xff0] sm:$0xff] }
0x158e   :  { %5914 = vmatpush1.msra.mxu1 %v4266_v18  ;;  %5987 = vmatpush1.msra.mxu0 %v4514_v14  ;;  %v4674_v27 = vld [vmem:[#allocation15 + $0x17b0] sm:$0xff]  ;;  %v4419_v6 = vld [vmem:[#allocation15 + $0xfb8] sm:$0xff] }
0x158f   :  { %5915 = vmatprep.subr.mxu1 %v4259_v44  ;;  %5988 = vmatprep.subr.mxu0 %v4507_v46  ;;  %v4667_v18 = vld [vmem:[#allocation15 + $0x1778] sm:$0xff]  ;;  %v4418_v14 = vld [vmem:[#allocation15 + $0xfb0] sm:$0xff] }
0x1590   :  { %5916 = vmatpush1.msra.mxu1 %v4258_v47  ;;  %5989 = vmatpush1.msra.mxu0 %v4506_v48  ;;  %v4666_v44 = vld [vmem:[#allocation15 + $0x1770] sm:$0xff]  ;;  %v4411_v46 = vld [vmem:[#allocation15 + $0xf78] sm:$0xff] }
0x1591   :  { %5917 = vmatprep.subr.mxu1 %v4251_v29  ;;  %5990 = vmatprep.subr.mxu0 %v4499_v49  ;;  %v4659_v47 = vld [vmem:[#allocation15 + $0x1738] sm:$0xff]  ;;  %v4410_v48 = vld [vmem:[#allocation15 + $0xf70] sm:$0xff] }
0x1592   :  { %5918 = vmatpush1.msra.mxu1 %v4250_v42  ;;  %5991 = vmatpush1.msra.mxu0 %v4498_v50  ;;  %v4658_v29 = vld [vmem:[#allocation15 + $0x1730] sm:$0xff]  ;;  %v4403_v49 = vld [vmem:[#allocation15 + $0xf38] sm:$0xff] }
0x1593   :  { %5919 = vmatprep.subr.mxu1 %v4243_v55  ;;  %5992 = vmatprep.subr.mxu0 %v4491_v59  ;;  %v4651_v42 = vld [vmem:[#allocation15 + $0x16f8] sm:$0xff]  ;;  %v4402_v50 = vld [vmem:[#allocation15 + $0xf30] sm:$0xff] }
0x1594   :  { %5920 = vmatpush1.msra.mxu1 %v4242_v61  ;;  %5993 = vmatpush1.msra.mxu0 %v4490_v22  ;;  %v4650_v55 = vld [vmem:[#allocation15 + $0x16f0] sm:$0xff]  ;;  %v4395_v59 = vld [vmem:[#allocation15 + $0xef8] sm:$0xff] }
0x1595   :  { %5921 = vmatprep.subr.mxu1 %v4235_v0  ;;  %5994 = vmatprep.subr.mxu0 %v4483_v34  ;;  %v4643_v61 = vld [vmem:[#allocation15 + $0x16b8] sm:$0xff]  ;;  %v4394_v22 = vld [vmem:[#allocation15 + $0xef0] sm:$0xff] }
0x1596   :  { %5922 = vmatpush1.msra.mxu1 %v4234_v58  ;;  %5995 = vmatpush1.msra.mxu0 %v4482_v43  ;;  %v4642_v0 = vld [vmem:[#allocation15 + $0x16b0] sm:$0xff]  ;;  %v4387_v34 = vld [vmem:[#allocation15 + $0xeb8] sm:$0xff] }
0x1597   :  { %5923 = vmatprep.subr.mxu1 %v4227_v35  ;;  %5996 = vmatprep.subr.mxu0 %v4475_v40  ;;  %v4635_v58 = vld [vmem:[#allocation15 + $0x1678] sm:$0xff]  ;;  %v4386_v43 = vld [vmem:[#allocation15 + $0xeb0] sm:$0xff] }
0x1598   :  { %5924 = vmatpush1.msra.mxu1 %v4226_v38  ;;  %5997 = vmatpush1.msra.mxu0 %v4474_v62  ;;  %v4634_v35 = vld [vmem:[#allocation15 + $0x1670] sm:$0xff]  ;;  %v4379_v40 = vld [vmem:[#allocation15 + $0xe78] sm:$0xff] }
0x1599   :  { %5925 = vmatprep.subr.mxu1 %v4219_v3  ;;  %5998 = vmatprep.subr.mxu0 %v4467_v63  ;;  %v4627_v38 = vld [vmem:[#allocation15 + $0x1638] sm:$0xff]  ;;  %v4378_v62 = vld [vmem:[#allocation15 + $0xe70] sm:$0xff]  ;;  %v7929_v63 = vpop.f32.mrf.mxu0 }
0x159a   :  { %5926 = vmatpush1.msra.mxu1 %v4218_v39  ;;  %5999 = vmatpush1.msra.mxu0 %v4466_v52  ;;  %v4626_v3 = vld [vmem:[#allocation15 + $0x1630] sm:$0xff]  ;;  %v4371_v39 = vld [vmem:[#allocation15 + $0xe38] sm:$0xff] }
0x159b   :  { %5927 = vmatprep.subr.mxu1 %v4211_v54  ;;  %6000 = vmatprep.subr.mxu0 %v4459_v12  ;;  %v4619_v52 = vld [vmem:[#allocation15 + $0x15f8] sm:$0xff]  ;;  %v4370_v54 = vld [vmem:[#allocation15 + $0xe30] sm:$0xff] }
0x159c   :  { %5928 = vmatpush1.msra.mxu1 %v4210_v16  ;;  %6001 = vmatpush1.msra.mxu0 %v4458_v7  ;;  %v4618_v12 = vld [vmem:[#allocation15 + $0x15f0] sm:$0xff]  ;;  %v7931_v16 = vpop.f32.mrf.mxu1  ;;  %v7933_v7 = vld [vmem:[#allocation16] sm:$0xff] }
0x159d   :  { %5929 = vmatprep.subr.mxu1 %v4203_v20  ;;  %6002 = vmatprep.subr.mxu0 %v4451_v24  ;;  %v4363_v20 = vld [vmem:[#allocation15 + $0xdf8] sm:$0xff] }
0x159e   :  { %5930 = vmatpush1.msra.mxu1 %v4202_v26  ;;  %6003 = vmatpush1.msra.mxu0 %v4450_v30  ;;  %v4611_v24 = vld [vmem:[#allocation15 + $0x15b8] sm:$0xff]  ;;  %v4949_v26 = vrot.slane %v7933_v7, %v7375_v45  ;;  %v4362_v30 = vld [vmem:[#allocation15 + $0xdf0] sm:$0xff] }
0x159f   :  { %5931 = vmatprep.subr.mxu1 %v4195_v11  ;;  %6004 = vmatprep.subr.mxu0 %v4443_v15  ;;  %v4610_v11 = vld [vmem:[#allocation15 + $0x15b0] sm:$0xff]  ;;  %v5050_v15 = vpop.f32.mrf.mxu0  ;;  %v4595_v45 = vld [vmem:[#allocation15 + $0x1538] sm:$0xff] }
0x15a0   :  { %5932 = vmatpush1.msra.mxu1 %v4194_v19  ;;  %6005 = vmatpush1.msra.mxu0 %v4442_v4  ;;  %v4355_v19 = vld [vmem:[#allocation15 + $0xdb8] sm:$0xff] }
0x15a1   :  { %5933 = vmatprep.subr.mxu1 %v4187_v31  ;;  %6006 = vmatprep.subr.mxu0 %v4435_v33  ;;  %v4603_v4 = vld [vmem:[#allocation15 + $0x1578] sm:$0xff]  ;;  %v4354_v31 = vld [vmem:[#allocation15 + $0xdb0] sm:$0xff] }
0x15a2   :  { %5934 = vmatpush1.msra.mxu1 %v4186_v51  ;;  %6007 = vmatpush1.msra.mxu0 %v4434_v10  ;;  %v4602_v33 = vld [vmem:[#allocation15 + $0x1570] sm:$0xff]  ;;  %v5121_v51 = vpop.f32.mrf.mxu1  ;;  %v7937_v10 = vpop.f32.mrf.mxu0 }
0x15a3   :  { %5935 = vmatprep.subr.mxu1 %v4179_v2  ;;  %6008 = vmatprep.subr.mxu0 %v4683_v28  ;;  %v4347_v2 = vld [vmem:[#allocation15 + $0xd78] sm:$0xff]  ;;  %v5051_v28 = vadd.f32 %v5050_v15, %v4949_v26 }
0x15a4   :  { %5936 = vmatpush1.msra.mxu1 %v4178_v5  ;;  %6009 = vmatpush2.msra.mxu0 %v4682_v56  ;;  %v4346_v5 = vld [vmem:[#allocation15 + $0xd70] sm:$0xff]  ;;  %v4795_v26 = vld [vmem:[#allocation15 + $0x1b78] sm:$0xff] }
0x15a5   :  { %5937 = vmatprep.subr.mxu1 %v4427_v17  ;;  %6010 = vmatprep.subr.mxu0 %v4675_v23  ;;  %v4594_v56 = vld [vmem:[#allocation15 + $0x1530] sm:$0xff]  ;;  %v7939_v17 = vpop.f32.mrf.mxu1  ;;  %v4339_v23 = vld [vmem:[#allocation15 + $0xd38] sm:$0xff] }
0x15a6   :  { %5938 = vmatpush2.msra.mxu1 %v4426_v1  ;;  %6011 = vmatpush2.msra.mxu0 %v4674_v27  ;;  %v4587_v1 = vld [vmem:[#allocation15 + $0x14f8] sm:$0xff]  ;;  %v4338_v27 = vld [vmem:[#allocation15 + $0xd30] sm:$0xff] }
0x15a7   :  { %5939 = vmatprep.subr.mxu1 %v4419_v6  ;;  %6012 = vmatprep.subr.mxu0 %v4667_v18  ;;  %v4586_v6 = vld [vmem:[#allocation15 + $0x14f0] sm:$0xff]  ;;  %v5192_v18 = vpop.f32.mrf.mxu0  ;;  %v4787_v15 = vld [vmem:[#allocation15 + $0x1b38] sm:$0xff] }
0x15a8   :  { %5940 = vmatpush2.msra.mxu1 %v4418_v14  ;;  %6013 = vmatpush2.msra.mxu0 %v4666_v44  ;;  %v4331_v14 = vld [vmem:[#allocation15 + $0xcf8] sm:$0xff] }
0x15a9   :  { %5941 = vmatprep.subr.mxu1 %v4411_v46  ;;  %6014 = vmatprep.subr.mxu0 %v4659_v47  ;;  %v4579_v44 = vld [vmem:[#allocation15 + $0x14b8] sm:$0xff]  ;;  %v5122_v46 = vadd.f32 %v5121_v51, %v5051_v28  ;;  %v4330_v47 = vld [vmem:[#allocation15 + $0xcf0] sm:$0xff]  ;;  %v6151_v28 = vld [vmem:[%s8377_s8 + $0xc8] sm:$0xff] }
0x15aa   :  { %5942 = vmatpush2.msra.mxu1 %v4410_v48  ;;  %6015 = vmatpush2.msra.mxu0 %v4658_v29  ;;  %v4578_v48 = vld [vmem:[#allocation15 + $0x14b0] sm:$0xff]  ;;  %v5263_v29 = vpop.f32.mrf.mxu1 }
0x15ab   :  { %5943 = vmatprep.subr.mxu1 %v4403_v49  ;;  %6016 = vmatprep.subr.mxu0 %v4651_v42  ;;  %v4323_v49 = vld [vmem:[#allocation15 + $0xcb8] sm:$0xff]  ;;  %v4778_v51 = vld [vmem:[#allocation15 + $0x1af0] sm:$0xff] }
0x15ac   :  { %5944 = vmatpush2.msra.mxu1 %v4402_v50  ;;  %6017 = vmatpush2.msra.mxu0 %v4650_v55  ;;  %v4571_v42 = vld [vmem:[#allocation15 + $0x1478] sm:$0xff]  ;;  %v5193_v50 = vadd.f32 %v5192_v18, %v5122_v46  ;;  %v4322_v55 = vld [vmem:[#allocation15 + $0xcb0] sm:$0xff] }
0x15ad   :  { %5945 = vmatprep.subr.mxu1 %v4395_v59  ;;  %6018 = vmatprep.subr.mxu0 %v4643_v61  ;;  %v4570_v59 = vld [vmem:[#allocation15 + $0x1470] sm:$0xff]  ;;  %v4315_v61 = vld [vmem:[#allocation15 + $0xc78] sm:$0xff] }
0x15ae   :  { %5946 = vmatpush2.msra.mxu1 %v4394_v22  ;;  %6019 = vmatpush2.msra.mxu0 %v4642_v0  ;;  %v4563_v22 = vld [vmem:[#allocation15 + $0x1438] sm:$0xff]  ;;  %v5264_v0 = vadd.f32 %v5263_v29, %v5193_v50  ;;  %v4754_v46 = vld [vmem:[#allocation15 + $0x1a30] sm:$0xff]  ;;  %v6147_v50 = vld [vmem:[%s8377_s8 + $0xa8] sm:$0xff] }
0x15af   :  { %5947 = vmatprep.subr.mxu1 %v4387_v34  ;;  %6020 = vmatprep.subr.mxu0 %v4635_v58  ;;  %v4314_v34 = vld [vmem:[#allocation15 + $0xc70] sm:$0xff]  ;;  %v4755_v18 = vld [vmem:[#allocation15 + $0x1a38] sm:$0xff] }
0x15b0   :  { %5948 = vmatpush2.msra.mxu1 %v4386_v43  ;;  %6021 = vmatpush2.msra.mxu0 %v4634_v35  ;;  %v4562_v58 = vld [vmem:[#allocation15 + $0x1430] sm:$0xff]  ;;  %v4307_v43 = vld [vmem:[#allocation15 + $0xc38] sm:$0xff] }
0x15b1   :  { %5949 = vmatprep.subr.mxu1 %v4379_v40  ;;  %6022 = vmatprep.subr.mxu0 %v4627_v38  ;;  %v6157_v35 = vld [vmem:[%s8377_s8 + $0xf8] sm:$0xff]  ;;  %v6148_v29 = vld [vmem:[%s8377_s8 + $0xb0] sm:$0xff] }
0x15b2   :  { %5950 = vmatpush2.msra.mxu1 %v4378_v62  ;;  %6023 = vmatpush2.msra.mxu0 %v4626_v3  ;;  %v4306_v40 = vld [vmem:[#allocation15 + $0xc30] sm:$0xff]  ;;  %v6119_v62 = vmax.f32 %v5264_v0, 0.0  ;;  %v4811_v3 = vld [vmem:[#allocation15 + $0x1bf8] sm:$0xff] }
0x15b3   :  { %5951 = vmatprep.subr.mxu1 %v4371_v39  ;;  %6024 = vmatprep.subr.mxu0 %v4619_v52  ;;  %v6141_v38 = vld [vmem:[%s8377_s8 + $0x78] sm:$0xff]  ;;  %v6156_v39 = vld [vmem:[%s8377_s8 + $0xf0] sm:$0xff]  ;;  %v6146_v0 = vld [vmem:[%s8377_s8 + $0xa0] sm:$0xff] }
0x15b4   :  { %5952 = vmatpush2.msra.mxu1 %v4370_v54  ;;  %6025 = vmatpush2.msra.mxu0 %v4618_v12  ;;  %v4810_v52 = vld [vmem:[#allocation15 + $0x1bf0] sm:$0xff]  ;;  %v4803_v12 = vld [vmem:[#allocation15 + $0x1bb8] sm:$0xff] }
0x15b5   :  { %5953 = vmatprep.subr.mxu1 %v4363_v20  ;;  %6026 = vmatprep.subr.mxu0 %v4611_v24  ;;  %v6140_v54 = vld [vmem:[%s8377_s8 + $0x70] sm:$0xff]  ;;  %v6139_v24 = vld [vmem:[%s8377_s8 + $0x68] sm:$0xff] }
0x15b6   :  { %5954 = vmatpush2.msra.mxu1 %v4362_v30  ;;  %6027 = vmatpush2.msra.mxu0 %v4610_v11  ;;  %v4802_v20 = vld [vmem:[#allocation15 + $0x1bb0] sm:$0xff]  ;;  %v6138_v11 = vld [vmem:[%s8377_s8 + $0x60] sm:$0xff] }
0x15b7   :  { %5955 = vmatprep.subr.mxu1 %v4355_v19  ;;  %6028 = vmatprep.subr.mxu0 %v4603_v4  ;;  %v4794_v30 = vld [vmem:[#allocation15 + $0x1b70] sm:$0xff] }
0x15b8   :  { %5956 = vmatpush2.msra.mxu1 %v4354_v31  ;;  %6029 = vmatpush2.msra.mxu0 %v4602_v33  ;;  %v4786_v19 = vld [vmem:[#allocation15 + $0x1b30] sm:$0xff]  ;;  %v4779_v31 = vld [vmem:[#allocation15 + $0x1af8] sm:$0xff] }
0x15b9   :  { %5957 = vmatprep.subr.mxu1 %v4347_v2  ;;  %6030 = vmatprep.subr.mxu0 %v4595_v45  ;;  %v6137_v4 = vld [vmem:[%s8377_s8 + $0x58] sm:$0xff]  ;;  %v6152_v33 = vld [vmem:[%s8377_s8 + $0xd0] sm:$0xff] }
0x15ba   :  { %5958 = vmatpush2.msra.mxu1 %v4346_v5  ;;  %6031 = vmatpush2.msra.mxu0 %v4594_v56  ;;  %v6136_v2 = vld [vmem:[%s8377_s8 + $0x50] sm:$0xff]  ;;  %v4771_v45 = vld [vmem:[#allocation15 + $0x1ab8] sm:$0xff]  ;;  %v6135_v56 = vld [vmem:[%s8377_s8 + $0x48] sm:$0xff] }
0x15bb   :  { %5959 = vmatprep.subr.mxu1 %v4339_v23  ;;  %6032 = vmatprep.subr.mxu0 %v4587_v1  ;;  %v4770_v5 = vld [vmem:[#allocation15 + $0x1ab0] sm:$0xff]  ;;  %v4763_v23 = vld [vmem:[#allocation15 + $0x1a78] sm:$0xff] }
0x15bc   :  { %5960 = vmatpush2.msra.mxu1 %v4338_v27  ;;  %6033 = vmatpush2.msra.mxu0 %v4586_v6  ;;  %v6150_v1 = vld [vmem:[%s8377_s8 + $0xc0] sm:$0xff]  ;;  %v4762_v27 = vld [vmem:[#allocation15 + $0x1a70] sm:$0xff] }
0x15bd   :  { %5961 = vmatprep.subr.mxu1 %v4331_v14  ;;  %6034 = vmatprep.subr.mxu0 %v4579_v44  ;;  %v6134_v6 = vld [vmem:[%s8377_s8 + $0x40] sm:$0xff]  ;;  %v6149_v14 = vld [vmem:[%s8377_s8 + $0xb8] sm:$0xff]  ;;  %v4945_v44 = vrot.slane %v7933_v7, %v7371_v37  ;;  %v6132_v37 = vld [vmem:[%s8377_s8 + $0x30] sm:$0xff] }
0x15be   :  { %5962 = vmatpush2.msra.mxu1 %v4330_v47  ;;  %6035 = vmatpush2.msra.mxu0 %v4578_v48  ;;  %v6133_v47 = vld [vmem:[%s8377_s8 + $0x38] sm:$0xff] }
0x15bf   :  { %5963 = vmatprep.subr.mxu1 %v4323_v49  ;;  %6036 = vmatprep.subr.mxu0 %v4571_v42  ;;  %v4747_v48 = vld [vmem:[#allocation15 + $0x19f8] sm:$0xff]  ;;  %v4746_v49 = vld [vmem:[#allocation15 + $0x19f0] sm:$0xff] }
0x15c0   :  { %5964 = vmatpush2.msra.mxu1 %v4322_v55  ;;  %6037 = vmatpush2.msra.mxu0 %v4570_v59  ;;  %v4739_v42 = vld [vmem:[#allocation15 + $0x19b8] sm:$0xff]  ;;  %v5049_v55 = vadd.f32 %v7929_v63, %v4945_v44  ;;  %v4738_v59 = vld [vmem:[#allocation15 + $0x19b0] sm:$0xff] }
0x15c1   :  { %5965 = vmatprep.subr.mxu1 %v4315_v61  ;;  %6038 = vmatprep.subr.mxu0 %v4563_v22  ;;  %v6131_v61 = vld [vmem:[%s8377_s8 + $0x28] sm:$0xff]  ;;  %v4731_v22 = vld [vmem:[#allocation15 + $0x1978] sm:$0xff] }
0x15c2   :  { %5966 = vmatpush2.msra.mxu1 %v4314_v34  ;;  %6039 = vmatpush2.msra.mxu0 %v4562_v58  ;;  %v4730_v34 = vld [vmem:[#allocation15 + $0x1970] sm:$0xff]  ;;  %v6130_v63 = vld [vmem:[%s8377_s8 + $0x20] sm:$0xff] }
0x15c3   :  { %5967 = vmatprep.subr.mxu1 %v4307_v43  ;;  %6041 = vmatmul.mubr.f32.vlgmr.msra.gmra.mxu0 %v7893_v57  ;;  %v6155_v57 = vld [vmem:[%s8377_s8 + $0xe8] sm:$0xff]  ;;  %v4723_v58 = vld [vmem:[#allocation15 + $0x1938] sm:$0xff] }
0x15c4   :  { %6614 = vmatprep.subr.mxu0 %v6157_v35  ;;  %5968 = vmatpush2.msra.mxu1 %v4306_v40  ;;  %v6145_v43 = vld [vmem:[%s8377_s8 + $0x98] sm:$0xff]  ;;  %v5120_v35 = vadd.f32 %v7931_v16, %v5049_v55  ;;  %v6128_v16 = vld [vmem:[%s8377_s8 + $0x10] sm:$0xff] }
0x15c5   :  { %6615 = vmatpush3.msra.mxu0 %v6141_v38  ;;  %6328 = vmatprep.mubr.f32.mxu0 %v6119_v62  ;;  %v4722_v40 = vld [vmem:[#allocation15 + $0x1930] sm:$0xff]  ;;  %v4715_v62 = vld [vmem:[#allocation15 + $0x18f8] sm:$0xff] }
0x15c6   :  { %5970 = vmatmul.mubr.f32.vlgmr.msra.gmra.mxu1 %v7875_v25  ;;  %6047 = vmatprep.subr.mxu1 %v4811_v3  ;;  %v6154_v25 = vld [vmem:[%s8377_s8 + $0xe0] sm:$0xff]  ;;  %v6129_v38 = vld [vmem:[%s8377_s8 + $0x18] sm:$0xff]  ;;  %v6144_v3 = vld [vmem:[%s8377_s8 + $0x90] sm:$0xff] }
0x15c7   :  { %6616 = vmatprep.subr.mxu0 %v6156_v39  ;;  %6048 = vmatpush1.msra.mxu1 %v4810_v52  ;;  %v5191_v39 = vadd.f32 %v7937_v10, %v5120_v35  ;;  %v4714_v52 = vld [vmem:[#allocation15 + $0x18f0] sm:$0xff]  ;;  %v6127_v10 = vld [vmem:[%s8377_s8 + $0x8] sm:$0xff]  ;;  %v4907_v44 = vld [vmem:[#allocation15 + $0x1ef8] sm:$0xff] }
0x15c8   :  { %6111 = vmatprep.mubr.f32.mxu1 %v7904_v53  ;;  %6617 = vmatpush3.msra.mxu0 %v6140_v54  ;;  %v6153_v53 = vld [vmem:[%s8377_s8 + $0xd8] sm:$0xff]  ;;  %v6200_v55 = vld [vmem:[%s8377_s8 + $0x250] sm:$0xff]  ;;  %v6198_v35 = vld [vmem:[%s8377_s8 + $0x240] sm:$0xff] }
0x15c9   :  { %6049 = vmatprep.subr.mxu1 %v4803_v12  ;;  %6618 = vmatprep.subr.mxu0 %v6155_v57  ;;  %v4707_v54 = vld [vmem:[#allocation15 + $0x18b8] sm:$0xff]  ;;  %v6143_v12 = vld [vmem:[%s8377_s8 + $0x88] sm:$0xff]  ;;  %v5262_v57 = vadd.f32 %v7939_v17, %v5191_v39 }
0x15ca   :  { %6050 = vmatpush1.msra.mxu1 %v4802_v20  ;;  %6619 = vmatpush3.msra.mxu0 %v6139_v24  ;;  %v4706_v20 = vld [vmem:[#allocation15 + $0x18b0] sm:$0xff]  ;;  %v4699_v24 = vld [vmem:[#allocation15 + $0x1878] sm:$0xff] }
0x15cb   :  { %6051 = vmatprep.subr.mxu1 %v4795_v26  ;;  %6620 = vmatprep.subr.mxu0 %v6154_v25  ;;  %v6142_v26 = vld [vmem:[%s8377_s8 + $0x80] sm:$0xff]  ;;  %v4698_v25 = vld [vmem:[#allocation15 + $0x1870] sm:$0xff] }
0x15cc   :  { %6052 = vmatpush1.msra.mxu1 %v4794_v30  ;;  %6621 = vmatpush3.msra.mxu0 %v6138_v11  ;;  %v6126_v17 = vld [vmem:[%s8377_s8] sm:$0xff]  ;;  %v6118_v11 = vmax.f32 %v5262_v57, 0.0 }
0x15cd   :  { %6053 = vmatprep.subr.mxu1 %v4787_v15  ;;  %6622 = vmatprep.subr.mxu0 %v6153_v53  ;;  %v4691_v30 = vld [vmem:[#allocation15 + $0x1838] sm:$0xff]  ;;  %v4690_v15 = vld [vmem:[#allocation15 + $0x1830] sm:$0xff] }
0x15ce   :  { %6054 = vmatpush1.msra.mxu1 %v4786_v19  ;;  %6623 = vmatpush3.msra.mxu0 %v6137_v4  ;;  %v4939_v53 = vld [vmem:[#allocation15 + $0x1ff8] sm:$0xff]  ;;  %v6612_v19 = vld [vmem:[#allocation3] ss:$0 sm:$0xff]  ;;  %v4938_v4 = vld [vmem:[#allocation15 + $0x1ff0] sm:$0xff] }
0x15cf   :  { %6055 = vmatprep.subr.mxu1 %v4779_v31  ;;  %6624 = vmatprep.subr.mxu0 %v6152_v33  ;;  %v6221_v31 = vld [vmem:[%s8377_s8 + $0x2f8] sm:$0xff] }
0x15d0   :  { %6056 = vmatpush1.msra.mxu1 %v4778_v51  ;;  %6625 = vmatpush3.msra.mxu0 %v6136_v2  ;;  %v4931_v33 = vld [vmem:[#allocation15 + $0x1fb8] sm:$0xff]  ;;  %v7132_v51 = vmov 0  }
0x15d1   :  { %6057 = vmatprep.subr.mxu1 %v4771_v45  ;;  %6626 = vmatprep.subr.mxu0 %v6151_v28  ;;  %v6205_v2 = vld [vmem:[%s8377_s8 + $0x278] sm:$0xff]  ;;  %v6220_v28 = vld [vmem:[%s8377_s8 + $0x2f0] sm:$0xff] }
0x15d2   :  { %6058 = vmatpush1.msra.mxu1 %v4770_v5  ;;  %6627 = vmatpush3.msra.mxu0 %v6135_v56  ;;  %v4930_v45 = vld [vmem:[#allocation15 + $0x1fb0] sm:$0xff]  ;;  %v4923_v5 = vld [vmem:[#allocation15 + $0x1f78] sm:$0xff] }
0x15d3   :  { %6059 = vmatprep.subr.mxu1 %v4763_v23  ;;  %6628 = vmatprep.subr.mxu0 %v6150_v1  ;;  %v6204_v56 = vld [vmem:[%s8377_s8 + $0x270] sm:$0xff]  ;;  %v6219_v1 = vld [vmem:[%s8377_s8 + $0x2e8] sm:$0xff]  ;;  %v4867_v39 = vld [vmem:[#allocation15 + $0x1db8] sm:$0xff] }
0x15d4   :  { %6060 = vmatpush1.msra.mxu1 %v4762_v27  ;;  %6629 = vmatpush3.msra.mxu0 %v6134_v6  ;;  %v4922_v23 = vld [vmem:[#allocation15 + $0x1f70] sm:$0xff]  ;;  %v4915_v27 = vld [vmem:[#allocation15 + $0x1f38] sm:$0xff]  ;;  %v6203_v6 = vld [vmem:[%s8377_s8 + $0x268] sm:$0xff] }
0x15d5   :  { %6061 = vmatprep.subr.mxu1 %v4755_v18  ;;  %6630 = vmatprep.subr.mxu0 %v6149_v14  ;;  %v4914_v18 = vld [vmem:[#allocation15 + $0x1f30] sm:$0xff]  ;;  %v6218_v14 = vld [vmem:[%s8377_s8 + $0x2e0] sm:$0xff] }
0x15d6   :  { %6062 = vmatpush1.msra.mxu1 %v4754_v46  ;;  %6631 = vmatpush3.msra.mxu0 %v6133_v47  ;;  %v6202_v46 = vld [vmem:[%s8377_s8 + $0x260] sm:$0xff]  ;;  %v4906_v47 = vld [vmem:[#allocation15 + $0x1ef0] sm:$0xff] }
0x15d7   :  { %6063 = vmatprep.subr.mxu1 %v4747_v48  ;;  %6632 = vmatprep.subr.mxu0 %v6148_v29  ;;  %v6217_v48 = vld [vmem:[%s8377_s8 + $0x2d8] sm:$0xff] }
0x15d8   :  { %6064 = vmatpush1.msra.mxu1 %v4746_v49  ;;  %6633 = vmatpush3.msra.mxu0 %v6132_v37  ;;  %v4899_v29 = vld [vmem:[#allocation15 + $0x1eb8] sm:$0xff]  ;;  %v4898_v37 = vld [vmem:[#allocation15 + $0x1eb0] sm:$0xff] }
0x15d9   :  { %6065 = vmatprep.subr.mxu1 %v4739_v42  ;;  %6634 = vmatprep.subr.mxu0 %v6147_v50  ;;  %v6201_v49 = vld [vmem:[%s8377_s8 + $0x258] sm:$0xff]  ;;  %v6216_v42 = vld [vmem:[%s8377_s8 + $0x2d0] sm:$0xff] }
0x15da   :  { %6066 = vmatpush1.msra.mxu1 %v4738_v59  ;;  %6635 = vmatpush3.msra.mxu0 %v6131_v61  ;;  %v4891_v50 = vld [vmem:[#allocation15 + $0x1e78] sm:$0xff]  ;;  %v4890_v59 = vld [vmem:[#allocation15 + $0x1e70] sm:$0xff]  ;;  %v6215_v61 = vld [vmem:[%s8377_s8 + $0x2c8] sm:$0xff] }
0x15db   :  { %6067 = vmatprep.subr.mxu1 %v4731_v22  ;;  %6636 = vmatprep.subr.mxu0 %v6146_v0  ;;  %v4883_v22 = vld [vmem:[#allocation15 + $0x1e38] sm:$0xff]  ;;  %v6199_v0 = vld [vmem:[%s8377_s8 + $0x248] sm:$0xff] }
0x15dc   :  { %6068 = vmatpush1.msra.mxu1 %v4730_v34  ;;  %6637 = vmatpush3.msra.mxu0 %v6130_v63  ;;  %v8089_v34 = vpop.f32.mrf.mxu0  ;;  %v4882_v63 = vld [vmem:[#allocation15 + $0x1e30] sm:$0xff]  ;;  %v4859_v57 = vld [vmem:[#allocation15 + $0x1d78] sm:$0xff] }
0x15dd   :  { %6069 = vmatprep.subr.mxu1 %v4723_v58  ;;  %6638 = vmatprep.subr.mxu0 %v6145_v43  ;;  %v6214_v58 = vld [vmem:[%s8377_s8 + $0x2c0] sm:$0xff] }
0x15de   :  { %6070 = vmatpush1.msra.mxu1 %v4722_v40  ;;  %6639 = vmatpush3.msra.mxu0 %v6129_v38  ;;  %v4875_v43 = vld [vmem:[#allocation15 + $0x1df8] sm:$0xff]  ;;  %v8097_v40 = vpop.f32.mrf.mxu1  ;;  %v4874_v38 = vld [vmem:[#allocation15 + $0x1df0] sm:$0xff] }
0x15df   :  { %6071 = vmatprep.subr.mxu1 %v4715_v62  ;;  %6640 = vmatprep.subr.mxu0 %v6144_v3  ;;  %v6213_v62 = vld [vmem:[%s8377_s8 + $0x2b8] sm:$0xff]  ;;  %v4957_v3 = vrot.slane %v7933_v7, %v3030_v8  ;;  %v6196_v8 = vld [vmem:[%s8377_s8 + $0x230] sm:$0xff] }
0x15e0   :  { %6072 = vmatpush1.msra.mxu1 %v4714_v52  ;;  %6641 = vmatpush3.msra.mxu0 %v6128_v16  ;;  %v6197_v52 = vld [vmem:[%s8377_s8 + $0x238] sm:$0xff]  ;;  %v5334_v16 = vpop.f32.mrf.mxu0 }
0x15e1   :  { %6073 = vmatprep.subr.mxu1 %v4707_v54  ;;  %6642 = vmatprep.subr.mxu0 %v6143_v12  ;;  %v4866_v54 = vld [vmem:[#allocation15 + $0x1db0] sm:$0xff] }
0x15e2   :  { %6074 = vmatpush1.msra.mxu1 %v4706_v20  ;;  %6643 = vmatpush3.msra.mxu0 %v6127_v10  ;;  %v6212_v12 = vld [vmem:[%s8377_s8 + $0x2b0] sm:$0xff]  ;;  %v5405_v20 = vpop.f32.mrf.mxu1 }
0x15e3   :  { %6075 = vmatprep.subr.mxu1 %v4699_v24  ;;  %6644 = vmatprep.subr.mxu0 %v6142_v26  ;;  %v4858_v10 = vld [vmem:[#allocation15 + $0x1d70] sm:$0xff]  ;;  %v6211_v24 = vld [vmem:[%s8377_s8 + $0x2a8] sm:$0xff]  ;;  %v5335_v26 = vadd.f32 %v5334_v16, %v4957_v3  ;;  %v6182_v3 = vld [vmem:[%s8377_s8 + $0x1c0] sm:$0xff]  ;;  %v4953_v16 = vrot.slane %v7933_v7, %v3026_v41 }
0x15e4   :  { %6076 = vmatpush1.msra.mxu1 %v4698_v25  ;;  %6645 = vmatpush3.msra.mxu0 %v6126_v17  ;;  %v4851_v25 = vld [vmem:[#allocation15 + $0x1d38] sm:$0xff]  ;;  %v6195_v17 = vld [vmem:[%s8377_s8 + $0x228] sm:$0xff] }
0x15e5   :  { %6077 = vmatprep.subr.mxu1 %v4691_v30  ;;  %6329 = vmatmul.mubr.f32.vlgmr.msra.gmra.mxu0 %v6118_v11  ;;  %v8120_v30 = vpop.f32.mrf.mxu0  ;;  %v8122_v11 = vpop.f32.mrf.mxu1  ;;  %v6179_v41 = vld [vmem:[%s8377_s8 + $0x1a8] sm:$0xff] }
0x15e6   :  { %6078 = vmatpush1.msra.mxu1 %v4690_v15  ;;  %6772 = vset.pattern.permute.xlu1 %v7132_v51  ;;  %v4850_v15 = vld [vmem:[#allocation15 + $0x1d30] sm:$0xff] }
0x15e7   :  { %6079 = vmatprep.subr.mxu1 %v4939_v53  ;;  %6261 = vperm.xlu1 %6772, %v6612_v19   ;;  %v6210_v53 = vld [vmem:[%s8377_s8 + $0x2a0] sm:$0xff]  ;;  %v5406_v19 = vadd.f32 %v5405_v20, %v5335_v26  ;;  %v6163_v20 = vld [vmem:[%s8377_s8 + $0x128] sm:$0xff] }
0x15e8   :  { %6080 = vmatpush2.msra.mxu1 %v4938_v4  ;;  %6684 = vmatprep.subr.mxu0 %v6221_v31  ;;  %v4843_v4 = vld [vmem:[#allocation15 + $0x1cf8] sm:$0xff] }
0x15e9   :  { %6081 = vmatprep.subr.mxu1 %v4931_v33  ;;  %6685 = vmatpush3.msra.mxu0 %v6205_v2  ;;  %v6194_v31 = vld [vmem:[%s8377_s8 + $0x220] sm:$0xff]  ;;  %v4842_v33 = vld [vmem:[#allocation15 + $0x1cf0] sm:$0xff] }
0x15ea   :  { %6082 = vmatpush2.msra.mxu1 %v4930_v45  ;;  %6686 = vmatprep.subr.mxu0 %v6220_v28  ;;  %v6209_v2 = vld [vmem:[%s8377_s8 + $0x298] sm:$0xff]  ;;  %v6162_v26 = vld [vmem:[%s8377_s8 + $0x120] sm:$0xff] }
0x15eb   :  { %6083 = vmatprep.subr.mxu1 %v4923_v5  ;;  %6687 = vmatpush3.msra.mxu0 %v6204_v56  ;;  %v4835_v45 = vld [vmem:[#allocation15 + $0x1cb8] sm:$0xff]  ;;  %v5476_v5 = vpop.f32.mrf.mxu0  ;;  %v5547_v56 = vpop.f32.mrf.mxu1 }
0x15ec   :  { %6084 = vmatpush2.msra.mxu1 %v4922_v23  ;;  %6688 = vmatprep.subr.mxu0 %v6219_v1  ;;  %v6193_v28 = vld [vmem:[%s8377_s8 + $0x218] sm:$0xff]  ;;  %v6208_v1 = vld [vmem:[%s8377_s8 + $0x290] sm:$0xff] }
0x15ed   :  { %6085 = vmatprep.subr.mxu1 %v4915_v27  ;;  %6689 = vmatpush3.msra.mxu0 %v6203_v6  ;;  %v4834_v23 = vld [vmem:[#allocation15 + $0x1cb0] sm:$0xff]  ;;  %v5477_v27 = vadd.f32 %v5476_v5, %v5406_v19  ;;  %v4827_v6 = vld [vmem:[#allocation15 + $0x1c78] sm:$0xff]  ;;  %v6251_v5 = vld [vmem:[%s8377_s8 + $0x3e8] sm:$0xff] }
0x15ee   :  { %6086 = vmatpush2.msra.mxu1 %v4914_v18  ;;  %6690 = vmatprep.subr.mxu0 %v6218_v14  ;;  %v6192_v18 = vld [vmem:[%s8377_s8 + $0x210] sm:$0xff] }
0x15ef   :  { %6087 = vmatprep.subr.mxu1 %v4907_v44  ;;  %6691 = vmatpush3.msra.mxu0 %v6202_v46  ;;  %v4826_v14 = vld [vmem:[#allocation15 + $0x1c70] sm:$0xff]  ;;  %v6207_v44 = vld [vmem:[%s8377_s8 + $0x288] sm:$0xff]  ;;  %v5548_v46 = vadd.f32 %v5547_v56, %v5477_v27 }
0x15f0   :  { %6088 = vmatpush2.msra.mxu1 %v4906_v47  ;;  %6692 = vmatprep.subr.mxu0 %v6217_v48  ;;  %v4819_v47 = vld [vmem:[#allocation15 + $0x1c38] sm:$0xff]  ;;  %v6191_v48 = vld [vmem:[%s8377_s8 + $0x208] sm:$0xff] }
0x15f1   :  { %6089 = vmatprep.subr.mxu1 %v4899_v29  ;;  %6693 = vmatpush3.msra.mxu0 %v6201_v49  ;;  %v4818_v29 = vld [vmem:[#allocation15 + $0x1c30] sm:$0xff]  ;;  %v6206_v49 = vld [vmem:[%s8377_s8 + $0x280] sm:$0xff]  ;;  %v6235_v56 = vld [vmem:[%s8377_s8 + $0x368] sm:$0xff] }
0x15f2   :  { %6090 = vmatpush2.msra.mxu1 %v4898_v37  ;;  %6694 = vmatprep.subr.mxu0 %v6216_v42  ;;  %v6189_v37 = vld [vmem:[%s8377_s8 + $0x1f8] sm:$0xff] }
0x15f3   :  { %6091 = vmatprep.subr.mxu1 %v4891_v50  ;;  %6695 = vmatpush3.msra.mxu0 %v6200_v55  ;;  %v6173_v42 = vld [vmem:[%s8377_s8 + $0x178] sm:$0xff]  ;;  %v6121_v50 = vmax.f32 %v5548_v46, 0.0  ;;  %v6188_v55 = vld [vmem:[%s8377_s8 + $0x1f0] sm:$0xff]  ;;  %v6231_v46 = vld [vmem:[%s8377_s8 + $0x348] sm:$0xff] }
0x15f4   :  { %6092 = vmatpush2.msra.mxu1 %v4890_v59  ;;  %6696 = vmatprep.subr.mxu0 %v6215_v61  ;;  %v6190_v59 = vld [vmem:[%s8377_s8 + $0x200] sm:$0xff]  ;;  %v6172_v61 = vld [vmem:[%s8377_s8 + $0x170] sm:$0xff]  ;;  %v6249_v27 = vld [vmem:[%s8377_s8 + $0x3d8] sm:$0xff] }
0x15f5   :  { %6093 = vmatprep.subr.mxu1 %v4883_v22  ;;  %6697 = vmatpush3.msra.mxu0 %v6199_v0  ;;  %v6187_v22 = vld [vmem:[%s8377_s8 + $0x1e8] sm:$0xff] }
0x15f6   :  { %6094 = vmatpush2.msra.mxu1 %v4882_v63  ;;  %6698 = vmatprep.subr.mxu0 %v6214_v58  ;;  %v6171_v0 = vld [vmem:[%s8377_s8 + $0x168] sm:$0xff]  ;;  %v6170_v63 = vld [vmem:[%s8377_s8 + $0x160] sm:$0xff]  ;;  %v6185_v58 = vld [vmem:[%s8377_s8 + $0x1d8] sm:$0xff] }
0x15f7   :  { %6095 = vmatprep.subr.mxu1 %v4875_v43  ;;  %6699 = vmatpush3.msra.mxu0 %v6198_v35  ;;  %v6169_v43 = vld [vmem:[%s8377_s8 + $0x158] sm:$0xff]  ;;  %v6168_v35 = vld [vmem:[%s8377_s8 + $0x150] sm:$0xff] }
0x15f8   :  { %6096 = vmatpush2.msra.mxu1 %v4874_v38  ;;  %6700 = vmatprep.subr.mxu0 %v6213_v62  ;;  %v6183_v38 = vld [vmem:[%s8377_s8 + $0x1c8] sm:$0xff] }
0x15f9   :  { %6097 = vmatprep.subr.mxu1 %v4867_v39  ;;  %6701 = vmatpush3.msra.mxu0 %v6197_v52  ;;  %v6167_v62 = vld [vmem:[%s8377_s8 + $0x148] sm:$0xff]  ;;  %v6166_v39 = vld [vmem:[%s8377_s8 + $0x140] sm:$0xff]  ;;  %v6181_v52 = vld [vmem:[%s8377_s8 + $0x1b8] sm:$0xff] }
0x15fa   :  { %6098 = vmatpush2.msra.mxu1 %v4866_v54  ;;  %6702 = vmatprep.subr.mxu0 %v6212_v12  ;;  %v6165_v54 = vld [vmem:[%s8377_s8 + $0x138] sm:$0xff]  ;;  %v6180_v12 = vld [vmem:[%s8377_s8 + $0x1b0] sm:$0xff] }
0x15fb   :  { %6099 = vmatprep.subr.mxu1 %v4859_v57  ;;  %6703 = vmatpush3.msra.mxu0 %v6196_v8  ;;  %v6164_v57 = vld [vmem:[%s8377_s8 + $0x130] sm:$0xff]  ;;  %v5333_v8 = vadd.f32 %v8089_v34, %v4953_v16  ;;  %v6177_v34 = vld [vmem:[%s8377_s8 + $0x198] sm:$0xff] }
0x15fc   :  { %6100 = vmatpush2.msra.mxu1 %v4858_v10  ;;  %6704 = vmatprep.subr.mxu0 %v6211_v24  ;;  %v6178_v10 = vld [vmem:[%s8377_s8 + $0x1a0] sm:$0xff] }
0x15fd   :  { %6101 = vmatprep.subr.mxu1 %v4851_v25  ;;  %6705 = vmatpush3.msra.mxu0 %v6195_v17  ;;  %v5404_v24 = vadd.f32 %v8097_v40, %v5333_v8  ;;  %v6161_v25 = vld [vmem:[%s8377_s8 + $0x118] sm:$0xff]  ;;  %v6176_v40 = vld [vmem:[%s8377_s8 + $0x190] sm:$0xff] }
0x15fe   :  { %6102 = vmatpush2.msra.mxu1 %v4850_v15  ;;  %6706 = vmatprep.subr.mxu0 %v6210_v53  ;;  %v6160_v15 = vld [vmem:[%s8377_s8 + $0x110] sm:$0xff]  ;;  %v6175_v53 = vld [vmem:[%s8377_s8 + $0x188] sm:$0xff] }
0x15ff   :  { %6103 = vmatprep.subr.mxu1 %v4843_v4  ;;  %6707 = vmatpush3.msra.mxu0 %v6194_v31  ;;  %v5475_v17 = vadd.f32 %v8120_v30, %v5404_v24  ;;  %v6159_v4 = vld [vmem:[%s8377_s8 + $0x108] sm:$0xff]  ;;  %v6174_v30 = vld [vmem:[%s8377_s8 + $0x180] sm:$0xff] }
0x1600   :  { %6104 = vmatpush2.msra.mxu1 %v4842_v33  ;;  %6708 = vmatprep.subr.mxu0 %v6209_v2  ;;  %v6158_v31 = vld [vmem:[%s8377_s8 + $0x100] sm:$0xff]  ;;  %v6237_v2 = vld [vmem:[%s8377_s8 + $0x378] sm:$0xff]  ;;  %v6239_v24 = vld [vmem:[%s8377_s8 + $0x388] sm:$0xff] }
0x1601   :  { %6105 = vmatprep.subr.mxu1 %v4835_v45  ;;  %6709 = vmatpush3.msra.mxu0 %v6193_v28  ;;  %v5546_v19 = vadd.f32 %v8122_v11, %v5475_v17  ;;  %v6253_v11 = vld [vmem:[%s8377_s8 + $0x3f8] sm:$0xff]  ;;  %v6252_v45 = vld [vmem:[%s8377_s8 + $0x3f0] sm:$0xff]  ;;  %v6903_v17 = vld [vmem:[#allocation16] sm:$0xff] }
0x1602   :  { %6106 = vmatpush2.msra.mxu1 %v4834_v23  ;;  %6710 = vmatprep.subr.mxu0 %v6208_v1  ;;  %v6236_v28 = vld [vmem:[%s8377_s8 + $0x370] sm:$0xff]  ;;  %v6250_v23 = vld [vmem:[%s8377_s8 + $0x3e0] sm:$0xff] }
0x1603   :  { %6107 = vmatprep.subr.mxu1 %v4827_v6  ;;  %6711 = vmatpush3.msra.mxu0 %v6192_v18  ;;  %v6120_v33 = vmax.f32 %v5546_v19, 0.0  ;;  %v6234_v1 = vld [vmem:[%s8377_s8 + $0x360] sm:$0xff]  ;;  %v6233_v6 = vld [vmem:[%s8377_s8 + $0x358] sm:$0xff]  ;;  %v6248_v18 = vld [vmem:[%s8377_s8 + $0x3d0] sm:$0xff]  ;;  %v4973_v19 = vrot.slane %v6903_v17, %v3046_v60 }
0x1604   :  { %6108 = vmatpush2.msra.mxu1 %v4826_v14  ;;  %6712 = vmatprep.subr.mxu0 %v6207_v44  ;;  %v6232_v14 = vld [vmem:[%s8377_s8 + $0x350] sm:$0xff]  ;;  %v6247_v44 = vld [vmem:[%s8377_s8 + $0x3c8] sm:$0xff] }
0x1605   :  { %6109 = vmatprep.subr.mxu1 %v4819_v47  ;;  %6713 = vmatpush3.msra.mxu0 %v6191_v48  ;;  %v6246_v47 = vld [vmem:[%s8377_s8 + $0x3c0] sm:$0xff] }
0x1606   :  { %6110 = vmatpush2.msra.mxu1 %v4818_v29  ;;  %6714 = vmatprep.subr.mxu0 %v6206_v49  ;;  %v6230_v48 = vld [vmem:[%s8377_s8 + $0x340] sm:$0xff]  ;;  %v5616_v29 = vpop.f32.mrf.mxu0  ;;  %v6245_v49 = vld [vmem:[%s8377_s8 + $0x3b8] sm:$0xff] }
0x1607   :  { %6112 = vmatmul.mubr.f32.vlgmr.msra.gmra.mxu1 %v7907_v9  ;;  %6649 = vmatprep.subr.mxu1 %v6189_v37  ;;  %v6186_v9 = vld [vmem:[%s8377_s8 + $0x1e0] sm:$0xff]  ;;  %v6229_v37 = vld [vmem:[%s8377_s8 + $0x338] sm:$0xff] }
0x1608   :  { %6650 = vmatpush3.msra.mxu1 %v6173_v42  ;;  %6398 = vmatprep.mubr.f32.mxu1 %v6121_v50  ;;  %v4961_v42 = vrot.slane %v7933_v7, %v3034_v21  ;;  %v5687_v50 = vpop.f32.mrf.mxu1  ;;  %v6243_v21 = vld [vmem:[%s8377_s8 + $0x3a8] sm:$0xff] }
0x1609   :  { %6651 = vmatprep.subr.mxu1 %v6188_v55  ;;  %6715 = vmatpush3.msra.mxu0 %v6190_v59  ;;  %v6244_v55 = vld [vmem:[%s8377_s8 + $0x3b0] sm:$0xff]  ;;  %v4965_v59 = vrot.slane %v7933_v7, %v3038_v32  ;;  %v6242_v32 = vld [vmem:[%s8377_s8 + $0x3a0] sm:$0xff] }
0x160a   :  { %6652 = vmatpush3.msra.mxu1 %v6172_v61  ;;  %6773 = vset.pattern.permute.xlu0 %v7132_v51  ;;  %v6184_v51 = vld [vmem:[%s8377_s8 + $0x1d0] sm:$0xff] }
0x160b   :  { %6653 = vmatprep.subr.mxu1 %v6187_v22  ;;  %v6228_v61 = vld [vmem:[%s8377_s8 + $0x330] sm:$0xff]  ;;  %v5618_v22 = vpop.f32.mrf.mxu0 }
0x160c   :  { %6654 = vmatpush3.msra.mxu1 %v6171_v0  ;;  %v6227_v0 = vld [vmem:[%s8377_s8 + $0x328] sm:$0xff]  ;;  %v5619_v7 = vadd.f32 %v5618_v22, %v4965_v59 }
0x160d   :  { %6655 = vmatprep.subr.mxu1 %v6186_v9  ;;  %v5617_v9 = vadd.f32 %v5616_v29, %v4961_v42 }
0x160e   :  { %6656 = vmatpush3.msra.mxu1 %v6170_v63  ;;  %v5689_v63 = vpop.f32.mrf.mxu1 }
0x160f   :  { %6657 = vmatprep.subr.mxu1 %v6185_v58  ;;  %v6226_v58 = vld [vmem:[%s8377_s8 + $0x320] sm:$0xff] }
0x1610   :  { %6658 = vmatpush3.msra.mxu1 %v6169_v43  ;;  %v5758_v43 = vpop.f32.mrf.mxu0 }
0x1611   :  { %6659 = vmatprep.subr.mxu1 %v6184_v51  ;;  %v5688_v51 = vadd.f32 %v5687_v50, %v5617_v9 }
0x1612   :  { %6660 = vmatpush3.msra.mxu1 %v6168_v35  ;;  %v5690_v35 = vadd.f32 %v5689_v63, %v5619_v7 }
0x1613   :  { %6661 = vmatprep.subr.mxu1 %v6183_v38  ;;  %v5760_v38 = vpop.f32.mrf.mxu0 }
0x1614   :  { %6662 = vmatpush3.msra.mxu1 %v6167_v62  ;;  %v5759_v62 = vadd.f32 %v5758_v43, %v5688_v51 }
0x1615   :  { %6663 = vmatprep.subr.mxu1 %v6182_v3 }
0x1616   :  { %6664 = vmatpush3.msra.mxu1 %v6166_v39  ;;  %v5761_v39 = vadd.f32 %v5760_v38, %v5690_v35 }
0x1617   :  { %6665 = vmatprep.subr.mxu1 %v6181_v52 }
0x1618   :  { %6666 = vmatpush3.msra.mxu1 %v6165_v54  ;;  %v6241_v54 = vld [vmem:[%s8377_s8 + $0x398] sm:$0xff] }
0x1619   :  { %6667 = vmatprep.subr.mxu1 %v6180_v12 }
0x161a   :  { %6668 = vmatpush3.msra.mxu1 %v6164_v57  ;;  %v6225_v57 = vld [vmem:[%s8377_s8 + $0x318] sm:$0xff] }
0x161b   :  { %6669 = vmatprep.subr.mxu1 %v6179_v41  ;;  %v6240_v41 = vld [vmem:[%s8377_s8 + $0x390] sm:$0xff] }
0x161c   :  { %6670 = vmatpush3.msra.mxu1 %v6163_v20  ;;  %v6224_v20 = vld [vmem:[%s8377_s8 + $0x310] sm:$0xff] }
0x161d   :  { %6671 = vmatprep.subr.mxu1 %v6178_v10 }
0x161e   :  { %6672 = vmatpush3.msra.mxu1 %v6162_v26  ;;  %v6223_v26 = vld [vmem:[%s8377_s8 + $0x308] sm:$0xff] }
0x161f   :  { %6673 = vmatprep.subr.mxu1 %v6177_v34  ;;  %v6238_v34 = vld [vmem:[%s8377_s8 + $0x380] sm:$0xff] }
0x1620   :  { %6674 = vmatpush3.msra.mxu1 %v6161_v25  ;;  %v6222_v25 = vld [vmem:[%s8377_s8 + $0x300] sm:$0xff]  ;;  %s7133_s8 = smov [#allocation19]  }
0x1621   :  { %6675 = vmatprep.subr.mxu1 %v6176_v40  ;;  %s6560_s19 = sshll.u32 %s7133_s8, 4  ;;  %s6561_s19 = int_to_ptr.vmem [resolvable:$true] %s6560_s19 }
0x1622   :  { %6676 = vmatpush3.msra.mxu1 %v6160_v15  ;;  %v4969_v15 = vrot.slane %v6903_v17, %v3042_v13  ;;  %s7084_s3 = scalar_lea.vmem %s6561_s19, 128  ;;  %p7089_p4 = scmp.lt.s32.totalorder %s6561_s19, %s6561_s19 }
0x1623   :  { %6677 = vmatprep.subr.mxu1 %v6175_v53  ;;  %p7085_p3 = scmp.ne.s32.totalorder %s6561_s19, %s7084_s3  ;;  %p7090_p5 = scmp.lt.s32.totalorder %s7084_s3, %s7084_s3 }
0x1624   :  { %6678 = vmatpush3.msra.mxu1 %v6159_v4 }
0x1625   :  { %6679 = vmatprep.subr.mxu1 %v6174_v30  ;;  %p7091_p6 = por %p7090_p5, %p7089_p4 }
0x1626   :  { %6680 = vmatpush3.msra.mxu1 %v6158_v31 }
0x1627   :  { %6399 = vmatmul.mubr.f32.vlgmr.msra.gmra.mxu1 %v6120_v33  ;;  %6719 = vmatprep.subr.mxu1 %v6253_v11  ;;  %p7092_p7 = pnand %p7091_p6, %p7085_p3 }
0x1628   :  { %6720 = vmatpush3.msra.mxu1 %v6237_v2 }
0x1629   :  { %6721 = vmatprep.subr.mxu1 %v6252_v45 }
0x162a   :  { %6722 = vmatpush3.msra.mxu1 %v6236_v28 }
0x162b   :  { %6723 = vmatprep.subr.mxu1 %v6251_v5 }
0x162c   :  { %6724 = vmatpush3.msra.mxu1 %v6235_v56 }
0x162d   :  { %6725 = vmatprep.subr.mxu1 %v6250_v23 }
0x162e   :  { %6726 = vmatpush3.msra.mxu1 %v6234_v1 }
0x162f   :  { %6727 = vmatprep.subr.mxu1 %v6249_v27 }
0x1630   :  { %6728 = vmatpush3.msra.mxu1 %v6233_v6 }
0x1631   :  { %6729 = vmatprep.subr.mxu1 %v6248_v18 }
0x1632   :  { %6730 = vmatpush3.msra.mxu1 %v6232_v14 }
0x1633   :  { %6731 = vmatprep.subr.mxu1 %v6247_v44 }
0x1634   :  { %6732 = vmatpush3.msra.mxu1 %v6231_v46 }
0x1635   :  { %6733 = vmatprep.subr.mxu1 %v6246_v47 }
0x1636   :  { %6734 = vmatpush3.msra.mxu1 %v6230_v48 }
0x1637   :  { %6735 = vmatprep.subr.mxu1 %v6245_v49 }
0x1638   :  { %6736 = vmatpush3.msra.mxu1 %v6229_v37 }
0x1639   :  { %6737 = vmatprep.subr.mxu1 %v6244_v55 }
0x163a   :  { %6738 = vmatpush3.msra.mxu1 %v6228_v61 }
0x163b   :  { %6739 = vmatprep.subr.mxu1 %v6243_v21 }
0x163c   :  { %6740 = vmatpush3.msra.mxu1 %v6227_v0  ;;  %v6613_v0 = vld [vmem:[#allocation18] ss:$0 sm:$0xff] }
0x163d   :  { %6741 = vmatprep.subr.mxu1 %v6242_v32 }
0x163e   :  { %6742 = vmatpush3.msra.mxu1 %v6226_v58 }
0x163f   :  { %6743 = vmatprep.subr.mxu1 %v6241_v54 }
0x1640   :  { %6744 = vmatpush3.msra.mxu1 %v6225_v57 }
0x1641   :  { %6745 = vmatprep.subr.mxu1 %v6240_v41  ;;  %v5900_v40 = vpop.f32.mrf.mxu0 }
0x1642   :  { %6746 = vmatpush3.msra.mxu1 %v6224_v20  ;;  %v5901_v30 = vadd.f32 %v5900_v40, %v4969_v15 }
0x1643   :  { %6747 = vmatprep.subr.mxu1 %v6239_v24  ;;  %v5902_v4 = vpop.f32.mrf.mxu0 }
0x1644   :  { %v5829_v3 = vpop.f32.mrf.mxu1  ;;  %6748 = vmatpush3.msra.mxu1 %v6223_v26  ;;  %v5903_v33 = vadd.f32 %v5902_v4, %v4973_v19 }
0x1645   :  { %v5830_v52 = vadd.f32 %v5829_v3, %v5759_v62  ;;  %6749 = vmatprep.subr.mxu1 %v6238_v34 }
0x1646   :  { %v5831_v16 = vpop.f32.mrf.mxu1  ;;  %6750 = vmatpush3.msra.mxu1 %v6222_v25 }
0x1647   :  { %v5832_v12 = vadd.f32 %v5831_v16, %v5761_v39  ;;  %v6122_v10 = vmax.f32 %v5830_v52, 0.0 }
0x1649   :  { %v6123_v8 = vmax.f32 %v5832_v12, 0.0 }
0x164b   :  { %6468 = vmatprep.mubr.f32.mxu0 %v6123_v8 }
0x164c   :  { %6469 = vmatmul.mubr.f32.vlgmr.msra.gmra.mxu0 %v6122_v10 }
0x1662   :  { %v6262_v48 = vpop.permute.xlu1 %6261 }
0x1683   :  { %v6042_v11 = vpop.f32.mrf.mxu0 }
0x1685   :  { %v6044_v28 = vpop.f32.mrf.mxu0 }
0x1686   :  { %v5971_v53 = vpop.f32.mrf.mxu1 }
0x1687   :  { %v5972_v2 = vadd.f32 %v5971_v53, %v5901_v30 }
0x1688   :  { %v5973_v31 = vpop.f32.mrf.mxu1 }
0x1689   :  { %v5974_v45 = vadd.f32 %v5973_v31, %v5903_v33  ;;  %v6043_v5 = vadd.f32 %v6042_v11, %v5972_v2 }
0x168b   :  { %v6045_v23 = vadd.f32 %v6044_v28, %v5974_v45 }
0x16a5   :  { %v6646_v36 = vpop.f32.mrf.mxu0 }
0x16a7   :  { %v6647_v60 = vpop.f32.mrf.mxu0 }
0x16a8   :  { %v6648_v47 = vadd.f32 %v6647_v60, %v6646_v36 }
0x16aa   :  { %v6331_v37 = vadd.f32 %v6648_v47, %v6262_v48 }
0x16c7   :  { %v6113_v56 = vpop.f32.mrf.mxu1 }
0x16c8   :  { %v6114_v1 = vadd.f32 %v6113_v56, %v6043_v5 }
0x16c9   :  { %v6115_v27 = vpop.f32.mrf.mxu1 }
0x16ca   :  { %v6116_v6 = vadd.f32 %v6115_v27, %v6045_v23  ;;  %v6124_v13 = vmax.f32 %v6114_v1, 0.0 }
0x16cc   :  { %v6125_v18 = vmax.f32 %v6116_v6, 0.0 }
0x16ce   :  { %6538 = vmatprep.mubr.f32.mxu1 %v6125_v18 }
0x16cf   :  { %6539 = vmatmul.mubr.f32.vlgmr.msra.gmra.mxu1 %v6124_v13 }
0x16e7   :  { %v6681_v14 = vpop.f32.mrf.mxu1 }
0x16e9   :  { %v6682_v46 = vpop.f32.mrf.mxu1 }
0x16ea   :  { %v6683_v49 = vadd.f32 %v6682_v46, %v6681_v14 }
0x16ec   :  { %v6401_v55 = vadd.f32 %v6683_v49, %v6331_v37 }
0x170c   :  { %v6716_v44 = vpop.f32.mrf.mxu0 }
0x170e   :  { %v6717_v29 = vpop.f32.mrf.mxu0 }
0x170f   :  { %v6718_v42 = vadd.f32 %v6717_v29, %v6716_v44 }
0x1711   :  { %v6471_v61 = vadd.f32 %v6718_v42, %v6401_v55 }
0x178f   :  { %v6751_v50 = vpop.f32.mrf.mxu1 }
0x1791   :  { %v6752_v59 = vpop.f32.mrf.mxu1 }
0x1792   :  { %v6753_v22 = vadd.f32 %v6752_v59, %v6751_v50 }
0x1794   :  { %v6541_v21 = vadd.f32 %v6753_v22, %v6471_v61 }
0x1796   :  { %v6544_v9 = vmax.f32 %v6541_v21, 0.0 }
0x1798   :  { %v6552_v63 = vmul.f32 %v6613_v0, %v6544_v9 }
0x179a   :  { %6553 = vst.msk [vmem:[#allocation19] sm:$0xff] %vm188_vm0, %v6552_v63 }
0x179b   :  { %7095 = shalt.err (!%p7092_p7)
}
0x179c   :  { %6563 = dma.vmem_to_hbm [thread:$0]  %s6561_s19, 128, %s8380_s11, [#allocation6]  }
0x179d   :  { %7114 = dma.done.wait [#allocation6], 128  }
0x179e   :  { %7115 = vsyncadd [#allocation6], 4294967168 }
0x179f   :  { %6567 = vsyncpa [#allocation5], 1 }
0x17a0   :  { %6568 = vsyncpa [#allocation8], 1 }
0x17a1   :  { %6569 = vsyncpa [#allocation11], 1 }
0x17a2   :  { %6570 = vsyncpa [#allocation14], 1 }
0x17a3   :  { %6571 = vsyncpa [#allocation17], 1 }
0x17a4   :  { %6572 = vsyncpa [#allocation6], 1 }

</bundles_post_ra>
